<compile_context>
chip_gen: v7x
topology: tpu7x:2x2x1
jax: 0.10.0
libtpu: 0.0.40
codegen_flags: <defaults>
</compile_context>

<pallas_src>
import jax
import jax.numpy as jnp
from jax.experimental import pallas as pl
from jax.experimental.pallas import tpu as pltpu


def _double_conv_kernel(x_ref, w1_ref, s1_ref, b1_ref, w2_ref, s2_ref, b2_ref,
                        o_ref, xp_scr):
    # x_ref:    (1, H, W, Cp)   bf16  channel-padded NHWC image
    # w{1,2}:   (9, Cp, Cp)     bf16  per-tap (kh*3+kw) conv weight slabs
    # s/b{1,2}: (1, Cp)         f32   folded BN scale/bias (0 in pad lanes)
    # o_ref:    (1, H, W, Cp)   bf16
    # xp_scr:   (H+2, Wp, Cp)   bf16  zero-halo padded layer input (VMEM),
    #                                 Wp = round_up(W+2, 8) (sublane aligned)
    H, W, Cp = o_ref.shape[1], o_ref.shape[2], o_ref.shape[3]
    Wp = xp_scr.shape[1]

    # Zero ONLY the 1-pixel halo border (interior is fully rewritten below,
    # pad columns [W+2, Wp) are never read).  Done every step so it is
    # correct regardless of grid-step ordering / megacore sharding.
    xp_scr[0:1, :, :] = jnp.zeros((1, Wp, Cp), xp_scr.dtype)
    xp_scr[H + 1:H + 2, :, :] = jnp.zeros((1, Wp, Cp), xp_scr.dtype)
    xp_scr[:, 0:1, :] = jnp.zeros((H + 2, 1, Cp), xp_scr.dtype)
    xp_scr[:, W + 1:W + 2, :] = jnp.zeros((H + 2, 1, Cp), xp_scr.dtype)

    def conv_bn_relu(w_ref, s_ref, b_ref):
        # 3x3 conv = 9 accumulating MXU matmuls on the shifted halo windows
        # (no materialized im2col patch -> ~half the VMEM ld/st traffic).
        acc = None
        for kh in range(3):
            for kw in range(3):
                win = xp_scr[kh:kh + H, kw:kw + W, :].reshape(H * W, Cp)
                part = jnp.dot(win, w_ref[kh * 3 + kw],
                               preferred_element_type=jnp.float32)
                acc = part if acc is None else acc + part
        # Fused BatchNorm (eval, folded) + ReLU, kept in f32.
        return jnp.maximum(acc * s_ref[...] + b_ref[...], 0.0)   # (H*W, Cp)

    # Layer 1: interior <- input image (already channel-padded to Cp lanes,
    # pad lanes are exactly 0).
    xp_scr[1:H + 1, 1:W + 1, :] = x_ref[0]
    y1 = conv_bn_relu(w1_ref, s1_ref, b1_ref)

    # Layer 2: interior <- layer-1 output, kept in VMEM (no HBM round trip).
    # TODO(synk): at UNet-scale H*W, store the epilogue through to xp_scr /
    # o_ref in row chunks (lax.fori_loop, unroll=True) to bound the f32
    # accumulator live range; at these shapes it fits comfortably.
    xp_scr[1:H + 1, 1:W + 1, :] = y1.reshape(H, W, Cp).astype(xp_scr.dtype)
    y2 = conv_bn_relu(w2_ref, s2_ref, b2_ref)

    o_ref[...] = y2.reshape(1, H, W, Cp).astype(o_ref.dtype)


def _round_up(v, m):
    return (v + m - 1) // m * m


def _fold_bn(gamma, beta, running_mean, running_var, eps=1e-5):
    scale = gamma / jnp.sqrt(running_var + eps)
    bias = beta - running_mean * scale
    return scale, bias


def _vmem_limit_bytes():
    # ~75% of physical VMEM: ~96 MiB on v5e/v6e (128 MiB), ~48 MiB on v7x
    # (64 MiB), leaving compiler-scratch headroom.
    try:
        cap = pltpu.get_tpu_info().vmem_capacity_bytes
    except Exception:
        cap = 64 << 20   # conservative fallback (safe on every generation)
    return int(min((cap * 3) // 4, 112 << 20))


@jax.jit
def double_conv(x_nchw, params):
    """Forward pass of DoubleConv.  Input/output NCHW f32, like PyTorch."""
    x = jnp.transpose(x_nchw, (0, 2, 3, 1))                  # NCHW -> NHWC
    N, H, W, Cin = x.shape
    Cout = params["w1_hwio"].shape[-1]
    # Lane-dense channel count shared by both layers (>= 128, multiple of 128).
    # TODO(synk): for tiny-Cin stems, pad the layer-1 contraction only to the
    # bf16 packing multiple instead of 128 (layer-1 MXU work is inflated here;
    # harmless at real UNet channel counts).
    Cp = _round_up(max(Cin, Cout, 128), 128)
    Wp = _round_up(W + 2, 8)          # sublane-aligned halo rows in the scratch

    # Channel pad + bf16 cast; under jit this fuses with the transpose above
    # into a single HBM pass.
    # TODO(synk): fold this pad/cast into the kernel (pass (1,H,W,Cin) blocks)
    # to drop the remaining extra HBM pass over the activation.
    xb = jnp.pad(x, ((0, 0), (0, 0), (0, 0), (0, Cp - Cin))).astype(jnp.bfloat16)

    def prep_w(w_hwio, cin):
        w = jnp.pad(w_hwio, ((0, 0), (0, 0), (0, Cp - cin), (0, Cp - Cout)))
        return w.reshape(9, Cp, Cp).astype(jnp.bfloat16)      # tap = kh*3 + kw

    w1 = prep_w(params["w1_hwio"], Cin)
    w2 = prep_w(params["w2_hwio"], Cout)

    def prep_bn(pfx):
        s, b = _fold_bn(params[f"{pfx}_gamma"], params[f"{pfx}_beta"],
                        params[f"{pfx}_mean"], params[f"{pfx}_var"])
        # Zero scale/bias in pad lanes so padded channels stay exactly 0.
        s = jnp.pad(s, (0, Cp - Cout)).reshape(1, Cp).astype(jnp.float32)
        b = jnp.pad(b, (0, Cp - Cout)).reshape(1, Cp).astype(jnp.float32)
        return s, b

    s1, b1 = prep_bn("bn1")
    s2, b2 = prep_bn("bn2")

    rep3 = lambda n: (0, 0, 0)
    rep2 = lambda n: (0, 0)
    # TODO(synk): UNet-scale images need spatial row tiling (grid=(N, H//TH)
    # with a 2-row halo, both axes "parallel") so per-step VMEM stays under
    # v7x's 64 MiB and both v7x TensorCores are busy even at N=1; the whole
    # image per step is fine at these shapes.
    # TODO(synk): single-buffer the grid-invariant w/s/b operands
    # (pipeline_mode=pl.Buffered(1)) once validated on the target jax build;
    # saves one weight-sized VMEM buffer per operand at UNet channel counts.
    out = pl.pallas_call(
        _double_conv_kernel,
        out_shape=jax.ShapeDtypeStruct((N, H, W, Cp), jnp.bfloat16),
        grid_spec=pltpu.PrefetchScalarGridSpec(
            num_scalar_prefetch=0,
            grid=(N,),
            in_specs=[
                pl.BlockSpec((1, H, W, Cp), lambda n: (n, 0, 0, 0)),
                pl.BlockSpec((9, Cp, Cp), rep3),
                pl.BlockSpec((1, Cp), rep2),
                pl.BlockSpec((1, Cp), rep2),
                pl.BlockSpec((9, Cp, Cp), rep3),
                pl.BlockSpec((1, Cp), rep2),
                pl.BlockSpec((1, Cp), rep2),
            ],
            out_specs=pl.BlockSpec((1, H, W, Cp), lambda n: (n, 0, 0, 0)),
            scratch_shapes=[
                pltpu.VMEM((H + 2, Wp, Cp), jnp.bfloat16),   # halo'd layer input
            ]),
        compiler_params=pltpu.CompilerParams(
            dimension_semantics=("parallel",),
            vmem_limit_bytes=_vmem_limit_bytes()),
    )(xb, w1, s1, b1, w2, s2, b2)

    y = out[..., :Cout].astype(jnp.float32)                  # drop pad lanes
    return jnp.transpose(y, (0, 3, 1, 2))                    # NHWC -> NCHW


def _reference(x_nchw, params):
    """Pure-JAX f32 reference (lax conv) for correctness check."""
    x = jnp.transpose(x_nchw, (0, 2, 3, 1)).astype(jnp.float32)

    def block(x, w, gamma, beta, mean, var):
        y = jax.lax.conv_general_dilated(
            x, w, window_strides=(1, 1), padding="SAME",
            dimension_numbers=("NHWC", "HWIO", "NHWC"))
        s, b = _fold_bn(gamma, beta, mean, var)
        return jnp.maximum(y * s + b, 0.0)

    y = block(x, params["w1_hwio"], params["bn1_gamma"], params["bn1_beta"],
              params["bn1_mean"], params["bn1_var"])
    y = block(y, params["w2_hwio"], params["bn2_gamma"], params["bn2_beta"],
              params["bn2_mean"], params["bn2_var"])
    return jnp.transpose(y, (0, 3, 1, 2))


def init_params(key, in_channels, out_channels):
    k1, k2, k3, k4 = jax.random.split(key, 4)
    # PyTorch Conv2d weight layout is (Cout, Cin, kH, kW); convert to HWIO.
    w1 = jax.random.normal(k1, (out_channels, in_channels, 3, 3),
                           jnp.float32) * 0.1
    w2 = jax.random.normal(k2, (out_channels, out_channels, 3, 3),
                           jnp.float32) * 0.1
    # TODO(synk): PyTorch training-mode BN (batch statistics + running-stat
    # updates) not implemented; eval-mode running-stats semantics are used.
    return {
        "w1_hwio": jnp.transpose(w1, (2, 3, 1, 0)),
        "w2_hwio": jnp.transpose(w2, (2, 3, 1, 0)),
        "bn1_gamma": 1.0 + 0.1 * jax.random.normal(k3, (out_channels,)),
        "bn1_beta": jnp.full((out_channels,), 0.05, jnp.float32),
        "bn1_mean": jnp.full((out_channels,), 0.01, jnp.float32),
        "bn1_var": jnp.full((out_channels,), 1.2, jnp.float32),
        "bn2_gamma": 1.0 + 0.1 * jax.random.normal(k4, (out_channels,)),
        "bn2_beta": jnp.full((out_channels,), -0.05, jnp.float32),
        "bn2_mean": jnp.full((out_channels,), -0.02, jnp.float32),
        "bn2_var": jnp.full((out_channels,), 0.8, jnp.float32),
    }


if __name__ == "__main__":
    key = jax.random.PRNGKey(0)
    k_x, k_p = jax.random.split(key)

    in_channels, out_channels = 4, 8
    x = jax.random.normal(k_x, (2, in_channels, 16, 16), jnp.float32)  # NCHW
    params = init_params(k_p, in_channels, out_channels)

    out = double_conv(x, params)
    out = jax.block_until_ready(out)

    ref = _reference(x, params)
    assert out.shape == (2, out_channels, 16, 16)
    # bf16 matmul operands + bf16 output vs f32 reference -> loosened tolerance.
    assert jnp.allclose(out, ref, atol=5e-2, rtol=5e-2), "mismatch vs reference"

    print("KERNEL_OK")
</pallas_src>

<mosaic_0001>
module attributes {stable_mosaic.version = 11 : i64} {
  func.func @_double_conv_kernel(%arg0: i32, %arg1: memref<1x16x16x128xbf16, #tpu.memory_space<vmem>>, %arg2: memref<9x128x128xbf16, #tpu.memory_space<vmem>>, %arg3: memref<1x128xf32, #tpu.memory_space<vmem>>, %arg4: memref<1x128xf32, #tpu.memory_space<vmem>>, %arg5: memref<9x128x128xbf16, #tpu.memory_space<vmem>>, %arg6: memref<1x128xf32, #tpu.memory_space<vmem>>, %arg7: memref<1x128xf32, #tpu.memory_space<vmem>>, %arg8: memref<1x16x16x128xbf16, #tpu.memory_space<vmem>>, %arg9: memref<18x24x128xbf16, #tpu.memory_space<vmem>>) attributes {dimension_semantics = [#tpu.dimension_semantics<parallel>], iteration_bounds = array<i64: 2>, scalar_prefetch = 0 : i64, scratch_operands = 1 : i64, tpu.core_type = #tpu.core_type<tc>, window_params = [{transform_indices = @transform_0, window_bounds = array<i64: 1, 16, 16, 128>}, {pipeline_mode = #tpu.pipeline_mode<synchronous>, transform_indices = @transform_1, window_bounds = array<i64: 9, 128, 128>}, {pipeline_mode = #tpu.pipeline_mode<synchronous>, transform_indices = @transform_2, window_bounds = array<i64: 1, 128>}, {pipeline_mode = #tpu.pipeline_mode<synchronous>, transform_indices = @transform_3, window_bounds = array<i64: 1, 128>}, {pipeline_mode = #tpu.pipeline_mode<synchronous>, transform_indices = @transform_4, window_bounds = array<i64: 9, 128, 128>}, {pipeline_mode = #tpu.pipeline_mode<synchronous>, transform_indices = @transform_5, window_bounds = array<i64: 1, 128>}, {pipeline_mode = #tpu.pipeline_mode<synchronous>, transform_indices = @transform_6, window_bounds = array<i64: 1, 128>}, {transform_indices = @transform_7, window_bounds = array<i64: 1, 16, 16, 128>}]} {
    %cst = arith.constant 0.000000e+00 : bf16
    %0 = vector.broadcast %cst : bf16 to vector<1x24x128xbf16>
    %c0 = arith.constant 0 : index
    %c0_0 = arith.constant 0 : index
    %c0_1 = arith.constant 0 : index
    %1 = vector.load %arg9[%c0, %c0_0, %c0_1] : memref<18x24x128xbf16, #tpu.memory_space<vmem>>, vector<1x24x128xbf16>
    tpu.vector_store %arg9[%c0, %c0_0, %c0_1], %0 {strides = array<i32>} : memref<18x24x128xbf16, #tpu.memory_space<vmem>>, vector<1x24x128xbf16>,
    %cst_2 = arith.constant 0.000000e+00 : bf16
    %2 = vector.broadcast %cst_2 : bf16 to vector<1x24x128xbf16>
    %c17 = arith.constant 17 : index
    %c0_3 = arith.constant 0 : index
    %c0_4 = arith.constant 0 : index
    %3 = vector.load %arg9[%c17, %c0_3, %c0_4] : memref<18x24x128xbf16, #tpu.memory_space<vmem>>, vector<1x24x128xbf16>
    tpu.vector_store %arg9[%c17, %c0_3, %c0_4], %2 {strides = array<i32>} : memref<18x24x128xbf16, #tpu.memory_space<vmem>>, vector<1x24x128xbf16>,
    %cst_5 = arith.constant 0.000000e+00 : bf16
    %4 = vector.broadcast %cst_5 : bf16 to vector<18x1x128xbf16>
    %c0_6 = arith.constant 0 : index
    %c0_7 = arith.constant 0 : index
    %c0_8 = arith.constant 0 : index
    %5 = vector.load %arg9[%c0_6, %c0_7, %c0_8] : memref<18x24x128xbf16, #tpu.memory_space<vmem>>, vector<18x1x128xbf16>
    tpu.vector_store %arg9[%c0_6, %c0_7, %c0_8], %4 {strides = array<i32>} : memref<18x24x128xbf16, #tpu.memory_space<vmem>>, vector<18x1x128xbf16>,
    %cst_9 = arith.constant 0.000000e+00 : bf16
    %6 = vector.broadcast %cst_9 : bf16 to vector<18x1x128xbf16>
    %c0_10 = arith.constant 0 : index
    %c17_11 = arith.constant 17 : index
    %c0_12 = arith.constant 0 : index
    %7 = vector.load %arg9[%c0_10, %c17_11, %c0_12] : memref<18x24x128xbf16, #tpu.memory_space<vmem>>, vector<18x1x128xbf16>
    tpu.vector_store %arg9[%c0_10, %c17_11, %c0_12], %6 {strides = array<i32>} : memref<18x24x128xbf16, #tpu.memory_space<vmem>>, vector<18x1x128xbf16>,
    %c0_13 = arith.constant 0 : index
    %c0_14 = arith.constant 0 : index
    %c0_15 = arith.constant 0 : index
    %c0_16 = arith.constant 0 : index
    %8 = vector.load %arg1[%c0_13, %c0_14, %c0_15, %c0_16] : memref<1x16x16x128xbf16, #tpu.memory_space<vmem>>, vector<1x16x16x128xbf16>
    %9 = vector.shape_cast %8 : vector<1x16x16x128xbf16> to vector<16x16x128xbf16>
    %c1 = arith.constant 1 : index
    %c1_17 = arith.constant 1 : index
    %c0_18 = arith.constant 0 : index
    %10 = vector.load %arg9[%c1, %c1_17, %c0_18] : memref<18x24x128xbf16, #tpu.memory_space<vmem>>, vector<16x16x128xbf16>
    tpu.vector_store %arg9[%c1, %c1_17, %c0_18], %9 {strides = array<i32>} : memref<18x24x128xbf16, #tpu.memory_space<vmem>>, vector<16x16x128xbf16>,
    %c0_19 = arith.constant 0 : index
    %c0_20 = arith.constant 0 : index
    %c0_21 = arith.constant 0 : index
    %11 = vector.load %arg9[%c0_19, %c0_20, %c0_21] : memref<18x24x128xbf16, #tpu.memory_space<vmem>>, vector<16x16x128xbf16>
    %12 = vector.shape_cast %11 : vector<16x16x128xbf16> to vector<256x128xbf16>
    %c0_22 = arith.constant 0 : index
    %c0_23 = arith.constant 0 : index
    %c0_24 = arith.constant 0 : index
    %13 = vector.load %arg2[%c0_22, %c0_23, %c0_24] : memref<9x128x128xbf16, #tpu.memory_space<vmem>>, vector<1x128x128xbf16>
    %14 = vector.shape_cast %13 : vector<1x128x128xbf16> to vector<128x128xbf16>
    %cst_25 = arith.constant dense<0.000000e+00> : vector<256x128xf32>
    %15 = tpu.matmul %12, %14, %cst_25 {dimension_numbers = #tpu.dot_dimension_numbers<[1], [0], [0], [1], [0, 0, 1, 1], [], []>} : vector<256x128xbf16>, vector<128x128xbf16>, vector<256x128xf32> -> vector<256x128xf32>
    %c0_26 = arith.constant 0 : index
    %c1_27 = arith.constant 1 : index
    %c0_28 = arith.constant 0 : index
    %16 = vector.load %arg9[%c0_26, %c1_27, %c0_28] : memref<18x24x128xbf16, #tpu.memory_space<vmem>>, vector<16x16x128xbf16>
    %17 = vector.shape_cast %16 : vector<16x16x128xbf16> to vector<256x128xbf16>
    %c1_29 = arith.constant 1 : index
    %c0_30 = arith.constant 0 : index
    %c0_31 = arith.constant 0 : index
    %18 = vector.load %arg2[%c1_29, %c0_30, %c0_31] : memref<9x128x128xbf16, #tpu.memory_space<vmem>>, vector<1x128x128xbf16>
    %19 = vector.shape_cast %18 : vector<1x128x128xbf16> to vector<128x128xbf16>
    %cst_32 = arith.constant dense<0.000000e+00> : vector<256x128xf32>
    %20 = tpu.matmul %17, %19, %cst_32 {dimension_numbers = #tpu.dot_dimension_numbers<[1], [0], [0], [1], [0, 0, 1, 1], [], []>} : vector<256x128xbf16>, vector<128x128xbf16>, vector<256x128xf32> -> vector<256x128xf32>
    %21 = arith.addf %15, %20 : vector<256x128xf32>
    %c0_33 = arith.constant 0 : index
    %c2 = arith.constant 2 : index
    %c0_34 = arith.constant 0 : index
    %22 = vector.load %arg9[%c0_33, %c2, %c0_34] : memref<18x24x128xbf16, #tpu.memory_space<vmem>>, vector<16x16x128xbf16>
    %23 = vector.shape_cast %22 : vector<16x16x128xbf16> to vector<256x128xbf16>
    %c2_35 = arith.constant 2 : index
    %c0_36 = arith.constant 0 : index
    %c0_37 = arith.constant 0 : index
    %24 = vector.load %arg2[%c2_35, %c0_36, %c0_37] : memref<9x128x128xbf16, #tpu.memory_space<vmem>>, vector<1x128x128xbf16>
    %25 = vector.shape_cast %24 : vector<1x128x128xbf16> to vector<128x128xbf16>
    %cst_38 = arith.constant dense<0.000000e+00> : vector<256x128xf32>
    %26 = tpu.matmul %23, %25, %cst_38 {dimension_numbers = #tpu.dot_dimension_numbers<[1], [0], [0], [1], [0, 0, 1, 1], [], []>} : vector<256x128xbf16>, vector<128x128xbf16>, vector<256x128xf32> -> vector<256x128xf32>
    %27 = arith.addf %21, %26 : vector<256x128xf32>
    %c1_39 = arith.constant 1 : index
    %c0_40 = arith.constant 0 : index
    %c0_41 = arith.constant 0 : index
    %28 = vector.load %arg9[%c1_39, %c0_40, %c0_41] : memref<18x24x128xbf16, #tpu.memory_space<vmem>>, vector<16x16x128xbf16>
    %29 = vector.shape_cast %28 : vector<16x16x128xbf16> to vector<256x128xbf16>
    %c3 = arith.constant 3 : index
    %c0_42 = arith.constant 0 : index
    %c0_43 = arith.constant 0 : index
    %30 = vector.load %arg2[%c3, %c0_42, %c0_43] : memref<9x128x128xbf16, #tpu.memory_space<vmem>>, vector<1x128x128xbf16>
    %31 = vector.shape_cast %30 : vector<1x128x128xbf16> to vector<128x128xbf16>
    %cst_44 = arith.constant dense<0.000000e+00> : vector<256x128xf32>
    %32 = tpu.matmul %29, %31, %cst_44 {dimension_numbers = #tpu.dot_dimension_numbers<[1], [0], [0], [1], [0, 0, 1, 1], [], []>} : vector<256x128xbf16>, vector<128x128xbf16>, vector<256x128xf32> -> vector<256x128xf32>
    %33 = arith.addf %27, %32 : vector<256x128xf32>
    %c1_45 = arith.constant 1 : index
    %c1_46 = arith.constant 1 : index
    %c0_47 = arith.constant 0 : index
    %34 = vector.load %arg9[%c1_45, %c1_46, %c0_47] : memref<18x24x128xbf16, #tpu.memory_space<vmem>>, vector<16x16x128xbf16>
    %35 = vector.shape_cast %34 : vector<16x16x128xbf16> to vector<256x128xbf16>
    %c4 = arith.constant 4 : index
    %c0_48 = arith.constant 0 : index
    %c0_49 = arith.constant 0 : index
    %36 = vector.load %arg2[%c4, %c0_48, %c0_49] : memref<9x128x128xbf16, #tpu.memory_space<vmem>>, vector<1x128x128xbf16>
    %37 = vector.shape_cast %36 : vector<1x128x128xbf16> to vector<128x128xbf16>
    %cst_50 = arith.constant dense<0.000000e+00> : vector<256x128xf32>
    %38 = tpu.matmul %35, %37, %cst_50 {dimension_numbers = #tpu.dot_dimension_numbers<[1], [0], [0], [1], [0, 0, 1, 1], [], []>} : vector<256x128xbf16>, vector<128x128xbf16>, vector<256x128xf32> -> vector<256x128xf32>
    %39 = arith.addf %33, %38 : vector<256x128xf32>
    %c1_51 = arith.constant 1 : index
    %c2_52 = arith.constant 2 : index
    %c0_53 = arith.constant 0 : index
    %40 = vector.load %arg9[%c1_51, %c2_52, %c0_53] : memref<18x24x128xbf16, #tpu.memory_space<vmem>>, vector<16x16x128xbf16>
    %41 = vector.shape_cast %40 : vector<16x16x128xbf16> to vector<256x128xbf16>
    %c5 = arith.constant 5 : index
    %c0_54 = arith.constant 0 : index
    %c0_55 = arith.constant 0 : index
    %42 = vector.load %arg2[%c5, %c0_54, %c0_55] : memref<9x128x128xbf16, #tpu.memory_space<vmem>>, vector<1x128x128xbf16>
    %43 = vector.shape_cast %42 : vector<1x128x128xbf16> to vector<128x128xbf16>
    %cst_56 = arith.constant dense<0.000000e+00> : vector<256x128xf32>
    %44 = tpu.matmul %41, %43, %cst_56 {dimension_numbers = #tpu.dot_dimension_numbers<[1], [0], [0], [1], [0, 0, 1, 1], [], []>} : vector<256x128xbf16>, vector<128x128xbf16>, vector<256x128xf32> -> vector<256x128xf32>
    %45 = arith.addf %39, %44 : vector<256x128xf32>
    %c2_57 = arith.constant 2 : index
    %c0_58 = arith.constant 0 : index
    %c0_59 = arith.constant 0 : index
    %46 = vector.load %arg9[%c2_57, %c0_58, %c0_59] : memref<18x24x128xbf16, #tpu.memory_space<vmem>>, vector<16x16x128xbf16>
    %47 = vector.shape_cast %46 : vector<16x16x128xbf16> to vector<256x128xbf16>
    %c6 = arith.constant 6 : index
    %c0_60 = arith.constant 0 : index
    %c0_61 = arith.constant 0 : index
    %48 = vector.load %arg2[%c6, %c0_60, %c0_61] : memref<9x128x128xbf16, #tpu.memory_space<vmem>>, vector<1x128x128xbf16>
    %49 = vector.shape_cast %48 : vector<1x128x128xbf16> to vector<128x128xbf16>
    %cst_62 = arith.constant dense<0.000000e+00> : vector<256x128xf32>
    %50 = tpu.matmul %47, %49, %cst_62 {dimension_numbers = #tpu.dot_dimension_numbers<[1], [0], [0], [1], [0, 0, 1, 1], [], []>} : vector<256x128xbf16>, vector<128x128xbf16>, vector<256x128xf32> -> vector<256x128xf32>
    %51 = arith.addf %45, %50 : vector<256x128xf32>
    %c2_63 = arith.constant 2 : index
    %c1_64 = arith.constant 1 : index
    %c0_65 = arith.constant 0 : index
    %52 = vector.load %arg9[%c2_63, %c1_64, %c0_65] : memref<18x24x128xbf16, #tpu.memory_space<vmem>>, vector<16x16x128xbf16>
    %53 = vector.shape_cast %52 : vector<16x16x128xbf16> to vector<256x128xbf16>
    %c7 = arith.constant 7 : index
    %c0_66 = arith.constant 0 : index
    %c0_67 = arith.constant 0 : index
    %54 = vector.load %arg2[%c7, %c0_66, %c0_67] : memref<9x128x128xbf16, #tpu.memory_space<vmem>>, vector<1x128x128xbf16>
    %55 = vector.shape_cast %54 : vector<1x128x128xbf16> to vector<128x128xbf16>
    %cst_68 = arith.constant dense<0.000000e+00> : vector<256x128xf32>
    %56 = tpu.matmul %53, %55, %cst_68 {dimension_numbers = #tpu.dot_dimension_numbers<[1], [0], [0], [1], [0, 0, 1, 1], [], []>} : vector<256x128xbf16>, vector<128x128xbf16>, vector<256x128xf32> -> vector<256x128xf32>
    %57 = arith.addf %51, %56 : vector<256x128xf32>
    %c2_69 = arith.constant 2 : index
    %c2_70 = arith.constant 2 : index
    %c0_71 = arith.constant 0 : index
    %58 = vector.load %arg9[%c2_69, %c2_70, %c0_71] : memref<18x24x128xbf16, #tpu.memory_space<vmem>>, vector<16x16x128xbf16>
    %59 = vector.shape_cast %58 : vector<16x16x128xbf16> to vector<256x128xbf16>
    %c8 = arith.constant 8 : index
    %c0_72 = arith.constant 0 : index
    %c0_73 = arith.constant 0 : index
    %60 = vector.load %arg2[%c8, %c0_72, %c0_73] : memref<9x128x128xbf16, #tpu.memory_space<vmem>>, vector<1x128x128xbf16>
    %61 = vector.shape_cast %60 : vector<1x128x128xbf16> to vector<128x128xbf16>
    %cst_74 = arith.constant dense<0.000000e+00> : vector<256x128xf32>
    %62 = tpu.matmul %59, %61, %cst_74 {dimension_numbers = #tpu.dot_dimension_numbers<[1], [0], [0], [1], [0, 0, 1, 1], [], []>} : vector<256x128xbf16>, vector<128x128xbf16>, vector<256x128xf32> -> vector<256x128xf32>
    %63 = arith.addf %57, %62 : vector<256x128xf32>
    %c0_75 = arith.constant 0 : index
    %c0_76 = arith.constant 0 : index
    %64 = vector.load %arg3[%c0_75, %c0_76] : memref<1x128xf32, #tpu.memory_space<vmem>>, vector<1x128xf32>
    %65 = vector.broadcast %64 : vector<1x128xf32> to vector<256x128xf32>
    %66 = arith.mulf %63, %65 : vector<256x128xf32>
    %c0_77 = arith.constant 0 : index
    %c0_78 = arith.constant 0 : index
    %67 = vector.load %arg4[%c0_77, %c0_78] : memref<1x128xf32, #tpu.memory_space<vmem>>, vector<1x128xf32>
    %68 = vector.broadcast %67 : vector<1x128xf32> to vector<256x128xf32>
    %69 = arith.addf %66, %68 : vector<256x128xf32>
    %cst_79 = arith.constant 0.000000e+00 : f32
    %70 = vector.broadcast %cst_79 : f32 to vector<256x128xf32>
    %71 = arith.maximumf %69, %70 : vector<256x128xf32>
    %72 = vector.shape_cast %71 : vector<256x128xf32> to vector<16x16x128xf32>
    %73 = arith.truncf %72 : vector<16x16x128xf32> to vector<16x16x128xbf16>
    %c1_80 = arith.constant 1 : index
    %c1_81 = arith.constant 1 : index
    %c0_82 = arith.constant 0 : index
    %74 = vector.load %arg9[%c1_80, %c1_81, %c0_82] : memref<18x24x128xbf16, #tpu.memory_space<vmem>>, vector<16x16x128xbf16>
    tpu.vector_store %arg9[%c1_80, %c1_81, %c0_82], %73 {strides = array<i32>} : memref<18x24x128xbf16, #tpu.memory_space<vmem>>, vector<16x16x128xbf16>,
    %c0_83 = arith.constant 0 : index
    %c0_84 = arith.constant 0 : index
    %c0_85 = arith.constant 0 : index
    %75 = vector.load %arg9[%c0_83, %c0_84, %c0_85] : memref<18x24x128xbf16, #tpu.memory_space<vmem>>, vector<16x16x128xbf16>
    %76 = vector.shape_cast %75 : vector<16x16x128xbf16> to vector<256x128xbf16>
    %c0_86 = arith.constant 0 : index
    %c0_87 = arith.constant 0 : index
    %c0_88 = arith.constant 0 : index
    %77 = vector.load %arg5[%c0_86, %c0_87, %c0_88] : memref<9x128x128xbf16, #tpu.memory_space<vmem>>, vector<1x128x128xbf16>
    %78 = vector.shape_cast %77 : vector<1x128x128xbf16> to vector<128x128xbf16>
    %cst_89 = arith.constant dense<0.000000e+00> : vector<256x128xf32>
    %79 = tpu.matmul %76, %78, %cst_89 {dimension_numbers = #tpu.dot_dimension_numbers<[1], [0], [0], [1], [0, 0, 1, 1], [], []>} : vector<256x128xbf16>, vector<128x128xbf16>, vector<256x128xf32> -> vector<256x128xf32>
    %c0_90 = arith.constant 0 : index
    %c1_91 = arith.constant 1 : index
    %c0_92 = arith.constant 0 : index
    %80 = vector.load %arg9[%c0_90, %c1_91, %c0_92] : memref<18x24x128xbf16, #tpu.memory_space<vmem>>, vector<16x16x128xbf16>
    %81 = vector.shape_cast %80 : vector<16x16x128xbf16> to vector<256x128xbf16>
    %c1_93 = arith.constant 1 : index
    %c0_94 = arith.constant 0 : index
    %c0_95 = arith.constant 0 : index
    %82 = vector.load %arg5[%c1_93, %c0_94, %c0_95] : memref<9x128x128xbf16, #tpu.memory_space<vmem>>, vector<1x128x128xbf16>
    %83 = vector.shape_cast %82 : vector<1x128x128xbf16> to vector<128x128xbf16>
    %cst_96 = arith.constant dense<0.000000e+00> : vector<256x128xf32>
    %84 = tpu.matmul %81, %83, %cst_96 {dimension_numbers = #tpu.dot_dimension_numbers<[1], [0], [0], [1], [0, 0, 1, 1], [], []>} : vector<256x128xbf16>, vector<128x128xbf16>, vector<256x128xf32> -> vector<256x128xf32>
    %85 = arith.addf %79, %84 : vector<256x128xf32>
    %c0_97 = arith.constant 0 : index
    %c2_98 = arith.constant 2 : index
    %c0_99 = arith.constant 0 : index
    %86 = vector.load %arg9[%c0_97, %c2_98, %c0_99] : memref<18x24x128xbf16, #tpu.memory_space<vmem>>, vector<16x16x128xbf16>
    %87 = vector.shape_cast %86 : vector<16x16x128xbf16> to vector<256x128xbf16>
    %c2_100 = arith.constant 2 : index
    %c0_101 = arith.constant 0 : index
    %c0_102 = arith.constant 0 : index
    %88 = vector.load %arg5[%c2_100, %c0_101, %c0_102] : memref<9x128x128xbf16, #tpu.memory_space<vmem>>, vector<1x128x128xbf16>
    %89 = vector.shape_cast %88 : vector<1x128x128xbf16> to vector<128x128xbf16>
    %cst_103 = arith.constant dense<0.000000e+00> : vector<256x128xf32>
    %90 = tpu.matmul %87, %89, %cst_103 {dimension_numbers = #tpu.dot_dimension_numbers<[1], [0], [0], [1], [0, 0, 1, 1], [], []>} : vector<256x128xbf16>, vector<128x128xbf16>, vector<256x128xf32> -> vector<256x128xf32>
    %91 = arith.addf %85, %90 : vector<256x128xf32>
    %c1_104 = arith.constant 1 : index
    %c0_105 = arith.constant 0 : index
    %c0_106 = arith.constant 0 : index
    %92 = vector.load %arg9[%c1_104, %c0_105, %c0_106] : memref<18x24x128xbf16, #tpu.memory_space<vmem>>, vector<16x16x128xbf16>
    %93 = vector.shape_cast %92 : vector<16x16x128xbf16> to vector<256x128xbf16>
    %c3_107 = arith.constant 3 : index
    %c0_108 = arith.constant 0 : index
    %c0_109 = arith.constant 0 : index
    %94 = vector.load %arg5[%c3_107, %c0_108, %c0_109] : memref<9x128x128xbf16, #tpu.memory_space<vmem>>, vector<1x128x128xbf16>
    %95 = vector.shape_cast %94 : vector<1x128x128xbf16> to vector<128x128xbf16>
    %cst_110 = arith.constant dense<0.000000e+00> : vector<256x128xf32>
    %96 = tpu.matmul %93, %95, %cst_110 {dimension_numbers = #tpu.dot_dimension_numbers<[1], [0], [0], [1], [0, 0, 1, 1], [], []>} : vector<256x128xbf16>, vector<128x128xbf16>, vector<256x128xf32> -> vector<256x128xf32>
    %97 = arith.addf %91, %96 : vector<256x128xf32>
    %c1_111 = arith.constant 1 : index
    %c1_112 = arith.constant 1 : index
    %c0_113 = arith.constant 0 : index
    %98 = vector.load %arg9[%c1_111, %c1_112, %c0_113] : memref<18x24x128xbf16, #tpu.memory_space<vmem>>, vector<16x16x128xbf16>
    %99 = vector.shape_cast %98 : vector<16x16x128xbf16> to vector<256x128xbf16>
    %c4_114 = arith.constant 4 : index
    %c0_115 = arith.constant 0 : index
    %c0_116 = arith.constant 0 : index
    %100 = vector.load %arg5[%c4_114, %c0_115, %c0_116] : memref<9x128x128xbf16, #tpu.memory_space<vmem>>, vector<1x128x128xbf16>
    %101 = vector.shape_cast %100 : vector<1x128x128xbf16> to vector<128x128xbf16>
    %cst_117 = arith.constant dense<0.000000e+00> : vector<256x128xf32>
    %102 = tpu.matmul %99, %101, %cst_117 {dimension_numbers = #tpu.dot_dimension_numbers<[1], [0], [0], [1], [0, 0, 1, 1], [], []>} : vector<256x128xbf16>, vector<128x128xbf16>, vector<256x128xf32> -> vector<256x128xf32>
    %103 = arith.addf %97, %102 : vector<256x128xf32>
    %c1_118 = arith.constant 1 : index
    %c2_119 = arith.constant 2 : index
    %c0_120 = arith.constant 0 : index
    %104 = vector.load %arg9[%c1_118, %c2_119, %c0_120] : memref<18x24x128xbf16, #tpu.memory_space<vmem>>, vector<16x16x128xbf16>
    %105 = vector.shape_cast %104 : vector<16x16x128xbf16> to vector<256x128xbf16>
    %c5_121 = arith.constant 5 : index
    %c0_122 = arith.constant 0 : index
    %c0_123 = arith.constant 0 : index
    %106 = vector.load %arg5[%c5_121, %c0_122, %c0_123] : memref<9x128x128xbf16, #tpu.memory_space<vmem>>, vector<1x128x128xbf16>
    %107 = vector.shape_cast %106 : vector<1x128x128xbf16> to vector<128x128xbf16>
    %cst_124 = arith.constant dense<0.000000e+00> : vector<256x128xf32>
    %108 = tpu.matmul %105, %107, %cst_124 {dimension_numbers = #tpu.dot_dimension_numbers<[1], [0], [0], [1], [0, 0, 1, 1], [], []>} : vector<256x128xbf16>, vector<128x128xbf16>, vector<256x128xf32> -> vector<256x128xf32>
    %109 = arith.addf %103, %108 : vector<256x128xf32>
    %c2_125 = arith.constant 2 : index
    %c0_126 = arith.constant 0 : index
    %c0_127 = arith.constant 0 : index
    %110 = vector.load %arg9[%c2_125, %c0_126, %c0_127] : memref<18x24x128xbf16, #tpu.memory_space<vmem>>, vector<16x16x128xbf16>
    %111 = vector.shape_cast %110 : vector<16x16x128xbf16> to vector<256x128xbf16>
    %c6_128 = arith.constant 6 : index
    %c0_129 = arith.constant 0 : index
    %c0_130 = arith.constant 0 : index
    %112 = vector.load %arg5[%c6_128, %c0_129, %c0_130] : memref<9x128x128xbf16, #tpu.memory_space<vmem>>, vector<1x128x128xbf16>
    %113 = vector.shape_cast %112 : vector<1x128x128xbf16> to vector<128x128xbf16>
    %cst_131 = arith.constant dense<0.000000e+00> : vector<256x128xf32>
    %114 = tpu.matmul %111, %113, %cst_131 {dimension_numbers = #tpu.dot_dimension_numbers<[1], [0], [0], [1], [0, 0, 1, 1], [], []>} : vector<256x128xbf16>, vector<128x128xbf16>, vector<256x128xf32> -> vector<256x128xf32>
    %115 = arith.addf %109, %114 : vector<256x128xf32>
    %c2_132 = arith.constant 2 : index
    %c1_133 = arith.constant 1 : index
    %c0_134 = arith.constant 0 : index
    %116 = vector.load %arg9[%c2_132, %c1_133, %c0_134] : memref<18x24x128xbf16, #tpu.memory_space<vmem>>, vector<16x16x128xbf16>
    %117 = vector.shape_cast %116 : vector<16x16x128xbf16> to vector<256x128xbf16>
    %c7_135 = arith.constant 7 : index
    %c0_136 = arith.constant 0 : index
    %c0_137 = arith.constant 0 : index
    %118 = vector.load %arg5[%c7_135, %c0_136, %c0_137] : memref<9x128x128xbf16, #tpu.memory_space<vmem>>, vector<1x128x128xbf16>
    %119 = vector.shape_cast %118 : vector<1x128x128xbf16> to vector<128x128xbf16>
    %cst_138 = arith.constant dense<0.000000e+00> : vector<256x128xf32>
    %120 = tpu.matmul %117, %119, %cst_138 {dimension_numbers = #tpu.dot_dimension_numbers<[1], [0], [0], [1], [0, 0, 1, 1], [], []>} : vector<256x128xbf16>, vector<128x128xbf16>, vector<256x128xf32> -> vector<256x128xf32>
    %121 = arith.addf %115, %120 : vector<256x128xf32>
    %c2_139 = arith.constant 2 : index
    %c2_140 = arith.constant 2 : index
    %c0_141 = arith.constant 0 : index
    %122 = vector.load %arg9[%c2_139, %c2_140, %c0_141] : memref<18x24x128xbf16, #tpu.memory_space<vmem>>, vector<16x16x128xbf16>
    %123 = vector.shape_cast %122 : vector<16x16x128xbf16> to vector<256x128xbf16>
    %c8_142 = arith.constant 8 : index
    %c0_143 = arith.constant 0 : index
    %c0_144 = arith.constant 0 : index
    %124 = vector.load %arg5[%c8_142, %c0_143, %c0_144] : memref<9x128x128xbf16, #tpu.memory_space<vmem>>, vector<1x128x128xbf16>
    %125 = vector.shape_cast %124 : vector<1x128x128xbf16> to vector<128x128xbf16>
    %cst_145 = arith.constant dense<0.000000e+00> : vector<256x128xf32>
    %126 = tpu.matmul %123, %125, %cst_145 {dimension_numbers = #tpu.dot_dimension_numbers<[1], [0], [0], [1], [0, 0, 1, 1], [], []>} : vector<256x128xbf16>, vector<128x128xbf16>, vector<256x128xf32> -> vector<256x128xf32>
    %127 = arith.addf %121, %126 : vector<256x128xf32>
    %c0_146 = arith.constant 0 : index
    %c0_147 = arith.constant 0 : index
    %128 = vector.load %arg6[%c0_146, %c0_147] : memref<1x128xf32, #tpu.memory_space<vmem>>, vector<1x128xf32>
    %129 = vector.broadcast %128 : vector<1x128xf32> to vector<256x128xf32>
    %130 = arith.mulf %127, %129 : vector<256x128xf32>
    %c0_148 = arith.constant 0 : index
    %c0_149 = arith.constant 0 : index
    %131 = vector.load %arg7[%c0_148, %c0_149] : memref<1x128xf32, #tpu.memory_space<vmem>>, vector<1x128xf32>
    %132 = vector.broadcast %131 : vector<1x128xf32> to vector<256x128xf32>
    %133 = arith.addf %130, %132 : vector<256x128xf32>
    %cst_150 = arith.constant 0.000000e+00 : f32
    %134 = vector.broadcast %cst_150 : f32 to vector<256x128xf32>
    %135 = arith.maximumf %133, %134 : vector<256x128xf32>
    %136 = vector.shape_cast %135 : vector<256x128xf32> to vector<1x16x16x128xf32>
    %137 = arith.truncf %136 : vector<1x16x16x128xf32> to vector<1x16x16x128xbf16>
    %c0_151 = arith.constant 0 : index
    %c0_152 = arith.constant 0 : index
    %c0_153 = arith.constant 0 : index
    %c0_154 = arith.constant 0 : index
    %138 = vector.load %arg8[%c0_151, %c0_152, %c0_153, %c0_154] : memref<1x16x16x128xbf16, #tpu.memory_space<vmem>>, vector<1x16x16x128xbf16>
    tpu.vector_store %arg8[%c0_151, %c0_152, %c0_153, %c0_154], %137 {strides = array<i32>} : memref<1x16x16x128xbf16, #tpu.memory_space<vmem>>, vector<1x16x16x128xbf16>,
    return
  }
  func.func @transform_0(%arg0: i32) -> (i32, i32, i32, i32) {
    %c0_i32 = arith.constant 0 : i32
    %c0_i32_0 = arith.constant 0 : i32
    %c0_i32_1 = arith.constant 0 : i32
    %c0_i32_2 = arith.constant 0 : i32
    return %arg0, %c0_i32, %c0_i32_0, %c0_i32_1 : i32, i32, i32, i32
  }
  func.func @transform_1(%arg0: i32) -> (i32, i32, i32) {
    %c0_i32 = arith.constant 0 : i32
    %c0_i32_0 = arith.constant 0 : i32
    %c0_i32_1 = arith.constant 0 : i32
    %c0_i32_2 = arith.constant 0 : i32
    return %c0_i32, %c0_i32_0, %c0_i32_1 : i32, i32, i32
  }
  func.func @transform_2(%arg0: i32) -> (i32, i32) {
    %c0_i32 = arith.constant 0 : i32
    %c0_i32_0 = arith.constant 0 : i32
    %c0_i32_1 = arith.constant 0 : i32
    return %c0_i32, %c0_i32_0 : i32, i32
  }
  func.func @transform_3(%arg0: i32) -> (i32, i32) {
    %c0_i32 = arith.constant 0 : i32
    %c0_i32_0 = arith.constant 0 : i32
    %c0_i32_1 = arith.constant 0 : i32
    return %c0_i32, %c0_i32_0 : i32, i32
  }
  func.func @transform_4(%arg0: i32) -> (i32, i32, i32) {
    %c0_i32 = arith.constant 0 : i32
    %c0_i32_0 = arith.constant 0 : i32
    %c0_i32_1 = arith.constant 0 : i32
    %c0_i32_2 = arith.constant 0 : i32
    return %c0_i32, %c0_i32_0, %c0_i32_1 : i32, i32, i32
  }
  func.func @transform_5(%arg0: i32) -> (i32, i32) {
    %c0_i32 = arith.constant 0 : i32
    %c0_i32_0 = arith.constant 0 : i32
    %c0_i32_1 = arith.constant 0 : i32
    return %c0_i32, %c0_i32_0 : i32, i32
  }
  func.func @transform_6(%arg0: i32) -> (i32, i32) {
    %c0_i32 = arith.constant 0 : i32
    %c0_i32_0 = arith.constant 0 : i32
    %c0_i32_1 = arith.constant 0 : i32
    return %c0_i32, %c0_i32_0 : i32, i32
  }
  func.func @transform_7(%arg0: i32) -> (i32, i32, i32, i32) {
    %c0_i32 = arith.constant 0 : i32
    %c0_i32_0 = arith.constant 0 : i32
    %c0_i32_1 = arith.constant 0 : i32
    %c0_i32_2 = arith.constant 0 : i32
    return %arg0, %c0_i32, %c0_i32_0, %c0_i32_1 : i32, i32, i32, i32
  }
}

</mosaic_0001>

<bundles_post_ra>
// kernel: double_conv.1
= control target key start
LH: loop header
LB: loop body
LE: loop exit
PB: predicated region body
PF: predicated region fallthrough
CT: control target
= control target key end

     0   :  { %s14646_s24 = smov 0   ;;  %s18048_s0 = inlined_call_operand.vmem [shape: bf16[2,16,16,128], index: 0, kind: input, shape index: {}]   ;;  %s18049_s1 = inlined_call_operand.vmem [shape: bf16[9,128,128], index: 1, kind: input, shape index: {}]   ;;  %s18050_s2 = inlined_call_operand.vmem [shape: f32[1,128], index: 2, kind: input, shape index: {}]   ;;  %s18051_s3 = inlined_call_operand.vmem [shape: f32[1,128], index: 3, kind: input, shape index: {}]   ;;  %s18052_s4 = inlined_call_operand.vmem [shape: bf16[9,128,128], index: 4, kind: input, shape index: {}]   ;;  %s18053_s5 = inlined_call_operand.vmem [shape: f32[1,128], index: 5, kind: input, shape index: {}]   ;;  %s18054_s6 = inlined_call_operand.vmem [shape: f32[1,128], index: 6, kind: input, shape index: {}]   ;;  %s18055_s7 = inlined_call_operand.vmem [shape: bf16[2,16,16,128], index: 7, kind: output, shape index: {}]  }
   0x1 LB: > { %s11440_s25 = sadd.s32 4294967295, %s14603_s24   ;;  %p11444_p0 = scmp.ge.s32.totalorder %s14603_s24, 1  ;;  %s14603_s24 = sphi %s14646_s24, %s17_s24  }
   0x2   : > { %p237_p1 = scmp.lt.s32.totalorder %s14603_s24, 3 }
   0x4   : > { %p238_p2 = pnand %p11444_p0, %p237_p1 }
   0x6   : > { %241 = sbr.rel (%p238_p2) target bundleno = 1736 (0x6c8), region = 48 }
   0xd   : > { %v14281_v0 = vld [vmem:[%s18049_s1 + $0x40] sm:$0xff]   ;;  %v14282_v1 = vld [vmem:[%s18049_s1 + $0x48] sm:$0xff]   ;;  %v14605_v2 = vmov 0   ;;  %p269_p3 = scmp.lt.s32.totalorder %s11440_s25, 1  ;;  %v14283_v3 = vld [vmem:[%s18049_s1 + $0x50] sm:$0xff]   ;;  %vm287_vm0 = vcmask 1040384  }
   0xe   : > { %280 = vst [vmem:[#allocation2] sm:$0xf] %v14605_v2  ;;  %281 = vst [vmem:[#allocation2 + $0x4] sm:$0xf] %v14605_v2  ;;  %12896 = vmatprep.subr.bf16.mxu0 %v14281_v0  ;;  %v14284_v4 = vld [vmem:[%s18049_s1 + $0x58] sm:$0xff]   ;;  %v18134_v6 = vmov 0 }
   0xf   : > { %282 = vst [vmem:[#allocation2 + $0x8] sm:$0xf] %v14605_v2  ;;  %284 = vst [vmem:[#allocation2 + $0xcc] sm:$0xf] %v14605_v2  ;;  %12897 = vmatpush3.bf16.msra.mxu0 %v14281_v0  ;;  %s18334_s25 = smov (!%p269_p3, %s11440_s25), 1  ;;  %v18137_v10 = vmov 0 }
  0x10   : > { %285 = vst [vmem:[#allocation2 + $0xd0] sm:$0xf] %v14605_v2  ;;  %286 = vst [vmem:[#allocation2 + $0xd4] sm:$0xf] %v14605_v2  ;;  %12898 = vmatprep.subr.bf16.mxu0 %v14282_v1  ;;  %s12303_s11 = sshll.u32 %s18334_s25, 7  ;;  %v14285_v13 = vld [vmem:[%s18049_s1 + $0x60] sm:$0xff]  }
  0x11   : > { %vm288_vm1 = vsmask.f32 256  ;;  %vm344_vm2 = vsmask.f32 7938  ;;  %s14679_s14 = scalar_lea.vmem %s18048_s0, %s12303_s11  ;;  %vm933_vm5 = vsmask.f32 3328  ;;  %s17971_s9 = scalar_lea.vmem %s18055_s7, %s12303_s11 }
  0x12   : > { %vm14670_vm3 = vmand %vm287_vm0, %vm288_vm1  ;;  %v293_v15 = vld [vmem:[#allocation2 + $0xc] sm:$0x1]  ;;  %v349_v16 = vld [vmem:[#allocation2 + $0x14] sm:$0x1]  ;;  %vm432_vm6 = vsmask.f32 4368 }
  0x13   : > { %12899 = vmatpush3.bf16.msra.mxu0 %v14282_v1  ;;  %v18135_v6 = vsel %vm14670_vm3, 4294967295, %v18134_v6  ;;  %vm14684_vm4 = vmand %vm287_vm0, %vm344_vm2  ;;  %v294_v19 = vsel %vm14670_vm3, 0, %v293_v15  ;;  %v400_v21 = vld [vmem:[%s14679_s14] sm:$0xf]  ;;  %v401_v22 = vld [vmem:[%s14679_s14 + $0x4] sm:$0xf] }
  0x14   : > { %12900 = vmatprep.subr.bf16.mxu0 %v14283_v3  ;;  %18136 = vst [vmem:[#allocation3_spill] sm:$0xff] %v18135_v6  ;;  %v18138_v10 = vsel %vm14684_vm4, 4294967295, %v18137_v10  ;;  %v350_v20 = vsel %vm14684_vm4, 0, %v349_v16  ;;  %295 = vst [vmem:[#allocation2 + $0xc] sm:$0x1] %v294_v19  ;;  %v435_v23 = vshrl.u32 %v400_v21, 16 }
  0x15   : > { %v290_v5 = vld [vmem:[#allocation2] sm:$0x1]  ;;  %v870_v8 = vld [vmem:[#allocation2 + $0x4] sm:$0xf]  ;;  %18139 = vst [vmem:[#allocation4_spill] sm:$0xff] %v18138_v10  ;;  %v438_v24 = vshll.u32 %v400_v21, 16  ;;  %vm14712_vm9 = vmor %vm288_vm1, %vm432_vm6 }
  0x16   : > { %v346_v7 = vld [vmem:[#allocation2 + $0x8] sm:$0x1]  ;;  %v291_v9 = vsel %vm14670_vm3, 0, %v290_v5  ;;  %v946_v11 = vshll.u32 %v870_v8, 16  ;;  %v950_v12 = vshrl.u32 %v870_v8, 16  ;;  %v443_v25 = vshrl.u32 %v401_v22, 16 }
  0x17   : > { %12901 = vmatpush3.bf16.msra.mxu0 %v14283_v3  ;;  %292 = vst [vmem:[#allocation2] sm:$0x1] %v291_v9  ;;  %v347_v14 = vsel %vm14684_vm4, 0, %v346_v7  ;;  %351 = vst [vmem:[#allocation2 + $0x14] sm:$0x1] %v350_v20  ;;  %v446_v26 = vshll.u32 %v401_v22, 16 }
  0x18   : > { %12902 = vmatprep.subr.bf16.mxu0 %v14284_v4  ;;  %348 = vst [vmem:[#allocation2 + $0x8] sm:$0x1] %v347_v14  ;;  %v14693_v17 = vrot.slane %v946_v11, 5  ;;  %v952_v18 = vrot.slane %v950_v12, 4  ;;  %vm755_vm7 = vcmask 1043456   ;;  %v437_v28 = vrot.slane %v435_v23, 7 }
  0x19   : > { %v296_v29 = vld [vmem:[#allocation2 + $0x18] sm:$0x1]  ;;  %v352_v30 = vld [vmem:[#allocation2 + $0x20] sm:$0x1]  ;;  %v14286_v31 = vld [vmem:[%s18049_s1 + $0x68] sm:$0xff]   ;;  %v445_v32 = vrot.slane %v443_v25, 7 }
  0x1a   : > { %v953_v27 = vor.u32 %v952_v18, %v14693_v17  ;;  %v297_v33 = vsel %vm14670_vm3, 0, %v296_v29  ;;  %v353_v34 = vsel %vm14684_vm4, 0, %v352_v30  ;;  %v402_v35 = vld [vmem:[%s14679_s14 + $0x8] sm:$0xf]  ;;  %vm934_vm8 = vsmask.f32 7440  ;;  %vm14722_vm10 = vmand %vm755_vm7, %vm344_vm2 }
  0x1b   : > { %12903 = vmatpush3.bf16.msra.mxu0 %v14284_v4  ;;  %v18140_v36 = vmov 0  ;;  %v440_v37 = vor.u32 %v438_v24, %v437_v28  ;;  %v441_v38 = vrot.slane %v437_v28, 4  ;;  %298 = vst [vmem:[#allocation2 + $0x18] sm:$0x1] %v297_v33  ;;  %354 = vst [vmem:[#allocation2 + $0x20] sm:$0x1] %v353_v34  ;;  %v448_v44 = vor.u32 %v446_v26, %v445_v32 }
  0x1c   : > { %12904 = vmatprep.subr.bf16.mxu0 %v14285_v13  ;;  %v18141_v36 = vsel %vm14712_vm9, 4294967295, %v18140_v36  ;;  %v403_v39 = vld [vmem:[%s14679_s14 + $0xc] sm:$0xf]  ;;  %v452_v40 = vshrl.u32 %v402_v35, 16  ;;  %v14287_v41 = vld [vmem:[%s18049_s1 + $0x70] sm:$0xff]   ;;  %v18143_v42 = vmov 0  ;;  %vm14730_vm11 = vmor %vm933_vm5, %vm934_vm8 }
  0x1d   : > { %18142 = vst [vmem:[#allocation5_spill] sm:$0xff] %v18141_v36  ;;  %v18144_v42 = vsel %vm14722_vm10, 4294967295, %v18143_v42  ;;  %v450_v45 = vrot.slane %v445_v32, 4  ;;  %v455_v46 = vshll.u32 %v402_v35, 16  ;;  %v460_v47 = vshrl.u32 %v403_v39, 16  ;;  %v14288_v7 = vld [vmem:[%s18049_s1 + $0x78] sm:$0xff]  }
  0x1e   : > { %18145 = vst [vmem:[#allocation6_spill] sm:$0xff] %v18144_v42  ;;  %v869_v43 = vld [vmem:[#allocation2] sm:$0xf]  ;;  %v954_v51 = vrot.slane %v953_v27, 4  ;;  %v454_v52 = vrot.slane %v452_v40, 7  ;;  %v449_v54 = vsel %vm14712_vm9, %v441_v38, %v448_v44  ;;  %v463_v57 = vshll.u32 %v403_v39, 16 }
  0x1f   : > { %12905 = vmatpush3.bf16.msra.mxu0 %v14285_v13  ;;  %v917_v48 = vld [vmem:[#allocation2 + $0x8] sm:$0x1]  ;;  %v937_v49 = vshrl.u32 %v869_v43, 16  ;;  %v940_v50 = vshll.u32 %v869_v43, 16  ;;  %v757_v55 = vld [vmem:[#allocation2 + $0xc] sm:$0xf] }
  0x20   : > { %12906 = vmatprep.subr.bf16.mxu0 %v14286_v31  ;;  %v956_v53 = vshll.u32 %v917_v48, 16  ;;  %v761_v56 = vld [vmem:[#allocation2 + $0x14] sm:$0x1]  ;;  %v758_v61 = vsel %vm14722_vm10, %v440_v37, %v757_v55  ;;  %760 = vst [vmem:[#allocation2 + $0x10] sm:$0xf] %v449_v54  ;;  %v457_v2 = vor.u32 %v455_v46, %v454_v52  ;;  %v458_v3 = vrot.slane %v454_v52, 4 }
  0x21   : > { %v939_v59 = vrot.slane %v937_v49, 4  ;;  %v942_v60 = vrot.slane %v940_v50, 5  ;;  %v762_v62 = vsel %vm14670_vm3, %v450_v45, %v761_v56  ;;  %v299_v63 = vld [vmem:[#allocation2 + $0x24] sm:$0x1]  ;;  %v355_v0 = vld [vmem:[#allocation2 + $0x2c] sm:$0x1] }
  0x22   : > { %v958_v1 = vrot.slane %v956_v53, 5  ;;  %759 = vst [vmem:[#allocation2 + $0xc] sm:$0xf] %v758_v61  ;;  %763 = vst [vmem:[#allocation2 + $0x14] sm:$0x1] %v762_v62  ;;  %v462_v4 = vrot.slane %v460_v47, 7 }
  0x23   : > { %v404_v5 = vld [vmem:[%s14679_s14 + $0x10] sm:$0xf]  ;;  %12907 = vmatpush3.bf16.msra.mxu0 %v14286_v31  ;;  %v943_v8 = vor.u32 %v942_v60, %v939_v59  ;;  %v300_v9 = vsel %vm14670_vm3, 0, %v299_v63  ;;  %v356_v11 = vsel %vm14684_vm4, 0, %v355_v0  ;;  %v405_v12 = vld [vmem:[%s14679_s14 + $0x14] sm:$0xf] }
  0x24   : > { %v469_v13 = vshrl.u32 %v404_v5, 16  ;;  %12908 = vmatprep.subr.bf16.mxu0 %v14287_v41  ;;  %v959_v14 = vsel %vm14730_vm11, %v954_v51, %v958_v1  ;;  %v465_v15 = vor.u32 %v463_v57, %v462_v4  ;;  %v467_v16 = vrot.slane %v462_v4, 4  ;;  %v764_v18 = vld [vmem:[#allocation2 + $0x18] sm:$0xf]  ;;  %v768_v19 = vld [vmem:[#allocation2 + $0x20] sm:$0x1] }
  0x25   : > { %301 = vst [vmem:[#allocation2 + $0x24] sm:$0x1] %v300_v9  ;;  %357 = vst [vmem:[#allocation2 + $0x2c] sm:$0x1] %v356_v11  ;;  %v472_v20 = vshll.u32 %v404_v5, 16  ;;  %v944_v21 = vrot.slane %v943_v8, 4  ;;  %v765_v22 = vsel %vm14722_vm10, %v457_v2, %v764_v18 }
  0x26   : > { %v471_v23 = vrot.slane %v469_v13, 7  ;;  %v477_v24 = vshrl.u32 %v405_v12, 16  ;;  %v466_v25 = vsel %vm14712_vm9, %v458_v3, %v465_v15  ;;  %766 = vst [vmem:[#allocation2 + $0x18] sm:$0xf] %v765_v22  ;;  %v769_v26 = vsel %vm14670_vm3, %v467_v16, %v768_v19  ;;  %v302_v28 = vld [vmem:[#allocation2 + $0x30] sm:$0x1] }
  0x27   : > { %v480_v27 = vshll.u32 %v405_v12, 16  ;;  %12909 = vmatpush3.bf16.msra.mxu0 %v14287_v41  ;;  %v949_v29 = vsel %vm14730_vm11, %v944_v21, %v14693_v17  ;;  %767 = vst [vmem:[#allocation2 + $0x1c] sm:$0xf] %v466_v25  ;;  %770 = vst [vmem:[#allocation2 + $0x20] sm:$0x1] %v769_v26  ;;  %v14761_v35 = vld [vmem:[%s18049_s1] sm:$0xff]  }
  0x28   : > { %v475_v30 = vrot.slane %v471_v23, 4  ;;  %v479_v31 = vrot.slane %v477_v24, 7  ;;  %v358_v32 = vld [vmem:[#allocation2 + $0x38] sm:$0x1]  ;;  %12910 = vmatprep.subr.bf16.mxu0 %v14288_v7  ;;  %v11465_v33 = vcombine.low %v949_v29, %v959_v14  ;;  %v872_v34 = vld [vmem:[#allocation2 + $0x10] sm:$0xf]  ;;  %v474_v37 = vor.u32 %v472_v20, %v471_v23 }
  0x29   : > { %v303_v38 = vsel %vm14670_vm3, 0, %v302_v28  ;;  %v359_v17 = vsel %vm14684_vm4, 0, %v358_v32  ;;  %v871_v39 = vld [vmem:[#allocation2 + $0xc] sm:$0xf]  ;;  %v918_v40 = vld [vmem:[#allocation2 + $0x14] sm:$0x1] }
  0x2a   : > { %v970_v41 = vshll.u32 %v872_v34, 16  ;;  %v974_v43 = vshrl.u32 %v872_v34, 16  ;;  %v482_v44 = vor.u32 %v480_v27, %v479_v31  ;;  %304 = vst [vmem:[#allocation2 + $0x30] sm:$0x1] %v303_v38  ;;  %360 = vst [vmem:[#allocation2 + $0x38] sm:$0x1] %v359_v17  ;;  %12912 = vmatprep.mubr.bf16.mxu0 %v11465_v33 }
  0x2b   : > { %v961_v45 = vshrl.u32 %v871_v39, 16  ;;  %v964_v46 = vshll.u32 %v871_v39, 16  ;;  %v980_v47 = vshll.u32 %v918_v40, 16  ;;  %v406_v48 = vld [vmem:[%s14679_s14 + $0x18] sm:$0xf]  ;;  %12911 = vmatpush3.bf16.msra.mxu0 %v14288_v7  ;;  %v484_v52 = vrot.slane %v479_v31, 4 }
  0x2c   : > { %v972_v49 = vrot.slane %v970_v41, 5  ;;  %v976_v50 = vrot.slane %v974_v43, 4  ;;  %v483_v51 = vsel %vm14712_vm9, %v475_v30, %v482_v44  ;;  %v771_v53 = vld [vmem:[#allocation2 + $0x24] sm:$0xf]  ;;  %12944 = vmatprep.subr.bf16.mxu0 %v14761_v35  ;;  %v775_v59 = vld [vmem:[#allocation2 + $0x2c] sm:$0x1] }
  0x2d   : > { %v963_v54 = vrot.slane %v961_v45, 4  ;;  %v966_v55 = vrot.slane %v964_v46, 5  ;;  %v982_v56 = vrot.slane %v980_v47, 5  ;;  %v772_v57 = vsel %vm14722_vm10, %v474_v37, %v771_v53  ;;  %774 = vst [vmem:[#allocation2 + $0x28] sm:$0xf] %v483_v51  ;;  %v14290_v25 = vld [vmem:[%s18049_s1 + $0x8] sm:$0xff]  }
  0x2e   : > { %v977_v60 = vor.u32 %v976_v50, %v972_v49  ;;  %v873_v61 = vld [vmem:[#allocation2 + $0x18] sm:$0xf]  ;;  %773 = vst [vmem:[#allocation2 + $0x24] sm:$0xf] %v772_v57  ;;  %v776_v62 = vsel %vm14670_vm3, %v484_v52, %v775_v59  ;;  %v486_v63 = vshrl.u32 %v406_v48, 16  ;;  %v489_v0 = vshll.u32 %v406_v48, 16 }
  0x2f   : > { %v967_v1 = vor.u32 %v966_v55, %v963_v54  ;;  %v874_v2 = vld [vmem:[#allocation2 + $0x1c] sm:$0xf]  ;;  %v919_v3 = vld [vmem:[#allocation2 + $0x20] sm:$0x1]  ;;  %v985_v4 = vshrl.u32 %v873_v61, 16  ;;  %v988_v5 = vshll.u32 %v873_v61, 16 }
  0x30   : > { %777 = vst [vmem:[#allocation2 + $0x2c] sm:$0x1] %v776_v62  ;;  %v978_v7 = vrot.slane %v977_v60, 4  ;;  %v994_v8 = vshll.u32 %v874_v2, 16  ;;  %v998_v9 = vshrl.u32 %v874_v2, 16  ;;  %v1004_v11 = vshll.u32 %v919_v3, 16 }
  0x31   : > { %v968_v12 = vrot.slane %v967_v1, 4  ;;  %v987_v13 = vrot.slane %v985_v4, 4  ;;  %v990_v14 = vrot.slane %v988_v5, 5  ;;  %v407_v15 = vld [vmem:[%s14679_s14 + $0x1c] sm:$0xf]  ;;  %v488_v16 = vrot.slane %v486_v63, 7 }
  0x32   : > { %v983_v18 = vsel %vm14730_vm11, %v978_v7, %v982_v56  ;;  %v996_v19 = vrot.slane %v994_v8, 5  ;;  %v1000_v20 = vrot.slane %v998_v9, 4  ;;  %v1006_v21 = vrot.slane %v1004_v11, 5  ;;  %v778_v22 = vld [vmem:[#allocation2 + $0x30] sm:$0xf] }
  0x33   : > { %v973_v23 = vsel %vm14730_vm11, %v968_v12, %v972_v49  ;;  %v991_v24 = vor.u32 %v990_v14, %v987_v13  ;;  %v491_v26 = vor.u32 %v489_v0, %v488_v16  ;;  %v492_v27 = vrot.slane %v488_v16, 4  ;;  %v305_v39 = vld [vmem:[#allocation2 + $0x3c] sm:$0x1]  ;;  %v361_v50 = vld [vmem:[#allocation2 + $0x44] sm:$0x1]  ;;  %v14291_v51 = vld [vmem:[%s18049_s1 + $0x10] sm:$0xff]  }
  0x34   : > { %v11466_v28 = vcombine.low %v973_v23, %v983_v18  ;;  %v1001_v29 = vor.u32 %v1000_v20, %v996_v19  ;;  %v876_v30 = vld [vmem:[#allocation2 + $0x28] sm:$0xf]  ;;  %v494_v31 = vshrl.u32 %v407_v15, 16  ;;  %v497_v32 = vshll.u32 %v407_v15, 16  ;;  %v782_v55 = vld [vmem:[#allocation2 + $0x38] sm:$0x1] }
  0x35   : > { %v992_v33 = vrot.slane %v991_v24, 4  ;;  %v875_v34 = vld [vmem:[#allocation2 + $0x24] sm:$0xf]  ;;  %v1018_v37 = vshll.u32 %v876_v30, 16  ;;  %v1022_v38 = vshrl.u32 %v876_v30, 16  ;;  %v779_v17 = vsel %vm14722_vm10, %v491_v26, %v778_v22  ;;  %v14292_v12 = vld [vmem:[%s18049_s1 + $0x18] sm:$0xff]  }
  0x36   : > { %12913 = vmatmul.mubr.bf16.vlgmr.msra.gmra.mrb[0].mxu0 %v11466_v28  ;;  %v1002_v40 = vrot.slane %v1001_v29, 4  ;;  %v1009_v43 = vshrl.u32 %v875_v34, 16  ;;  %v1012_v44 = vshll.u32 %v875_v34, 16  ;;  %v496_v45 = vrot.slane %v494_v31, 7  ;;  %780 = vst [vmem:[#allocation2 + $0x30] sm:$0xf] %v779_v17 }
  0x37   : > { %v920_v41 = vld [vmem:[#allocation2 + $0x2c] sm:$0x1]  ;;  %12945 = vmatpush3.bf16.msra.mxu0 %v14761_v35  ;;  %v997_v46 = vsel %vm14730_vm11, %v992_v33, %v996_v19  ;;  %v1020_v47 = vrot.slane %v1018_v37, 5  ;;  %v1024_v48 = vrot.slane %v1022_v38, 4  ;;  %v408_v56 = vld [vmem:[%s14679_s14 + $0x20] sm:$0xf] }
  0x38   : > { %v1028_v49 = vshll.u32 %v920_v41, 16  ;;  %v1007_v52 = vsel %vm14730_vm11, %v1002_v40, %v1006_v21  ;;  %v1011_v53 = vrot.slane %v1009_v43, 4  ;;  %v1014_v54 = vrot.slane %v1012_v44, 5  ;;  %12946 = vmatprep.subr.bf16.mxu0 %v14290_v25  ;;  %v409_v62 = vld [vmem:[%s14679_s14 + $0x24] sm:$0xf] }
  0x39   : > { %v499_v35 = vor.u32 %v497_v32, %v496_v45  ;;  %v11467_v57 = vcombine.low %v997_v46, %v1007_v52  ;;  %v1025_v59 = vor.u32 %v1024_v48, %v1020_v47  ;;  %v501_v61 = vrot.slane %v496_v45, 4  ;;  %v308_v63 = vld [vmem:[#allocation2 + $0x48] sm:$0x1]  ;;  %v364_v4 = vld [vmem:[#allocation2 + $0x50] sm:$0x1]  ;;  %v14293_v17 = vld [vmem:[%s18049_s1 + $0x20] sm:$0xff]  }
  0x3a   : > { %v1030_v60 = vrot.slane %v1028_v49, 5  ;;  %v1015_v0 = vor.u32 %v1014_v54, %v1011_v53  ;;  %v306_v2 = vsel %vm14670_vm3, 0, %v305_v39  ;;  %v362_v3 = vsel %vm14684_vm4, 0, %v361_v50  ;;  %v14802_v5 = vld [vmem:[%s14679_s14 + $0x28] sm:$0xf] }
  0x3b   : > { %v500_v1 = vsel %vm14712_vm9, %v492_v27, %v499_v35  ;;  %12916 = vmatprep.mubr.bf16.mxu0 %v11467_v57  ;;  %v1026_v7 = vrot.slane %v1025_v59, 4  ;;  %12947 = vmatpush3.bf16.msra.mxu0 %v14290_v25  ;;  %v783_v8 = vsel %vm14670_vm3, %v501_v61, %v782_v55  ;;  %307 = vst [vmem:[#allocation2 + $0x3c] sm:$0x1] %v306_v2  ;;  %363 = vst [vmem:[#allocation2 + $0x44] sm:$0x1] %v362_v3  ;;  %vm1963_vm12 = vcmask 1042432  }
  0x3c   : > { %781 = vst [vmem:[#allocation2 + $0x34] sm:$0xf] %v500_v1  ;;  %v503_v9 = vshrl.u32 %v408_v56, 16  ;;  %v506_v11 = vshll.u32 %v408_v56, 16  ;;  %v1016_v13 = vrot.slane %v1015_v0, 4  ;;  %v511_v14 = vshrl.u32 %v409_v62, 16  ;;  %12948 = vmatprep.subr.bf16.mxu0 %v14291_v51 }
  0x3d   : > { %784 = vst [vmem:[#allocation2 + $0x38] sm:$0x1] %v783_v8  ;;  %v514_v15 = vshll.u32 %v409_v62, 16  ;;  %v309_v16 = vsel %vm14670_vm3, 0, %v308_v63  ;;  %v411_v18 = vld [vmem:[%s14679_s14 + $0x2c] sm:$0xf]  ;;  %v1031_v19 = vsel %vm14730_vm11, %v1026_v7, %v1030_v60 }
  0x3e   : > { %v877_v20 = vld [vmem:[#allocation2 + $0x30] sm:$0xf]  ;;  %v505_v21 = vrot.slane %v503_v9, 7  ;;  %310 = vst [vmem:[#allocation2 + $0x48] sm:$0x1] %v309_v16  ;;  %v365_v22 = vsel %vm14684_vm4, 0, %v364_v4  ;;  %v1021_v24 = vsel %vm14730_vm11, %v1016_v13, %v1020_v47 }
  0x3f   : > { %v520_v23 = vshrl.u32 %v14802_v5, 16  ;;  %v1033_v25 = vshrl.u32 %v877_v20, 16  ;;  %v1036_v26 = vshll.u32 %v877_v20, 16  ;;  %v513_v27 = vrot.slane %v511_v14, 7  ;;  %366 = vst [vmem:[#allocation2 + $0x50] sm:$0x1] %v365_v22  ;;  %12949 = vmatpush3.bf16.msra.mxu0 %v14291_v51 }
  0x40   : > { %v11468_v28 = vcombine.low %v1021_v24, %v1031_v19  ;;  %v508_v29 = vor.u32 %v506_v11, %v505_v21  ;;  %v509_v30 = vrot.slane %v505_v21, 4  ;;  %v311_v38 = vld [vmem:[#allocation2 + $0x54] sm:$0x1]  ;;  %12950 = vmatprep.subr.bf16.mxu0 %v14292_v12  ;;  %v523_v39 = vshll.u32 %v14802_v5, 16  ;;  %v367_v44 = vld [vmem:[#allocation2 + $0x5c] sm:$0x1] }
  0x41   : > { %v522_v31 = vrot.slane %v520_v23, 7  ;;  %v1035_v32 = vrot.slane %v1033_v25, 4  ;;  %v1038_v33 = vrot.slane %v1036_v26, 5  ;;  %v516_v34 = vor.u32 %v514_v15, %v513_v27  ;;  %v14826_v50 = vld [vmem:[%s14679_s14 + $0x30] sm:$0xf]  ;;  %v14294_v63 = vld [vmem:[%s18049_s1 + $0x28] sm:$0xff]  }
  0x42   : > { %v518_v37 = vrot.slane %v513_v27, 4  ;;  %12917 = vmatmul.mubr.bf16.gmra.mrb[4].mxu0 %v11468_v28  ;;  %v528_v41 = vshrl.u32 %v411_v18, 16  ;;  %v531_v43 = vshll.u32 %v411_v18, 16  ;;  %v785_v48 = vld [vmem:[#allocation2 + $0x3c] sm:$0xf]  ;;  %v312_v3 = vsel %vm14670_vm3, 0, %v311_v38 }
  0x43   : > { %v526_v40 = vrot.slane %v522_v31, 4  ;;  %v878_v45 = vld [vmem:[#allocation2 + $0x34] sm:$0xf]  ;;  %v1039_v46 = vor.u32 %v1038_v33, %v1035_v32  ;;  %v517_v47 = vsel %vm14712_vm9, %v509_v30, %v516_v34  ;;  %v789_v49 = vld [vmem:[#allocation2 + $0x44] sm:$0x1]  ;;  %v786_v54 = vsel %vm14722_vm10, %v508_v29, %v785_v48  ;;  %12951 = vmatpush3.bf16.msra.mxu0 %v14292_v12 }
  0x44   : > { %v921_v51 = vld [vmem:[#allocation2 + $0x38] sm:$0x1]  ;;  %v1042_v52 = vshll.u32 %v878_v45, 16  ;;  %v1046_v53 = vshrl.u32 %v878_v45, 16  ;;  %788 = vst [vmem:[#allocation2 + $0x40] sm:$0xf] %v517_v47  ;;  %v790_v35 = vsel %vm14670_vm3, %v518_v37, %v789_v49  ;;  %v525_v59 = vor.u32 %v523_v39, %v522_v31  ;;  %12952 = vmatprep.subr.bf16.mxu0 %v14293_v17 }
  0x45   : > { %v14833_v55 = vld [vmem:[%s14679_s14 + $0x34] sm:$0xf]  ;;  %v1040_v56 = vrot.slane %v1039_v46, 4  ;;  %v1052_v57 = vshll.u32 %v921_v51, 16  ;;  %787 = vst [vmem:[#allocation2 + $0x3c] sm:$0xf] %v786_v54 }
  0x46   : > { %791 = vst [vmem:[#allocation2 + $0x44] sm:$0x1] %v790_v35  ;;  %v530_v60 = vrot.slane %v528_v41, 7  ;;  %v792_v61 = vld [vmem:[#allocation2 + $0x48] sm:$0xf]  ;;  %v1044_v0 = vrot.slane %v1042_v52, 5 }
  0x47   : > { %v314_v62 = vld [vmem:[#allocation2 + $0x60] sm:$0x1]  ;;  %v1048_v1 = vrot.slane %v1046_v53, 4  ;;  %v796_v2 = vld [vmem:[#allocation2 + $0x50] sm:$0x1]  ;;  %v368_v4 = vsel %vm14684_vm4, 0, %v367_v44  ;;  %v793_v9 = vsel %vm14722_vm10, %v525_v59, %v792_v61  ;;  %12953 = vmatpush3.bf16.msra.mxu0 %v14293_v17 }
  0x48   : > { %v1054_v5 = vrot.slane %v1052_v57, 5  ;;  %v533_v7 = vor.u32 %v531_v43, %v530_v60  ;;  %v535_v8 = vrot.slane %v530_v60, 4  ;;  %313 = vst [vmem:[#allocation2 + $0x54] sm:$0x1] %v312_v3  ;;  %369 = vst [vmem:[#allocation2 + $0x5c] sm:$0x1] %v368_v4  ;;  %v1045_v13 = vsel %vm14730_vm11, %v1040_v56, %v1044_v0  ;;  %12954 = vmatprep.subr.bf16.mxu0 %v14294_v63 }
  0x49   : > { %v370_v11 = vld [vmem:[#allocation2 + $0x68] sm:$0x1]  ;;  %v14845_v12 = vld [vmem:[%s14679_s14 + $0x38] sm:$0xf]  ;;  %v1049_v14 = vor.u32 %v1048_v1, %v1044_v0  ;;  %794 = vst [vmem:[#allocation2 + $0x48] sm:$0xf] %v793_v9 }
  0x4a   : > { %v537_v15 = vshrl.u32 %v14826_v50, 16  ;;  %v540_v16 = vshll.u32 %v14826_v50, 16  ;;  %v14852_v18 = vld [vmem:[%s14679_s14 + $0x3c] sm:$0xf]  ;;  %v534_v19 = vsel %vm14712_vm9, %v526_v40, %v533_v7  ;;  %v797_v20 = vsel %vm14670_vm3, %v535_v8, %v796_v2  ;;  %v14295_v23 = vld [vmem:[%s18049_s1 + $0x30] sm:$0xff]   ;;  %v14884_v3 = vld [vmem:[%s18049_s1 + $0x80] sm:$0xff]  }
  0x4b   : > { %v545_v21 = vshrl.u32 %v14833_v55, 16  ;;  %v548_v22 = vshll.u32 %v14833_v55, 16  ;;  %v1050_v24 = vrot.slane %v1049_v14, 4  ;;  %795 = vst [vmem:[#allocation2 + $0x4c] sm:$0xf] %v534_v19  ;;  %v315_v26 = vsel %vm14670_vm3, 0, %v314_v62  ;;  %12955 = vmatpush3.bf16.msra.mxu0 %v14294_v63 }
  0x4c   : > { %798 = vst [vmem:[#allocation2 + $0x50] sm:$0x1] %v797_v20  ;;  %v539_v25 = vrot.slane %v537_v15, 7  ;;  %v371_v27 = vsel %vm14684_vm4, 0, %v370_v11  ;;  %v880_v28 = vld [vmem:[#allocation2 + $0x40] sm:$0xf]  ;;  %12956 = vmatprep.subr.bf16.mxu0 %v14295_v23 }
  0x4d   : > { %v547_v29 = vrot.slane %v545_v21, 7  ;;  %316 = vst [vmem:[#allocation2 + $0x60] sm:$0x1] %v315_v26  ;;  %372 = vst [vmem:[#allocation2 + $0x68] sm:$0x1] %v371_v27  ;;  %v554_v30 = vshrl.u32 %v14845_v12, 16  ;;  %v1055_v33 = vsel %vm14730_vm11, %v1050_v24, %v1054_v5 }
  0x4e   : > { %v557_v31 = vshll.u32 %v14845_v12, 16  ;;  %v562_v32 = vshrl.u32 %v14852_v18, 16  ;;  %v879_v34 = vld [vmem:[#allocation2 + $0x3c] sm:$0xf]  ;;  %v922_v37 = vld [vmem:[#allocation2 + $0x44] sm:$0x1]  ;;  %v542_v39 = vor.u32 %v540_v16, %v539_v25  ;;  %v11469_v40 = vcombine.low %v1045_v13, %v1055_v33 }
  0x4f   : > { %v1066_v38 = vshll.u32 %v880_v28, 16  ;;  %v1070_v17 = vshrl.u32 %v880_v28, 16  ;;  %v1057_v41 = vshrl.u32 %v879_v34, 16  ;;  %v1060_v43 = vshll.u32 %v879_v34, 16  ;;  %v14296_v45 = vld [vmem:[%s18049_s1 + $0x38] sm:$0xff]   ;;  %12957 = vmatpush3.bf16.msra.mxu0 %v14295_v23 }
  0x50   : > { %v1076_v44 = vshll.u32 %v922_v37, 16  ;;  %v543_v48 = vrot.slane %v539_v25, 4  ;;  %v550_v49 = vor.u32 %v548_v22, %v547_v29  ;;  %v799_v50 = vld [vmem:[#allocation2 + $0x54] sm:$0xf]  ;;  %12920 = vmatprep.mubr.bf16.mxu0 %v11469_v40  ;;  %v881_v54 = vld [vmem:[#allocation2 + $0x48] sm:$0xf]  ;;  %12958 = vmatprep.subr.bf16.mxu0 %v14296_v45 }
  0x51   : > { %v1068_v46 = vrot.slane %v1066_v38, 5  ;;  %v1072_v47 = vrot.slane %v1070_v17, 4  ;;  %v1059_v51 = vrot.slane %v1057_v41, 4  ;;  %v1062_v52 = vrot.slane %v1060_v43, 5  ;;  %v803_v60 = vld [vmem:[#allocation2 + $0x5c] sm:$0x1] }
  0x52   : > { %v1078_v53 = vrot.slane %v1076_v44, 5  ;;  %v552_v35 = vrot.slane %v547_v29, 4  ;;  %v1081_v56 = vshrl.u32 %v881_v54, 16  ;;  %v1084_v57 = vshll.u32 %v881_v54, 16  ;;  %v882_v62 = vld [vmem:[#allocation2 + $0x4c] sm:$0xf] }
  0x53   : > { %v1073_v55 = vor.u32 %v1072_v47, %v1068_v46  ;;  %v551_v59 = vsel %vm14712_vm9, %v543_v48, %v550_v49  ;;  %v1063_v61 = vor.u32 %v1062_v52, %v1059_v51  ;;  %v923_v63 = vld [vmem:[#allocation2 + $0x50] sm:$0x1]  ;;  %v800_v0 = vsel %vm14722_vm10, %v542_v39, %v799_v50  ;;  %v317_v21 = vld [vmem:[#allocation2 + $0x6c] sm:$0x1]  ;;  %v373_v22 = vld [vmem:[#allocation2 + $0x74] sm:$0x1]  ;;  %12959 = vmatpush3.bf16.msra.mxu0 %v14296_v45 }
  0x54   : > { %802 = vst [vmem:[#allocation2 + $0x58] sm:$0xf] %v551_v59  ;;  %v804_v1 = vsel %vm14670_vm3, %v552_v35, %v803_v60  ;;  %v556_v2 = vrot.slane %v554_v30, 7  ;;  %v1083_v5 = vrot.slane %v1081_v56, 4  ;;  %v1086_v7 = vrot.slane %v1084_v57, 5  ;;  %12992 = vmatprep.subr.bf16.mxu0 %v14884_v3 }
  0x55   : > { %v1074_v4 = vrot.slane %v1073_v55, 4  ;;  %v1090_v8 = vshll.u32 %v882_v62, 16  ;;  %801 = vst [vmem:[#allocation2 + $0x54] sm:$0xf] %v800_v0  ;;  %805 = vst [vmem:[#allocation2 + $0x5c] sm:$0x1] %v804_v1 }
  0x56   : > { %v1064_v9 = vrot.slane %v1063_v61, 4  ;;  %v1094_v11 = vshrl.u32 %v882_v62, 16  ;;  %v1100_v12 = vshll.u32 %v923_v63, 16  ;;  %v559_v13 = vor.u32 %v557_v31, %v556_v2  ;;  %v806_v14 = vld [vmem:[#allocation2 + $0x60] sm:$0xf] }
  0x57   : > { %v1079_v15 = vsel %vm14730_vm11, %v1074_v4, %v1078_v53  ;;  %v1087_v16 = vor.u32 %v1086_v7, %v1083_v5  ;;  %v1092_v19 = vrot.slane %v1090_v8, 5  ;;  %v560_v20 = vrot.slane %v556_v2, 4  ;;  %v416_v27 = vld [vmem:[%s14679_s14 + $0x40] sm:$0xf]  ;;  %v810_v33 = vld [vmem:[#allocation2 + $0x68] sm:$0x1] }
  0x58   : > { %v1069_v23 = vsel %vm14730_vm11, %v1064_v9, %v1068_v46  ;;  %v1096_v24 = vrot.slane %v1094_v11, 4  ;;  %v1102_v25 = vrot.slane %v1100_v12, 5  ;;  %v564_v26 = vrot.slane %v562_v32, 7  ;;  %v417_v52 = vld [vmem:[%s14679_s14 + $0x44] sm:$0xf] }
  0x59   : > { %v11470_v28 = vcombine.low %v1069_v23, %v1079_v15  ;;  %v1088_v29 = vrot.slane %v1087_v16, 4  ;;  %v565_v30 = vshll.u32 %v14852_v18, 16  ;;  %v807_v31 = vsel %vm14722_vm10, %v559_v13, %v806_v14  ;;  %v320_v56 = vld [vmem:[#allocation2 + $0x78] sm:$0x1]  ;;  %v376_v62 = vld [vmem:[#allocation2 + $0x80] sm:$0x1] }
  0x5a   : > { %v1097_v34 = vor.u32 %v1096_v24, %v1092_v19  ;;  %v569_v37 = vrot.slane %v564_v26, 4  ;;  %808 = vst [vmem:[#allocation2 + $0x60] sm:$0xf] %v807_v31  ;;  %v318_v38 = vsel %vm14670_vm3, 0, %v317_v21  ;;  %v374_v32 = vsel %vm14684_vm4, 0, %v373_v22 }
  0x5b   : > { %12921 = vmatmul.mubr.bf16.gmra.mrb[8].mxu0 %v11470_v28  ;;  %v14899_v17 = vld [vmem:[#allocation2 + $0x58] sm:$0xf]  ;;  %v567_v39 = vor.u32 %v565_v30, %v564_v26  ;;  %319 = vst [vmem:[#allocation2 + $0x6c] sm:$0x1] %v318_v38  ;;  %375 = vst [vmem:[#allocation2 + $0x74] sm:$0x1] %v374_v32  ;;  %v1093_v41 = vsel %vm14730_vm11, %v1088_v29, %v1092_v19 }
  0x5c   : > { %v571_v18 = vshrl.u32 %v416_v27, 16  ;;  %v574_v40 = vshll.u32 %v416_v27, 16  ;;  %v1098_v43 = vrot.slane %v1097_v34, 4  ;;  %v14903_v44 = vld [vmem:[#allocation2 + $0x54] sm:$0xf]  ;;  %v1114_v46 = vshll.u32 %v14899_v17, 16 }
  0x5d   : > { %v924_v45 = vld [vmem:[#allocation2 + $0x5c] sm:$0x1]  ;;  %v811_v47 = vsel %vm14670_vm3, %v569_v37, %v810_v33  ;;  %v1105_v48 = vshrl.u32 %v14903_v44, 16  ;;  %v1108_v49 = vshll.u32 %v14903_v44, 16  ;;  %v1118_v50 = vshrl.u32 %v14899_v17, 16 }
  0x5e   : > { %v1124_v51 = vshll.u32 %v924_v45, 16  ;;  %812 = vst [vmem:[#allocation2 + $0x68] sm:$0x1] %v811_v47  ;;  %v1103_v53 = vsel %vm14730_vm11, %v1098_v43, %v1102_v25  ;;  %v1116_v54 = vrot.slane %v1114_v46, 5  ;;  %v568_v35 = vsel %vm14712_vm9, %v560_v20, %v567_v39  ;;  %v418_v4 = vld [vmem:[%s14679_s14 + $0x48] sm:$0xf] }
  0x5f   : > { %v573_v55 = vrot.slane %v571_v18, 7  ;;  %v11471_v57 = vcombine.low %v1093_v41, %v1103_v53  ;;  %v1107_v59 = vrot.slane %v1105_v48, 4  ;;  %v1110_v60 = vrot.slane %v1108_v49, 5  ;;  %809 = vst [vmem:[#allocation2 + $0x64] sm:$0xf] %v568_v35 }
  0x60   : > { %v1120_v61 = vrot.slane %v1118_v50, 4  ;;  %v1126_v63 = vrot.slane %v1124_v51, 5  ;;  %v579_v2 = vshrl.u32 %v417_v52, 16  ;;  %v582_v9 = vshll.u32 %v417_v52, 16  ;;  %v419_v23 = vld [vmem:[%s14679_s14 + $0x4c] sm:$0xf] }
  0x61   : > { %v576_v0 = vor.u32 %v574_v40, %v573_v55  ;;  %v577_v1 = vrot.slane %v573_v55, 4  ;;  %12924 = vmatprep.mubr.bf16.mxu0 %v11471_v57  ;;  %v1111_v5 = vor.u32 %v1110_v60, %v1107_v59  ;;  %v14917_v8 = vld [vmem:[#allocation2 + $0x60] sm:$0xf]  ;;  %v321_v11 = vsel %vm14670_vm3, 0, %v320_v56  ;;  %v323_v37 = vld [vmem:[#allocation2 + $0x84] sm:$0x1] }
  0x62   : > { %v1121_v7 = vor.u32 %v1120_v61, %v1116_v54  ;;  %v1129_v12 = vshrl.u32 %v14917_v8, 16  ;;  %v1132_v13 = vshll.u32 %v14917_v8, 16  ;;  %v581_v14 = vrot.slane %v579_v2, 7  ;;  %v813_v15 = vld [vmem:[#allocation2 + $0x6c] sm:$0xf] }
  0x63   : > { %322 = vst [vmem:[#allocation2 + $0x78] sm:$0x1] %v321_v11  ;;  %v377_v16 = vsel %vm14684_vm4, 0, %v376_v62  ;;  %v1112_v19 = vrot.slane %v1111_v5, 4  ;;  %v814_v21 = vsel %vm14722_vm10, %v576_v0, %v813_v15  ;;  %v817_v22 = vld [vmem:[#allocation2 + $0x74] sm:$0x1] }
  0x64   : > { %v1122_v20 = vrot.slane %v1121_v7, 4  ;;  %378 = vst [vmem:[#allocation2 + $0x80] sm:$0x1] %v377_v16  ;;  %v588_v24 = vshrl.u32 %v418_v4, 16  ;;  %v1131_v26 = vrot.slane %v1129_v12, 4  ;;  %v1134_v27 = vrot.slane %v1132_v13, 5 }
  0x65   : > { %v925_v25 = vld [vmem:[#allocation2 + $0x68] sm:$0x1]  ;;  %v584_v28 = vor.u32 %v582_v9, %v581_v14  ;;  %v586_v29 = vrot.slane %v581_v14, 4  ;;  %815 = vst [vmem:[#allocation2 + $0x6c] sm:$0xf] %v814_v21  ;;  %v1117_v30 = vsel %vm14730_vm11, %v1112_v19, %v1116_v54  ;;  %v591_v47 = vshll.u32 %v418_v4, 16 }
  0x66   : > { %v1127_v31 = vsel %vm14730_vm11, %v1122_v20, %v1126_v63  ;;  %v1148_v33 = vshll.u32 %v925_v25, 16  ;;  %v590_v34 = vrot.slane %v588_v24, 7  ;;  %v14932_v32 = vld [vmem:[#allocation2 + $0x64] sm:$0xf]  ;;  %v1135_v39 = vor.u32 %v1134_v27, %v1131_v26  ;;  %v379_v41 = vld [vmem:[#allocation2 + $0x8c] sm:$0x1] }
  0x67   : > { %v11472_v38 = vcombine.low %v1117_v30, %v1127_v31  ;;  %v585_v18 = vsel %vm14712_vm9, %v577_v1, %v584_v28  ;;  %v818_v40 = vsel %vm14670_vm3, %v586_v29, %v817_v22  ;;  %v1138_v43 = vshll.u32 %v14932_v32, 16  ;;  %v420_v48 = vld [vmem:[%s14679_s14 + $0x50] sm:$0xf]  ;;  %v421_v53 = vld [vmem:[%s14679_s14 + $0x54] sm:$0xf] }
  0x68   : > { %v1142_v45 = vshrl.u32 %v14932_v32, 16  ;;  %v1150_v46 = vrot.slane %v1148_v33, 5  ;;  %816 = vst [vmem:[#allocation2 + $0x70] sm:$0xf] %v585_v18  ;;  %819 = vst [vmem:[#allocation2 + $0x74] sm:$0x1] %v818_v40  ;;  %v593_v55 = vor.u32 %v591_v47, %v590_v34 }
  0x69   : > { %12925 = vmatmul.mubr.bf16.gmra.mrb[12].mxu0 %v11472_v38  ;;  %v1136_v49 = vrot.slane %v1135_v39, 4  ;;  %v594_v50 = vrot.slane %v590_v34, 4  ;;  %v596_v51 = vshrl.u32 %v419_v23, 16  ;;  %v599_v52 = vshll.u32 %v419_v23, 16  ;;  %v326_v19 = vld [vmem:[#allocation2 + $0x90] sm:$0x1] }
  0x6a   : > { %v1140_v54 = vrot.slane %v1138_v43, 5  ;;  %v1144_v35 = vrot.slane %v1142_v45, 4  ;;  %v820_v56 = vld [vmem:[#allocation2 + $0x78] sm:$0xf]  ;;  %v324_v57 = vsel %vm14670_vm3, 0, %v323_v37  ;;  %v380_v60 = vsel %vm14684_vm4, 0, %v379_v41 }
  0x6b   : > { %v598_v59 = vrot.slane %v596_v51, 7  ;;  %325 = vst [vmem:[#allocation2 + $0x84] sm:$0x1] %v324_v57  ;;  %v605_v61 = vshrl.u32 %v420_v48, 16  ;;  %v608_v62 = vshll.u32 %v420_v48, 16  ;;  %v821_v2 = vsel %vm14722_vm10, %v593_v55, %v820_v56 }
  0x6c   : > { %v1141_v63 = vsel %vm14730_vm11, %v1136_v49, %v1140_v54  ;;  %v1145_v0 = vor.u32 %v1144_v35, %v1140_v54  ;;  %v14948_v1 = vld [vmem:[#allocation2 + $0x6c] sm:$0xf]  ;;  %v824_v4 = vld [vmem:[#allocation2 + $0x80] sm:$0x1]  ;;  %381 = vst [vmem:[#allocation2 + $0x8c] sm:$0x1] %v380_v60 }
  0x6d   : > { %v613_v5 = vshrl.u32 %v421_v53, 16  ;;  %v1153_v7 = vshrl.u32 %v14948_v1, 16  ;;  %v1156_v9 = vshll.u32 %v14948_v1, 16  ;;  %v601_v11 = vor.u32 %v599_v52, %v598_v59  ;;  %822 = vst [vmem:[#allocation2 + $0x78] sm:$0xf] %v821_v2 }
  0x6e   : > { %v603_v12 = vrot.slane %v598_v59, 4  ;;  %v1146_v13 = vrot.slane %v1145_v0, 4  ;;  %v607_v14 = vrot.slane %v605_v61, 7  ;;  %v616_v16 = vshll.u32 %v421_v53, 16  ;;  %v382_v26 = vld [vmem:[#allocation2 + $0x98] sm:$0x1] }
  0x6f   : > { %v615_v15 = vrot.slane %v613_v5, 7  ;;  %v14954_v20 = vld [vmem:[#allocation2 + $0x70] sm:$0xf]  ;;  %v926_v21 = vld [vmem:[#allocation2 + $0x74] sm:$0x1]  ;;  %v1155_v22 = vrot.slane %v1153_v7, 4  ;;  %v602_v24 = vsel %vm14712_vm9, %v594_v50, %v601_v11 }
  0x70   : > { %v1158_v23 = vrot.slane %v1156_v9, 5  ;;  %v825_v25 = vsel %vm14670_vm3, %v603_v12, %v824_v4  ;;  %v1151_v27 = vsel %vm14730_vm11, %v1146_v13, %v1150_v46  ;;  %v1162_v28 = vshll.u32 %v14954_v20, 16  ;;  %823 = vst [vmem:[#allocation2 + $0x7c] sm:$0xf] %v602_v24  ;;  %v422_v31 = vld [vmem:[%s14679_s14 + $0x58] sm:$0xf] }
  0x71   : > { %v1166_v29 = vshrl.u32 %v14954_v20, 16  ;;  %v1172_v30 = vshll.u32 %v926_v21, 16  ;;  %826 = vst [vmem:[#allocation2 + $0x80] sm:$0x1] %v825_v25  ;;  %v11473_v33 = vcombine.low %v1141_v63, %v1151_v27  ;;  %v610_v37 = vor.u32 %v608_v62, %v607_v14  ;;  %v14966_v39 = vld [vmem:[%s14679_s14 + $0x5c] sm:$0xf] }
  0x72   : > { %v1159_v34 = vor.u32 %v1158_v23, %v1155_v22  ;;  %v611_v38 = vrot.slane %v607_v14, 4  ;;  %v1164_v18 = vrot.slane %v1162_v28, 5  ;;  %v618_v43 = vor.u32 %v616_v16, %v615_v15  ;;  %v827_v45 = vld [vmem:[#allocation2 + $0x84] sm:$0xf] }
  0x73   : > { %v1168_v40 = vrot.slane %v1166_v29, 4  ;;  %v1174_v41 = vrot.slane %v1172_v30, 5  ;;  %12928 = vmatprep.mubr.bf16.mxu0 %v11473_v33  ;;  %v620_v47 = vrot.slane %v615_v15, 4  ;;  %v828_v48 = vsel %vm14722_vm10, %v610_v37, %v827_v45  ;;  %v831_v49 = vld [vmem:[#allocation2 + $0x8c] sm:$0x1] }
  0x74   : > { %v1160_v46 = vrot.slane %v1159_v34, 4  ;;  %v327_v50 = vsel %vm14670_vm3, 0, %v326_v19  ;;  %v14972_v52 = vld [vmem:[#allocation2 + $0x78] sm:$0xf]  ;;  %v619_v53 = vsel %vm14712_vm9, %v611_v38, %v618_v43  ;;  %829 = vst [vmem:[#allocation2 + $0x84] sm:$0xf] %v828_v48 }
  0x75   : > { %v1169_v51 = vor.u32 %v1168_v40, %v1164_v18  ;;  %328 = vst [vmem:[#allocation2 + $0x90] sm:$0x1] %v327_v50  ;;  %v383_v54 = vsel %vm14684_vm4, 0, %v382_v26  ;;  %v622_v35 = vshrl.u32 %v422_v31, 16  ;;  %v1177_v56 = vshrl.u32 %v14972_v52, 16 }
  0x76   : > { %v1165_v55 = vsel %vm14730_vm11, %v1160_v46, %v1164_v18  ;;  %v1180_v57 = vshll.u32 %v14972_v52, 16  ;;  %830 = vst [vmem:[#allocation2 + $0x88] sm:$0xf] %v619_v53  ;;  %v832_v59 = vsel %vm14670_vm3, %v620_v47, %v831_v49  ;;  %384 = vst [vmem:[#allocation2 + $0x98] sm:$0x1] %v383_v54  ;;  %v625_v62 = vshll.u32 %v422_v31, 16 }
  0x77   : > { %v1170_v60 = vrot.slane %v1169_v51, 4  ;;  %833 = vst [vmem:[#allocation2 + $0x8c] sm:$0x1] %v832_v59  ;;  %v624_v61 = vrot.slane %v622_v35, 7  ;;  %v630_v63 = vshrl.u32 %v14966_v39, 16  ;;  %v1179_v4 = vrot.slane %v1177_v56, 4 }
  0x78   : > { %v14985_v0 = vld [vmem:[#allocation2 + $0x7c] sm:$0xf]  ;;  %v927_v2 = vld [vmem:[#allocation2 + $0x80] sm:$0x1]  ;;  %v1182_v5 = vrot.slane %v1180_v57, 5  ;;  %v633_v26 = vshll.u32 %v14966_v39, 16 }
  0x79   : > { %v1175_v7 = vsel %vm14730_vm11, %v1170_v60, %v1174_v41  ;;  %v1186_v9 = vshll.u32 %v14985_v0, 16  ;;  %v1190_v11 = vshrl.u32 %v14985_v0, 16  ;;  %v1196_v12 = vshll.u32 %v927_v2, 16  ;;  %v329_v34 = vld [vmem:[#allocation2 + $0x9c] sm:$0x1] }
  0x7a   : > { %v11474_v13 = vcombine.low %v1165_v55, %v1175_v7  ;;  %v1183_v14 = vor.u32 %v1182_v5, %v1179_v4  ;;  %v628_v15 = vrot.slane %v624_v61, 4  ;;  %v632_v22 = vrot.slane %v630_v63, 7  ;;  %v385_v37 = vld [vmem:[#allocation2 + $0xa4] sm:$0x1]  ;;  %v424_v45 = vld [vmem:[%s14679_s14 + $0x60] sm:$0xf] }
  0x7b   : > { %v1188_v16 = vrot.slane %v1186_v9, 5  ;;  %v1192_v19 = vrot.slane %v1190_v11, 4  ;;  %v1198_v21 = vrot.slane %v1196_v12, 5  ;;  %v14991_v24 = vld [vmem:[#allocation2 + $0x84] sm:$0xf]  ;;  %v627_v25 = vor.u32 %v625_v62, %v624_v61 }
  0x7c   : > { %12929 = vmatmul.mubr.bf16.gmra.mrb[16].mxu0 %v11474_v13  ;;  %v1184_v23 = vrot.slane %v1183_v14, 4  ;;  %v834_v27 = vld [vmem:[#allocation2 + $0x90] sm:$0xf]  ;;  %v1201_v30 = vshrl.u32 %v14991_v24, 16  ;;  %v1204_v31 = vshll.u32 %v14991_v24, 16  ;;  %v637_v33 = vrot.slane %v632_v22, 4 }
  0x7d   : > { %v1193_v28 = vor.u32 %v1192_v19, %v1188_v16  ;;  %v14994_v29 = vld [vmem:[#allocation2 + $0x88] sm:$0xf]  ;;  %v635_v41 = vor.u32 %v633_v26, %v632_v22  ;;  %v838_v43 = vld [vmem:[#allocation2 + $0x98] sm:$0x1]  ;;  %v425_v46 = vld [vmem:[%s14679_s14 + $0x64] sm:$0xf]  ;;  %v835_v56 = vsel %vm14722_vm10, %v627_v25, %v834_v27 }
  0x7e   : > { %v1189_v38 = vsel %vm14730_vm11, %v1184_v23, %v1188_v16  ;;  %v928_v18 = vld [vmem:[#allocation2 + $0x8c] sm:$0x1]  ;;  %v1210_v40 = vshll.u32 %v14994_v29, 16  ;;  %v1214_v39 = vshrl.u32 %v14994_v29, 16  ;;  %v1203_v48 = vrot.slane %v1201_v30, 4 }
  0x7f   : > { %v1194_v47 = vrot.slane %v1193_v28, 4  ;;  %v1206_v49 = vrot.slane %v1204_v31, 5  ;;  %v1220_v50 = vshll.u32 %v928_v18, 16  ;;  %v332_v51 = vld [vmem:[#allocation2 + $0xa8] sm:$0x1]  ;;  %v636_v55 = vsel %vm14712_vm9, %v628_v15, %v635_v41 }
  0x80   : > { %v388_v53 = vld [vmem:[#allocation2 + $0xb0] sm:$0x1]  ;;  %v1212_v54 = vrot.slane %v1210_v40, 5  ;;  %v1216_v35 = vrot.slane %v1214_v39, 4  ;;  %v426_v57 = vld [vmem:[%s14679_s14 + $0x68] sm:$0xf]  ;;  %v839_v62 = vsel %vm14670_vm3, %v637_v33, %v838_v43 }
  0x81   : > { %v1199_v59 = vsel %vm14730_vm11, %v1194_v47, %v1198_v21  ;;  %v1207_v60 = vor.u32 %v1206_v49, %v1203_v48  ;;  %v1222_v61 = vrot.slane %v1220_v50, 5  ;;  %836 = vst [vmem:[#allocation2 + $0x90] sm:$0xf] %v835_v56  ;;  %837 = vst [vmem:[#allocation2 + $0x94] sm:$0xf] %v636_v55  ;;  %v330_v5 = vsel %vm14670_vm3, 0, %v329_v34 }
  0x82   : > { %v15014_v63 = vld [vmem:[%s14679_s14 + $0x6c] sm:$0xf]  ;;  %v11475_v2 = vcombine.low %v1189_v38, %v1199_v59  ;;  %v1217_v4 = vor.u32 %v1216_v35, %v1212_v54  ;;  %840 = vst [vmem:[#allocation2 + $0x98] sm:$0x1] %v839_v62  ;;  %v386_v7 = vsel %vm14684_vm4, 0, %v385_v37  ;;  %v639_v11 = vshrl.u32 %v424_v45, 16 }
  0x83   : > { %v1208_v9 = vrot.slane %v1207_v60, 4  ;;  %331 = vst [vmem:[#allocation2 + $0x9c] sm:$0x1] %v330_v5  ;;  %387 = vst [vmem:[#allocation2 + $0xa4] sm:$0x1] %v386_v7  ;;  %v642_v12 = vshll.u32 %v424_v45, 16 }
  0x84   : > { %v647_v13 = vshrl.u32 %v425_v46, 16  ;;  %12932 = vmatprep.mubr.bf16.mxu0 %v11475_v2  ;;  %v1218_v14 = vrot.slane %v1217_v4, 4  ;;  %v650_v15 = vshll.u32 %v425_v46, 16  ;;  %v333_v16 = vsel %vm14670_vm3, 0, %v332_v51  ;;  %v335_v41 = vld [vmem:[#allocation2 + $0xb4] sm:$0x1] }
  0x85   : > { %v389_v19 = vsel %vm14684_vm4, 0, %v388_v53  ;;  %v1213_v21 = vsel %vm14730_vm11, %v1208_v9, %v1212_v54  ;;  %v641_v22 = vrot.slane %v639_v11, 7  ;;  %334 = vst [vmem:[#allocation2 + $0xa8] sm:$0x1] %v333_v16  ;;  %v656_v25 = vshrl.u32 %v426_v57, 16 }
  0x86   : > { %v649_v23 = vrot.slane %v647_v13, 7  ;;  %390 = vst [vmem:[#allocation2 + $0xb0] sm:$0x1] %v389_v19  ;;  %v1223_v26 = vsel %vm14730_vm11, %v1218_v14, %v1222_v61  ;;  %v659_v27 = vshll.u32 %v426_v57, 16  ;;  %v664_v28 = vshrl.u32 %v15014_v63, 16 }
  0x87   : > { %v11476_v30 = vcombine.low %v1213_v21, %v1223_v26  ;;  %v645_v31 = vrot.slane %v641_v22, 4  ;;  %v667_v34 = vshll.u32 %v15014_v63, 16  ;;  %v644_v18 = vor.u32 %v642_v12, %v641_v22  ;;  %v391_v49 = vld [vmem:[#allocation2 + $0xbc] sm:$0x1]  ;;  %v428_v61 = vld [vmem:[%s14679_s14 + $0x70] sm:$0xf] }
  0x88   : > { %v652_v33 = vor.u32 %v650_v15, %v649_v23  ;;  %v15030_v37 = vld [vmem:[#allocation2 + $0x90] sm:$0xf]  ;;  %v15032_v38 = vld [vmem:[#allocation2 + $0x94] sm:$0xf]  ;;  %v654_v40 = vrot.slane %v649_v23, 4  ;;  %v658_v39 = vrot.slane %v656_v25, 7 }
  0x89   : > { %12933 = vmatmul.mubr.bf16.gmra.mrb[20].mxu0 %v11476_v30  ;;  %v15034_v43 = vld [vmem:[#allocation2 + $0x98] sm:$0x1]  ;;  %v1225_v45 = vshrl.u32 %v15030_v37, 16  ;;  %v1228_v46 = vshll.u32 %v15030_v37, 16  ;;  %v1234_v47 = vshll.u32 %v15032_v38, 16  ;;  %v1238_v48 = vshrl.u32 %v15032_v38, 16 }
  0x8a   : > { %v1244_v50 = vshll.u32 %v15034_v43, 16  ;;  %v653_v51 = vsel %vm14712_vm9, %v645_v31, %v652_v33  ;;  %v841_v53 = vld [vmem:[#allocation2 + $0x9c] sm:$0xf]  ;;  %v845_v54 = vld [vmem:[#allocation2 + $0xa4] sm:$0x1]  ;;  %v661_v35 = vor.u32 %v659_v27, %v658_v39  ;;  %v662_v55 = vrot.slane %v658_v39, 4 }
  0x8b   : > { %v1227_v56 = vrot.slane %v1225_v45, 4  ;;  %v1230_v57 = vrot.slane %v1228_v46, 5  ;;  %v1236_v59 = vrot.slane %v1234_v47, 5  ;;  %v1240_v60 = vrot.slane %v1238_v48, 4  ;;  %844 = vst [vmem:[#allocation2 + $0xa0] sm:$0xf] %v653_v51 }
  0x8c   : > { %v1246_v62 = vrot.slane %v1244_v50, 5  ;;  %v842_v63 = vsel %vm14722_vm10, %v644_v18, %v841_v53  ;;  %v846_v2 = vsel %vm14670_vm3, %v654_v40, %v845_v54  ;;  %v666_v4 = vrot.slane %v664_v28, 7  ;;  %v848_v5 = vld [vmem:[#allocation2 + $0xa8] sm:$0xf]  ;;  %v429_v7 = vld [vmem:[%s14679_s14 + $0x74] sm:$0xf] }
  0x8d   : > { %v1231_v9 = vor.u32 %v1230_v57, %v1227_v56  ;;  %v1241_v11 = vor.u32 %v1240_v60, %v1236_v59  ;;  %843 = vst [vmem:[#allocation2 + $0x9c] sm:$0xf] %v842_v63  ;;  %847 = vst [vmem:[#allocation2 + $0xa4] sm:$0x1] %v846_v2  ;;  %v849_v12 = vsel %vm14722_vm10, %v661_v35, %v848_v5  ;;  %v852_v13 = vld [vmem:[#allocation2 + $0xb0] sm:$0x1] }
  0x8e   : > { %v336_v14 = vsel %vm14670_vm3, 0, %v335_v41  ;;  %v669_v15 = vor.u32 %v667_v34, %v666_v4  ;;  %v671_v16 = vrot.slane %v666_v4, 4  ;;  %850 = vst [vmem:[#allocation2 + $0xa8] sm:$0xf] %v849_v12  ;;  %v392_v19 = vsel %vm14684_vm4, 0, %v391_v49 }
  0x8f   : > { %337 = vst [vmem:[#allocation2 + $0xb4] sm:$0x1] %v336_v14  ;;  %v673_v21 = vshrl.u32 %v428_v61, 16  ;;  %v1232_v22 = vrot.slane %v1231_v9, 4  ;;  %v1242_v23 = vrot.slane %v1241_v11, 4  ;;  %v676_v25 = vshll.u32 %v428_v61, 16 }
  0x90   : > { %393 = vst [vmem:[#allocation2 + $0xbc] sm:$0x1] %v392_v19  ;;  %v681_v26 = vshrl.u32 %v429_v7, 16  ;;  %v670_v27 = vsel %vm14712_vm9, %v662_v55, %v669_v15  ;;  %v853_v28 = vsel %vm14670_vm3, %v671_v16, %v852_v13  ;;  %v684_v31 = vshll.u32 %v429_v7, 16 }
  0x91   : > { %v675_v30 = vrot.slane %v673_v21, 7  ;;  %v1237_v33 = vsel %vm14730_vm11, %v1232_v22, %v1236_v59  ;;  %v1247_v34 = vsel %vm14730_vm11, %v1242_v23, %v1246_v62  ;;  %851 = vst [vmem:[#allocation2 + $0xac] sm:$0xf] %v670_v27  ;;  %854 = vst [vmem:[#allocation2 + $0xb0] sm:$0x1] %v853_v28  ;;  %vm1964_vm13 = vcmask 1046532  }
  0x92   : > { %v683_v18 = vrot.slane %v681_v26, 7  ;;  %v11477_v40 = vcombine.low %v1237_v33, %v1247_v34  ;;  %v15063_v39 = vld [vmem:[#allocation2 + $0xa0] sm:$0xf]  ;;  %vm15184_vm14 = vmor %vm1963_vm12, %vm1964_vm13 }
  0x93   : > { %v679_v41 = vrot.slane %v675_v30, 4  ;;  %v1258_v45 = vshll.u32 %v15063_v39, 16  ;;  %v1262_v46 = vshrl.u32 %v15063_v39, 16  ;;  %v678_v47 = vor.u32 %v676_v25, %v675_v30 }
  0x94   : > { %v686_v48 = vor.u32 %v684_v31, %v683_v18  ;;  %12936 = vmatprep.mubr.bf16.mxu0 %v11477_v40  ;;  %v15067_v49 = vld [vmem:[#allocation2 + $0x9c] sm:$0xf]  ;;  %v15069_v50 = vld [vmem:[#allocation2 + $0xa4] sm:$0x1]  ;;  %v688_v51 = vrot.slane %v683_v18, 4 }
  0x95   : > { %v1249_v53 = vshrl.u32 %v15067_v49, 16  ;;  %v1252_v54 = vshll.u32 %v15067_v49, 16  ;;  %v1260_v35 = vrot.slane %v1258_v45, 5  ;;  %v1264_v55 = vrot.slane %v1262_v46, 4  ;;  %v15073_v56 = vld [vmem:[#allocation2 + $0xa8] sm:$0xf] }
  0x96   : > { %v1268_v57 = vshll.u32 %v15069_v50, 16  ;;  %v1273_v59 = vshrl.u32 %v15073_v56, 16  ;;  %v1276_v60 = vshll.u32 %v15073_v56, 16  ;;  %v687_v61 = vsel %vm14712_vm9, %v679_v41, %v686_v48  ;;  %v855_v62 = vld [vmem:[#allocation2 + $0xb4] sm:$0xf] }
  0x97   : > { %v1251_v63 = vrot.slane %v1249_v53, 4  ;;  %v1254_v2 = vrot.slane %v1252_v54, 5  ;;  %v1265_v4 = vor.u32 %v1264_v55, %v1260_v35  ;;  %v856_v5 = vsel %vm14722_vm10, %v678_v47, %v855_v62  ;;  %858 = vst [vmem:[#allocation2 + $0xb8] sm:$0xf] %v687_v61  ;;  %v859_v7 = vld [vmem:[#allocation2 + $0xbc] sm:$0x1] }
  0x98   : > { %v1270_v9 = vrot.slane %v1268_v57, 5  ;;  %v15082_v11 = vld [vmem:[#allocation2 + $0xac] sm:$0xf]  ;;  %v15084_v12 = vld [vmem:[#allocation2 + $0xb0] sm:$0x1]  ;;  %v1275_v13 = vrot.slane %v1273_v59, 4  ;;  %v860_v14 = vsel %vm14670_vm3, %v688_v51, %v859_v7 }
  0x99   : > { %857 = vst [vmem:[#allocation2 + $0xb4] sm:$0xf] %v856_v5  ;;  %v1255_v15 = vor.u32 %v1254_v2, %v1251_v63  ;;  %v1266_v16 = vrot.slane %v1265_v4, 4  ;;  %v1278_v19 = vrot.slane %v1276_v60, 5  ;;  %v1282_v21 = vshll.u32 %v15082_v11, 16 }
  0x9a   : > { %861 = vst [vmem:[#allocation2 + $0xbc] sm:$0x1] %v860_v14  ;;  %v1286_v22 = vshrl.u32 %v15082_v11, 16  ;;  %v1292_v23 = vshll.u32 %v15084_v12, 16  ;;  %v15567_v42 = vld [vmem:[#allocation2 + $0xac] sm:$0xf] }
  0x9b   : > { %v1256_v25 = vrot.slane %v1255_v15, 4  ;;  %v1271_v26 = vsel %vm14730_vm11, %v1266_v16, %v1270_v9  ;;  %v1279_v27 = vor.u32 %v1278_v19, %v1275_v13  ;;  %v1284_v28 = vrot.slane %v1282_v21, 5  ;;  %v15114_v15 = vld [vmem:[#allocation2 + $0x4] sm:$0xf]  ;;  %v14522_v16 = vld [vmem:[#allocation2] sm:$0xf] }
  0x9c   : > { %v1288_v30 = vrot.slane %v1286_v22, 4  ;;  %v1294_v40 = vrot.slane %v1292_v23, 5  ;;  %v11489_v19 = vcombine.low %v14522_v16, %v15114_v15  ;;  %v15117_v22 = vld [vmem:[#allocation2 + $0x10] sm:$0xf]  ;;  %v14524_v23 = vld [vmem:[#allocation2 + $0xc] sm:$0xf] }
  0x9d   : > { %v1261_v31 = vsel %vm14730_vm11, %v1256_v25, %v1260_v35  ;;  %v1280_v33 = vrot.slane %v1279_v27, 4  ;;  %v11490_v25 = vcombine.low %v14524_v23, %v15117_v22  ;;  %v15120_v27 = vld [vmem:[#allocation2 + $0x1c] sm:$0xf]  ;;  %v11502_v23 = vcombine.low %v15067_v49, %v15063_v39  ;;  %v1916_v49 = vld [vmem:[#allocation2 + $0xc] sm:$0xe]  ;;  %18152 = vst [vmem:[#allocation9_spill] sm:$0xff] %v15567_v42 }
  0x9e   : > { %v11478_v34 = vcombine.low %v1261_v31, %v1271_v26  ;;  %v1289_v18 = vor.u32 %v1288_v30, %v1284_v28  ;;  %v15095_v41 = vld [vmem:[#allocation2 + $0xb8] sm:$0xf]  ;;  %v14302_v30 = vld [vmem:[%s18049_s1 + $0x88] sm:$0xff]   ;;  %v14305_v31 = vld [vmem:[%s18049_s1 + $0x90] sm:$0xff]  }
  0x9f   : > { %v1306_v46 = vshll.u32 %v15095_v41, 16  ;;  %v1310_v47 = vshrl.u32 %v15095_v41, 16  ;;  %v1285_v48 = vsel %vm14730_vm11, %v1280_v33, %v1284_v28  ;;  %v14525_v26 = vld [vmem:[#allocation2 + $0x18] sm:$0xf]  ;;  %v15130_v33 = vld [vmem:[#allocation2 + $0x28] sm:$0xf] }
  0xa0   : > { %v15097_v45 = vld [vmem:[#allocation2 + $0xb4] sm:$0xf]  ;;  %12937 = vmatmul.mubr.bf16.gmra.mrb[24].mxu0 %v11478_v34  ;;  %v1290_v51 = vrot.slane %v1289_v18, 4  ;;  %v11491_v28 = vcombine.low %v14525_v26, %v15120_v27  ;;  %v14528_v34 = vld [vmem:[#allocation2 + $0x24] sm:$0xf] }
  0xa1   : > { %v15103_v53 = vld [vmem:[#allocation2 + $0xbc] sm:$0x1]  ;;  %v1297_v54 = vshrl.u32 %v15097_v45, 16  ;;  %v1300_v35 = vshll.u32 %v15097_v45, 16  ;;  %v1308_v55 = vrot.slane %v1306_v46, 5  ;;  %v1312_v57 = vrot.slane %v1310_v47, 4 }
  0xa2   : > { %v1316_v59 = vshll.u32 %v15103_v53, 16  ;;  %v1295_v60 = vsel %vm14730_vm11, %v1290_v51, %v1294_v40  ;;  %v11492_v18 = vcombine.low %v14528_v34, %v15130_v33  ;;  %v14529_v40 = vld [vmem:[#allocation2 + $0x30] sm:$0xf]  ;;  %v15133_v46 = vld [vmem:[#allocation2 + $0x34] sm:$0xf] }
  0xa3   : > { %v1299_v61 = vrot.slane %v1297_v54, 4  ;;  %v1302_v62 = vrot.slane %v1300_v35, 5  ;;  %v11479_v63 = vcombine.low %v1285_v48, %v1295_v60  ;;  %v1313_v2 = vor.u32 %v1312_v57, %v1308_v55  ;;  %v14311_v48 = vld [vmem:[%s18049_s1 + $0xa0] sm:$0xff]   ;;  %v14532_v54 = vld [vmem:[#allocation2 + $0x3c] sm:$0xf] }
  0xa4   : > { %v1318_v4 = vrot.slane %v1316_v59, 5  ;;  %v11493_v47 = vcombine.low %v14529_v40, %v15133_v46  ;;  %v15142_v51 = vld [vmem:[#allocation2 + $0x40] sm:$0xf]  ;;  %v14533_v57 = vld [vmem:[#allocation2 + $0x48] sm:$0xf] }
  0xa5   : > { %v1303_v5 = vor.u32 %v1302_v62, %v1299_v61  ;;  %12940 = vmatprep.mubr.bf16.mxu0 %v11479_v63  ;;  %v1314_v7 = vrot.slane %v1313_v2, 4  ;;  %v11494_v35 = vcombine.low %v14532_v54, %v15142_v51  ;;  %v15148_v59 = vld [vmem:[#allocation2 + $0x4c] sm:$0xf]  ;;  %v14317_v61 = vld [vmem:[%s18049_s1 + $0xb0] sm:$0xff]   ;;  %v11496_v62 = vcombine.low %v14903_v44, %v14899_v17  ;;  %v14320_v63 = vld [vmem:[%s18049_s1 + $0xb8] sm:$0xff]  }
  0xa6   : > { %v11495_v60 = vcombine.low %v14533_v57, %v15148_v59  ;;  %v11497_v2 = vcombine.low %v14917_v8, %v14932_v32  ;;  %v11498_v17 = vcombine.low %v14948_v1, %v14954_v20  ;;  %v11499_v44 = vcombine.low %v14972_v52, %v14985_v0  ;;  %v1915_v32 = vld [vmem:[#allocation2] sm:$0xe]  ;;  %v430_v20 = vld [vmem:[%s14679_s14 + $0x78] sm:$0xf]  ;;  %v431_v52 = vld [vmem:[%s14679_s14 + $0x7c] sm:$0xf] }
  0xa7   : > { %v1304_v9 = vrot.slane %v1303_v5, 4  ;;  %v1319_v13 = vsel %vm14730_vm11, %v1314_v7, %v1318_v4  ;;  %v15164_v4 = vld [vmem:[%s18049_s1 + $0xc0] sm:$0xff]   ;;  %v11500_v8 = vcombine.low %v14991_v24, %v14994_v29  ;;  %v14535_v7 = vld [vmem:[#allocation2 + $0x8] sm:$0x1]  ;;  %v1968_v0 = vrot.slane %v15114_v15, 5 }
  0xa8   : > { %v338_v5 = vld [vmem:[#allocation2 + $0xc0] sm:$0x1]  ;;  %v698_v16 = vshrl.u32 %v431_v52, 16  ;;  %v11513_v24 = vrot.slane %v1915_v32, 9  ;;  %v11504_v57 = vcombine.low %v15097_v45, %v15095_v41 }
  0xa9   : > { %v1309_v14 = vsel %vm14730_vm11, %v1304_v9, %v1308_v55  ;;  %v14314_v55 = vld [vmem:[%s18049_s1 + $0xa8] sm:$0xff]   ;;  %v1971_v9 = vrot.slane %v14535_v7, 5  ;;  %v339_v1 = vsel %vm14670_vm3, 0, %v338_v5  ;;  %v1970_v26 = vrot.slane %v1968_v0, 4 }
  0xaa   : > { %v11480_v21 = vcombine.low %v1309_v14, %v1319_v13  ;;  %v11501_v13 = vcombine.low %v15030_v37, %v15032_v38  ;;  %340 = vst [vmem:[#allocation2 + $0xc0] sm:$0x1] %v339_v1  ;;  %v690_v14 = vshrl.u32 %v430_v20, 16  ;;  %v701_v37 = vshll.u32 %v431_v52, 16 }
  0xab   : > { %v1972_v54 = vsel %vm15184_vm14, %v1970_v26, %v1971_v9  ;;  %v1989_v5 = vrot.slane %v15130_v33, 5  ;;  %v1996_v9 = vrot.slane %v15133_v46, 5 }
  0xac   : > { %12941 = vmatmul.mubr.bf16.gmra.mrb[28].mxu0 %v11480_v21  ;;  %v692_v29 = vrot.slane %v690_v14, 7  ;;  %v15180_v21 = vrot.slane %v698_v16, 7  ;;  %v14322_v16 = vld [vmem:[%s18049_s1 + $0xc8] sm:$0xff]  }
  0xad   : > { %12960 = vmatprep.mubr.bf16.mxu0 %v11489_v19  ;;  %v693_v19 = vshll.u32 %v430_v20, 16  ;;  %v1991_v52 = vrot.slane %v1989_v5, 4  ;;  %v1998_v33 = vrot.slane %v1996_v9, 4 }
  0xae   : > { %v696_v15 = vrot.slane %v692_v29, 4 }
  0xb1   : > { %v862_v34 = vld [vmem:[#allocation2 + $0xc0] sm:$0xf] }
  0xb4   : > { %12961 = vmatmul.mubr.bf16.vlgmr.msra.gmra.mrb[0].mxu0 %v11490_v25 }
  0xb5   : > { %12993 = vmatpush3.bf16.msra.mxu0 %v14884_v3  ;;  %12964 = vmatprep.mubr.bf16.mxu0 %v11491_v28  ;;  %v14308_v3 = vld [vmem:[%s18049_s1 + $0x98] sm:$0xff]   ;;  %v695_v28 = vor.u32 %v693_v19, %v692_v29 }
  0xb6   : > { %12994 = vmatprep.subr.bf16.mxu0 %v14302_v30  ;;  %v14539_v29 = vld [vmem:[#allocation2 + $0x38] sm:$0x1] }
  0xb7   : > { %v863_v40 = vsel %vm14722_vm10, %v695_v28, %v862_v34  ;;  %v1999_v19 = vrot.slane %v14539_v29, 5 }
  0xb8   : > { %864 = vst [vmem:[#allocation2 + $0xc0] sm:$0xf] %v863_v40 }
  0xb9   : > { %12995 = vmatpush3.bf16.msra.mxu0 %v14302_v30  ;;  %v703_v30 = vor.u32 %v701_v37, %v15180_v21  ;;  %v2000_v28 = vsel %vm15184_vm14, %v1998_v33, %v1999_v19  ;;  %v1924_v19 = vld [vmem:[#allocation2 + $0x6c] sm:$0xe] }
  0xba   : > { %12996 = vmatprep.subr.bf16.mxu0 %v14305_v31 }
  0xbc   : > { %12965 = vmatmul.mubr.bf16.gmra.mrb[4].mxu0 %v11492_v18  ;;  %v704_v18 = vsel %vm14712_vm9, %v696_v15, %v703_v30  ;;  %v1920_v15 = vld [vmem:[#allocation2 + $0x3c] sm:$0xe]  ;;  %v2010_v30 = vrot.slane %v15148_v59, 5 }
  0xbd   : > { %12968 = vmatprep.mubr.bf16.mxu0 %v11493_v47  ;;  %12997 = vmatpush3.bf16.msra.mxu0 %v14305_v31  ;;  %v11503_v31 = vcombine.low %v15073_v56, %v15082_v11  ;;  %865 = vst [vmem:[#allocation2 + $0xc4] sm:$0xf] %v704_v18  ;;  %v1917_v47 = vld [vmem:[#allocation2 + $0x18] sm:$0xe]  ;;  %v1969_v56 = vsel %vm15184_vm14, %v11513_v24, %v1968_v0  ;;  %v14538_v0 = vld [vmem:[#allocation2 + $0x2c] sm:$0x1] }
  0xbe   : > { %12998 = vmatprep.subr.bf16.mxu0 %v14308_v3  ;;  %v1992_v14 = vrot.slane %v14538_v0, 5  ;;  %v11518_v40 = vrot.slane %v1920_v15, 9 }
  0xc0   : > { %v1993_v37 = vsel %vm15184_vm14, %v1991_v52, %v1992_v14  ;;  %v14326_v52 = vld [vmem:[%s18049_s1 + $0xe8] sm:$0xff]  }
  0xc1   : > { %12999 = vmatpush3.bf16.msra.mxu0 %v14308_v3  ;;  %v1975_v3 = vrot.slane %v15117_v22, 5 }
  0xc2   : > { %13000 = vmatprep.subr.bf16.mxu0 %v14311_v48 }
  0xc4   : > { %12969 = vmatmul.mubr.bf16.gmra.mrb[8].mxu0 %v11494_v35  ;;  %v14536_v35 = vld [vmem:[#allocation2 + $0x14] sm:$0x1] }
  0xc5   : > { %12972 = vmatprep.mubr.bf16.mxu0 %v11495_v60  ;;  %13001 = vmatpush3.bf16.msra.mxu0 %v14311_v48  ;;  %v1982_v48 = vrot.slane %v15120_v27, 5  ;;  %v11545_v60 = vcombine.low %v1969_v56, %v1972_v54  ;;  %v1918_v27 = vld [vmem:[#allocation2 + $0x24] sm:$0xe]  ;;  %v14541_v56 = vld [vmem:[#allocation2 + $0x50] sm:$0x1] }
  0xc6   : > { %13002 = vmatprep.subr.bf16.mxu0 %v14314_v55  ;;  %v11516_v1 = vrot.slane %v1918_v27, 9  ;;  %v2013_v54 = vrot.slane %v14541_v56, 5  ;;  %v1923_v27 = vld [vmem:[#allocation2 + $0x60] sm:$0xe]  ;;  %v1926_v56 = vld [vmem:[#allocation2 + $0x84] sm:$0xe] }
  0xc8   : > { %v1990_v46 = vsel %vm15184_vm14, %v11516_v1, %v1989_v5  ;;  %v14545_v1 = vld [vmem:[#allocation2 + $0x68] sm:$0x1] }
  0xc9   : > { %13003 = vmatpush3.bf16.msra.mxu0 %v14314_v55  ;;  %v1978_v55 = vrot.slane %v14536_v35, 5  ;;  %v11548_v34 = vcombine.low %v1990_v46, %v1993_v37  ;;  %v14324_v35 = vld [vmem:[%s18049_s1 + $0xd8] sm:$0xff]  }
  0xca   : > { %13004 = vmatprep.subr.bf16.mxu0 %v14317_v61  ;;  %v14547_v46 = vld [vmem:[#allocation2 + $0x7c] sm:$0xf] }
  0xcb   : > { %v2038_v37 = vrot.slane %v14547_v46, 5 }
  0xcc   : > { %12973 = vmatmul.mubr.bf16.gmra.mrb[12].mxu0 %v11496_v62  ;;  %v1977_v62 = vrot.slane %v1975_v3, 4 }
  0xcd   : > { %12976 = vmatprep.mubr.bf16.mxu0 %v11497_v2  ;;  %13005 = vmatpush3.bf16.msra.mxu0 %v14317_v61  ;;  %v11514_v61 = vrot.slane %v1916_v49, 9  ;;  %v1984_v2 = vrot.slane %v1982_v48, 4  ;;  %v14540_v49 = vld [vmem:[#allocation2 + $0x44] sm:$0x1] }
  0xce   : > { %13006 = vmatprep.subr.bf16.mxu0 %v14320_v63  ;;  %v1979_v32 = vsel %vm15184_vm14, %v1977_v62, %v1978_v55 }
  0xd1   : > { %13007 = vmatpush3.bf16.msra.mxu0 %v14320_v63  ;;  %v11515_v63 = vrot.slane %v1917_v47, 9  ;;  %v2006_v47 = vrot.slane %v14540_v49, 5 }
  0xd2   : > { %13040 = vmatprep.subr.bf16.mxu0 %v15164_v4 }
  0xd3   : > { %v1983_v45 = vsel %vm15184_vm14, %v11515_v63, %v1982_v48  ;;  %v2012_v48 = vrot.slane %v2010_v30, 4 }
  0xd4   : > { %12977 = vmatmul.mubr.bf16.gmra.mrb[16].mxu0 %v11498_v17  ;;  %v14537_v17 = vld [vmem:[#allocation2 + $0x20] sm:$0x1] }
  0xd5   : > { %12980 = vmatprep.mubr.bf16.mxu0 %v11499_v44  ;;  %v1985_v22 = vrot.slane %v14537_v17, 5  ;;  %v1919_v44 = vld [vmem:[#allocation2 + $0x30] sm:$0xe]  ;;  %v2014_v63 = vsel %vm15184_vm14, %v2012_v48, %v2013_v54  ;;  %v14550_v54 = vld [vmem:[#allocation2 + $0x88] sm:$0xf] }
  0xd6   : > { %v11517_v24 = vrot.slane %v1919_v44, 9 }
  0xd7   : > { %v1986_v7 = vsel %vm15184_vm14, %v1984_v2, %v1985_v22  ;;  %v14543_v2 = vld [vmem:[#allocation2 + $0x64] sm:$0xf] }
  0xd8   : > { %v11547_v20 = vcombine.low %v1983_v45, %v1986_v7  ;;  %v1997_v26 = vsel %vm15184_vm14, %v11517_v24, %v1996_v9  ;;  %v2024_v17 = vrot.slane %v14543_v2, 5  ;;  %v14325_v22 = vld [vmem:[%s18049_s1 + $0xe0] sm:$0xff]   ;;  %v14544_v45 = vld [vmem:[#allocation2 + $0x5c] sm:$0x1]  ;;  %v11521_v9 = vrot.slane %v1923_v27, 9 }
  0xd9   : > { %v11549_v18 = vcombine.low %v1997_v26, %v2000_v28  ;;  %v2020_v7 = vrot.slane %v14544_v45, 5  ;;  %v1925_v26 = vld [vmem:[#allocation2 + $0x78] sm:$0xe]  ;;  %v11524_v2 = vrot.slane %v1926_v56, 9  ;;  %v2059_v45 = vrot.slane %v15063_v39, 5  ;;  %v14335_v56 = vld [vmem:[#allocation2 + $0x3c] sm:$0xff]  }
  0xda   : > { %v2025_v33 = vsel %vm15184_vm14, %v11521_v9, %v2024_v17  ;;  %v2069_v39 = vrot.slane %v15084_v12, 5 }
  0xdc   : > { %12981 = vmatmul.mubr.bf16.gmra.mrb[20].mxu0 %v11500_v8  ;;  %v1976_v8 = vsel %vm15184_vm14, %v11514_v61, %v1975_v3 }
  0xdd   : > { %12984 = vmatprep.mubr.bf16.mxu0 %v11501_v13  ;;  %v11546_v13 = vcombine.low %v1976_v8, %v1979_v32 }
  0xe4   : > { %12985 = vmatmul.mubr.bf16.gmra.mrb[24].mxu0 %v11502_v23  ;;  %v2003_v23 = vrot.slane %v15142_v51, 5 }
  0xe5   : > { %12988 = vmatprep.mubr.bf16.mxu0 %v11503_v31  ;;  %v1921_v31 = vld [vmem:[#allocation2 + $0x48] sm:$0xe] }
  0xe6   : > { %v2005_v51 = vrot.slane %v2003_v23, 4  ;;  %v11519_v3 = vrot.slane %v1921_v31, 9  ;;  %v2004_v59 = vsel %vm15184_vm14, %v11518_v40, %v2003_v23  ;;  %v14327_v23 = vld [vmem:[%s18049_s1 + $0xf0] sm:$0xff]   ;;  %v2040_v40 = vrot.slane %v2038_v37, 4 }
  0xe7   : > { %v14548_v31 = vld [vmem:[#allocation2 + $0x74] sm:$0x1] }
  0xe8   : > { %v2007_v55 = vsel %vm15184_vm14, %v2005_v51, %v2006_v47  ;;  %v2011_v62 = vsel %vm15184_vm14, %v11519_v3, %v2010_v30  ;;  %v14549_v51 = vld [vmem:[#allocation2 + $0x80] sm:$0x1]  ;;  %v14328_v47 = vld [vmem:[%s18049_s1 + $0xf8] sm:$0xff]  }
  0xe9   : > { %v11550_v44 = vcombine.low %v2004_v59, %v2007_v55  ;;  %v11551_v8 = vcombine.low %v2011_v62, %v2014_v63  ;;  %v2041_v49 = vrot.slane %v14549_v51, 5 }
  0xeb   : > { %v2042_v55 = vsel %vm15184_vm14, %v2040_v40, %v2041_v49  ;;  %v705_v40 = vrot.slane %v15180_v21, 4  ;;  %v14332_v49 = vld [vmem:[#allocation2 + $0x24] sm:$0xff]   ;;  %v14337_v21 = vld [vmem:[%s18049_s1 + $0x110] sm:$0xff]  }
  0xec   : > { %12989 = vmatmul.mubr.bf16.gmra.mrb[28].mxu0 %v11504_v57  ;;  %v1922_v57 = vld [vmem:[#allocation2 + $0x54] sm:$0xe] }
  0xed   : > { %13008 = vmatprep.mubr.bf16.mxu0 %v11545_v60  ;;  %v14542_v60 = vld [vmem:[#allocation2 + $0x58] sm:$0xf]  ;;  %v11520_v32 = vrot.slane %v1922_v57, 9  ;;  %v2052_v57 = vrot.slane %v15032_v38, 5 }
  0xee   : > { %v2017_v61 = vrot.slane %v14542_v60, 5  ;;  %v14331_v60 = vld [vmem:[%s18049_s1 + $0x100] sm:$0xff]  }
  0xf0   : > { %v2019_v5 = vrot.slane %v2017_v61, 4  ;;  %v2018_v0 = vsel %vm15184_vm14, %v11520_v32, %v2017_v61  ;;  %v1927_v61 = vld [vmem:[#allocation2 + $0x90] sm:$0xe]  ;;  %v2055_v32 = vrot.slane %v15034_v43, 5  ;;  %v2066_v43 = vrot.slane %v15082_v11, 5 }
  0xf1   : > { %v2073_v11 = vrot.slane %v15095_v41, 5 }
  0xf2   : > { %v2021_v14 = vsel %vm15184_vm14, %v2019_v5, %v2020_v7 }
  0xf3   : > { %v11552_v28 = vcombine.low %v2018_v0, %v2021_v14  ;;  %v2061_v14 = vrot.slane %v2059_v45, 4 }
  0xf4   : > { %13009 = vmatmul.mubr.bf16.vlgmr.msra.gmra.mrb[0].mxu0 %v11546_v13  ;;  %v2026_v13 = vrot.slane %v2024_v17, 4 }
  0xf5   : > { %13041 = vmatpush3.bf16.msra.mxu0 %v15164_v4  ;;  %13012 = vmatprep.mubr.bf16.mxu0 %v11547_v20  ;;  %v14323_v4 = vld [vmem:[%s18049_s1 + $0xd0] sm:$0xff]   ;;  %v2027_v20 = vrot.slane %v14545_v1, 5  ;;  %v1929_v1 = vld [vmem:[#allocation2 + $0xa8] sm:$0xe] }
  0xf6   : > { %13042 = vmatprep.subr.bf16.mxu0 %v14322_v16 }
  0xf7   : > { %v2028_v29 = vsel %vm15184_vm14, %v2026_v13, %v2027_v20  ;;  %v1928_v13 = vld [vmem:[#allocation2 + $0x9c] sm:$0xe] }
  0xf8   : > { %v11553_v15 = vcombine.low %v2025_v33, %v2028_v29  ;;  %v11526_v0 = vrot.slane %v1928_v13, 9  ;;  %v2068_v33 = vrot.slane %v2066_v43, 4 }
  0xf9   : > { %13043 = vmatpush3.bf16.msra.mxu0 %v14322_v16  ;;  %v14546_v16 = vld [vmem:[#allocation2 + $0x70] sm:$0xf] }
  0xfa   : > { %13044 = vmatprep.subr.bf16.mxu0 %v14323_v4  ;;  %v2031_v24 = vrot.slane %v14546_v16, 5  ;;  %v2062_v16 = vrot.slane %v15069_v50, 5  ;;  %v2060_v29 = vsel %vm15184_vm14, %v11526_v0, %v2059_v45  ;;  %v2070_v50 = vsel %vm15184_vm14, %v2068_v33, %v2069_v39  ;;  %v2792_v33 = vld [vmem:[#allocation2 + $0x24] sm:$0xf] }
  0xfc   : > { %13013 = vmatmul.mubr.bf16.gmra.mrb[4].mxu0 %v11548_v34  ;;  %v2033_v30 = vrot.slane %v2031_v24, 4  ;;  %v2034_v34 = vrot.slane %v14548_v31, 5 }
  0xfd   : > { %13016 = vmatprep.mubr.bf16.mxu0 %v11549_v18  ;;  %13045 = vmatpush3.bf16.msra.mxu0 %v14323_v4  ;;  %v11522_v4 = vrot.slane %v1924_v19, 9  ;;  %v11523_v18 = vrot.slane %v1925_v26, 9  ;;  %v2063_v19 = vsel %vm15184_vm14, %v2061_v14, %v2062_v16  ;;  %v14352_v14 = vld [vmem:[%s18049_s1 + $0x138] sm:$0xff]  }
  0xfe   : > { %13046 = vmatprep.subr.bf16.mxu0 %v14324_v35  ;;  %v2035_v48 = vsel %vm15184_vm14, %v2033_v30, %v2034_v34 }
  0xff   : > { %v2032_v3 = vsel %vm15184_vm14, %v11522_v4, %v2031_v24  ;;  %v2039_v59 = vsel %vm15184_vm14, %v11523_v18, %v2038_v37  ;;  %v11527_v24 = vrot.slane %v1929_v1, 9  ;;  %v1930_v37 = vld [vmem:[#allocation2 + $0xb4] sm:$0xe]  ;;  %v394_v4 = vld [vmem:[#allocation2 + $0xc8] sm:$0x1]  ;;  %v14329_v18 = vld [vmem:[#allocation2 + $0xc] sm:$0xff]  }
 0x100   : > { %v11554_v62 = vcombine.low %v2032_v3, %v2035_v48  ;;  %v11555_v63 = vcombine.low %v2039_v59, %v2042_v55  ;;  %v11528_v12 = vrot.slane %v1930_v37, 9  ;;  %v395_v31 = vsel %vm14684_vm4, 0, %v394_v4  ;;  %v14334_v3 = vld [vmem:[%s18049_s1 + $0x108] sm:$0xff]   ;;  %v14333_v48 = vld [vmem:[#allocation2 + $0x30] sm:$0xff]   ;;  %v14343_v55 = vld [vmem:[%s18049_s1 + $0x120] sm:$0xff]  }
 0x101   : > { %13047 = vmatpush3.bf16.msra.mxu0 %v14324_v35  ;;  %v2045_v35 = vrot.slane %v14550_v54, 5  ;;  %v2067_v46 = vsel %vm15184_vm14, %v11527_v24, %v2066_v43  ;;  %396 = vst [vmem:[#allocation2 + $0xc8] sm:$0x1] %v395_v31  ;;  %v14340_v54 = vld [vmem:[%s18049_s1 + $0x118] sm:$0xff]   ;;  %v15314_v59 = vld [vmem:[#allocation2 + $0x10] sm:$0xf] }
 0x102   : > { %13048 = vmatprep.subr.bf16.mxu0 %v14325_v22  ;;  %v11559_v26 = vcombine.low %v2067_v46, %v2070_v50  ;;  %v2074_v30 = vsel %vm15184_vm14, %v11528_v12, %v2073_v11  ;;  %v14341_v1 = vld [vmem:[#allocation2 + $0x6c] sm:$0xff]   ;;  %v15345_v46 = vld [vmem:[#allocation2 + $0x28] sm:$0xf]  ;;  %v14342_v12 = vld [vmem:[#allocation2 + $0x78] sm:$0xff]  }
 0x103   : > { %v2047_v17 = vrot.slane %v2045_v35, 4  ;;  %v2046_v38 = vsel %vm15184_vm14, %v11524_v2, %v2045_v35  ;;  %v2786_v35 = vld [vmem:[#allocation2 + $0xc] sm:$0xf]  ;;  %v14338_v2 = vld [vmem:[#allocation2 + $0x54] sm:$0xff]   ;;  %v14344_v4 = vld [vmem:[#allocation2 + $0x84] sm:$0xff]  }
 0x104   : > { %13017 = vmatmul.mubr.bf16.gmra.mrb[8].mxu0 %v11550_v44  ;;  %v11525_v44 = vrot.slane %v1927_v61, 9  ;;  %v14336_v61 = vld [vmem:[#allocation2 + $0x48] sm:$0xff]  }
 0x105   : > { %13020 = vmatprep.mubr.bf16.mxu0 %v11551_v8  ;;  %13049 = vmatpush3.bf16.msra.mxu0 %v14325_v22  ;;  %v14551_v22 = vld [vmem:[#allocation2 + $0x8c] sm:$0x1]  ;;  %v2054_v8 = vrot.slane %v2052_v57, 4 }
 0x106   : > { %13050 = vmatprep.subr.bf16.mxu0 %v14326_v52  ;;  %v2048_v27 = vrot.slane %v14551_v22, 5  ;;  %v2053_v7 = vsel %vm15184_vm14, %v11525_v44, %v2052_v57  ;;  %v2835_v57 = vshrl.u32 %v2786_v35, 16  ;;  %v14346_v22 = vld [vmem:[%s18049_s1 + $0x128] sm:$0xff]   ;;  %v15326_v44 = vld [vmem:[#allocation2 + $0x1c] sm:$0xf] }
 0x107   : > { %v2056_v9 = vsel %vm15184_vm14, %v2054_v8, %v2055_v32  ;;  %v14349_v32 = vld [vmem:[%s18049_s1 + $0x130] sm:$0xff]   ;;  %v2872_v0 = vshrl.u32 %v15326_v44, 16 }
 0x108   : > { %v2049_v5 = vsel %vm15184_vm14, %v2047_v17, %v2048_v27  ;;  %v866_v51 = vld [vmem:[#allocation2 + $0xc8] sm:$0x1]  ;;  %v2789_v17 = vld [vmem:[#allocation2 + $0x18] sm:$0xf]  ;;  %v15324_v27 = vld [vmem:[#allocation2 + $0x14] sm:$0x1] }
 0x109   : > { %13051 = vmatpush3.bf16.msra.mxu0 %v14326_v52  ;;  %v11556_v20 = vcombine.low %v2046_v38, %v2049_v5  ;;  %v11557_v52 = vcombine.low %v2053_v7, %v2056_v9  ;;  %v2859_v8 = vshrl.u32 %v2789_v17, 16  ;;  %v2837_v38 = vrot.slane %v2835_v57, 4  ;;  %v14339_v9 = vld [vmem:[#allocation2 + $0x60] sm:$0xff]  }
 0x10a   : > { %13052 = vmatprep.subr.bf16.mxu0 %v14327_v23  ;;  %v2854_v13 = vshll.u32 %v15324_v27, 16  ;;  %v2862_v43 = vshll.u32 %v2789_v17, 16  ;;  %v2798_v17 = vld [vmem:[#allocation2 + $0x3c] sm:$0xf] }
 0x10c   : > { %13021 = vmatmul.mubr.bf16.gmra.mrb[12].mxu0 %v11552_v28  ;;  %v2075_v28 = vrot.slane %v2073_v11, 4  ;;  %v15342_v39 = vrot.slane %v2854_v13, 5 }
 0x10d   : > { %13024 = vmatprep.mubr.bf16.mxu0 %v11553_v15  ;;  %13053 = vmatpush3.bf16.msra.mxu0 %v14327_v23  ;;  %v11558_v23 = vcombine.low %v2060_v29, %v2063_v19  ;;  %v2076_v15 = vrot.slane %v15103_v53, 5  ;;  %v14330_v53 = vld [vmem:[#allocation2 + $0x18] sm:$0xff]   ;;  %v2861_v29 = vrot.slane %v2859_v8, 4  ;;  %v2864_v19 = vrot.slane %v2862_v43, 5 }
 0x10e   : > { %13054 = vmatprep.subr.bf16.mxu0 %v14328_v47 }
 0x10f   : > { %v2077_v41 = vsel %vm15184_vm14, %v2075_v28, %v2076_v15  ;;  %v15356_v28 = vld [vmem:[%s18049_s1 + $0x140] sm:$0xff]   ;;  %v2883_v15 = vshrl.u32 %v2792_v33, 16  ;;  %v2865_v31 = vor.u32 %v2864_v19, %v2861_v29  ;;  %v2801_v29 = vld [vmem:[#allocation2 + $0x48] sm:$0xf] }
 0x110   : > { %v11560_v34 = vcombine.low %v2074_v30, %v2077_v41  ;;  %v2886_v30 = vshll.u32 %v2792_v33, 16  ;;  %v2892_v41 = vshll.u32 %v15345_v46, 16 }
 0x111   : > { %13055 = vmatpush3.bf16.msra.mxu0 %v14328_v47  ;;  %v867_v47 = vsel %vm14670_vm3, %v705_v40, %v866_v51  ;;  %v15360_v40 = vld [vmem:[#allocation2 + $0x2c] sm:$0x1] }
 0x112   : > { %13088 = vmatprep.subr.bf16.mxu0 %v14331_v60  ;;  %868 = vst [vmem:[#allocation2 + $0xc8] sm:$0x1] %v867_v47  ;;  %v2888_v47 = vrot.slane %v2886_v30, 5 }
 0x114   : > { %13025 = vmatmul.mubr.bf16.gmra.mrb[16].mxu0 %v11554_v62  ;;  %v2844_v62 = vshll.u32 %v15314_v59, 16 }
 0x115   : > { %13028 = vmatprep.mubr.bf16.mxu0 %v11555_v63  ;;  %v2848_v63 = vshrl.u32 %v15314_v59, 16 }
 0x116   : > { %v15331_v45 = vrot.slane %v2844_v62, 5 }
 0x117   : > { %v2850_v7 = vrot.slane %v2848_v63, 4 }
 0x119   : > { %v2851_v24 = vor.u32 %v2850_v7, %v15331_v45 }
 0x11b   : > { %v15349_v37 = vrot.slane %v2851_v24, 4 }
 0x11c   : > { %13029 = vmatmul.mubr.bf16.gmra.mrb[20].mxu0 %v11556_v20  ;;  %v15334_v20 = vld [vmem:[#allocation2 + $0x20] sm:$0x1] }
 0x11d   : > { %13032 = vmatprep.mubr.bf16.mxu0 %v11557_v52  ;;  %v2868_v52 = vshll.u32 %v15326_v44, 16  ;;  %v2878_v11 = vshll.u32 %v15334_v20, 16 }
 0x11f   : > { %v15365_v51 = vrot.slane %v2878_v11, 5 }
 0x124   : > { %13033 = vmatmul.mubr.bf16.gmra.mrb[24].mxu0 %v11558_v23  ;;  %v15351_v23 = vrot.slane %v2868_v52, 5  ;;  %v2931_v52 = vshrl.u32 %v2798_v17, 16 }
 0x125   : > { %13036 = vmatprep.mubr.bf16.mxu0 %v11559_v26  ;;  %v2874_v26 = vrot.slane %v2872_v0, 4  ;;  %v2934_v0 = vshll.u32 %v2798_v17, 16 }
 0x127   : > { %v2936_v30 = vrot.slane %v2934_v0, 5 }
 0x12c   : > { %13037 = vmatmul.mubr.bf16.gmra.mrb[28].mxu0 %v11560_v34  ;;  %v2795_v34 = vld [vmem:[#allocation2 + $0x30] sm:$0xf] }
 0x12d   : > { %13056 = vmatprep.mubr.bf16.mxu0 %v14329_v18  ;;  %v2875_v18 = vor.u32 %v2874_v26, %v15351_v23  ;;  %v2910_v57 = vshll.u32 %v2795_v34, 16  ;;  %v2857_v26 = vsel %vm14730_vm11, %v15349_v37, %v15342_v39 }
 0x12f   : > { %v2912_v7 = vrot.slane %v2910_v57, 5 }
 0x134   : > { %13057 = vmatmul.mubr.bf16.vlgmr.msra.gmra.mrb[0].mxu0 %v14330_v53  ;;  %v15363_v53 = vrot.slane %v2865_v31, 4 }
 0x135   : > { %13089 = vmatpush3.bf16.msra.mxu0 %v14331_v60  ;;  %13060 = vmatprep.mubr.bf16.mxu0 %v14332_v49  ;;  %v2838_v60 = vshll.u32 %v2786_v35, 16  ;;  %v2885_v49 = vrot.slane %v2883_v15, 4  ;;  %v14345_v35 = vld [vmem:[#allocation2 + $0x90] sm:$0xff]  }
 0x136   : > { %13090 = vmatprep.subr.bf16.mxu0 %v14334_v3  ;;  %v2871_v39 = vsel %vm14730_vm11, %v15363_v53, %v15351_v23 }
 0x137   : > { %v2840_v5 = vrot.slane %v2838_v60, 5  ;;  %v14347_v60 = vld [vmem:[#allocation2 + $0x9c] sm:$0xff]   ;;  %v2889_v63 = vor.u32 %v2888_v47, %v2885_v49  ;;  %v2958_v49 = vshll.u32 %v2801_v29, 16  ;;  %v2804_v47 = vld [vmem:[#allocation2 + $0x54] sm:$0xf] }
 0x139   : > { %13091 = vmatpush3.bf16.msra.mxu0 %v14334_v3  ;;  %v2841_v16 = vor.u32 %v2840_v5, %v2837_v38  ;;  %v15367_v3 = vld [vmem:[#allocation2 + $0x34] sm:$0xf]  ;;  %v15383_v5 = vld [vmem:[#allocation2 + $0x40] sm:$0xf] }
 0x13a   : > { %13092 = vmatprep.subr.bf16.mxu0 %v14337_v21  ;;  %v2920_v62 = vshrl.u32 %v15367_v3, 16  ;;  %v2944_v24 = vshrl.u32 %v15383_v5, 16 }
 0x13b   : > { %v15347_v50 = vrot.slane %v2841_v16, 4  ;;  %v2940_v16 = vshll.u32 %v15383_v5, 16 }
 0x13c   : > { %13061 = vmatmul.mubr.bf16.gmra.mrb[4].mxu0 %v14333_v48  ;;  %v15371_v48 = vrot.slane %v2892_v41, 5  ;;  %v2922_v13 = vrot.slane %v2920_v62, 4  ;;  %v15400_v41 = vld [vmem:[#allocation2 + $0x4c] sm:$0xf]  ;;  %v2979_v62 = vshrl.u32 %v2804_v47, 16 }
 0x13d   : > { %13064 = vmatprep.mubr.bf16.mxu0 %v14335_v56  ;;  %13093 = vmatpush3.bf16.msra.mxu0 %v14337_v21  ;;  %v15369_v21 = vrot.slane %v2875_v18, 4  ;;  %v2896_v56 = vshrl.u32 %v15345_v46, 16  ;;  %v2847_v11 = vsel %vm14730_vm11, %v15347_v50, %v15331_v45  ;;  %v2955_v18 = vshrl.u32 %v2801_v29, 16  ;;  %v15402_v45 = vld [vmem:[#allocation2 + $0x58] sm:$0xf] }
 0x13e   : > { %13094 = vmatprep.subr.bf16.mxu0 %v14340_v54  ;;  %v11625_v50 = vcombine.low %v2847_v11, %v2857_v26  ;;  %v15408_v37 = vrot.slane %v2940_v16, 5  ;;  %v2988_v17 = vshll.u32 %v15402_v45, 16  ;;  %v2981_v16 = vrot.slane %v2979_v62, 4  ;;  %v15443_v11 = vld [vmem:[#allocation2 + $0x5c] sm:$0x1] }
 0x13f   : > { %v2898_v8 = vrot.slane %v2896_v56, 4  ;;  %v2946_v56 = vrot.slane %v2944_v24, 4  ;;  %v2881_v23 = vsel %vm14730_vm11, %v15369_v21, %v15365_v51  ;;  %v15432_v51 = vld [vmem:[#allocation2 + $0x50] sm:$0x1]  ;;  %v2807_v21 = vld [vmem:[#allocation2 + $0x60] sm:$0xf] }
 0x140   : > { %v15440_v24 = vrot.slane %v2988_v17, 5  ;;  %v3003_v26 = vshrl.u32 %v2807_v21, 16 }
 0x141   : > { %13095 = vmatpush3.bf16.msra.mxu0 %v14340_v54  ;;  %v2907_v54 = vshrl.u32 %v2795_v34, 16  ;;  %v2899_v33 = vor.u32 %v2898_v8, %v15371_v48  ;;  %v2992_v8 = vshrl.u32 %v15402_v45, 16 }
 0x142   : > { %13096 = vmatprep.subr.bf16.mxu0 %v14343_v55 }
 0x143   : > { %v2909_v38 = vrot.slane %v2907_v54, 4  ;;  %v14351_v54 = vld [vmem:[#allocation2 + $0xc0] sm:$0xff]  }
 0x144   : > { %13065 = vmatmul.mubr.bf16.gmra.mrb[8].mxu0 %v14336_v61  ;;  %v2916_v61 = vshll.u32 %v15367_v3, 16 }
 0x145   : > { %13068 = vmatprep.mubr.bf16.mxu0 %v14338_v2  ;;  %13097 = vmatpush3.bf16.msra.mxu0 %v14343_v55  ;;  %v2902_v55 = vshll.u32 %v15360_v40, 16  ;;  %v15377_v2 = vld [vmem:[#allocation2 + $0x38] sm:$0x1]  ;;  %v2913_v19 = vor.u32 %v2912_v7, %v2909_v38  ;;  %v2957_v38 = vrot.slane %v2955_v18, 4  ;;  %v2960_v7 = vrot.slane %v2958_v49, 5 }
 0x146   : > { %13098 = vmatprep.subr.bf16.mxu0 %v14346_v22  ;;  %v2926_v43 = vshll.u32 %v15377_v2, 16 }
 0x147   : > { %v2914_v31 = vrot.slane %v2913_v19, 4  ;;  %v2961_v29 = vor.u32 %v2960_v7, %v2957_v38  ;;  %v2974_v19 = vshll.u32 %v15432_v51, 16  ;;  %v2813_v38 = vld [vmem:[#allocation2 + $0x78] sm:$0xf]  ;;  %v15466_v7 = vld [vmem:[#allocation2 + $0x7c] sm:$0xf] }
 0x148   : > { %v2928_v34 = vrot.slane %v2926_v43, 5 }
 0x149   : > { %13099 = vmatpush3.bf16.msra.mxu0 %v14346_v22  ;;  %v15379_v22 = vrot.slane %v2889_v63, 4  ;;  %v2982_v63 = vshll.u32 %v2804_v47, 16  ;;  %v15457_v62 = vrot.slane %v2974_v19, 5  ;;  %v3064_v19 = vshrl.u32 %v15466_v7, 16 }
 0x14a   : > { %13100 = vmatprep.subr.bf16.mxu0 %v14349_v32 }
 0x14b   : > { %v2895_v53 = vsel %vm14730_vm11, %v15379_v22, %v15371_v48 }
 0x14c   : > { %13069 = vmatmul.mubr.bf16.gmra.mrb[12].mxu0 %v14339_v9  ;;  %v15385_v9 = vrot.slane %v2916_v61, 5  ;;  %v2968_v61 = vshrl.u32 %v15400_v41, 16 }
 0x14d   : > { %13072 = vmatprep.mubr.bf16.mxu0 %v14341_v1  ;;  %13101 = vmatpush3.bf16.msra.mxu0 %v14349_v32  ;;  %v15381_v32 = vrot.slane %v2902_v55, 5  ;;  %v14348_v1 = vld [vmem:[#allocation2 + $0xa8] sm:$0xff]   ;;  %v15410_v55 = vld [vmem:[#allocation2 + $0x44] sm:$0x1] }
 0x14e   : > { %13102 = vmatprep.subr.bf16.mxu0 %v14352_v14  ;;  %v2923_v15 = vor.u32 %v2922_v13, %v15385_v9  ;;  %v2919_v43 = vsel %vm14730_vm11, %v2914_v31, %v15385_v9  ;;  %v2984_v9 = vrot.slane %v2982_v63, 5 }
 0x151   : > { %13103 = vmatpush3.bf16.msra.mxu0 %v14352_v14  ;;  %v14350_v14 = vld [vmem:[#allocation2 + $0xb4] sm:$0xff]  }
 0x152   : > { %13136 = vmatprep.subr.bf16.mxu0 %v15356_v28 }
 0x154   : > { %13073 = vmatmul.mubr.bf16.gmra.mrb[16].mxu0 %v14342_v12  ;;  %v2900_v12 = vrot.slane %v2899_v33, 4  ;;  %v2994_v33 = vrot.slane %v2992_v8, 4 }
 0x155   : > { %13076 = vmatprep.mubr.bf16.mxu0 %v14344_v4  ;;  %v2933_v4 = vrot.slane %v2931_v52, 4  ;;  %v2950_v52 = vshll.u32 %v15410_v55, 16 }
 0x156   : > { %v2905_v13 = vsel %vm14730_vm11, %v2900_v12, %v15381_v32  ;;  %v15438_v32 = vld [vmem:[#allocation2 + $0x64] sm:$0xf]  ;;  %v3006_v12 = vshll.u32 %v2807_v21, 16 }
 0x157   : > { %v2937_v57 = vor.u32 %v2936_v30, %v2933_v4  ;;  %v2952_v4 = vrot.slane %v2950_v52, 5  ;;  %v3012_v30 = vshll.u32 %v15438_v32, 16  ;;  %v3016_v31 = vshrl.u32 %v15438_v32, 16 }
 0x158   : > { %v11627_v18 = vcombine.low %v2895_v53, %v2905_v13  ;;  %v3008_v63 = vrot.slane %v3006_v12, 5  ;;  %v15468_v13 = vld [vmem:[#allocation2 + $0x68] sm:$0x1] }
 0x159   : > { %v2938_v22 = vrot.slane %v2937_v57, 4  ;;  %v15450_v57 = vld [vmem:[#allocation2 + $0x70] sm:$0xf]  ;;  %v3018_v53 = vrot.slane %v3016_v31, 4 }
 0x15a   : > { %v3036_v52 = vshll.u32 %v15450_v57, 16  ;;  %v3040_v21 = vshrl.u32 %v15450_v57, 16 }
 0x15b   : > { %v2943_v17 = vsel %vm14730_vm11, %v2938_v22, %v15408_v37 }
 0x15c   : > { %13077 = vmatmul.mubr.bf16.gmra.mrb[20].mxu0 %v14345_v35  ;;  %v2924_v35 = vrot.slane %v2923_v15, 4 }
 0x15d   : > { %13080 = vmatprep.mubr.bf16.mxu0 %v14347_v60  ;;  %v2964_v60 = vshll.u32 %v15400_v41, 16 }
 0x15e   : > { %v2929_v48 = vsel %vm14730_vm11, %v2924_v35, %v2928_v34  ;;  %v11626_v34 = vcombine.low %v2871_v39, %v2881_v23  ;;  %v2810_v35 = vld [vmem:[#allocation2 + $0x6c] sm:$0xf]  ;;  %v3005_v39 = vrot.slane %v3003_v26, 4  ;;  %v15464_v23 = vrot.slane %v3012_v30, 5 }
 0x15f   : > { %v15436_v0 = vrot.slane %v2964_v60, 5  ;;  %v11628_v49 = vcombine.low %v2919_v43, %v2929_v48  ;;  %v14354_v60 = vld [vmem:[%s18049_s1 + $0x148] sm:$0xff]   ;;  %v3027_v43 = vshrl.u32 %v2810_v35, 16 }
 0x160   : > { %v3009_v12 = vor.u32 %v3008_v63, %v3005_v39 }
 0x161   : > { %v3029_v30 = vrot.slane %v3027_v43, 4 }
 0x164   : > { %13081 = vmatmul.mubr.bf16.gmra.mrb[24].mxu0 %v14348_v1  ;;  %v2947_v1 = vor.u32 %v2946_v56, %v15408_v37  ;;  %v2995_v56 = vor.u32 %v2994_v33, %v15440_v24  ;;  %v3054_v33 = vshll.u32 %v2813_v38, 16 }
 0x165   : > { %13084 = vmatprep.mubr.bf16.mxu0 %v14350_v14  ;;  %v2970_v14 = vrot.slane %v2968_v61, 4  ;;  %v15455_v61 = vrot.slane %v2961_v29, 4  ;;  %v3060_v29 = vshll.u32 %v15466_v7, 16 }
 0x166   : > { %v2948_v15 = vrot.slane %v2947_v1, 4  ;;  %v3030_v1 = vshll.u32 %v2810_v35, 16  ;;  %v2996_v22 = vrot.slane %v2995_v56, 4  ;;  %v14356_v35 = vld [vmem:[%s18049_s1 + $0x158] sm:$0xff]   ;;  %v3056_v63 = vrot.slane %v3054_v33, 5 }
 0x167   : > { %v2971_v47 = vor.u32 %v2970_v14, %v15436_v0 }
 0x168   : > { %v2953_v8 = vsel %vm14730_vm11, %v2948_v15, %v2952_v4  ;;  %v3022_v15 = vshll.u32 %v15468_v13, 16  ;;  %v15480_v4 = vld [vmem:[#allocation2 + $0x74] sm:$0x1]  ;;  %v3032_v31 = vrot.slane %v3030_v1, 5 }
 0x169   : > { %v2972_v37 = vrot.slane %v2971_v47, 4  ;;  %v11629_v26 = vcombine.low %v2943_v17, %v2953_v8  ;;  %v2967_v47 = vsel %vm14730_vm11, %v15455_v61, %v15436_v0  ;;  %v15499_v0 = vrot.slane %v3060_v29, 5  ;;  %v15501_v17 = vld [vmem:[#allocation2 + $0x88] sm:$0xf]  ;;  %v2819_v29 = vld [vmem:[#allocation2 + $0x90] sm:$0xf] }
 0x16a   : > { %v3066_v61 = vrot.slane %v3064_v19, 4  ;;  %v3033_v43 = vor.u32 %v3032_v31, %v3029_v30 }
 0x16c   : > { %13085 = vmatmul.mubr.bf16.gmra.mrb[28].mxu0 %v14351_v54  ;;  %v2998_v54 = vshll.u32 %v15443_v11, 16  ;;  %v3034_v30 = vrot.slane %v3033_v43, 4 }
 0x16d   : > { %13104 = vmatprep.mubr.bf16.mxu0 %v11625_v50  ;;  %v2985_v50 = vor.u32 %v2984_v9, %v2981_v16  ;;  %v14355_v16 = vld [vmem:[%s18049_s1 + $0x150] sm:$0xff]   ;;  %v3051_v9 = vshrl.u32 %v2813_v38, 16  ;;  %v15510_v38 = vld [vmem:[#allocation2 + $0x80] sm:$0x1] }
 0x16e   : > { %v3000_v14 = vrot.slane %v2998_v54, 5  ;;  %v3070_v33 = vshll.u32 %v15510_v38, 16 }
 0x16f   : > { %v2986_v48 = vrot.slane %v2985_v50, 4  ;;  %v2977_v50 = vsel %vm14730_vm11, %v2972_v37, %v15457_v62  ;;  %v3053_v39 = vrot.slane %v3051_v9, 4  ;;  %v15503_v62 = vrot.slane %v3009_v12, 4 }
 0x170   : > { %v3001_v54 = vsel %vm14730_vm11, %v2996_v22, %v3000_v14  ;;  %v3084_v37 = vshll.u32 %v15501_v17, 16  ;;  %v11630_v22 = vcombine.low %v2967_v47, %v2977_v50  ;;  %v3067_v9 = vor.u32 %v3066_v61, %v15499_v0  ;;  %v2822_v50 = vld [vmem:[#allocation2 + $0x9c] sm:$0xf] }
 0x171   : > { %v2991_v56 = vsel %vm14730_vm11, %v2986_v48, %v15440_v24  ;;  %v15507_v24 = vrot.slane %v3022_v15, 5  ;;  %v3088_v48 = vshrl.u32 %v15501_v17, 16  ;;  %v3057_v14 = vor.u32 %v3056_v63, %v3053_v39  ;;  %v15530_v15 = vld [vmem:[#allocation2 + $0x94] sm:$0xf]  ;;  %v15534_v39 = vld [vmem:[#allocation2 + $0xa0] sm:$0xf] }
 0x172   : > { %v11631_v19 = vcombine.low %v2991_v56, %v3001_v54  ;;  %v15532_v56 = vrot.slane %v3084_v37, 5  ;;  %v3068_v61 = vrot.slane %v3067_v9, 4  ;;  %v3123_v43 = vshrl.u32 %v2822_v50, 16 }
 0x173   : > { %v3090_v54 = vrot.slane %v3088_v48, 4  ;;  %v3058_v63 = vrot.slane %v3057_v14, 4  ;;  %v3132_v37 = vshll.u32 %v15534_v39, 16  ;;  %v3136_v48 = vshrl.u32 %v15534_v39, 16 }
 0x174   : > { %13105 = vmatmul.mubr.bf16.vlgmr.msra.gmra.mrb[0].mxu0 %v11626_v34  ;;  %v15482_v34 = vrot.slane %v3036_v52, 5 }
 0x175   : > { %13137 = vmatpush3.bf16.msra.mxu0 %v15356_v28  ;;  %13108 = vmatprep.mubr.bf16.mxu0 %v11627_v18  ;;  %v3019_v28 = vor.u32 %v3018_v53, %v15464_v23  ;;  %v3042_v18 = vrot.slane %v3040_v21, 4  ;;  %v3046_v53 = vshll.u32 %v15480_v4, 16  ;;  %v3091_v9 = vor.u32 %v3090_v54, %v15532_v56 }
 0x176   : > { %13138 = vmatprep.subr.bf16.mxu0 %v14354_v60 }
 0x177   : > { %v15505_v8 = vrot.slane %v3019_v28, 4  ;;  %v3043_v1 = vor.u32 %v3042_v18, %v15482_v34  ;;  %v3048_v12 = vrot.slane %v3046_v53, 5  ;;  %v15528_v28 = vld [vmem:[#allocation2 + $0x8c] sm:$0x1]  ;;  %v3108_v53 = vshll.u32 %v15530_v15, 16 }
 0x179   : > { %13139 = vmatpush3.bf16.msra.mxu0 %v14354_v60  ;;  %v2816_v60 = vld [vmem:[#allocation2 + $0x84] sm:$0xf]  ;;  %v3044_v31 = vrot.slane %v3043_v1, 4  ;;  %v3126_v1 = vshll.u32 %v2822_v50, 16 }
 0x17a   : > { %13140 = vmatprep.subr.bf16.mxu0 %v14355_v16  ;;  %v3075_v52 = vshrl.u32 %v2816_v60, 16  ;;  %v3078_v21 = vshll.u32 %v2816_v60, 16  ;;  %v3102_v60 = vshll.u32 %v2819_v29, 16 }
 0x17c   : > { %13109 = vmatmul.mubr.bf16.gmra.mrb[4].mxu0 %v11628_v49  ;;  %v14357_v49 = vld [vmem:[%s18049_s1 + $0x160] sm:$0xff]   ;;  %v3077_v18 = vrot.slane %v3075_v52, 4  ;;  %v3080_v47 = vrot.slane %v3078_v21, 5  ;;  %v3039_v52 = vsel %vm14730_vm11, %v3034_v30, %v15482_v34  ;;  %v3049_v21 = vsel %vm14730_vm11, %v3044_v31, %v3048_v12  ;;  %v15555_v12 = vld [vmem:[#allocation2 + $0x98] sm:$0x1] }
 0x17d   : > { %13112 = vmatprep.mubr.bf16.mxu0 %v11629_v26  ;;  %13141 = vmatpush3.bf16.msra.mxu0 %v14355_v16  ;;  %v3015_v16 = vsel %vm14730_vm11, %v15503_v62, %v15464_v23  ;;  %v3025_v26 = vsel %vm14730_vm11, %v15505_v8, %v15507_v24  ;;  %v3099_v23 = vshrl.u32 %v2819_v29, 16  ;;  %v3072_v62 = vrot.slane %v3070_v33, 5  ;;  %v14358_v24 = vld [vmem:[%s18049_s1 + $0x168] sm:$0xff]   ;;  %18150 = vst [vmem:[#allocation7_spill] sm:$0xff] %v15555_v12 }
 0x17e   : > { %13142 = vmatprep.subr.bf16.mxu0 %v14356_v35  ;;  %v3094_v8 = vshll.u32 %v15528_v28, 16  ;;  %v3081_v14 = vor.u32 %v3080_v47, %v3077_v18  ;;  %v3104_v29 = vrot.slane %v3102_v60, 5  ;;  %v3125_v18 = vrot.slane %v3123_v43, 4 }
 0x17f   : > { %v3101_v33 = vrot.slane %v3099_v23, 4  ;;  %v3073_v34 = vsel %vm14730_vm11, %v3068_v61, %v3072_v62  ;;  %v3128_v47 = vrot.slane %v3126_v1, 5  ;;  %v11632_v50 = vcombine.low %v3015_v16, %v3025_v26  ;;  %v15562_v23 = vld [vmem:[#allocation2 + $0xa4] sm:$0x1]  ;;  %v14360_v16 = vld [vmem:[%s18049_s1 + $0x178] sm:$0xff]  }
 0x180   : > { %v3096_v30 = vrot.slane %v3094_v8, 5  ;;  %v11633_v54 = vcombine.low %v3039_v52, %v3049_v21  ;;  %18151 = vst [vmem:[#allocation8_spill] sm:$0xff] %v15562_v23  ;;  %v3138_v60 = vrot.slane %v3136_v48, 4  ;;  %v3082_v61 = vrot.slane %v3081_v14, 4  ;;  %v2828_v52 = vld [vmem:[#allocation2 + $0xb4] sm:$0xf] }
 0x181   : > { %13143 = vmatpush3.bf16.msra.mxu0 %v14356_v35  ;;  %v3112_v35 = vshrl.u32 %v15530_v15, 16  ;;  %v3092_v62 = vrot.slane %v3091_v9, 4  ;;  %v3105_v8 = vor.u32 %v3104_v29, %v3101_v33  ;;  %v3118_v36 = vshll.u32 %v15555_v12, 16  ;;  %v15574_v21 = vld [vmem:[#allocation2 + $0xb8] sm:$0xf] }
 0x182   : > { %13144 = vmatprep.subr.bf16.mxu0 %v14357_v49  ;;  %v3142_v43 = vshll.u32 %v15562_v23, 16  ;;  %18153 = vst [vmem:[#allocation10_spill] sm:$0xff] %v15574_v21  ;;  %v3156_v48 = vshll.u32 %v15567_v42, 16  ;;  %v3160_v14 = vshrl.u32 %v15567_v42, 16  ;;  %v3087_v9 = vsel %vm14730_vm11, %v3082_v61, %v15532_v56  ;;  %v15591_v61 = vld [vmem:[#allocation2 + $0xb0] sm:$0x1] }
 0x183   : > { %v3114_v31 = vrot.slane %v3112_v35, 4  ;;  %v3129_v35 = vor.u32 %v3128_v47, %v3125_v18  ;;  %v3097_v33 = vsel %vm14730_vm11, %v3092_v62, %v3096_v30  ;;  %v3106_v29 = vrot.slane %v3105_v8, 4  ;;  %v15593_v12 = vld [vmem:[#allocation2 + $0xc4] sm:$0xf] }
 0x184   : > { %13113 = vmatmul.mubr.bf16.gmra.mrb[8].mxu0 %v11630_v22  ;;  %v3063_v22 = vsel %vm14730_vm11, %v3058_v63, %v15499_v0  ;;  %v15564_v0 = vrot.slane %v3132_v37, 5  ;;  %v2825_v63 = vld [vmem:[#allocation2 + $0xa8] sm:$0xf]  ;;  %v3180_v18 = vshll.u32 %v15574_v21, 16  ;;  %v3184_v47 = vshrl.u32 %v15574_v21, 16 }
 0x185   : > { %13116 = vmatprep.mubr.bf16.mxu0 %v11631_v19  ;;  %13145 = vmatpush3.bf16.msra.mxu0 %v14357_v49  ;;  %v14359_v49 = vld [vmem:[%s18049_s1 + $0x170] sm:$0xff]   ;;  %v15560_v19 = vrot.slane %v3108_v53, 5  ;;  %v11634_v53 = vcombine.low %v3063_v22, %v3073_v34  ;;  %v3147_v1 = vshrl.u32 %v2825_v63, 16  ;;  %v3150_v37 = vshll.u32 %v2825_v63, 16 }
 0x186   : > { %13146 = vmatprep.subr.bf16.mxu0 %v14358_v24  ;;  %v3120_v22 = vrot.slane %v3118_v36, 5  ;;  %v3171_v34 = vshrl.u32 %v2828_v52, 16  ;;  %v3130_v56 = vrot.slane %v3129_v35, 4  ;;  %v3162_v62 = vrot.slane %v3160_v14, 4 }
 0x187   : > { %v3115_v26 = vor.u32 %v3114_v31, %v15560_v19  ;;  %v3174_v31 = vshll.u32 %v2828_v52, 16  ;;  %v3149_v63 = vrot.slane %v3147_v1, 4  ;;  %v3152_v36 = vrot.slane %v3150_v37, 5  ;;  %v2831_v52 = vld [vmem:[#allocation2 + $0xc0] sm:$0xf] }
 0x188   : > { %v11635_v8 = vcombine.low %v3087_v9, %v3097_v33  ;;  %v3173_v10 = vrot.slane %v3171_v34, 4  ;;  %v3182_v42 = vrot.slane %v3180_v18, 5  ;;  %v3186_v23 = vrot.slane %v3184_v47, 4  ;;  %v15602_v1 = vld [vmem:[#allocation2 + $0xbc] sm:$0x1] }
 0x189   : > { %13147 = vmatpush3.bf16.msra.mxu0 %v14358_v24  ;;  %v3139_v24 = vor.u32 %v3138_v60, %v15564_v0  ;;  %v3144_v60 = vrot.slane %v3142_v43, 5  ;;  %v3176_v21 = vrot.slane %v3174_v31, 5  ;;  %v3166_v43 = vshll.u32 %v15591_v61, 16 }
 0x18a   : > { %13148 = vmatprep.subr.bf16.mxu0 %v14359_v49  ;;  %v3153_v37 = vor.u32 %v3152_v36, %v3149_v63  ;;  %v3195_v14 = vshrl.u32 %v2831_v52, 16  ;;  %v3204_v9 = vshll.u32 %v15593_v12, 16  ;;  %v3208_v33 = vshrl.u32 %v15593_v12, 16 }
 0x18b   : > { %v3140_v30 = vrot.slane %v3139_v24, 4  ;;  %v3168_v47 = vrot.slane %v3166_v43, 5 }
 0x18c   : > { %13117 = vmatmul.mubr.bf16.gmra.mrb[12].mxu0 %v11632_v50  ;;  %v15589_v50 = vld [vmem:[%s18049_s1 + $0x180] sm:$0xff]   ;;  %v3154_v18 = vrot.slane %v3153_v37, 4  ;;  %v3210_v63 = vrot.slane %v3208_v33, 4 }
 0x18d   : > { %13120 = vmatprep.mubr.bf16.mxu0 %v11633_v54  ;;  %13149 = vmatpush3.bf16.msra.mxu0 %v14359_v49  ;;  %v3116_v54 = vrot.slane %v3115_v26, 4  ;;  %v3158_v49 = vrot.slane %v3156_v48, 5  ;;  %v3111_v26 = vsel %vm14730_vm11, %v3106_v29, %v15560_v19  ;;  %v3145_v24 = vsel %vm14730_vm11, %v3140_v30, %v3144_v60 }
 0x18e   : > { %13150 = vmatprep.subr.bf16.mxu0 %v14360_v16  ;;  %v3198_v19 = vshll.u32 %v2831_v52, 16  ;;  %v3177_v29 = vor.u32 %v3176_v21, %v3173_v10  ;;  %v3206_v60 = vrot.slane %v3204_v9, 5  ;;  %v341_v9 = vld [vmem:[#allocation2 + $0xcc] sm:$0x1] }
 0x18f   : > { %v3121_v35 = vsel %vm14730_vm11, %v3116_v54, %v3120_v22  ;;  %v3163_v48 = vor.u32 %v3162_v62, %v3158_v49  ;;  %v3187_v22 = vor.u32 %v3186_v23, %v3182_v42  ;;  %v3197_v54 = vrot.slane %v3195_v14, 4 }
 0x190   : > { %v11636_v34 = vcombine.low %v3111_v26, %v3121_v35  ;;  %v3178_v30 = vrot.slane %v3177_v29, 4  ;;  %v3159_v10 = vsel %vm14730_vm11, %v3154_v18, %v3158_v49  ;;  %v3211_v52 = vor.u32 %v3210_v63, %v3206_v60  ;;  %v3541_v18 = vld [vmem:[#allocation2 + $0x18] sm:$0xe] }
 0x191   : > { %13151 = vmatpush3.bf16.msra.mxu0 %v14360_v16  ;;  %v3135_v16 = vsel %vm14730_vm11, %v3130_v56, %v15564_v0  ;;  %v3164_v0 = vrot.slane %v3163_v48, 4  ;;  %v3200_v56 = vrot.slane %v3198_v19, 5  ;;  %v3188_v36 = vrot.slane %v3187_v22, 4 }
 0x192   : > { %13184 = vmatprep.subr.bf16.mxu0 %v15589_v50  ;;  %v11637_v31 = vcombine.low %v3135_v16, %v3145_v24  ;;  %v3183_v35 = vsel %vm14730_vm11, %v3178_v30, %v3182_v42  ;;  %v3606_v16 = vrot.slane %v15314_v59, 5  ;;  %v3540_v24 = vld [vmem:[#allocation2 + $0xc] sm:$0xe]  ;;  %v3212_v14 = vrot.slane %v3211_v52, 4  ;;  %v3543_v52 = vld [vmem:[#allocation2 + $0x30] sm:$0xe] }
 0x193   : > { %v3169_v23 = vsel %vm14730_vm11, %v3164_v0, %v3168_v47  ;;  %v3201_v21 = vor.u32 %v3200_v56, %v3197_v54  ;;  %v11649_v33 = vrot.slane %v3540_v24, 9  ;;  %v3609_v22 = vrot.slane %v15324_v27, 5  ;;  %v3542_v47 = vld [vmem:[#allocation2 + $0x24] sm:$0xe] }
 0x194   : > { %13121 = vmatmul.mubr.bf16.gmra.mrb[16].mxu0 %v11634_v53  ;;  %v3190_v53 = vshll.u32 %v15602_v1, 16  ;;  %v11638_v37 = vcombine.low %v3159_v10, %v3169_v23  ;;  %v3608_v29 = vrot.slane %v3606_v16, 4  ;;  %v3620_v0 = vrot.slane %v15345_v46, 5 }
 0x195   : > { %13124 = vmatprep.mubr.bf16.mxu0 %v11635_v8  ;;  %v15612_v8 = vld [vmem:[#allocation2 + $0xc8] sm:$0x1]  ;;  %v3202_v49 = vrot.slane %v3201_v21, 4  ;;  %v11650_v63 = vrot.slane %v3541_v18, 9  ;;  %v3627_v46 = vrot.slane %v15367_v3, 5  ;;  %v3651_v18 = vrot.slane %v15443_v11, 5 }
 0x196   : > { %v3192_v62 = vrot.slane %v3190_v53, 5  ;;  %v3214_v26 = vshll.u32 %v15612_v8, 16  ;;  %v342_v53 = vsel %vm14670_vm3, 0, %v341_v9  ;;  %v3610_v27 = vsel %vm15184_vm14, %v3608_v29, %v3609_v22  ;;  %v14362_v3 = vld [vmem:[%s18049_s1 + $0x188] sm:$0xff]   ;;  %v3546_v22 = vld [vmem:[#allocation2 + $0x54] sm:$0xe] }
 0x197   : > { %343 = vst [vmem:[#allocation2 + $0xcc] sm:$0x1] %v342_v53  ;;  %v3207_v42 = vsel %vm14730_vm11, %v3202_v49, %v3206_v60  ;;  %v3616_v60 = vrot.slane %v15334_v20, 5  ;;  %v3629_v24 = vrot.slane %v3627_v46, 4  ;;  %v3648_v29 = vrot.slane %v15402_v45, 5 }
 0x198   : > { %v3193_v43 = vsel %vm14730_vm11, %v3188_v36, %v3192_v62  ;;  %v3216_v19 = vrot.slane %v3214_v26, 5  ;;  %v11651_v36 = vrot.slane %v3542_v47, 9  ;;  %v3622_v62 = vrot.slane %v3620_v0, 4 }
 0x199   : > { %v11639_v48 = vcombine.low %v3183_v35, %v3193_v43  ;;  %v3634_v26 = vrot.slane %v15383_v5, 5 }
 0x19a   : > { %v3217_v59 = vsel %vm14730_vm11, %v3212_v14, %v3216_v19  ;;  %v3621_v21 = vsel %vm15184_vm14, %v11651_v36, %v3620_v0  ;;  %v3637_v14 = vrot.slane %v15410_v55, 5  ;;  %v3545_v55 = vld [vmem:[#allocation2 + $0x48] sm:$0xe]  ;;  %v14364_v0 = vld [vmem:[%s18049_s1 + $0x198] sm:$0xff]  }
 0x19b   : > { %v11640_v54 = vcombine.low %v3207_v42, %v3217_v59  ;;  %v3636_v49 = vrot.slane %v3634_v26, 4  ;;  %v11654_v59 = vrot.slane %v3545_v55, 9  ;;  %v3690_v55 = vrot.slane %v15534_v39, 5 }
 0x19c   : > { %13125 = vmatmul.mubr.bf16.gmra.mrb[20].mxu0 %v11636_v34  ;;  %v3613_v34 = vrot.slane %v15326_v44, 5  ;;  %v3623_v44 = vrot.slane %v15360_v40, 5  ;;  %v3544_v40 = vld [vmem:[#allocation2 + $0x3c] sm:$0xe] }
 0x19d   : > { %13128 = vmatprep.mubr.bf16.mxu0 %v11637_v31  ;;  %v3607_v31 = vsel %vm15184_vm14, %v11649_v33, %v3606_v16  ;;  %v11652_v16 = vrot.slane %v3543_v52, 9  ;;  %v3638_v33 = vsel %vm15184_vm14, %v3636_v49, %v3637_v14 }
 0x19e   : > { %v11681_v56 = vcombine.low %v3607_v31, %v3610_v27  ;;  %v3615_v30 = vrot.slane %v3613_v34, 4  ;;  %v3614_v10 = vsel %vm15184_vm14, %v11650_v63, %v3613_v34  ;;  %v3624_v20 = vsel %vm15184_vm14, %v3622_v62, %v3623_v44 }
 0x19f   : > { %v11683_v43 = vcombine.low %v3621_v21, %v3624_v20  ;;  %v3628_v5 = vsel %vm15184_vm14, %v11652_v16, %v3627_v46  ;;  %v3644_v34 = vrot.slane %v15432_v51, 5  ;;  %v11655_v31 = vrot.slane %v3546_v22, 9  ;;  %v3550_v16 = vld [vmem:[#allocation2 + $0x84] sm:$0xe] }
 0x1a0   : > { %v3617_v23 = vsel %vm15184_vm14, %v3615_v30, %v3616_v60  ;;  %v3650_v27 = vrot.slane %v3648_v29, 4  ;;  %v3655_v51 = vrot.slane %v15438_v32, 5  ;;  %v3662_v63 = vrot.slane %v15450_v57, 5  ;;  %v14365_v30 = vld [vmem:[%s18049_s1 + $0x1a0] sm:$0xff]   ;;  %v3548_v60 = vld [vmem:[#allocation2 + $0x6c] sm:$0xe] }
 0x1a1   : > { %v11682_v35 = vcombine.low %v3614_v10, %v3617_v23  ;;  %v3658_v32 = vrot.slane %v15468_v13, 5  ;;  %v11657_v23 = vrot.slane %v3548_v60, 9  ;;  %v3665_v21 = vrot.slane %v15480_v4, 5  ;;  %v14366_v57 = vld [vmem:[%s18049_s1 + $0x1a8] sm:$0xff]  }
 0x1a2   : > { %v3652_v11 = vsel %vm15184_vm14, %v3650_v27, %v3651_v18  ;;  %v3657_v10 = vrot.slane %v3655_v51, 4  ;;  %v3664_v46 = vrot.slane %v3662_v63, 4  ;;  %v3669_v13 = vrot.slane %v15466_v7, 5  ;;  %v18155_v27 = vld [vmem:[#allocation8_spill] sm:$0xff] }
 0x1a3   : > { %v11659_v49 = vrot.slane %v3550_v16, 9  ;;  %v3693_v18 = vrot.slane %v18155_v27, 5  ;;  %v4428_v27 = vld [vmem:[#allocation2 + $0x24] sm:$0xf] }
 0x1a4   : > { %13129 = vmatmul.mubr.bf16.gmra.mrb[24].mxu0 %v11638_v37  ;;  %v3630_v37 = vrot.slane %v15377_v2, 5  ;;  %v3641_v2 = vrot.slane %v15400_v41, 5  ;;  %v3659_v52 = vsel %vm15184_vm14, %v3657_v10, %v3658_v32  ;;  %v3666_v4 = vsel %vm15184_vm14, %v3664_v46, %v3665_v21 }
 0x1a5   : > { %13132 = vmatprep.mubr.bf16.mxu0 %v11639_v48  ;;  %v11653_v48 = vrot.slane %v3544_v40, 9  ;;  %v3549_v40 = vld [vmem:[#allocation2 + $0x78] sm:$0xe]  ;;  %v3671_v7 = vrot.slane %v3669_v13, 4  ;;  %v3700_v10 = vrot.slane %v15591_v61, 5  ;;  %v3707_v46 = vrot.slane %v15602_v1, 5 }
 0x1a6   : > { %v3631_v19 = vsel %vm15184_vm14, %v3629_v24, %v3630_v37  ;;  %v3643_v41 = vrot.slane %v3641_v2, 4  ;;  %v3642_v45 = vsel %vm15184_vm14, %v11654_v59, %v3641_v2  ;;  %v18154_v59 = vld [vmem:[#allocation7_spill] sm:$0xff] }
 0x1a7   : > { %v3635_v9 = vsel %vm15184_vm14, %v11653_v48, %v3634_v26  ;;  %v11684_v53 = vcombine.low %v3628_v5, %v3631_v19  ;;  %v3663_v26 = vsel %vm15184_vm14, %v11657_v23, %v3662_v63  ;;  %v3672_v48 = vrot.slane %v15510_v38, 5 }
 0x1a8   : > { %v11685_v42 = vcombine.low %v3635_v9, %v3638_v33  ;;  %v3645_v47 = vsel %vm15184_vm14, %v3643_v41, %v3644_v34  ;;  %v11689_v37 = vcombine.low %v3663_v26, %v3666_v4  ;;  %v3679_v5 = vrot.slane %v15528_v28, 5  ;;  %v3551_v33 = vld [vmem:[#allocation2 + $0x90] sm:$0xe] }
 0x1a9   : > { %v11686_v36 = vcombine.low %v3642_v45, %v3645_v47  ;;  %v3673_v2 = vsel %vm15184_vm14, %v3671_v7, %v3672_v48  ;;  %v3683_v38 = vrot.slane %v15530_v15, 5  ;;  %v3686_v41 = vrot.slane %v18154_v59, 5  ;;  %v18156_v45 = vld [vmem:[#allocation9_spill] sm:$0xff]  ;;  %v14369_v7 = vld [vmem:[#allocation2 + $0x18] sm:$0xff]  }
 0x1aa   : > { %v3697_v47 = vrot.slane %v18156_v45, 5  ;;  %v14370_v48 = vld [vmem:[#allocation2 + $0x24] sm:$0xff]   ;;  %v4498_v45 = vshrl.u32 %v4428_v27, 16 }
 0x1ab   : > { %v3685_v15 = vrot.slane %v3683_v38, 4 }
 0x1ac   : > { %13133 = vmatmul.mubr.bf16.gmra.mrb[28].mxu0 %v11640_v54  ;;  %v3649_v54 = vsel %vm15184_vm14, %v11655_v31, %v3648_v29  ;;  %v3552_v29 = vld [vmem:[#allocation2 + $0x9c] sm:$0xe]  ;;  %v3692_v31 = vrot.slane %v3690_v55, 4 }
 0x1ad   : > { %13152 = vmatprep.mubr.bf16.mxu0 %v11681_v56  ;;  %v3547_v56 = vld [vmem:[#allocation2 + $0x60] sm:$0xe]  ;;  %v11687_v62 = vcombine.low %v3649_v54, %v3652_v11  ;;  %v11661_v34 = vrot.slane %v3552_v29, 9  ;;  %v3553_v11 = vld [vmem:[#allocation2 + $0xa8] sm:$0xe]  ;;  %v14392_v29 = vld [vmem:[%s18049_s1 + $0x1f8] sm:$0xff]  }
 0x1ae   : > { %v11656_v44 = vrot.slane %v3547_v56, 9  ;;  %v3694_v54 = vsel %vm15184_vm14, %v3692_v31, %v3693_v18  ;;  %v18157_v56 = vld [vmem:[#allocation10_spill] sm:$0xff] }
 0x1af   : > { %v3704_v63 = vrot.slane %v18157_v56, 5  ;;  %v14384_v18 = vld [vmem:[#allocation2 + $0x90] sm:$0xff]  }
 0x1b0   : > { %v3656_v20 = vsel %vm15184_vm14, %v11656_v44, %v3655_v51  ;;  %v3691_v51 = vsel %vm15184_vm14, %v11661_v34, %v3690_v55  ;;  %v3699_v44 = vrot.slane %v3697_v47, 4  ;;  %v14379_v55 = vld [vmem:[#allocation2 + $0x6c] sm:$0xff]  }
 0x1b1   : > { %v11688_v24 = vcombine.low %v3656_v20, %v3659_v52  ;;  %v3706_v23 = vrot.slane %v3704_v63, 4  ;;  %v3711_v20 = vrot.slane %v15593_v12, 5 }
 0x1b3   : > { %v3708_v61 = vsel %vm15184_vm14, %v3706_v23, %v3707_v46 }
 0x1b4   : > { %13153 = vmatmul.mubr.bf16.vlgmr.msra.gmra.mrb[0].mxu0 %v11682_v35  ;;  %v3676_v35 = vrot.slane %v15501_v17, 5  ;;  %v14368_v17 = vld [vmem:[%s18049_s1 + $0x1b8] sm:$0xff]  }
 0x1b5   : > { %13185 = vmatpush3.bf16.msra.mxu0 %v15589_v50  ;;  %13156 = vmatprep.mubr.bf16.mxu0 %v11683_v43  ;;  %v14363_v50 = vld [vmem:[%s18049_s1 + $0x190] sm:$0xff]  }
 0x1b6   : > { %13186 = vmatprep.subr.bf16.mxu0 %v14362_v3  ;;  %v14367_v43 = vld [vmem:[%s18049_s1 + $0x1b0] sm:$0xff]   ;;  %v3678_v14 = vrot.slane %v3676_v35, 4  ;;  %v3677_v9 = vsel %vm15184_vm14, %v11659_v49, %v3676_v35  ;;  %v3714_v35 = vrot.slane %v15612_v8, 5  ;;  %v14374_v8 = vld [vmem:[%s18049_s1 + $0x1c8] sm:$0xff]  }
 0x1b7   : > { %v14372_v49 = vld [vmem:[#allocation2 + $0x30] sm:$0xff]  }
 0x1b8   : > { %v3680_v28 = vsel %vm15184_vm14, %v3678_v14, %v3679_v5  ;;  %v14377_v14 = vld [vmem:[%s18049_s1 + $0x1d0] sm:$0xff]   ;;  %v14373_v5 = vld [vmem:[#allocation2 + $0x3c] sm:$0xff]  }
 0x1b9   : > { %13187 = vmatpush3.bf16.msra.mxu0 %v14362_v3  ;;  %v11658_v3 = vrot.slane %v3549_v40, 9  ;;  %v3713_v40 = vrot.slane %v3711_v20, 4 }
 0x1ba   : > { %13188 = vmatprep.subr.bf16.mxu0 %v14363_v50 }
 0x1bb   : > { %v3670_v19 = vsel %vm15184_vm14, %v11658_v3, %v3669_v13  ;;  %v3555_v13 = vld [vmem:[#allocation2 + $0xc0] sm:$0xe]  ;;  %v3715_v12 = vsel %vm15184_vm14, %v3713_v40, %v3714_v35  ;;  %v15799_v40 = vld [vmem:[#allocation2 + $0x2c] sm:$0x1] }
 0x1bc   : > { %13157 = vmatmul.mubr.bf16.gmra.mrb[4].mxu0 %v11684_v53  ;;  %v11690_v22 = vcombine.low %v3670_v19, %v3673_v2  ;;  %v11691_v53 = vcombine.low %v3677_v9, %v3680_v28  ;;  %v11664_v1 = vrot.slane %v3555_v13, 9  ;;  %v14380_v19 = vld [vmem:[%s18049_s1 + $0x1d8] sm:$0xff]   ;;  %v14383_v2 = vld [vmem:[%s18049_s1 + $0x1e0] sm:$0xff]   ;;  %v14386_v28 = vld [vmem:[%s18049_s1 + $0x1e8] sm:$0xff]  }
 0x1bd   : > { %13160 = vmatprep.mubr.bf16.mxu0 %v11685_v42  ;;  %13189 = vmatpush3.bf16.msra.mxu0 %v14363_v50  ;;  %v14371_v50 = vld [vmem:[%s18049_s1 + $0x1c0] sm:$0xff]   ;;  %v11660_v42 = vrot.slane %v3551_v33, 9  ;;  %v14389_v33 = vld [vmem:[%s18049_s1 + $0x1f0] sm:$0xff]  }
 0x1be   : > { %13190 = vmatprep.subr.bf16.mxu0 %v14364_v0  ;;  %v3712_v16 = vsel %vm15184_vm14, %v11664_v1, %v3711_v20  ;;  %v14378_v9 = vld [vmem:[#allocation2 + $0x60] sm:$0xff]  }
 0x1bf   : > { %v3684_v39 = vsel %vm15184_vm14, %v11660_v42, %v3683_v38  ;;  %v11696_v3 = vcombine.low %v3712_v16, %v3715_v12  ;;  %v14376_v38 = vld [vmem:[#allocation2 + $0x54] sm:$0xff]   ;;  %v15778_v42 = vld [vmem:[%s18049_s1 + $0x200] sm:$0xff]  }
 0x1c0   : > { %v14385_v20 = vld [vmem:[#allocation2 + $0x9c] sm:$0xff]  }
 0x1c1   : > { %13191 = vmatpush3.bf16.msra.mxu0 %v14364_v0  ;;  %v3687_v0 = vsel %vm15184_vm14, %v3685_v15, %v3686_v41  ;;  %v14382_v15 = vld [vmem:[#allocation2 + $0x84] sm:$0xff]   ;;  %v15797_v1 = vld [vmem:[#allocation2 + $0x40] sm:$0xf] }
 0x1c2   : > { %13192 = vmatprep.subr.bf16.mxu0 %v14365_v30  ;;  %v11692_v60 = vcombine.low %v3684_v39, %v3687_v0  ;;  %v15782_v39 = vld [vmem:[#allocation2 + $0x28] sm:$0xf]  ;;  %v4431_v0 = vld [vmem:[#allocation2 + $0x30] sm:$0xf] }
 0x1c4   : > { %13161 = vmatmul.mubr.bf16.gmra.mrb[8].mxu0 %v11686_v36  ;;  %v11693_v36 = vcombine.low %v3691_v51, %v3694_v54  ;;  %v15785_v51 = vld [vmem:[#allocation2 + $0x34] sm:$0xf]  ;;  %v4434_v54 = vld [vmem:[#allocation2 + $0x3c] sm:$0xf] }
 0x1c5   : > { %13164 = vmatprep.mubr.bf16.mxu0 %v11687_v62  ;;  %13193 = vmatpush3.bf16.msra.mxu0 %v14365_v30  ;;  %v3554_v30 = vld [vmem:[#allocation2 + $0xb4] sm:$0xe]  ;;  %v11662_v62 = vrot.slane %v3553_v11, 9  ;;  %v4535_v23 = vshrl.u32 %v15785_v51, 16  ;;  %v4546_v46 = vshrl.u32 %v4434_v54, 16 }
 0x1c6   : > { %13194 = vmatprep.subr.bf16.mxu0 %v14366_v57  ;;  %v11663_v32 = vrot.slane %v3554_v30, 9 }
 0x1c7   : > { %v3698_v21 = vsel %vm15184_vm14, %v11662_v62, %v3697_v47  ;;  %v4501_v47 = vshll.u32 %v4428_v27, 16  ;;  %v4511_v62 = vshrl.u32 %v15782_v39, 16  ;;  %v14388_v27 = vld [vmem:[#allocation2 + $0xb4] sm:$0xff]  }
 0x1c8   : > { %v3705_v52 = vsel %vm15184_vm14, %v11663_v32, %v3704_v63  ;;  %v4531_v32 = vshll.u32 %v15785_v51, 16 }
 0x1c9   : > { %13195 = vmatpush3.bf16.msra.mxu0 %v14366_v57  ;;  %v3701_v57 = vsel %vm15184_vm14, %v3699_v44, %v3700_v10  ;;  %v11695_v4 = vcombine.low %v3705_v52, %v3708_v61  ;;  %v4522_v44 = vshrl.u32 %v4431_v0, 16  ;;  %v4525_v10 = vshll.u32 %v4431_v0, 16  ;;  %v14387_v52 = vld [vmem:[#allocation2 + $0xa8] sm:$0xff]  }
 0x1ca   : > { %13196 = vmatprep.subr.bf16.mxu0 %v14367_v43  ;;  %v11694_v26 = vcombine.low %v3698_v21, %v3701_v57  ;;  %v4549_v21 = vshll.u32 %v4434_v54, 16  ;;  %v4500_v57 = vrot.slane %v4498_v45, 4 }
 0x1cb   : > { %v4524_v16 = vrot.slane %v4522_v44, 4  ;;  %v4527_v12 = vrot.slane %v4525_v10, 5 }
 0x1cc   : > { %13165 = vmatmul.mubr.bf16.gmra.mrb[12].mxu0 %v11688_v24  ;;  %v15803_v24 = vld [vmem:[#allocation2 + $0x38] sm:$0x1] }
 0x1cd   : > { %13168 = vmatprep.mubr.bf16.mxu0 %v11689_v37  ;;  %13197 = vmatpush3.bf16.msra.mxu0 %v14367_v43  ;;  %v397_v43 = vld [vmem:[#allocation2 + $0xd4] sm:$0x1] }
 0x1ce   : > { %13198 = vmatprep.subr.bf16.mxu0 %v14368_v17  ;;  %v398_v37 = vsel %vm14684_vm4, 0, %v397_v43  ;;  %v4513_v43 = vrot.slane %v4511_v62, 4 }
 0x1cf   : > { %399 = vst [vmem:[#allocation2 + $0xd4] sm:$0x1] %v398_v37  ;;  %v15805_v37 = vrot.slane %v4531_v32, 5 }
 0x1d1   : > { %13199 = vmatpush3.bf16.msra.mxu0 %v14368_v17  ;;  %v14375_v17 = vld [vmem:[#allocation2 + $0x48] sm:$0xff]  }
 0x1d2   : > { %13232 = vmatprep.subr.bf16.mxu0 %v14371_v50 }
 0x1d4   : > { %13169 = vmatmul.mubr.bf16.gmra.mrb[16].mxu0 %v11690_v22  ;;  %v4425_v22 = vld [vmem:[#allocation2 + $0x18] sm:$0xf] }
 0x1d5   : > { %13172 = vmatprep.mubr.bf16.mxu0 %v11691_v53  ;;  %v15773_v53 = vld [vmem:[#allocation2 + $0x1c] sm:$0xf]  ;;  %v4474_v59 = vshrl.u32 %v4425_v22, 16  ;;  %v4477_v41 = vshll.u32 %v4425_v22, 16 }
 0x1d6   : > { %v4483_v34 = vshll.u32 %v15773_v53, 16  ;;  %v4487_v31 = vshrl.u32 %v15773_v53, 16 }
 0x1d7   : > { %v4476_v11 = vrot.slane %v4474_v59, 4  ;;  %v4479_v56 = vrot.slane %v4477_v41, 5  ;;  %v15818_v41 = vld [vmem:[#allocation2 + $0x4c] sm:$0xf] }
 0x1d8   : > { %v15787_v63 = vrot.slane %v4483_v34, 5  ;;  %v4489_v30 = vrot.slane %v4487_v31, 4 }
 0x1d9   : > { %v4480_v61 = vor.u32 %v4479_v56, %v4476_v11 }
 0x1da   : > { %v4490_v13 = vor.u32 %v4489_v30, %v15787_v63 }
 0x1dc   : > { %13173 = vmatmul.mubr.bf16.gmra.mrb[20].mxu0 %v11692_v60  ;;  %v15789_v60 = vld [vmem:[#allocation2 + $0x20] sm:$0x1] }
 0x1dd   : > { %13176 = vmatprep.mubr.bf16.mxu0 %v11693_v36  ;;  %v4507_v36 = vshll.u32 %v15782_v39, 16 }
 0x1df   : > { %v15801_v35 = vrot.slane %v4507_v36, 5 }
 0x1e4   : > { %13177 = vmatmul.mubr.bf16.gmra.mrb[24].mxu0 %v11694_v26  ;;  %v4493_v26 = vshll.u32 %v15789_v60, 16 }
 0x1e5   : > { %13180 = vmatprep.mubr.bf16.mxu0 %v11695_v4  ;;  %v4503_v4 = vrot.slane %v4501_v47, 5  ;;  %v14390_v47 = vld [vmem:[#allocation2 + $0xc0] sm:$0xff]  }
 0x1ec   : > { %13181 = vmatmul.mubr.bf16.gmra.mrb[28].mxu0 %v11696_v3  ;;  %v4537_v3 = vrot.slane %v4535_v23, 4 }
 0x1ed   : > { %13200 = vmatprep.mubr.bf16.mxu0 %v14369_v7  ;;  %v4548_v7 = vrot.slane %v4546_v46, 4  ;;  %v4583_v46 = vshrl.u32 %v15818_v41, 16 }
 0x1f4   : > { %13201 = vmatmul.mubr.bf16.vlgmr.msra.gmra.mrb[0].mxu0 %v14370_v48  ;;  %v4551_v48 = vrot.slane %v4549_v21, 5  ;;  %v4440_v21 = vld [vmem:[#allocation2 + $0x54] sm:$0xf] }
 0x1f5   : > { %13233 = vmatpush3.bf16.msra.mxu0 %v14371_v50  ;;  %13204 = vmatprep.mubr.bf16.mxu0 %v14372_v49  ;;  %v14381_v50 = vld [vmem:[#allocation2 + $0x78] sm:$0xff]   ;;  %v15807_v49 = vld [vmem:[#allocation2 + $0x44] sm:$0x1] }
 0x1f6   : > { %13234 = vmatprep.subr.bf16.mxu0 %v14374_v8  ;;  %v4565_v22 = vshll.u32 %v15807_v49, 16 }
 0x1f8   : > { %v15839_v44 = vrot.slane %v4565_v22, 5 }
 0x1f9   : > { %13235 = vmatpush3.bf16.msra.mxu0 %v14374_v8  ;;  %v4555_v8 = vshll.u32 %v15797_v1, 16 }
 0x1fa   : > { %13236 = vmatprep.subr.bf16.mxu0 %v14377_v14 }
 0x1fc   : > { %13205 = vmatmul.mubr.bf16.gmra.mrb[4].mxu0 %v14373_v5  ;;  %v4481_v5 = vrot.slane %v4480_v61, 4  ;;  %v15852_v61 = vld [vmem:[#allocation2 + $0xd4] sm:$0x1] }
 0x1fd   : > { %13208 = vmatprep.mubr.bf16.mxu0 %v14375_v17  ;;  %13237 = vmatpush3.bf16.msra.mxu0 %v14377_v14  ;;  %v4559_v14 = vshrl.u32 %v15797_v1, 16  ;;  %v4495_v17 = vrot.slane %v4493_v26, 5 }
 0x1fe   : > { %13238 = vmatprep.subr.bf16.mxu0 %v14380_v19 }
 0x1ff   : > { %v4561_v59 = vrot.slane %v4559_v14, 4 }
 0x201   : > { %13239 = vmatpush3.bf16.msra.mxu0 %v14380_v19  ;;  %v4504_v19 = vor.u32 %v4503_v4, %v4500_v57  ;;  %v4443_v4 = vld [vmem:[#allocation2 + $0x60] sm:$0xf] }
 0x202   : > { %13240 = vmatprep.subr.bf16.mxu0 %v14383_v2 }
 0x203   : > { %v15823_v0 = vrot.slane %v4504_v19, 4 }
 0x204   : > { %13209 = vmatmul.mubr.bf16.gmra.mrb[8].mxu0 %v14376_v38  ;;  %v4437_v38 = vld [vmem:[#allocation2 + $0x48] sm:$0xf] }
 0x205   : > { %13212 = vmatprep.mubr.bf16.mxu0 %v14378_v9  ;;  %13241 = vmatpush3.bf16.msra.mxu0 %v14383_v2  ;;  %v4517_v2 = vshll.u32 %v15799_v40, 16  ;;  %v4491_v9 = vrot.slane %v4490_v13, 4  ;;  %v4570_v34 = vshrl.u32 %v4437_v38, 16  ;;  %v4573_v31 = vshll.u32 %v4437_v38, 16  ;;  %v15864_v38 = vld [vmem:[#allocation2 + $0x50] sm:$0x1] }
 0x206   : > { %13242 = vmatprep.subr.bf16.mxu0 %v14386_v28  ;;  %v4510_v57 = vsel %vm14730_vm11, %v15823_v0, %v15801_v35 }
 0x207   : > { %v15825_v45 = vrot.slane %v4517_v2, 5  ;;  %v4496_v54 = vsel %vm14730_vm11, %v4491_v9, %v4495_v17  ;;  %v4572_v32 = vrot.slane %v4570_v34, 4  ;;  %v4575_v23 = vrot.slane %v4573_v31, 5  ;;  %v14391_v2 = vld [vmem:[#allocation2 + $0xcc] sm:$0xff]  }
 0x208   : > { %v4585_v17 = vrot.slane %v4583_v46, 4 }
 0x209   : > { %13243 = vmatpush3.bf16.msra.mxu0 %v14386_v28  ;;  %v4514_v28 = vor.u32 %v4513_v43, %v15801_v35  ;;  %v5194_v43 = vld [vmem:[#allocation2 + $0xcc] sm:$0xe] }
 0x20a   : > { %13244 = vmatprep.subr.bf16.mxu0 %v14389_v33 }
 0x20b   : > { %v15829_v11 = vrot.slane %v4514_v28, 4 }
 0x20c   : > { %13213 = vmatmul.mubr.bf16.gmra.mrb[12].mxu0 %v14379_v55  ;;  %v4541_v55 = vshll.u32 %v15803_v24, 16 }
 0x20d   : > { %13216 = vmatprep.mubr.bf16.mxu0 %v14381_v50  ;;  %13245 = vmatpush3.bf16.msra.mxu0 %v14389_v33  ;;  %v4528_v33 = vor.u32 %v4527_v12, %v4524_v16  ;;  %v4538_v50 = vor.u32 %v4537_v3, %v15805_v37  ;;  %v4520_v26 = vsel %vm14730_vm11, %v15829_v11, %v15825_v45  ;;  %v5353_v12 = vrot.slane %v15852_v61, 5  ;;  %v4446_v11 = vld [vmem:[#allocation2 + $0x6c] sm:$0xf] }
 0x20e   : > { %13246 = vmatprep.subr.bf16.mxu0 %v14392_v29  ;;  %v15833_v30 = vrot.slane %v4541_v55, 5  ;;  %v4594_v3 = vshrl.u32 %v4440_v21, 16 }
 0x20f   : > { %v15831_v56 = vrot.slane %v4528_v33, 4  ;;  %v15835_v36 = vrot.slane %v4538_v50, 4  ;;  %v4618_v33 = vshrl.u32 %v4443_v4, 16  ;;  %v4621_v50 = vshll.u32 %v4443_v4, 16  ;;  %v15906_v4 = vld [vmem:[#allocation2 + $0x68] sm:$0x1] }
 0x210   : > { %v4596_v31 = vrot.slane %v4594_v3, 4 }
 0x211   : > { %13247 = vmatpush3.bf16.msra.mxu0 %v14392_v29  ;;  %v4552_v29 = vor.u32 %v4551_v48, %v4548_v7  ;;  %v4597_v7 = vshll.u32 %v4440_v21, 16  ;;  %v15862_v48 = vld [vmem:[#allocation2 + $0x64] sm:$0xf]  ;;  %v4534_v34 = vsel %vm14730_vm11, %v15831_v56, %v15805_v37  ;;  %v4544_v0 = vsel %vm14730_vm11, %v15835_v36, %v15833_v30  ;;  %v15894_v37 = vld [vmem:[#allocation2 + $0x5c] sm:$0x1] }
 0x212   : > { %13280 = vmatprep.subr.bf16.mxu0 %v15778_v42  ;;  %v4631_v22 = vshrl.u32 %v15862_v48, 16  ;;  %v15901_v36 = vld [vmem:[#allocation2 + $0x70] sm:$0xf]  ;;  %v4613_v21 = vshll.u32 %v15894_v37, 16 }
 0x213   : > { %v15837_v62 = vrot.slane %v4552_v29, 4  ;;  %v4627_v29 = vshll.u32 %v15862_v48, 16  ;;  %v4651_v3 = vshll.u32 %v15901_v36, 16 }
 0x214   : > { %13217 = vmatmul.mubr.bf16.gmra.mrb[16].mxu0 %v14382_v15  ;;  %v15816_v15 = vrot.slane %v4555_v8, 5  ;;  %v11800_v8 = vrot.slane %v5194_v43, 9  ;;  %v4642_v43 = vshrl.u32 %v4446_v11, 16 }
 0x215   : > { %13220 = vmatprep.mubr.bf16.mxu0 %v14384_v18  ;;  %v4486_v18 = vsel %vm14730_vm11, %v4481_v5, %v15787_v63  ;;  %v4579_v63 = vshll.u32 %v15818_v41, 16  ;;  %v4576_v5 = vor.u32 %v4575_v23, %v4572_v32  ;;  %v15903_v32 = vrot.slane %v4627_v29, 5 }
 0x216   : > { %v4562_v10 = vor.u32 %v4561_v59, %v15816_v15  ;;  %v11761_v13 = vcombine.low %v4486_v18, %v4496_v54  ;;  %v4558_v45 = vsel %vm14730_vm11, %v15837_v62, %v15816_v15  ;;  %v4589_v54 = vshll.u32 %v15864_v38, 16 }
 0x217   : > { %v15860_v35 = vrot.slane %v4579_v63, 5  ;;  %v4577_v63 = vrot.slane %v4576_v5, 4  ;;  %v4620_v15 = vrot.slane %v4618_v33, 4  ;;  %v4623_v62 = vrot.slane %v4621_v50, 5  ;;  %v14394_v33 = vld [vmem:[%s18049_s1 + $0x208] sm:$0xff]  }
 0x218   : > { %v4563_v14 = vrot.slane %v4562_v10, 4  ;;  %v4633_v23 = vrot.slane %v4631_v22, 4  ;;  %v15920_v29 = vrot.slane %v4613_v21, 5 }
 0x219   : > { %v4582_v22 = vsel %vm14730_vm11, %v4577_v63, %v15860_v35 }
 0x21a   : > { %v4568_v56 = vsel %vm14730_vm11, %v4563_v14, %v15839_v44 }
 0x21b   : > { %v11764_v14 = vcombine.low %v4558_v45, %v4568_v56  ;;  %v15929_v45 = vld [vmem:[#allocation2 + $0x88] sm:$0xf] }
 0x21c   : > { %13221 = vmatmul.mubr.bf16.gmra.mrb[20].mxu0 %v14385_v20  ;;  %v15848_v20 = vld [vmem:[#allocation2 + $0x58] sm:$0xf] }
 0x21d   : > { %13224 = vmatprep.mubr.bf16.mxu0 %v14387_v52  ;;  %v15850_v52 = vld [vmem:[#allocation2 + $0xd0] sm:$0xf]  ;;  %v4603_v9 = vshll.u32 %v15848_v20, 16  ;;  %v4607_v28 = vshrl.u32 %v15848_v20, 16 }
 0x21e   : > { %v5350_v16 = vrot.slane %v15850_v52, 5 }
 0x21f   : > { %v15899_v10 = vrot.slane %v4603_v9, 5  ;;  %v4609_v30 = vrot.slane %v4607_v28, 4  ;;  %v4449_v9 = vld [vmem:[#allocation2 + $0x78] sm:$0xf]  ;;  %v15913_v28 = vld [vmem:[#allocation2 + $0x7c] sm:$0xf] }
 0x220   : > { %v5352_v19 = vrot.slane %v5350_v16, 4  ;;  %v15870_v55 = vsel %vm15184_vm14, %v11800_v8, %v5350_v16  ;;  %v4645_v16 = vshll.u32 %v4446_v11, 16  ;;  %v11762_v8 = vcombine.low %v4510_v57, %v4520_v26 }
 0x221   : > { %18159 = vst [vmem:[#allocation7_spill] sm:$0xff] %v15870_v55  ;;  %v4610_v5 = vor.u32 %v4609_v30, %v15899_v10  ;;  %v4644_v57 = vrot.slane %v4642_v43, 4  ;;  %v4669_v11 = vshll.u32 %v4449_v9, 16  ;;  %v4675_v56 = vshll.u32 %v15913_v28, 16  ;;  %v16030_v55 = vld [vmem:[#allocation2 + $0xb8] sm:$0xf] }
 0x222   : > { %v15876_v59 = vsel %vm15184_vm14, %v5352_v19, %v5353_v12  ;;  %v4591_v12 = vrot.slane %v4589_v54, 5  ;;  %v4634_v19 = vor.u32 %v4633_v23, %v15903_v32  ;;  %v4647_v26 = vrot.slane %v4645_v16, 5  ;;  %v14395_v23 = vld [vmem:[%s18049_s1 + $0x210] sm:$0xff]   ;;  %18163 = vst [vmem:[#allocation4_spill] sm:$0xff] %v16030_v55 }
 0x223   : > { %18160 = vst [vmem:[#allocation8_spill] sm:$0xff] %v15876_v59  ;;  %v4666_v54 = vshrl.u32 %v4449_v9, 16  ;;  %v4679_v30 = vshrl.u32 %v15913_v28, 16  ;;  %v4699_v43 = vshll.u32 %v15929_v45, 16  ;;  %v4703_v16 = vshrl.u32 %v15929_v45, 16 }
 0x224   : > { %13225 = vmatmul.mubr.bf16.gmra.mrb[24].mxu0 %v14388_v27  ;;  %v4599_v27 = vrot.slane %v4597_v7, 5  ;;  %v4655_v7 = vshrl.u32 %v15901_v36, 16 }
 0x225   : > { %13228 = vmatprep.mubr.bf16.mxu0 %v14390_v47  ;;  %v4586_v47 = vor.u32 %v4585_v17, %v15860_v35  ;;  %v4624_v17 = vor.u32 %v4623_v62, %v4620_v15  ;;  %v4611_v35 = vrot.slane %v4610_v5, 4  ;;  %v4635_v15 = vrot.slane %v4634_v19, 4 }
 0x226   : > { %v4600_v46 = vor.u32 %v4599_v27, %v4596_v31  ;;  %v15927_v31 = vrot.slane %v4651_v3, 5  ;;  %v4657_v27 = vrot.slane %v4655_v7, 4  ;;  %v15943_v7 = vld [vmem:[#allocation2 + $0x80] sm:$0x1]  ;;  %v15945_v5 = vrot.slane %v4675_v56, 5 }
 0x227   : > { %v4587_v44 = vrot.slane %v4586_v47, 4  ;;  %v15931_v47 = vld [vmem:[#allocation2 + $0x74] sm:$0x1]  ;;  %v4625_v63 = vrot.slane %v4624_v17, 4  ;;  %v4681_v17 = vrot.slane %v4679_v30, 4 }
 0x228   : > { %v15918_v50 = vrot.slane %v4600_v46, 4  ;;  %v4661_v3 = vshll.u32 %v15931_v47, 16 }
 0x229   : > { %v4630_v9 = vsel %vm14730_vm11, %v4625_v63, %v15903_v32  ;;  %v4682_v30 = vor.u32 %v4681_v17, %v15945_v5 }
 0x22a   : > { %v4606_v19 = vsel %vm14730_vm11, %v15918_v50, %v15899_v10  ;;  %v15962_v10 = vrot.slane %v4699_v43, 5  ;;  %v4705_v50 = vrot.slane %v4703_v16, 4  ;;  %v15970_v32 = vrot.slane %v4661_v3, 5 }
 0x22c   : > { %13229 = vmatmul.mubr.bf16.gmra.mrb[28].mxu0 %v14391_v2  ;;  %v4637_v2 = vshll.u32 %v15906_v4, 16  ;;  %v4706_v43 = vor.u32 %v4705_v50, %v15962_v10  ;;  %v15997_v50 = vld [vmem:[#allocation2 + $0xac] sm:$0xf] }
 0x22d   : > { %13248 = vmatprep.mubr.bf16.mxu0 %v11761_v13  ;;  %v11763_v13 = vcombine.low %v4534_v34, %v4544_v0  ;;  %v4592_v34 = vsel %vm14730_vm11, %v4587_v44, %v4591_v12  ;;  %v4452_v0 = vld [vmem:[#allocation2 + $0x84] sm:$0xf]  ;;  %v4648_v12 = vor.u32 %v4647_v26, %v4644_v57  ;;  %v4455_v26 = vld [vmem:[#allocation2 + $0x90] sm:$0xf] }
 0x22e   : > { %v4639_v62 = vrot.slane %v4637_v2, 5  ;;  %v4690_v46 = vshrl.u32 %v4452_v0, 16  ;;  %v4693_v21 = vshll.u32 %v4452_v0, 16  ;;  %v11765_v44 = vcombine.low %v4582_v22, %v4592_v34 }
 0x22f   : > { %v4616_v2 = vsel %vm14730_vm11, %v4611_v35, %v15920_v29  ;;  %v15966_v29 = vrot.slane %v4648_v12, 4  ;;  %v4714_v35 = vshrl.u32 %v4455_v26, 16  ;;  %v4717_v63 = vshll.u32 %v4455_v26, 16  ;;  %v4458_v12 = vld [vmem:[#allocation2 + $0x9c] sm:$0xf] }
 0x230   : > { %v4640_v57 = vsel %vm14730_vm11, %v4635_v15, %v4639_v62  ;;  %v4692_v22 = vrot.slane %v4690_v46, 4  ;;  %v4695_v34 = vrot.slane %v4693_v21, 5  ;;  %v11766_v46 = vcombine.low %v4606_v19, %v4616_v2 }
 0x231   : > { %v4683_v19 = vrot.slane %v4682_v30, 4  ;;  %v4716_v2 = vrot.slane %v4714_v35, 4  ;;  %v4719_v26 = vrot.slane %v4717_v63, 5 }
 0x232   : > { %v4696_v21 = vor.u32 %v4695_v34, %v4692_v22  ;;  %v4741_v34 = vshll.u32 %v4458_v12, 16 }
 0x234   : > { %13249 = vmatmul.mubr.bf16.vlgmr.msra.gmra.mrb[0].mxu0 %v11762_v8  ;;  %v4668_v8 = vrot.slane %v4666_v54, 4  ;;  %v4685_v54 = vshll.u32 %v15943_v7, 16  ;;  %v4743_v6 = vrot.slane %v4741_v34, 5 }
 0x235   : > { %13281 = vmatpush3.bf16.msra.mxu0 %v15778_v42  ;;  %13252 = vmatprep.mubr.bf16.mxu0 %v11763_v13  ;;  %v4658_v42 = vor.u32 %v4657_v27, %v15927_v31  ;;  %v4671_v13 = vrot.slane %v4669_v11, 5  ;;  %v15964_v27 = vld [vmem:[#allocation2 + $0x94] sm:$0xf]  ;;  %v15973_v11 = vld [vmem:[#allocation2 + $0x8c] sm:$0x1] }
 0x236   : > { %13282 = vmatprep.subr.bf16.mxu0 %v14394_v33  ;;  %v4723_v15 = vshll.u32 %v15964_v27, 16  ;;  %v4727_v62 = vshrl.u32 %v15964_v27, 16  ;;  %v4709_v16 = vshll.u32 %v15973_v11, 16  ;;  %v4687_v3 = vrot.slane %v4685_v54, 5 }
 0x237   : > { %v15968_v0 = vrot.slane %v4658_v42, 4  ;;  %v4672_v56 = vor.u32 %v4671_v13, %v4668_v8  ;;  %v11767_v42 = vcombine.low %v4630_v9, %v4640_v57  ;;  %v15991_v8 = vld [vmem:[#allocation2 + $0x98] sm:$0x1]  ;;  %v15993_v13 = vld [vmem:[#allocation2 + $0xa0] sm:$0xf] }
 0x238   : > { %v4461_v9 = vld [vmem:[#allocation2 + $0xa8] sm:$0xf]  ;;  %v15995_v57 = vrot.slane %v4723_v15, 5  ;;  %v4729_v22 = vrot.slane %v4727_v62, 4  ;;  %v4733_v54 = vshll.u32 %v15991_v8, 16  ;;  %v4747_v30 = vshll.u32 %v15993_v13, 16 }
 0x239   : > { %13283 = vmatpush3.bf16.msra.mxu0 %v14394_v33  ;;  %v14396_v33 = vld [vmem:[%s18049_s1 + $0x218] sm:$0xff]   ;;  %v4673_v17 = vrot.slane %v4672_v56, 4  ;;  %v14398_v56 = vld [vmem:[%s18049_s1 + $0x228] sm:$0xff]   ;;  %v4762_v35 = vshrl.u32 %v4461_v9, 16  ;;  %v4765_v63 = vshll.u32 %v4461_v9, 16  ;;  %v4688_v62 = vsel %vm14730_vm11, %v4683_v19, %v4687_v3 }
 0x23a   : > { %13284 = vmatprep.subr.bf16.mxu0 %v14395_v23  ;;  %v16018_v3 = vld [vmem:[#allocation2 + $0xa4] sm:$0x1] }
 0x23b   : > { %v4678_v15 = vsel %vm14730_vm11, %v4673_v17, %v15945_v5  ;;  %v4735_v17 = vrot.slane %v4733_v54, 5  ;;  %18161 = vst [vmem:[#allocation9_spill] sm:$0xff] %v16018_v3  ;;  %v4757_v59 = vshll.u32 %v16018_v3, 16  ;;  %v4470_v3 = vld [vmem:[#allocation2 + $0xcc] sm:$0xf] }
 0x23c   : > { %13253 = vmatmul.mubr.bf16.gmra.mrb[4].mxu0 %v11764_v14  ;;  %v14397_v14 = vld [vmem:[%s18049_s1 + $0x220] sm:$0xff]  }
 0x23d   : > { %13256 = vmatprep.mubr.bf16.mxu0 %v11765_v44  ;;  %13285 = vmatpush3.bf16.msra.mxu0 %v14395_v23  ;;  %v4654_v23 = vsel %vm14730_vm11, %v15966_v29, %v15927_v31  ;;  %v4664_v44 = vsel %vm14730_vm11, %v15968_v0, %v15970_v32  ;;  %v4738_v31 = vshrl.u32 %v4458_v12, 16  ;;  %v4697_v29 = vrot.slane %v4696_v21, 4 }
 0x23e   : > { %13286 = vmatprep.subr.bf16.mxu0 %v14396_v33  ;;  %v4707_v0 = vrot.slane %v4706_v43, 4  ;;  %v4711_v32 = vrot.slane %v4709_v16, 5  ;;  %v4771_v21 = vshll.u32 %v15997_v50, 16  ;;  %v4775_v43 = vshrl.u32 %v15997_v50, 16 }
 0x23f   : > { %v4720_v16 = vor.u32 %v4719_v26, %v4716_v2  ;;  %v4730_v12 = vor.u32 %v4729_v22, %v15995_v57  ;;  %v4740_v18 = vrot.slane %v4738_v31, 4  ;;  %v4764_v2 = vrot.slane %v4762_v35, 4  ;;  %v16025_v31 = vld [vmem:[#allocation2 + $0xb0] sm:$0x1] }
 0x240   : > { %v4712_v5 = vsel %vm14730_vm11, %v4707_v0, %v4711_v32  ;;  %v4767_v26 = vrot.slane %v4765_v63, 5  ;;  %v11768_v9 = vcombine.low %v4654_v23, %v4664_v44  ;;  %v11769_v22 = vcombine.low %v4678_v15, %v4688_v62  ;;  %18162 = vst [vmem:[#allocation10_spill] sm:$0xff] %v16025_v31  ;;  %v14400_v23 = vld [vmem:[%s18049_s1 + $0x238] sm:$0xff]   ;;  %v4467_v15 = vld [vmem:[#allocation2 + $0xc0] sm:$0xf] }
 0x241   : > { %13287 = vmatpush3.bf16.msra.mxu0 %v14396_v33  ;;  %v4751_v33 = vshrl.u32 %v15993_v13, 16  ;;  %v4777_v34 = vrot.slane %v4775_v43, 4  ;;  %v4721_v0 = vrot.slane %v4720_v16, 4  ;;  %v4731_v32 = vrot.slane %v4730_v12, 4  ;;  %v16037_v62 = vld [vmem:[#allocation2 + $0xc4] sm:$0xf] }
 0x242   : > { %13288 = vmatprep.subr.bf16.mxu0 %v14397_v14  ;;  %v4744_v54 = vor.u32 %v4743_v6, %v4740_v18  ;;  %v4781_v35 = vshll.u32 %v16025_v31, 16  ;;  %v16049_v31 = vld [vmem:[#allocation2 + $0xbc] sm:$0x1] }
 0x243   : > { %v4753_v19 = vrot.slane %v4751_v33, 4  ;;  %v4768_v33 = vor.u32 %v4767_v26, %v4764_v2  ;;  %v4726_v43 = vsel %vm14730_vm11, %v4721_v0, %v15995_v57  ;;  %v4736_v16 = vsel %vm14730_vm11, %v4731_v32, %v4735_v17 }
 0x244   : > { %13257 = vmatmul.mubr.bf16.gmra.mrb[8].mxu0 %v11766_v46  ;;  %v4702_v46 = vsel %vm14730_vm11, %v4697_v29, %v15962_v10  ;;  %v16027_v10 = vrot.slane %v4771_v21, 5  ;;  %v4464_v29 = vld [vmem:[#allocation2 + $0xb4] sm:$0xf]  ;;  %v4799_v21 = vshrl.u32 %v16030_v55, 16  ;;  %v4745_v12 = vrot.slane %v4744_v54, 4 }
 0x245   : > { %13260 = vmatprep.mubr.bf16.mxu0 %v11767_v42  ;;  %13289 = vmatpush3.bf16.msra.mxu0 %v14397_v14  ;;  %v14399_v14 = vld [vmem:[%s18049_s1 + $0x230] sm:$0xff]   ;;  %v16023_v42 = vrot.slane %v4747_v30, 5  ;;  %v11770_v30 = vcombine.low %v4702_v46, %v4712_v5  ;;  %v4786_v63 = vshrl.u32 %v4464_v29, 16  ;;  %v4789_v18 = vshll.u32 %v4464_v29, 16 }
 0x246   : > { %13290 = vmatprep.subr.bf16.mxu0 %v14398_v56  ;;  %v4778_v6 = vor.u32 %v4777_v34, %v16027_v10  ;;  %v4759_v46 = vrot.slane %v4757_v59, 5  ;;  %v4810_v5 = vshrl.u32 %v4467_v15, 16  ;;  %v4819_v2 = vshll.u32 %v16037_v62, 16 }
 0x247   : > { %v4754_v44 = vor.u32 %v4753_v19, %v16023_v42  ;;  %v4813_v19 = vshll.u32 %v4467_v15, 16  ;;  %v4823_v26 = vshrl.u32 %v16037_v62, 16  ;;  %v4769_v34 = vrot.slane %v4768_v33, 4 }
 0x248   : > { %v4788_v29 = vrot.slane %v4786_v63, 4  ;;  %v4791_v57 = vrot.slane %v4789_v18, 5  ;;  %v4801_v17 = vrot.slane %v4799_v21, 4  ;;  %v11771_v32 = vcombine.low %v4726_v43, %v4736_v16  ;;  %v16057_v63 = vld [vmem:[#allocation2 + $0xc8] sm:$0x1] }
 0x249   : > { %13291 = vmatpush3.bf16.msra.mxu0 %v14398_v56  ;;  %v4795_v56 = vshll.u32 %v16030_v55, 16  ;;  %v4779_v55 = vrot.slane %v4778_v6, 4  ;;  %v4812_v59 = vrot.slane %v4810_v5, 4  ;;  %v4821_v54 = vrot.slane %v4819_v2, 5 }
 0x24a   : > { %13292 = vmatprep.subr.bf16.mxu0 %v14399_v14  ;;  %v4825_v15 = vrot.slane %v4823_v26, 4  ;;  %v4792_v18 = vor.u32 %v4791_v57, %v4788_v29  ;;  %v4834_v21 = vshrl.u32 %v4470_v3, 16  ;;  %v4843_v43 = vshll.u32 %v15850_v52, 16 }
 0x24b   : > { %v4797_v0 = vrot.slane %v4795_v56, 5  ;;  %v4847_v16 = vshrl.u32 %v15850_v52, 16 }
 0x24c   : > { %13261 = vmatmul.mubr.bf16.gmra.mrb[12].mxu0 %v11768_v9  ;;  %v4755_v9 = vrot.slane %v4754_v44, 4  ;;  %v4750_v44 = vsel %vm14730_vm11, %v4745_v12, %v16023_v42  ;;  %v4837_v42 = vshll.u32 %v4470_v3, 16  ;;  %v4793_v2 = vrot.slane %v4792_v18, 4 }
 0x24d   : > { %13264 = vmatprep.mubr.bf16.mxu0 %v11769_v22  ;;  %13293 = vmatpush3.bf16.msra.mxu0 %v14399_v14  ;;  %v4783_v22 = vrot.slane %v4781_v35, 5  ;;  %v4815_v14 = vrot.slane %v4813_v19, 5  ;;  %v4805_v35 = vshll.u32 %v16049_v31, 16  ;;  %v4802_v56 = vor.u32 %v4801_v17, %v4797_v0 }
 0x24e   : > { %13294 = vmatprep.subr.bf16.mxu0 %v14400_v23  ;;  %v4760_v33 = vsel %vm14730_vm11, %v4755_v9, %v4759_v46  ;;  %v4826_v46 = vor.u32 %v4825_v15, %v4821_v54  ;;  %v4836_v9 = vrot.slane %v4834_v21, 4  ;;  %v4798_v52 = vsel %vm14730_vm11, %v4793_v2, %v4797_v0 }
 0x24f   : > { %v4784_v6 = vsel %vm14730_vm11, %v4779_v55, %v4783_v22  ;;  %v4816_v12 = vor.u32 %v4815_v14, %v4812_v59  ;;  %v11772_v5 = vcombine.low %v4750_v44, %v4760_v33  ;;  %v4807_v26 = vrot.slane %v4805_v35, 5  ;;  %v5179_v35 = vld [vmem:[#allocation2 + $0x18] sm:$0xe] }
 0x250   : > { %v4839_v55 = vrot.slane %v4837_v42, 5  ;;  %v4849_v22 = vrot.slane %v4847_v16, 4  ;;  %v4827_v57 = vrot.slane %v4826_v46, 4  ;;  %v4853_v14 = vshll.u32 %v15852_v61, 16  ;;  %v5180_v46 = vld [vmem:[#allocation2 + $0x24] sm:$0xe] }
 0x251   : > { %13295 = vmatpush3.bf16.msra.mxu0 %v14400_v23  ;;  %v4774_v23 = vsel %vm14730_vm11, %v4769_v34, %v16027_v10  ;;  %v4803_v10 = vrot.slane %v4802_v56, 4  ;;  %v4845_v34 = vrot.slane %v4843_v43, 5  ;;  %v4817_v29 = vrot.slane %v4816_v12, 4 }
 0x252   : > { %v11773_v19 = vcombine.low %v4774_v23, %v4784_v6  ;;  %v5245_v33 = vrot.slane %v15773_v53, 5  ;;  %v4855_v56 = vrot.slane %v4853_v14, 5  ;;  %v11785_v21 = vrot.slane %v5179_v35, 9 }
 0x253   : > { %v4808_v17 = vsel %vm14730_vm11, %v4803_v10, %v4807_v26  ;;  %v4850_v59 = vor.u32 %v4849_v22, %v4845_v34  ;;  %v4822_v15 = vsel %vm14730_vm11, %v4817_v29, %v4821_v54  ;;  %v5248_v43 = vrot.slane %v15789_v60, 5  ;;  %v5181_v60 = vld [vmem:[#allocation2 + $0x30] sm:$0xe] }
 0x254   : > { %13265 = vmatmul.mubr.bf16.gmra.mrb[16].mxu0 %v11770_v30  ;;  %v4829_v30 = vshll.u32 %v16057_v63, 16  ;;  %v11774_v23 = vcombine.low %v4798_v52, %v4808_v17  ;;  %v5247_v42 = vrot.slane %v5245_v33, 4  ;;  %v5252_v53 = vrot.slane %v15782_v39, 5 }
 0x255   : > { %13268 = vmatprep.mubr.bf16.mxu0 %v11771_v32  ;;  %v4840_v32 = vor.u32 %v4839_v55, %v4836_v9  ;;  %v4851_v18 = vrot.slane %v4850_v59, 4  ;;  %v5246_v16 = vsel %vm15184_vm14, %v11785_v21, %v5245_v33  ;;  %v11786_v2 = vrot.slane %v5180_v46, 9  ;;  %v5186_v46 = vld [vmem:[#allocation2 + $0x6c] sm:$0xe] }
 0x256   : > { %v4831_v3 = vrot.slane %v4829_v30, 5  ;;  %v5249_v12 = vsel %vm15184_vm14, %v5247_v42, %v5248_v43  ;;  %v5259_v30 = vrot.slane %v15785_v51, 5  ;;  %v5254_v10 = vrot.slane %v5252_v53, 4 }
 0x257   : > { %v4841_v0 = vrot.slane %v4840_v32, 4  ;;  %v4856_v54 = vsel %vm14730_vm11, %v4851_v18, %v4855_v56  ;;  %v5255_v26 = vrot.slane %v15799_v40, 5  ;;  %v11787_v9 = vrot.slane %v5181_v60, 9 }
 0x258   : > { %v4832_v44 = vsel %vm14730_vm11, %v4827_v57, %v4831_v3  ;;  %v5261_v55 = vrot.slane %v5259_v30, 4  ;;  %v5262_v39 = vrot.slane %v15803_v24, 5  ;;  %v5266_v51 = vrot.slane %v15797_v1, 5  ;;  %v5182_v57 = vld [vmem:[#allocation2 + $0x3c] sm:$0xe] }
 0x259   : > { %v11775_v6 = vcombine.low %v4822_v15, %v4832_v44  ;;  %v4846_v61 = vsel %vm14730_vm11, %v4841_v0, %v4845_v34  ;;  %v5253_v34 = vsel %vm15184_vm14, %v11786_v2, %v5252_v53  ;;  %v5256_v22 = vsel %vm15184_vm14, %v5254_v10, %v5255_v26  ;;  %v5183_v24 = vld [vmem:[#allocation2 + $0x48] sm:$0xe] }
 0x25a   : > { %v5260_v29 = vsel %vm15184_vm14, %v11787_v9, %v5259_v30  ;;  %v5263_v40 = vsel %vm15184_vm14, %v5261_v55, %v5262_v39  ;;  %v5273_v3 = vrot.slane %v15818_v41, 5  ;;  %v11818_v52 = vcombine.low %v5253_v34, %v5256_v22  ;;  %v5188_v22 = vld [vmem:[#allocation2 + $0x84] sm:$0xe] }
 0x25b   : > { %v11819_v17 = vcombine.low %v5260_v29, %v5263_v40  ;;  %v11788_v32 = vrot.slane %v5182_v57, 9  ;;  %v5268_v59 = vrot.slane %v5266_v51, 4  ;;  %v5269_v14 = vrot.slane %v15807_v49, 5 }
 0x25c   : > { %13269 = vmatmul.mubr.bf16.gmra.mrb[20].mxu0 %v11772_v5  ;;  %v11776_v5 = vcombine.low %v4846_v61, %v4856_v54  ;;  %v11789_v15 = vrot.slane %v5183_v24, 9  ;;  %v5275_v44 = vrot.slane %v5273_v3, 4  ;;  %v5276_v1 = vrot.slane %v15864_v38, 5  ;;  %v5185_v38 = vld [vmem:[#allocation2 + $0x60] sm:$0xe] }
 0x25d   : > { %13272 = vmatprep.mubr.bf16.mxu0 %v11773_v19  ;;  %v11817_v19 = vcombine.low %v5246_v16, %v5249_v12  ;;  %v5267_v33 = vsel %vm15184_vm14, %v11788_v32, %v5266_v51  ;;  %v5270_v35 = vsel %vm15184_vm14, %v5268_v59, %v5269_v14  ;;  %v5280_v41 = vrot.slane %v15848_v20, 5 }
 0x25e   : > { %v5277_v49 = vsel %vm15184_vm14, %v5275_v44, %v5276_v1  ;;  %v5287_v0 = vrot.slane %v15862_v48, 5  ;;  %v11820_v18 = vcombine.low %v5267_v33, %v5270_v35  ;;  %v5283_v43 = vrot.slane %v15894_v37, 5 }
 0x25f   : > { %v5282_v42 = vrot.slane %v5280_v41, 4  ;;  %v11791_v61 = vrot.slane %v5185_v38, 9  ;;  %v5290_v20 = vrot.slane %v15906_v4, 5  ;;  %v5294_v48 = vrot.slane %v15901_v36, 5  ;;  %v5187_v4 = vld [vmem:[#allocation2 + $0x78] sm:$0xe] }
 0x260   : > { %v5289_v54 = vrot.slane %v5287_v0, 4  ;;  %v5301_v30 = vrot.slane %v15913_v28, 5  ;;  %v5297_v10 = vrot.slane %v15931_v47, 5  ;;  %v11793_v26 = vrot.slane %v5187_v4, 9  ;;  %v18165_v38 = vld [vmem:[#allocation10_spill] sm:$0xff] }
 0x261   : > { %v5284_v16 = vsel %vm15184_vm14, %v5282_v42, %v5283_v43  ;;  %v5288_v12 = vsel %vm15184_vm14, %v11791_v61, %v5287_v0  ;;  %v5296_v2 = vrot.slane %v5294_v48, 4  ;;  %v5304_v36 = vrot.slane %v15943_v7, 5  ;;  %v5189_v7 = vld [vmem:[#allocation2 + $0x90] sm:$0xe]  ;;  %v5192_v61 = vld [vmem:[#allocation2 + $0xb4] sm:$0xe] }
 0x262   : > { %v5291_v37 = vsel %vm15184_vm14, %v5289_v54, %v5290_v20  ;;  %v5303_v9 = vrot.slane %v5301_v30, 4  ;;  %v5308_v28 = vrot.slane %v15929_v45, 5  ;;  %v5302_v34 = vsel %vm15184_vm14, %v11793_v26, %v5301_v30  ;;  %v5193_v20 = vld [vmem:[#allocation2 + $0xc0] sm:$0xe] }
 0x263   : > { %v5298_v39 = vsel %vm15184_vm14, %v5296_v2, %v5297_v10  ;;  %v5315_v51 = vrot.slane %v15964_v27, 5  ;;  %v11794_v57 = vrot.slane %v5188_v22, 9  ;;  %v5311_v24 = vrot.slane %v15973_v11, 5  ;;  %v18167_v10 = vld [vmem:[#allocation7_spill] sm:$0xff]  ;;  %v6314_v22 = vld [vmem:[#allocation2] sm:$0xf] }
 0x264   : > { %13273 = vmatmul.mubr.bf16.gmra.mrb[24].mxu0 %v11774_v23  ;;  %v5274_v23 = vsel %vm15184_vm14, %v11789_v15, %v5273_v3  ;;  %v5305_v47 = vsel %vm15184_vm14, %v5303_v9, %v5304_v36  ;;  %v5310_v3 = vrot.slane %v5308_v28, 4  ;;  %v5318_v45 = vrot.slane %v15991_v8, 5  ;;  %v5190_v15 = vld [vmem:[#allocation2 + $0x9c] sm:$0xe]  ;;  %v5191_v8 = vld [vmem:[#allocation2 + $0xa8] sm:$0xe] }
 0x265   : > { %13276 = vmatprep.mubr.bf16.mxu0 %v11775_v6  ;;  %v5184_v6 = vld [vmem:[#allocation2 + $0x54] sm:$0xe]  ;;  %v11821_v56 = vcombine.low %v5274_v23, %v5277_v49  ;;  %v11825_v40 = vcombine.low %v5302_v34, %v5305_v47  ;;  %v5309_v32 = vsel %vm15184_vm14, %v11794_v57, %v5308_v28  ;;  %v5322_v27 = vrot.slane %v15993_v13, 5  ;;  %v18164_v23 = vld [vmem:[#allocation9_spill] sm:$0xff]  ;;  %v14401_v9 = vld [vmem:[%s18052_s4 + $0x40] sm:$0xff]  }
 0x266   : > { %v11790_v21 = vrot.slane %v5184_v6, 9  ;;  %v5312_v59 = vsel %vm15184_vm14, %v5310_v3, %v5311_v24  ;;  %v5329_v44 = vrot.slane %v15997_v50, 5  ;;  %v11796_v35 = vrot.slane %v5190_v15, 9  ;;  %v18166_v50 = vld [vmem:[#allocation4_spill] sm:$0xff]  ;;  %13328 = vmatprep.subr.bf16.mxu1 %v14401_v9  ;;  %v14402_v36 = vld [vmem:[%s18052_s4 + $0x48] sm:$0xff]   ;;  %v14407_v47 = vld [vmem:[%s18052_s4 + $0x70] sm:$0xff]  }
 0x267   : > { %v11826_v1 = vcombine.low %v5309_v32, %v5312_v59  ;;  %v5325_v49 = vrot.slane %v18164_v23, 5  ;;  %v11797_v6 = vrot.slane %v5191_v8, 9  ;;  %v5332_v13 = vrot.slane %v18165_v38, 5  ;;  %13329 = vmatpush3.bf16.msra.mxu1 %v14401_v9  ;;  %v14405_v28 = vld [vmem:[%s18052_s4 + $0x60] sm:$0xff]   ;;  %v14406_v34 = vld [vmem:[%s18052_s4 + $0x68] sm:$0xff]  }
 0x268   : > { %v5281_v53 = vsel %vm15184_vm14, %v11790_v21, %v5280_v41  ;;  %v5324_v41 = vrot.slane %v5322_v27, 4  ;;  %v5331_v0 = vrot.slane %v5329_v44, 4  ;;  %v5336_v21 = vrot.slane %v18166_v50, 5  ;;  %13330 = vmatprep.subr.bf16.mxu1 %v14402_v36 }
 0x269   : > { %v11822_v60 = vcombine.low %v5281_v53, %v5284_v16  ;;  %v5330_v42 = vsel %vm15184_vm14, %v11797_v6, %v5329_v44  ;;  %v5343_v54 = vrot.slane %v16037_v62, 5  ;;  %v5346_v4 = vrot.slane %v16057_v63, 5  ;;  %v18168_v63 = vld [vmem:[#allocation8_spill] sm:$0xff] }
 0x26a   : > { %v5333_v43 = vsel %vm15184_vm14, %v5331_v0, %v5332_v13  ;;  %v18169_v26 = vcombine.low %v18167_v10, %v18168_v63 }
 0x26b   : > { %v11829_v16 = vcombine.low %v5330_v42, %v5333_v43  ;;  %v5345_v30 = vrot.slane %v5343_v54, 4  ;;  %13331 = vmatpush3.bf16.msra.mxu1 %v14402_v36 }
 0x26c   : > { %13277 = vmatmul.mubr.bf16.gmra.mrb[28].mxu0 %v11776_v5  ;;  %v11823_v5 = vcombine.low %v5288_v12, %v5291_v37  ;;  %v5338_v12 = vrot.slane %v5336_v21, 4  ;;  %v5339_v37 = vrot.slane %v16049_v31, 5 }
 0x26d   : > { %13296 = vmatprep.mubr.bf16.mxu0 %v11817_v19  ;;  %v11792_v19 = vrot.slane %v5186_v46, 9  ;;  %v11799_v46 = vrot.slane %v5193_v20, 9 }
 0x26f   : > { %v5295_v55 = vsel %vm15184_vm14, %v11792_v19, %v5294_v48  ;;  %v11798_v48 = vrot.slane %v5192_v61, 9  ;;  %v5344_v62 = vsel %vm15184_vm14, %v11799_v46, %v5343_v54  ;;  %v5347_v19 = vsel %vm15184_vm14, %v5345_v30, %v5346_v4 }
 0x270   : > { %v11824_v29 = vcombine.low %v5295_v55, %v5298_v39  ;;  %v11831_v31 = vcombine.low %v5344_v62, %v5347_v19  ;;  %v14403_v55 = vld [vmem:[%s18052_s4 + $0x50] sm:$0xff]   ;;  %v14404_v39 = vld [vmem:[%s18052_s4 + $0x58] sm:$0xff]  }
 0x271   : > { %13332 = vmatprep.subr.bf16.mxu1 %v14403_v55 }
 0x272   : > { %13333 = vmatpush3.bf16.msra.mxu1 %v14403_v55 }
 0x273   : > { %13334 = vmatprep.subr.bf16.mxu1 %v14404_v39 }
 0x274   : > { %13297 = vmatmul.mubr.bf16.vlgmr.msra.gmra.mrb[0].mxu0 %v11818_v52  ;;  %v11795_v52 = vrot.slane %v5189_v7, 9  ;;  %v6379_v7 = vshrl.u32 %v6314_v22, 16 }
 0x275   : > { %13300 = vmatprep.mubr.bf16.mxu0 %v11819_v17  ;;  %v5317_v17 = vrot.slane %v5315_v51, 4 }
 0x276   : > { %v5316_v14 = vsel %vm15184_vm14, %v11795_v52, %v5315_v51  ;;  %13335 = vmatpush3.bf16.msra.mxu1 %v14404_v39  ;;  %v6315_v51 = vld [vmem:[#allocation2 + $0x4] sm:$0xf]  ;;  %v6381_v3 = vrot.slane %v6379_v7, 4  ;;  %v6209_v39 = vld [vmem:[#allocation2 + $0x18] sm:$0xf] }
 0x277   : > { %v5319_v11 = vsel %vm15184_vm14, %v5317_v17, %v5318_v45  ;;  %13336 = vmatprep.subr.bf16.mxu1 %v14405_v28  ;;  %v6392_v57 = vshrl.u32 %v6315_v51, 16  ;;  %v6362_v45 = vld [vmem:[#allocation2 + $0x8] sm:$0x1] }
 0x278   : > { %v11827_v33 = vcombine.low %v5316_v14, %v5319_v11  ;;  %v14408_v14 = vld [vmem:[%s18052_s4 + $0x78] sm:$0xff]  }
 0x279   : > { %v6394_v17 = vrot.slane %v6392_v57, 4 }
 0x27a   : > { %13337 = vmatpush3.bf16.msra.mxu1 %v14405_v28 }
 0x27b   : > { %13338 = vmatprep.subr.bf16.mxu1 %v14406_v34 }
 0x27c   : > { %13301 = vmatmul.mubr.bf16.gmra.mrb[4].mxu0 %v11820_v18  ;;  %v5323_v18 = vsel %vm15184_vm14, %v11796_v35, %v5322_v27  ;;  %v6398_v27 = vshll.u32 %v6362_v45, 16  ;;  %v16204_v35 = vld [vmem:[%s18052_s4] sm:$0xff]  }
 0x27d   : > { %13304 = vmatprep.mubr.bf16.mxu0 %v11821_v56  ;;  %v5326_v56 = vsel %vm15184_vm14, %v5324_v41, %v5325_v49  ;;  %v16210_v41 = vld [vmem:[%s18050_s2] ss:$0 sm:$0xff] }
 0x27e   : > { %v11828_v53 = vcombine.low %v5323_v18, %v5326_v56  ;;  %13339 = vmatpush3.bf16.msra.mxu1 %v14406_v34  ;;  %v6400_v44 = vrot.slane %v6398_v27, 5  ;;  %v16215_v49 = vld [vmem:[%s18051_s3] ss:$0 sm:$0xff] }
 0x27f   : > { %13340 = vmatprep.subr.bf16.mxu1 %v14407_v47 }
 0x282   : > { %13341 = vmatpush3.bf16.msra.mxu1 %v14407_v47 }
 0x283   : > { %13342 = vmatprep.subr.bf16.mxu1 %v14408_v14 }
 0x284   : > { %13305 = vmatmul.mubr.bf16.gmra.mrb[8].mxu0 %v11822_v60  ;;  %v5337_v60 = vsel %vm15184_vm14, %v11798_v48, %v5336_v21 }
 0x285   : > { %13308 = vmatprep.mubr.bf16.mxu0 %v11823_v5  ;;  %v5340_v5 = vsel %vm15184_vm14, %v5338_v12, %v5339_v37 }
 0x286   : > { %v11830_v2 = vcombine.low %v5337_v60, %v5340_v5  ;;  %13343 = vmatpush3.bf16.msra.mxu1 %v14408_v14  ;;  %v6206_v14 = vld [vmem:[#allocation2 + $0x14] sm:$0x1] }
 0x287   : > { %13376 = vmatprep.subr.bf16.mxu1 %v16204_v35 }
 0x28c   : > { %13309 = vmatmul.mubr.bf16.gmra.mrb[12].mxu0 %v11824_v29  ;;  %v6382_v29 = vshll.u32 %v6314_v22, 16 }
 0x28d   : > { %13312 = vmatprep.mubr.bf16.mxu0 %v11825_v40  ;;  %v6388_v40 = vshll.u32 %v6315_v51, 16 }
 0x28e   : > { %v6384_v24 = vrot.slane %v6382_v29, 5 }
 0x28f   : > { %v6390_v52 = vrot.slane %v6388_v40, 5 }
 0x290   : > { %v6385_v32 = vor.u32 %v6384_v24, %v6381_v3  ;;  %v6213_v24 = vld [vmem:[#allocation2 + $0x20] sm:$0x1] }
 0x291   : > { %v6395_v59 = vor.u32 %v6394_v17, %v6390_v52 }
 0x292   : > { %v6386_v11 = vrot.slane %v6385_v32, 4 }
 0x293   : > { %v6396_v15 = vrot.slane %v6395_v59, 4 }
 0x294   : > { %13313 = vmatmul.mubr.bf16.gmra.mrb[16].mxu0 %v11826_v1  ;;  %v6391_v8 = vsel %vm14730_vm11, %v6386_v11, %v6390_v52 }
 0x295   : > { %13316 = vmatprep.mubr.bf16.mxu0 %v11827_v33  ;;  %v6401_v1 = vsel %vm14730_vm11, %v6396_v15, %v6400_v44  ;;  %v14552_v15 = vld [vmem:[#allocation2 + $0xc] sm:$0xf] }
 0x296   : > { %v11891_v33 = vcombine.low %v6391_v8, %v6401_v1 }
 0x298   : > { %13344 = vmatprep.mubr.bf16.mxu1 %v11891_v33 }
 0x29c   : > { %13317 = vmatmul.mubr.bf16.gmra.mrb[20].mxu0 %v11828_v53 }
 0x29d   : > { %13320 = vmatprep.mubr.bf16.mxu0 %v11829_v16 }
 0x2a4   : > { %13321 = vmatmul.mubr.bf16.gmra.mrb[24].mxu0 %v11830_v2 }
 0x2a5   : > { %13324 = vmatprep.mubr.bf16.mxu0 %v11831_v31 }
 0x2ac   : > { %13325 = vmatmul.mubr.bf16.gmra.mrb[28].mxu0 %v18169_v26 }
 0x347   : > { %v13298_v23 = vpop.f32.mrb[0].mxu0 }
 0x348   : > { %v5686_v6 = vmul.f32 %v13298_v23, %v16210_v41  ;;  %v5518_v0 = vpop.f32.mrb[1].mxu0 }
 0x349   : > { %v5684_v38 = vmul.f32 %v16210_v41, %v5518_v0  ;;  %v13299_v13 = vpop.f32.mrb[2].mxu0 }
 0x34a   : > { %v5725_v18 = vadd.f32 %v16215_v49, %v5686_v6  ;;  %v5687_v56 = vmul.f32 %v13299_v13, %v16210_v41  ;;  %v5521_v50 = vpop.f32.mrb[3].mxu0 }
 0x34b   : > { %v5723_v21 = vadd.f32 %v16215_v49, %v5684_v38  ;;  %v5685_v42 = vmul.f32 %v16210_v41, %v5521_v50 }
 0x34c   : > { %v5757_v43 = vmax.f32 %v5725_v18, 0.0  ;;  %v5726_v61 = vadd.f32 %v16215_v49, %v5687_v56 }
 0x34d   : > { %v5755_v54 = vmax.f32 %v5723_v21, 0.0  ;;  %v5724_v20 = vadd.f32 %v16215_v49, %v5685_v42 }
 0x34e   : > { %v12307_v53 = vpack.c.bf16 %v5757_v43, %v5757_v43  ;;  %v5758_v16 = vmax.f32 %v5726_v61, 0.0 }
 0x34f   : > { %v12305_v48 = vpack.c.bf16 %v5755_v54, %v5755_v54  ;;  %v5756_v12 = vmax.f32 %v5724_v20, 0.0  ;;  %v13302_v37 = vpop.f32.mrb[4].mxu0 }
 0x350   : > { %v5901_v46 = vshrl.u32 %v12307_v53, 16  ;;  %v5904_v30 = vshll.u32 %v12307_v53, 16  ;;  %v12308_v4 = vpack.c.bf16 %v5758_v16, %v5758_v16  ;;  %v5690_v60 = vmul.f32 %v13302_v37, %v16210_v41  ;;  %v5534_v5 = vpop.f32.mrb[5].mxu0  ;;  %v6223_v37 = vld [vmem:[#allocation2 + $0x30] sm:$0xf] }
 0x351   : > { %v5884_v62 = vshrl.u32 %v12305_v48, 16  ;;  %v5887_v19 = vshll.u32 %v12305_v48, 16  ;;  %v12306_v2 = vpack.c.bf16 %v5756_v12, %v5756_v12  ;;  %v5688_v31 = vmul.f32 %v16210_v41, %v5534_v5  ;;  %v13303_v10 = vpop.f32.mrb[6].mxu0 }
 0x352   : > { %v5903_v63 = vrot.slane %v5901_v46, 7  ;;  %v5909_v26 = vshrl.u32 %v12308_v4, 16  ;;  %v5912_v9 = vshll.u32 %v12308_v4, 16  ;;  %v5729_v36 = vadd.f32 %v16215_v49, %v5690_v60  ;;  %v5537_v55 = vpop.f32.mrb[7].mxu0 }
 0x353   : > { %v5886_v28 = vrot.slane %v5884_v62, 7  ;;  %v5892_v34 = vshrl.u32 %v12306_v2, 16  ;;  %v5895_v47 = vshll.u32 %v12306_v2, 16  ;;  %v5727_v22 = vadd.f32 %v16215_v49, %v5688_v31 }
 0x354   : > { %v5906_v51 = vor.u32 %v5904_v30, %v5903_v63  ;;  %v5907_v7 = vrot.slane %v5903_v63, 4  ;;  %v5911_v29 = vrot.slane %v5909_v26, 7  ;;  %v5761_v40 = vmax.f32 %v5729_v36, 0.0 }
 0x355   : > { %v5889_v57 = vor.u32 %v5887_v19, %v5886_v28  ;;  %v5890_v3 = vrot.slane %v5886_v28, 4  ;;  %v5894_v52 = vrot.slane %v5892_v34, 7  ;;  %v5759_v17 = vmax.f32 %v5727_v22, 0.0  ;;  %v6216_v19 = vld [vmem:[#allocation2 + $0x24] sm:$0xf] }
 0x356   : > { %v6210_v32 = vsel %vm14722_vm10, %v5906_v51, %v6209_v39  ;;  %v5914_v59 = vor.u32 %v5912_v9, %v5911_v29  ;;  %v5916_v27 = vrot.slane %v5911_v29, 4  ;;  %v12311_v11 = vpack.c.bf16 %v5761_v40, %v5761_v40 }
 0x357   : > { %6211 = vst [vmem:[#allocation2 + $0x18] sm:$0xf] %v6210_v32  ;;  %v6203_v44 = vsel %vm14722_vm10, %v5889_v57, %v14552_v15  ;;  %v5897_v8 = vor.u32 %v5895_v47, %v5894_v52  ;;  %v5899_v1 = vrot.slane %v5894_v52, 4  ;;  %v12309_v33 = vpack.c.bf16 %v5759_v17, %v5759_v17  ;;  %v13306_v23 = vpop.f32.mrb[8].mxu0 }
 0x358   : > { %6204 = vst [vmem:[#allocation2 + $0xc] sm:$0xf] %v6203_v44  ;;  %v5915_v0 = vsel %vm14712_vm9, %v5907_v7, %v5914_v59  ;;  %v6214_v13 = vsel %vm14670_vm3, %v5916_v27, %v6213_v24  ;;  %v5935_v18 = vshrl.u32 %v12311_v11, 16  ;;  %v5938_v56 = vshll.u32 %v12311_v11, 16  ;;  %v5550_v50 = vpop.f32.mrb[9].mxu0 }
 0x359   : > { %6212 = vst [vmem:[#allocation2 + $0x1c] sm:$0xf] %v5915_v0  ;;  %6215 = vst [vmem:[#allocation2 + $0x20] sm:$0x1] %v6214_v13  ;;  %v5898_v21 = vsel %vm14712_vm9, %v5890_v3, %v5897_v8  ;;  %v6207_v42 = vsel %vm14670_vm3, %v5899_v1, %v6206_v14  ;;  %v5918_v43 = vshrl.u32 %v12309_v33, 16  ;;  %v5921_v61 = vshll.u32 %v12309_v33, 16 }
 0x35a   : > { %v13307_v54 = vpop.f32.mrb[10].mxu0  ;;  %6205 = vst [vmem:[#allocation2 + $0x10] sm:$0xf] %v5898_v21  ;;  %6208 = vst [vmem:[#allocation2 + $0x14] sm:$0x1] %v6207_v42  ;;  %v16241_v20 = vrot.slane %v5935_v18, 7  ;;  %v5691_v53 = vmul.f32 %v13303_v10, %v16210_v41  ;;  %v5689_v16 = vmul.f32 %v16210_v41, %v5537_v55  ;;  %v5694_v48 = vmul.f32 %v13306_v23, %v16210_v41 }
 0x35b   : > { %v5553_v12 = vpop.f32.mrb[11].mxu0  ;;  %v16246_v46 = vrot.slane %v5918_v43, 7  ;;  %v5692_v30 = vmul.f32 %v16210_v41, %v5550_v50  ;;  %v5695_v4 = vmul.f32 %v13307_v54, %v16210_v41  ;;  %v6227_v1 = vld [vmem:[#allocation2 + $0x38] sm:$0x1]  ;;  %v6220_v50 = vld [vmem:[#allocation2 + $0x2c] sm:$0x1] }
 0x35c   : > { %v5693_v60 = vmul.f32 %v16210_v41, %v5553_v12  ;;  %v5940_v5 = vor.u32 %v5938_v56, %v16241_v20  ;;  %v5941_v62 = vrot.slane %v16241_v20, 4  ;;  %v5730_v2 = vadd.f32 %v16215_v49, %v5691_v53 }
 0x35d   : > { %v5728_v31 = vadd.f32 %v16215_v49, %v5689_v16  ;;  %v5923_v10 = vor.u32 %v5921_v61, %v16246_v46  ;;  %v5924_v63 = vrot.slane %v16246_v46, 4  ;;  %v5733_v26 = vadd.f32 %v16215_v49, %v5694_v48  ;;  %v6230_v46 = vld [vmem:[#allocation2 + $0x3c] sm:$0xf] }
 0x35e   : > { %v5731_v9 = vadd.f32 %v16215_v49, %v5692_v30  ;;  %v6224_v36 = vsel %vm14722_vm10, %v5940_v5, %v6223_v37  ;;  %v5762_v55 = vmax.f32 %v5730_v2, 0.0  ;;  %v5734_v28 = vadd.f32 %v16215_v49, %v5695_v4  ;;  %v6237_v37 = vld [vmem:[#allocation2 + $0x48] sm:$0xf] }
 0x35f   : > { %v5760_v39 = vmax.f32 %v5728_v31, 0.0  ;;  %6225 = vst [vmem:[#allocation2 + $0x30] sm:$0xf] %v6224_v36  ;;  %v6217_v34 = vsel %vm14722_vm10, %v5923_v10, %v6216_v19  ;;  %v5765_v47 = vmax.f32 %v5733_v26, 0.0  ;;  %v5732_v51 = vadd.f32 %v16215_v49, %v5693_v60  ;;  %v13310_v7 = vpop.f32.mrb[12].mxu0 }
 0x360   : > { %v5763_v22 = vmax.f32 %v5731_v9, 0.0  ;;  %6218 = vst [vmem:[#allocation2 + $0x24] sm:$0xf] %v6217_v34  ;;  %v12312_v29 = vpack.c.bf16 %v5762_v55, %v5762_v55  ;;  %v5766_v57 = vmax.f32 %v5734_v28, 0.0  ;;  %v5698_v3 = vmul.f32 %v13310_v7, %v16210_v41  ;;  %v5566_v24 = vpop.f32.mrb[13].mxu0 }
 0x361   : > { %v12310_v40 = vpack.c.bf16 %v5760_v39, %v5760_v39  ;;  %v12315_v52 = vpack.c.bf16 %v5765_v47, %v5765_v47  ;;  %v5764_v32 = vmax.f32 %v5732_v51, 0.0  ;;  %v5696_v59 = vmul.f32 %v16210_v41, %v5566_v24  ;;  %v13311_v27 = vpop.f32.mrb[14].mxu0 }
 0x362   : > { %v12313_v17 = vpack.c.bf16 %v5763_v22, %v5763_v22  ;;  %v5943_v14 = vshrl.u32 %v12312_v29, 16  ;;  %v5946_v11 = vshll.u32 %v12312_v29, 16  ;;  %v5569_v8 = vpop.f32.mrb[15].mxu0  ;;  %v12316_v21 = vpack.c.bf16 %v5766_v57, %v5766_v57 }
 0x363   : > { %v5926_v15 = vshrl.u32 %v12310_v40, 16  ;;  %v5929_v44 = vshll.u32 %v12310_v40, 16  ;;  %v5969_v33 = vshrl.u32 %v12315_v52, 16  ;;  %v5972_v23 = vshll.u32 %v12315_v52, 16 }
 0x364   : > { %v5952_v0 = vshrl.u32 %v12313_v17, 16  ;;  %v5955_v13 = vshll.u32 %v12313_v17, 16  ;;  %v5945_v18 = vrot.slane %v5943_v14, 7  ;;  %v12314_v42 = vpack.c.bf16 %v5764_v32, %v5764_v32 }
 0x365   : > { %v5928_v56 = vrot.slane %v5926_v15, 7  ;;  %v5971_v43 = vrot.slane %v5969_v33, 7  ;;  %v5737_v54 = vadd.f32 %v16215_v49, %v5698_v3  ;;  %v5735_v20 = vadd.f32 %v16215_v49, %v5696_v59  ;;  %v6241_v3 = vld [vmem:[#allocation2 + $0x50] sm:$0x1] }
 0x366   : > { %v5954_v61 = vrot.slane %v5952_v0, 7  ;;  %v5948_v53 = vor.u32 %v5946_v11, %v5945_v18  ;;  %v5950_v16 = vrot.slane %v5945_v18, 4  ;;  %v5977_v55 = vshrl.u32 %v12316_v21, 16  ;;  %v6234_v11 = vld [vmem:[#allocation2 + $0x44] sm:$0x1] }
 0x367   : > { %v5931_v48 = vor.u32 %v5929_v44, %v5928_v56  ;;  %v5933_v12 = vrot.slane %v5928_v56, 4  ;;  %v5974_v30 = vor.u32 %v5972_v23, %v5971_v43  ;;  %v5975_v4 = vrot.slane %v5971_v43, 4  ;;  %v13314_v19 = vpop.f32.mrb[16].mxu0 }
 0x368   : > { %v5957_v60 = vor.u32 %v5955_v13, %v5954_v61  ;;  %v5958_v5 = vrot.slane %v5954_v61, 4  ;;  %v5949_v2 = vsel %vm14712_vm9, %v5941_v62, %v5948_v53  ;;  %v6228_v31 = vsel %vm14670_vm3, %v5950_v16, %v6227_v1  ;;  %v5582_v9 = vpop.f32.mrb[17].mxu0 }
 0x369   : > { %v5932_v10 = vsel %vm14712_vm9, %v5924_v63, %v5931_v48  ;;  %v6221_v26 = vsel %vm14670_vm3, %v5933_v12, %v6220_v50  ;;  %6226 = vst [vmem:[#allocation2 + $0x34] sm:$0xf] %v5949_v2  ;;  %6229 = vst [vmem:[#allocation2 + $0x38] sm:$0x1] %v6228_v31  ;;  %v6238_v36 = vsel %vm14722_vm10, %v5974_v30, %v6237_v37  ;;  %v5980_v39 = vshll.u32 %v12316_v21, 16  ;;  %v13315_v28 = vpop.f32.mrb[18].mxu0 }
 0x36a   : > { %6219 = vst [vmem:[#allocation2 + $0x28] sm:$0xf] %v5932_v10  ;;  %6222 = vst [vmem:[#allocation2 + $0x2c] sm:$0x1] %v6221_v26  ;;  %v6231_v62 = vsel %vm14722_vm10, %v5957_v60, %v6230_v46  ;;  %v5960_v63 = vshrl.u32 %v12314_v42, 16  ;;  %v5963_v34 = vshll.u32 %v12314_v42, 16  ;;  %v5699_v29 = vmul.f32 %v13311_v27, %v16210_v41 }
 0x36b   : > { %6239 = vst [vmem:[#allocation2 + $0x48] sm:$0xf] %v6238_v36  ;;  %6232 = vst [vmem:[#allocation2 + $0x3c] sm:$0xf] %v6231_v62  ;;  %v5769_v47 = vmax.f32 %v5737_v54, 0.0  ;;  %v5767_v22 = vmax.f32 %v5735_v20, 0.0  ;;  %v5697_v40 = vmul.f32 %v16210_v41, %v5569_v8  ;;  %v5702_v57 = vmul.f32 %v13314_v19, %v16210_v41 }
 0x36c   : > { %v16281_v51 = vpop.f32.mrb[19].mxu0  ;;  %v5979_v7 = vrot.slane %v5977_v55, 7  ;;  %v5962_v24 = vrot.slane %v5960_v63, 7  ;;  %v5700_v32 = vmul.f32 %v16210_v41, %v5582_v9  ;;  %v5738_v15 = vadd.f32 %v16215_v49, %v5699_v29  ;;  %v6251_v54 = vld [vmem:[#allocation2 + $0x60] sm:$0xf] }
 0x36d   : > { %v12319_v52 = vpack.c.bf16 %v5769_v47, %v5769_v47  ;;  %v12317_v17 = vpack.c.bf16 %v5767_v22, %v5767_v22  ;;  %v5736_v44 = vadd.f32 %v16215_v49, %v5697_v40  ;;  %v5741_v16 = vadd.f32 %v16215_v49, %v5702_v57  ;;  %v6244_v30 = vld [vmem:[#allocation2 + $0x54] sm:$0xf]  ;;  %v6316_v55 = vld [vmem:[#allocation2 + $0xc] sm:$0xf]  ;;  %v6255_v63 = vld [vmem:[#allocation2 + $0x68] sm:$0x1] }
 0x36e   : > { %v5982_v59 = vor.u32 %v5980_v39, %v5979_v7  ;;  %v5984_v14 = vrot.slane %v5979_v7, 4  ;;  %v5965_v1 = vor.u32 %v5963_v34, %v5962_v24  ;;  %v5967_v33 = vrot.slane %v5962_v24, 4 }
 0x36f   : > { %v6003_v27 = vshrl.u32 %v12319_v52, 16  ;;  %v6006_v23 = vshll.u32 %v12319_v52, 16  ;;  %v5986_v13 = vshrl.u32 %v12317_v17, 16  ;;  %v5989_v18 = vshll.u32 %v12317_v17, 16  ;;  %v16293_v56 = vpop.f32.mrb[20].mxu0 }
 0x370   : > { %v5983_v8 = vsel %vm14712_vm9, %v5975_v4, %v5982_v59  ;;  %v6242_v0 = vsel %vm14670_vm3, %v5984_v14, %v6241_v3  ;;  %v5966_v50 = vsel %vm14712_vm9, %v5958_v5, %v5965_v1  ;;  %v6235_v21 = vsel %vm14670_vm3, %v5967_v33, %v6234_v11  ;;  %v16299_v61 = vpop.f32.mrb[21].mxu0  ;;  %v6248_v14 = vld [vmem:[#allocation2 + $0x5c] sm:$0x1] }
 0x371   : > { %6240 = vst [vmem:[#allocation2 + $0x4c] sm:$0xf] %v5983_v8  ;;  %6243 = vst [vmem:[#allocation2 + $0x50] sm:$0x1] %v6242_v0  ;;  %v6005_v42 = vrot.slane %v6003_v27, 7  ;;  %v5770_v43 = vmax.f32 %v5738_v15, 0.0  ;;  %v5739_v48 = vadd.f32 %v16215_v49, %v5700_v32  ;;  %v5703_v60 = vmul.f32 %v13315_v28, %v16210_v41 }
 0x372   : > { %6233 = vst [vmem:[#allocation2 + $0x40] sm:$0xf] %v5966_v50  ;;  %6236 = vst [vmem:[#allocation2 + $0x44] sm:$0x1] %v6235_v21  ;;  %v5988_v20 = vrot.slane %v5986_v13, 7  ;;  %v5768_v53 = vmax.f32 %v5736_v44, 0.0  ;;  %v5701_v40 = vmul.f32 %v16210_v41, %v16281_v51 }
 0x373   : > { %v16303_v12 = vpop.f32.mrb[22].mxu0  ;;  %v6008_v37 = vor.u32 %v6006_v23, %v6005_v42  ;;  %v6009_v46 = vrot.slane %v6005_v42, 4  ;;  %v12320_v4 = vpack.c.bf16 %v5770_v43, %v5770_v43  ;;  %v5773_v10 = vmax.f32 %v5741_v16, 0.0  ;;  %v6265_v13 = vld [vmem:[#allocation2 + $0x78] sm:$0xf] }
 0x374   : > { %v16306_v5 = vpop.f32.mrb[23].mxu0  ;;  %v5991_v19 = vor.u32 %v5989_v18, %v5988_v20  ;;  %v5992_v2 = vrot.slane %v5988_v20, 4  ;;  %v12318_v31 = vpack.c.bf16 %v5768_v53, %v5768_v53  ;;  %v5771_v62 = vmax.f32 %v5739_v48, 0.0  ;;  %v6317_v21 = vld [vmem:[#allocation2 + $0x10] sm:$0xf] }
 0x375   : > { %v6252_v26 = vsel %vm14722_vm10, %v6008_v37, %v6251_v54  ;;  %v6011_v9 = vshrl.u32 %v12320_v4, 16  ;;  %v6014_v36 = vshll.u32 %v12320_v4, 16  ;;  %v12323_v47 = vpack.c.bf16 %v5773_v10, %v5773_v10  ;;  %v6258_v53 = vld [vmem:[#allocation2 + $0x6c] sm:$0xf] }
 0x376   : > { %6253 = vst [vmem:[#allocation2 + $0x60] sm:$0xf] %v6252_v26  ;;  %v6245_v39 = vsel %vm14722_vm10, %v5991_v19, %v6244_v30  ;;  %v5994_v34 = vshrl.u32 %v12318_v31, 16  ;;  %v5997_v28 = vshll.u32 %v12318_v31, 16  ;;  %v12321_v7 = vpack.c.bf16 %v5771_v62, %v5771_v62  ;;  %v6363_v30 = vld [vmem:[#allocation2 + $0x14] sm:$0x1] }
 0x377   : > { %6246 = vst [vmem:[#allocation2 + $0x54] sm:$0xf] %v6245_v39  ;;  %v6013_v22 = vrot.slane %v6011_v9, 7  ;;  %v5742_v29 = vadd.f32 %v16215_v49, %v5703_v60  ;;  %v6037_v3 = vshrl.u32 %v12323_v47, 16  ;;  %v6040_v24 = vshll.u32 %v12323_v47, 16  ;;  %v16315_v17 = vpop.f32.mrb[24].mxu0 }
 0x378   : > { %v5996_v57 = vrot.slane %v5994_v34, 7  ;;  %v6403_v52 = vshrl.u32 %v6316_v55, 16  ;;  %v6020_v11 = vshrl.u32 %v12321_v7, 16  ;;  %v6023_v15 = vshll.u32 %v12321_v7, 16  ;;  %v16317_v44 = vpop.f32.mrb[25].mxu0 }
 0x379   : > { %v6016_v32 = vor.u32 %v6014_v36, %v6013_v22  ;;  %v6018_v59 = vrot.slane %v6013_v22, 4  ;;  %v16319_v27 = vrot.slane %v6037_v3, 7  ;;  %v5774_v23 = vmax.f32 %v5742_v29, 0.0  ;;  %v16321_v8 = vpop.f32.mrb[26].mxu0  ;;  %v6318_v31 = vld [vmem:[#allocation2 + $0x18] sm:$0xf] }
 0x37a   : > { %v5999_v1 = vor.u32 %v5997_v28, %v5996_v57  ;;  %v6001_v33 = vrot.slane %v5996_v57, 4  ;;  %v16327_v18 = vrot.slane %v6020_v11, 7  ;;  %v5740_v50 = vadd.f32 %v16215_v49, %v5701_v40  ;;  %v16330_v42 = vpop.f32.mrb[27].mxu0  ;;  %v6319_v62 = vld [vmem:[#allocation2 + $0x1c] sm:$0xf] }
 0x37b   : > { %v6017_v51 = vsel %vm14712_vm9, %v6009_v46, %v6016_v32  ;;  %v6256_v0 = vsel %vm14670_vm3, %v6018_v59, %v6255_v63  ;;  %v6042_v20 = vor.u32 %v6040_v24, %v16319_v27  ;;  %v6043_v16 = vrot.slane %v16319_v27, 4  ;;  %v6269_v39 = vld [vmem:[#allocation2 + $0x80] sm:$0x1] }
 0x37c   : > { %6254 = vst [vmem:[#allocation2 + $0x64] sm:$0xf] %v6017_v51  ;;  %6257 = vst [vmem:[#allocation2 + $0x68] sm:$0x1] %v6256_v0  ;;  %v6000_v43 = vsel %vm14712_vm9, %v5992_v2, %v5999_v1  ;;  %v6249_v54 = vsel %vm14670_vm3, %v6001_v33, %v6248_v14  ;;  %v6025_v48 = vor.u32 %v6023_v15, %v16327_v18  ;;  %v5772_v46 = vmax.f32 %v5740_v50, 0.0 }
 0x37d   : > { %6247 = vst [vmem:[#allocation2 + $0x58] sm:$0xf] %v6000_v43  ;;  %6250 = vst [vmem:[#allocation2 + $0x5c] sm:$0x1] %v6249_v54  ;;  %v12324_v37 = vpack.c.bf16 %v5774_v23, %v5774_v23  ;;  %v6266_v4 = vsel %vm14722_vm10, %v6042_v20, %v6265_v13  ;;  %v6405_v60 = vrot.slane %v6403_v52, 4  ;;  %v6406_v19 = vshll.u32 %v6316_v55, 16 }
 0x37e   : > { %v6412_v2 = vshll.u32 %v6317_v21, 16  ;;  %6267 = vst [vmem:[#allocation2 + $0x78] sm:$0xf] %v6266_v4  ;;  %v6026_v10 = vrot.slane %v16327_v18, 4  ;;  %v6259_v26 = vsel %vm14722_vm10, %v6025_v48, %v6258_v53  ;;  %v12322_v36 = vpack.c.bf16 %v5772_v46, %v5772_v46  ;;  %v6262_v1 = vld [vmem:[#allocation2 + $0x74] sm:$0x1] }
 0x37f   : > { %v6045_v9 = vshrl.u32 %v12324_v37, 16  ;;  %6260 = vst [vmem:[#allocation2 + $0x6c] sm:$0xf] %v6259_v26  ;;  %v6408_v63 = vrot.slane %v6406_v19, 5  ;;  %v6416_v28 = vshrl.u32 %v6317_v21, 16  ;;  %v6422_v47 = vshll.u32 %v6363_v30, 16 }
 0x380   : > { %v6414_v34 = vrot.slane %v6412_v2, 5  ;;  %v16344_v22 = vpop.f32.mrb[28].mxu0  ;;  %v6048_v7 = vshll.u32 %v12324_v37, 16  ;;  %v6028_v29 = vshrl.u32 %v12322_v36, 16  ;;  %v6031_v40 = vshll.u32 %v12322_v36, 16 }
 0x381   : > { %v6047_v55 = vrot.slane %v6045_v9, 7  ;;  %v16346_v57 = vpop.f32.mrb[29].mxu0  ;;  %v6409_v3 = vor.u32 %v6408_v63, %v6405_v60  ;;  %v6418_v24 = vrot.slane %v6416_v28, 4  ;;  %v6424_v52 = vrot.slane %v6422_v47, 5  ;;  %v6364_v0 = vld [vmem:[#allocation2 + $0x20] sm:$0x1] }
 0x382   : > { %v6427_v32 = vshrl.u32 %v6318_v31, 16  ;;  %v16348_v59 = vpop.f32.mrb[30].mxu0  ;;  %v6030_v15 = vrot.slane %v6028_v29, 7  ;;  %v6430_v33 = vshll.u32 %v6318_v31, 16  ;;  %v6436_v18 = vshll.u32 %v6319_v62, 16 }
 0x383   : > { %v6050_v14 = vor.u32 %v6048_v7, %v6047_v55  ;;  %v6052_v11 = vrot.slane %v6047_v55, 4  ;;  %v16350_v27 = vpop.f32.mrb[31].mxu0  ;;  %v6410_v23 = vrot.slane %v6409_v3, 4  ;;  %v6419_v51 = vor.u32 %v6418_v24, %v6414_v34  ;;  %v6320_v26 = vld [vmem:[#allocation2 + $0x24] sm:$0xf] }
 0x384   : > { %v6429_v13 = vrot.slane %v6427_v32, 4  ;;  %v6033_v43 = vor.u32 %v6031_v40, %v6030_v15  ;;  %v6035_v54 = vrot.slane %v6030_v15, 4  ;;  %v6432_v48 = vrot.slane %v6430_v33, 5  ;;  %v6321_v55 = vld [vmem:[#allocation2 + $0x28] sm:$0xf] }
 0x385   : > { %v6051_v50 = vsel %vm14712_vm9, %v6043_v16, %v6050_v14  ;;  %v6270_v21 = vsel %vm14670_vm3, %v6052_v11, %v6269_v39  ;;  %v6415_v20 = vsel %vm14730_vm11, %v6410_v23, %v6414_v34  ;;  %v6420_v53 = vrot.slane %v6419_v51, 4  ;;  %v14411_v11 = vld [vmem:[%s18052_s4 + $0x10] sm:$0xff]  }
 0x386   : > { %6268 = vst [vmem:[#allocation2 + $0x7c] sm:$0xf] %v6051_v50  ;;  %6271 = vst [vmem:[#allocation2 + $0x80] sm:$0x1] %v6270_v21  ;;  %v6438_v37 = vrot.slane %v6436_v18, 5  ;;  %v6034_v46 = vsel %vm14712_vm9, %v6026_v10, %v6033_v43  ;;  %v6263_v30 = vsel %vm14670_vm3, %v6035_v54, %v6262_v1  ;;  %v6440_v16 = vshrl.u32 %v6319_v62, 16 }
 0x387   : > { %v6446_v4 = vshll.u32 %v6364_v0, 16  ;;  %6261 = vst [vmem:[#allocation2 + $0x70] sm:$0xf] %v6034_v46  ;;  %6264 = vst [vmem:[#allocation2 + $0x74] sm:$0x1] %v6263_v30  ;;  %v6425_v60 = vsel %vm14730_vm11, %v6420_v53, %v6424_v52  ;;  %v6433_v19 = vor.u32 %v6432_v48, %v6429_v13  ;;  %v5706_v2 = vmul.f32 %v16293_v56, %v16210_v41  ;;  %v14410_v10 = vld [vmem:[%s18052_s4 + $0x8] sm:$0xff]  }
 0x388   : > { %v5704_v31 = vmul.f32 %v16210_v41, %v16299_v61  ;;  %v11892_v9 = vcombine.low %v6415_v20, %v6425_v60  ;;  %v6442_v36 = vrot.slane %v6440_v16, 4  ;;  %v5707_v39 = vmul.f32 %v16303_v12, %v16210_v41  ;;  %v6279_v54 = vld [vmem:[#allocation2 + $0x90] sm:$0xf]  ;;  %v14412_v46 = vld [vmem:[%s18052_s4 + $0x18] sm:$0xff]  }
 0x389   : > { %v6448_v62 = vrot.slane %v6446_v4, 5  ;;  %v6434_v63 = vrot.slane %v6433_v19, 4  ;;  %v5745_v34 = vadd.f32 %v16215_v49, %v5706_v2  ;;  %v5705_v56 = vmul.f32 %v16210_v41, %v16306_v5  ;;  %v6272_v4 = vld [vmem:[#allocation2 + $0x84] sm:$0xf] }
 0x38a   : > { %v5743_v28 = vadd.f32 %v16215_v49, %v5704_v31  ;;  %13345 = vmatmul.mubr.bf16.vlgmr.msra.gmra.mrb[0].mxu1 %v11892_v9  ;;  %v6443_v61 = vor.u32 %v6442_v36, %v6438_v37  ;;  %v5746_v47 = vadd.f32 %v16215_v49, %v5707_v39  ;;  %v6451_v7 = vshrl.u32 %v6320_v26, 16 }
 0x38b   : > { %v6454_v29 = vshll.u32 %v6320_v26, 16  ;;  %v6439_v40 = vsel %vm14730_vm11, %v6434_v63, %v6438_v37  ;;  %13377 = vmatpush3.bf16.msra.mxu1 %v16204_v35  ;;  %v5777_v12 = vmax.f32 %v5745_v34, 0.0  ;;  %v5744_v24 = vadd.f32 %v16215_v49, %v5705_v56  ;;  %v6283_v34 = vld [vmem:[#allocation2 + $0x98] sm:$0x1] }
 0x38c   : > { %v5775_v3 = vmax.f32 %v5743_v28, 0.0  ;;  %v6444_v52 = vrot.slane %v6443_v61, 4  ;;  %v5778_v32 = vmax.f32 %v5746_v47, 0.0  ;;  %v6453_v14 = vrot.slane %v6451_v7, 4  ;;  %13378 = vmatprep.subr.bf16.mxu1 %v14410_v10  ;;  %v14413_v7 = vld [vmem:[%s18052_s4 + $0x20] sm:$0xff]  }
 0x38d   : > { %v6456_v5 = vrot.slane %v6454_v29, 5  ;;  %v12327_v15 = vpack.c.bf16 %v5777_v12, %v5777_v12  ;;  %v5776_v33 = vmax.f32 %v5744_v24, 0.0  ;;  %v6460_v23 = vshll.u32 %v6321_v55, 16  ;;  %v6276_v12 = vld [vmem:[#allocation2 + $0x8c] sm:$0x1] }
 0x38e   : > { %v12325_v1 = vpack.c.bf16 %v5775_v3, %v5775_v3  ;;  %v6449_v35 = vsel %vm14730_vm11, %v6444_v52, %v6448_v62  ;;  %v12328_v51 = vpack.c.bf16 %v5778_v32, %v5778_v32  ;;  %v6464_v13 = vshrl.u32 %v6321_v55, 16  ;;  %v16392_v55 = vld [vmem:[#allocation2 + $0x30] sm:$0xf]  ;;  %v16401_v52 = vld [vmem:[#allocation2 + $0x34] sm:$0xf] }
 0x38f   : > { %v6457_v0 = vor.u32 %v6456_v5, %v6453_v14  ;;  %v11893_v18 = vcombine.low %v6439_v40, %v6449_v35  ;;  %v6071_v50 = vshrl.u32 %v12327_v15, 16  ;;  %v6074_v21 = vshll.u32 %v12327_v15, 16  ;;  %13379 = vmatpush3.bf16.msra.mxu1 %v14410_v10  ;;  %v6365_v10 = vld [vmem:[#allocation2 + $0x2c] sm:$0x1]  ;;  %v6366_v15 = vld [vmem:[#allocation2 + $0x38] sm:$0x1] }
 0x390   : > { %v6054_v43 = vshrl.u32 %v12325_v1, 16  ;;  %v6057_v20 = vshll.u32 %v12325_v1, 16  ;;  %v6079_v53 = vshrl.u32 %v12328_v51, 16  ;;  %v6082_v48 = vshll.u32 %v12328_v51, 16  ;;  %13380 = vmatprep.subr.bf16.mxu1 %v14411_v11  ;;  %v14414_v51 = vld [vmem:[%s18052_s4 + $0x28] sm:$0xff]  }
 0x391   : > { %v12326_v37 = vpack.c.bf16 %v5776_v33, %v5776_v33  ;;  %13348 = vmatprep.mubr.bf16.mxu1 %v11893_v18  ;;  %v6073_v30 = vrot.slane %v6071_v50, 7  ;;  %v6458_v60 = vrot.slane %v6457_v0, 4  ;;  %v6462_v19 = vrot.slane %v6460_v23, 5 }
 0x392   : > { %v6056_v16 = vrot.slane %v6054_v43, 7  ;;  %v6081_v2 = vrot.slane %v6079_v53, 7  ;;  %v6466_v9 = vrot.slane %v6464_v13, 4  ;;  %v6470_v24 = vshll.u32 %v6365_v10, 16 }
 0x393   : > { %v6062_v31 = vshrl.u32 %v12326_v37, 16  ;;  %v6065_v26 = vshll.u32 %v12326_v37, 16  ;;  %v6076_v36 = vor.u32 %v6074_v21, %v6073_v30  ;;  %v6077_v62 = vrot.slane %v6073_v30, 4  ;;  %13381 = vmatpush3.bf16.msra.mxu1 %v14411_v11  ;;  %v16418_v21 = vld [vmem:[#allocation2 + $0x3c] sm:$0xf] }
 0x394   : > { %v6059_v39 = vor.u32 %v6057_v20, %v6056_v16  ;;  %v6060_v63 = vrot.slane %v6056_v16, 4  ;;  %v6084_v28 = vor.u32 %v6082_v48, %v6081_v2  ;;  %v6086_v56 = vrot.slane %v6081_v2, 4  ;;  %13382 = vmatprep.subr.bf16.mxu1 %v14412_v46 }
 0x395   : > { %v6064_v61 = vrot.slane %v6062_v31, 7  ;;  %v6463_v47 = vsel %vm14730_vm11, %v6458_v60, %v6462_v19  ;;  %v6280_v29 = vsel %vm14722_vm10, %v6076_v36, %v6279_v54  ;;  %v6467_v3 = vor.u32 %v6466_v9, %v6462_v19  ;;  %v16437_v36 = vld [vmem:[#allocation2 + $0x40] sm:$0xf] }
 0x396   : > { %v6273_v40 = vsel %vm14722_vm10, %v6059_v39, %v6272_v4  ;;  %6281 = vst [vmem:[#allocation2 + $0x90] sm:$0xf] %v6280_v29  ;;  %v6085_v32 = vsel %vm14712_vm9, %v6077_v62, %v6084_v28  ;;  %v6284_v14 = vsel %vm14670_vm3, %v6086_v56, %v6283_v34  ;;  %v6472_v33 = vrot.slane %v6470_v24, 5 }
 0x397   : > { %6274 = vst [vmem:[#allocation2 + $0x84] sm:$0xf] %v6273_v40  ;;  %v6067_v5 = vor.u32 %v6065_v26, %v6064_v61  ;;  %v6069_v11 = vrot.slane %v6064_v61, 4  ;;  %6282 = vst [vmem:[#allocation2 + $0x94] sm:$0xf] %v6085_v32  ;;  %v6468_v1 = vrot.slane %v6467_v3, 4  ;;  %13383 = vmatpush3.bf16.msra.mxu1 %v14412_v46  ;;  %v5710_v30 = vmul.f32 %v16315_v17, %v16210_v41 }
 0x398   : > { %6285 = vst [vmem:[#allocation2 + $0x98] sm:$0x1] %v6284_v14  ;;  %v6475_v23 = vshrl.u32 %v16392_v55, 16  ;;  %v6478_v35 = vshll.u32 %v16392_v55, 16  ;;  %v6484_v18 = vshll.u32 %v16401_v52, 16  ;;  %v6488_v50 = vshrl.u32 %v16401_v52, 16  ;;  %13384 = vmatprep.subr.bf16.mxu1 %v14413_v7 }
 0x399   : > { %v6068_v0 = vsel %vm14712_vm9, %v6060_v63, %v6067_v5  ;;  %v6277_v13 = vsel %vm14670_vm3, %v6069_v11, %v6276_v12  ;;  %v6473_v43 = vsel %vm14730_vm11, %v6468_v1, %v6472_v33  ;;  %v6494_v53 = vshll.u32 %v6366_v15, 16  ;;  %v14415_v17 = vld [vmem:[%s18052_s4 + $0x30] sm:$0xff]   ;;  %v6367_v32 = vld [vmem:[#allocation2 + $0x44] sm:$0x1] }
 0x39a   : > { %6275 = vst [vmem:[#allocation2 + $0x88] sm:$0xf] %v6068_v0  ;;  %6278 = vst [vmem:[#allocation2 + $0x8c] sm:$0x1] %v6277_v13  ;;  %v6477_v54 = vrot.slane %v6475_v23, 4  ;;  %v6480_v20 = vrot.slane %v6478_v35, 5  ;;  %v11894_v48 = vcombine.low %v6463_v47, %v6473_v43  ;;  %v5708_v60 = vmul.f32 %v16210_v41, %v16317_v44 }
 0x39b   : > { %v6486_v37 = vrot.slane %v6484_v18, 5  ;;  %v6490_v46 = vrot.slane %v6488_v50, 4  ;;  %v6496_v4 = vrot.slane %v6494_v53, 5  ;;  %v5711_v19 = vmul.f32 %v16321_v8, %v16210_v41  ;;  %13385 = vmatpush3.bf16.msra.mxu1 %v14413_v7  ;;  %v16454_v33 = vld [vmem:[%s18052_s4 + $0x80] sm:$0xff]  }
 0x39c   : > { %v6481_v16 = vor.u32 %v6480_v20, %v6477_v54  ;;  %13349 = vmatmul.mubr.bf16.gmra.mrb[4].mxu1 %v11894_v48  ;;  %v5749_v31 = vadd.f32 %v16215_v49, %v5710_v30  ;;  %v5709_v26 = vmul.f32 %v16210_v41, %v16330_v42  ;;  %v6499_v10 = vshrl.u32 %v16418_v21, 16  ;;  %13386 = vmatprep.subr.bf16.mxu1 %v14414_v51  ;;  %v6293_v54 = vld [vmem:[#allocation2 + $0xa8] sm:$0xf] }
 0x39d   : > { %v6491_v2 = vor.u32 %v6490_v46, %v6486_v37  ;;  %v5747_v44 = vadd.f32 %v16215_v49, %v5708_v60  ;;  %v5750_v8 = vadd.f32 %v16215_v49, %v5711_v19  ;;  %v6502_v62 = vshll.u32 %v16418_v21, 16 }
 0x39e   : > { %v6482_v9 = vrot.slane %v6481_v16, 4  ;;  %v5781_v63 = vmax.f32 %v5749_v31, 0.0  ;;  %v5748_v41 = vadd.f32 %v16215_v49, %v5709_v26  ;;  %v6501_v42 = vrot.slane %v6499_v10, 4  ;;  %v14416_v49 = vld [vmem:[%s18052_s4 + $0x38] sm:$0xff]  }
 0x39f   : > { %v6492_v39 = vrot.slane %v6491_v2, 4  ;;  %v5779_v28 = vmax.f32 %v5747_v44, 0.0  ;;  %v5782_v56 = vmax.f32 %v5750_v8, 0.0  ;;  %v6504_v61 = vrot.slane %v6502_v62, 5  ;;  %13387 = vmatpush3.bf16.msra.mxu1 %v14414_v51  ;;  %v6286_v16 = vld [vmem:[#allocation2 + $0x9c] sm:$0xf] }
 0x3a0   : > { %v6487_v34 = vsel %vm14730_vm11, %v6482_v9, %v6486_v37  ;;  %v12331_v7 = vpack.c.bf16 %v5781_v63, %v5781_v63  ;;  %v5780_v29 = vmax.f32 %v5748_v41, 0.0  ;;  %v6508_v40 = vshll.u32 %v16437_v36, 16  ;;  %13388 = vmatprep.subr.bf16.mxu1 %v14415_v17  ;;  %v16460_v9 = vld [vmem:[#allocation2 + $0x48] sm:$0xf]  ;;  %v16464_v63 = vld [vmem:[#allocation2 + $0x4c] sm:$0xf] }
 0x3a1   : > { %v6497_v47 = vsel %vm14730_vm11, %v6492_v39, %v6496_v4  ;;  %v12329_v3 = vpack.c.bf16 %v5779_v28, %v5779_v28  ;;  %v12332_v24 = vpack.c.bf16 %v5782_v56, %v5782_v56  ;;  %v6505_v14 = vor.u32 %v6504_v61, %v6501_v42  ;;  %v6297_v4 = vld [vmem:[#allocation2 + $0xb0] sm:$0x1] }
 0x3a2   : > { %v11895_v12 = vcombine.low %v6487_v34, %v6497_v47  ;;  %v6105_v5 = vshrl.u32 %v12331_v7, 16  ;;  %v6108_v11 = vshll.u32 %v12331_v7, 16  ;;  %v12330_v15 = vpack.c.bf16 %v5780_v29, %v5780_v29  ;;  %v16466_v41 = vld [vmem:[#allocation2 + $0x50] sm:$0x1] }
 0x3a3   : > { %v16449_v1 = vrot.slane %v6508_v40, 5  ;;  %v6088_v23 = vshrl.u32 %v12329_v3, 16  ;;  %v6091_v35 = vshll.u32 %v12329_v3, 16  ;;  %v6113_v51 = vshrl.u32 %v12332_v24, 16  ;;  %13389 = vmatpush3.bf16.msra.mxu1 %v14415_v17  ;;  %v6290_v17 = vld [vmem:[#allocation2 + $0xa4] sm:$0x1] }
 0x3a4   : > { %13352 = vmatprep.mubr.bf16.mxu1 %v11895_v12  ;;  %v6116_v0 = vshll.u32 %v12332_v24, 16  ;;  %v6107_v13 = vrot.slane %v6105_v5, 7  ;;  %v6096_v18 = vshrl.u32 %v12330_v15, 16  ;;  %v6099_v50 = vshll.u32 %v12330_v15, 16  ;;  %13390 = vmatprep.subr.bf16.mxu1 %v14416_v49 }
 0x3a5   : > { %v6506_v43 = vrot.slane %v6505_v14, 4  ;;  %v6090_v20 = vrot.slane %v6088_v23, 7  ;;  %v6115_v53 = vrot.slane %v6113_v51, 7  ;;  %v6512_v48 = vshrl.u32 %v16437_v36, 16  ;;  %v14553_v14 = vld [vmem:[%s18050_s2] ss:$0 sm:$0xff] }
 0x3a6   : > { %v6518_v37 = vshll.u32 %v6367_v32, 16  ;;  %v6110_v46 = vor.u32 %v6108_v11, %v6107_v13  ;;  %v6111_v30 = vrot.slane %v6107_v13, 4  ;;  %v6098_v60 = vrot.slane %v6096_v18, 7  ;;  %v16490_v51 = vld [vmem:[#allocation2 + $0x54] sm:$0xf] }
 0x3a7   : > { %v6511_v19 = vsel %vm14730_vm11, %v6506_v43, %v16449_v1  ;;  %v6093_v2 = vor.u32 %v6091_v35, %v6090_v20  ;;  %v6094_v31 = vrot.slane %v6090_v20, 4  ;;  %v6118_v26 = vor.u32 %v6116_v0, %v6115_v53  ;;  %13391 = vmatpush3.bf16.msra.mxu1 %v14416_v49  ;;  %v14554_v13 = vld [vmem:[%s18051_s3] ss:$0 sm:$0xff] }
 0x3a8   : > { %v6120_v10 = vrot.slane %v6115_v53, 4  ;;  %v6294_v44 = vsel %vm14722_vm10, %v6110_v46, %v6293_v54  ;;  %v6101_v8 = vor.u32 %v6099_v50, %v6098_v60  ;;  %v6103_v62 = vrot.slane %v6098_v60, 4  ;;  %13424 = vmatprep.subr.bf16.mxu1 %v16454_v33 }
 0x3a9   : > { %v6514_v39 = vrot.slane %v6512_v48, 4  ;;  %6295 = vst [vmem:[#allocation2 + $0xa8] sm:$0xf] %v6294_v44  ;;  %v6287_v42 = vsel %vm14722_vm10, %v6093_v2, %v6286_v16  ;;  %v6119_v34 = vsel %vm14712_vm9, %v6111_v30, %v6118_v26  ;;  %v6520_v56 = vrot.slane %v6518_v37, 5 }
 0x3aa   : > { %v6298_v28 = vsel %vm14670_vm3, %v6120_v10, %v6297_v4  ;;  %6288 = vst [vmem:[#allocation2 + $0x9c] sm:$0xf] %v6287_v42  ;;  %6296 = vst [vmem:[#allocation2 + $0xac] sm:$0xf] %v6119_v34  ;;  %v6102_v61 = vsel %vm14712_vm9, %v6094_v31, %v6101_v8  ;;  %v6291_v47 = vsel %vm14670_vm3, %v6103_v62, %v6290_v17  ;;  %v6523_v29 = vshrl.u32 %v16460_v9, 16 }
 0x3ab   : > { %6299 = vst [vmem:[#allocation2 + $0xb0] sm:$0x1] %v6298_v28  ;;  %v6515_v7 = vor.u32 %v6514_v39, %v16449_v1  ;;  %6289 = vst [vmem:[#allocation2 + $0xa0] sm:$0xf] %v6102_v61  ;;  %v6526_v40 = vshll.u32 %v16460_v9, 16  ;;  %v6532_v49 = vshll.u32 %v16464_v63, 16  ;;  %v5714_v5 = vmul.f32 %v14553_v14, %v16344_v22 }
 0x3ac   : > { %6292 = vst [vmem:[#allocation2 + $0xa4] sm:$0x1] %v6291_v47  ;;  %v6536_v12 = vshrl.u32 %v16464_v63, 16  ;;  %v6542_v3 = vshll.u32 %v16466_v41, 16  ;;  %v6525_v32 = vrot.slane %v6523_v29, 4  ;;  %v5712_v11 = vmul.f32 %v14553_v14, %v16346_v57 }
 0x3ad   : > { %v6516_v24 = vrot.slane %v6515_v7, 4  ;;  %v6528_v15 = vrot.slane %v6526_v40, 5  ;;  %v6534_v1 = vrot.slane %v6532_v49, 5  ;;  %v5753_v18 = vadd.f32 %v14554_v13, %v5714_v5  ;;  %v16505_v17 = vld [vmem:[#allocation2 + $0x58] sm:$0xf] }
 0x3ae   : > { %v6538_v23 = vrot.slane %v6536_v12, 4  ;;  %v6544_v35 = vrot.slane %v6542_v3, 5  ;;  %v5751_v50 = vadd.f32 %v14554_v13, %v5712_v11  ;;  %v5715_v43 = vmul.f32 %v14553_v14, %v16348_v59  ;;  %v6307_v34 = vld [vmem:[#allocation2 + $0xc0] sm:$0xf]  ;;  %v16509_v5 = vld [vmem:[#allocation2 + $0x5c] sm:$0x1] }
 0x3af   : > { %v6521_v0 = vsel %vm14730_vm11, %v6516_v24, %v6520_v56  ;;  %v6529_v54 = vor.u32 %v6528_v15, %v6525_v32  ;;  %v5713_v20 = vmul.f32 %v14553_v14, %v16350_v27  ;;  %v5785_v53 = vmax.f32 %v5753_v18, 0.0  ;;  %v6300_v56 = vld [vmem:[#allocation2 + $0xb4] sm:$0xf] }
 0x3b0   : > { %v11896_v22 = vcombine.low %v6511_v19, %v6521_v0  ;;  %v6539_v57 = vor.u32 %v6538_v23, %v6534_v1  ;;  %v5783_v48 = vmax.f32 %v5751_v50, 0.0  ;;  %v5754_v37 = vadd.f32 %v14554_v13, %v5715_v43  ;;  %v16511_v43 = vld [vmem:[#allocation2 + $0x60] sm:$0xf] }
 0x3b1   : > { %v6547_v46 = vshrl.u32 %v16490_v51, 16  ;;  %v6530_v30 = vrot.slane %v6529_v54, 4  ;;  %v5752_v4 = vadd.f32 %v14554_v13, %v5713_v20  ;;  %v6550_v60 = vshll.u32 %v16490_v51, 16 }
 0x3b2   : > { %13353 = vmatmul.mubr.bf16.gmra.mrb[8].mxu1 %v11896_v22  ;;  %v6540_v16 = vrot.slane %v6539_v57, 4  ;;  %v12335_v2 = vpack.c.bf16 %v5785_v53, %v5785_v53  ;;  %v12333_v31 = vpack.c.bf16 %v5783_v48, %v5783_v48  ;;  %v5786_v26 = vmax.f32 %v5754_v37, 0.0  ;;  %v6304_v57 = vld [vmem:[#allocation2 + $0xbc] sm:$0x1]  ;;  %v16518_v48 = vld [vmem:[#allocation2 + $0x64] sm:$0xf] }
 0x3b3   : > { %v6549_v59 = vrot.slane %v6547_v46, 4  ;;  %v6535_v19 = vsel %vm14730_vm11, %v6530_v30, %v6534_v1  ;;  %v5784_v10 = vmax.f32 %v5752_v4, 0.0  ;;  %v6552_v44 = vrot.slane %v6550_v60, 5  ;;  %v16520_v4 = vld [vmem:[#allocation2 + $0x68] sm:$0x1] }
 0x3b4   : > { %v6545_v27 = vsel %vm14730_vm11, %v6540_v16, %v6544_v35  ;;  %v6139_v62 = vshrl.u32 %v12335_v2, 16  ;;  %v6142_v39 = vshll.u32 %v12335_v2, 16  ;;  %v6122_v42 = vshrl.u32 %v12333_v31, 16  ;;  %v6311_v35 = vld [vmem:[#allocation2 + $0xc8] sm:$0x1] }
 0x3b5   : > { %v11897_v8 = vcombine.low %v6535_v19, %v6545_v27  ;;  %v6125_v28 = vshll.u32 %v12333_v31, 16  ;;  %v12336_v61 = vpack.c.bf16 %v5786_v26, %v5786_v26  ;;  %v12334_v47 = vpack.c.bf16 %v5784_v10, %v5784_v10  ;;  %v16522_v60 = vld [vmem:[#allocation2 + $0x6c] sm:$0xf] }
 0x3b6   : > { %v6553_v7 = vor.u32 %v6552_v44, %v6549_v59  ;;  %v6141_v29 = vrot.slane %v6139_v62, 7  ;;  %v6124_v40 = vrot.slane %v6122_v42, 7  ;;  %v6556_v49 = vshll.u32 %v16505_v17, 16  ;;  %v16527_v59 = vld [vmem:[#allocation2 + $0x70] sm:$0xf] }
 0x3b7   : > { %13356 = vmatprep.mubr.bf16.mxu1 %v11897_v8  ;;  %v6560_v12 = vshrl.u32 %v16505_v17, 16  ;;  %v6147_v3 = vshrl.u32 %v12336_v61, 16  ;;  %v6150_v24 = vshll.u32 %v12336_v61, 16  ;;  %v6130_v32 = vshrl.u32 %v12334_v47, 16  ;;  %v16545_v61 = vld [vmem:[#allocation2 + $0x7c] sm:$0xf] }
 0x3b8   : > { %v6133_v14 = vshll.u32 %v12334_v47, 16  ;;  %v6144_v11 = vor.u32 %v6142_v39, %v6141_v29  ;;  %v6145_v15 = vrot.slane %v6141_v29, 4  ;;  %v6127_v1 = vor.u32 %v6125_v28, %v6124_v40 }
 0x3b9   : > { %v6128_v23 = vrot.slane %v6124_v40, 4  ;;  %v6149_v0 = vrot.slane %v6147_v3, 7  ;;  %v6132_v13 = vrot.slane %v6130_v32, 7  ;;  %v6554_v18 = vrot.slane %v6553_v7, 4  ;;  %v16549_v40 = vld [vmem:[#allocation2 + $0x74] sm:$0x1] }
 0x3ba   : > { %v6558_v50 = vrot.slane %v6556_v49, 5  ;;  %v6308_v22 = vsel %vm14722_vm10, %v6144_v11, %v6307_v34  ;;  %v6301_v54 = vsel %vm14722_vm10, %v6127_v1, %v6300_v56  ;;  %v6562_v20 = vrot.slane %v6560_v12, 4  ;;  %v16539_v34 = vld [vmem:[#allocation2 + $0x78] sm:$0xf] }
 0x3bb   : > { %v6566_v53 = vshll.u32 %v16509_v5, 16  ;;  %6309 = vst [vmem:[#allocation2 + $0xc0] sm:$0xf] %v6308_v22  ;;  %6302 = vst [vmem:[#allocation2 + $0xb4] sm:$0xf] %v6301_v54  ;;  %v6152_v37 = vor.u32 %v6150_v24, %v6149_v0  ;;  %v6154_v46 = vrot.slane %v6149_v0, 4  ;;  %v6135_v30 = vor.u32 %v6133_v14, %v6132_v13 }
 0x3bc   : > { %v6137_v16 = vrot.slane %v6132_v13, 4  ;;  %v6559_v45 = vsel %vm14730_vm11, %v6554_v18, %v6558_v50  ;;  %v6563_v2 = vor.u32 %v6562_v20, %v6558_v50  ;;  %v6571_v26 = vshrl.u32 %v16511_v43, 16  ;;  %v16554_v0 = vld [vmem:[#allocation2 + $0x80] sm:$0x1] }
 0x3bd   : > { %v6568_v31 = vrot.slane %v6566_v53, 5  ;;  %v6153_v19 = vsel %vm14712_vm9, %v6145_v15, %v6152_v37  ;;  %v6312_v27 = vsel %vm14670_vm3, %v6154_v46, %v6311_v35  ;;  %v6136_v10 = vsel %vm14712_vm9, %v6128_v23, %v6135_v30  ;;  %v16559_v30 = vld [vmem:[#allocation2 + $0x84] sm:$0xf] }
 0x3be   : > { %v6305_v44 = vsel %vm14670_vm3, %v6137_v16, %v6304_v57  ;;  %6310 = vst [vmem:[#allocation2 + $0xc4] sm:$0xf] %v6153_v19  ;;  %6313 = vst [vmem:[#allocation2 + $0xc8] sm:$0x1] %v6312_v27  ;;  %v6564_v8 = vrot.slane %v6563_v2, 4  ;;  %v6573_v62 = vrot.slane %v6571_v26, 4 }
 0x3bf   : > { %6303 = vst [vmem:[#allocation2 + $0xb8] sm:$0xf] %v6136_v10  ;;  %6306 = vst [vmem:[#allocation2 + $0xbc] sm:$0x1] %v6305_v44  ;;  %v6574_v39 = vshll.u32 %v16511_v43, 16  ;;  %v6580_v42 = vshll.u32 %v16518_v48, 16 }
 0x3c0   : > { %v6584_v28 = vshrl.u32 %v16518_v48, 16  ;;  %v6590_v6 = vshll.u32 %v16520_v4, 16  ;;  %v6595_v56 = vshrl.u32 %v16522_v60, 16  ;;  %v6598_v38 = vshll.u32 %v16522_v60, 16  ;;  %v16567_v44 = vld [vmem:[#allocation2 + $0x88] sm:$0xf] }
 0x3c1   : > { %v6569_v47 = vsel %vm14730_vm11, %v6564_v8, %v6568_v31  ;;  %v6576_v7 = vrot.slane %v6574_v39, 5  ;;  %v6582_v29 = vrot.slane %v6580_v42, 5  ;;  %v6604_v49 = vshll.u32 %v16527_v59, 16 }
 0x3c2   : > { %v11898_v12 = vcombine.low %v6559_v45, %v6569_v47  ;;  %v6586_v3 = vrot.slane %v6584_v28, 4  ;;  %v6592_v24 = vrot.slane %v6590_v6, 5  ;;  %v6597_v32 = vrot.slane %v6595_v56, 4  ;;  %v16572_v28 = vld [vmem:[#allocation2 + $0x90] sm:$0xf] }
 0x3c3   : > { %v6577_v14 = vor.u32 %v6576_v7, %v6573_v62  ;;  %v6600_v11 = vrot.slane %v6598_v38, 5  ;;  %v6606_v15 = vrot.slane %v6604_v49, 5  ;;  %v6608_v1 = vshrl.u32 %v16527_v59, 16  ;;  %v16574_v47 = vld [vmem:[#allocation2 + $0x8c] sm:$0x1] }
 0x3c4   : > { %13357 = vmatmul.mubr.bf16.gmra.mrb[12].mxu1 %v11898_v12  ;;  %v6587_v23 = vor.u32 %v6586_v3, %v6582_v29  ;;  %v6614_v35 = vshll.u32 %v16549_v40, 16  ;;  %v6619_v13 = vshrl.u32 %v16539_v34, 16  ;;  %v6622_v18 = vshll.u32 %v16539_v34, 16 }
 0x3c5   : > { %v6578_v50 = vrot.slane %v6577_v14, 4  ;;  %v6601_v22 = vor.u32 %v6600_v11, %v6597_v32  ;;  %v6610_v54 = vrot.slane %v6608_v1, 4  ;;  %v6628_v57 = vshll.u32 %v16545_v61, 16 }
 0x3c6   : > { %v6588_v20 = vrot.slane %v6587_v23, 4  ;;  %v6616_v53 = vrot.slane %v6614_v35, 5  ;;  %v6621_v37 = vrot.slane %v6619_v13, 4  ;;  %v6624_v46 = vrot.slane %v6622_v18, 5  ;;  %v16586_v13 = vld [vmem:[#allocation2 + $0x98] sm:$0x1] }
 0x3c7   : > { %v6583_v16 = vsel %vm14730_vm11, %v6578_v50, %v6582_v29  ;;  %v6602_v45 = vrot.slane %v6601_v22, 4  ;;  %v6611_v2 = vor.u32 %v6610_v54, %v6606_v15  ;;  %v6630_v31 = vrot.slane %v6628_v57, 5 }
 0x3c8   : > { %v6593_v26 = vsel %vm14730_vm11, %v6588_v20, %v6592_v24  ;;  %v6625_v19 = vor.u32 %v6624_v46, %v6621_v37  ;;  %v6632_v27 = vshrl.u32 %v16545_v61, 16  ;;  %v6638_v10 = vshll.u32 %v16554_v0, 16  ;;  %v16581_v24 = vld [vmem:[#allocation2 + $0x94] sm:$0xf]  ;;  %v16591_v20 = vld [vmem:[#allocation2 + $0x9c] sm:$0xf] }
 0x3c9   : > { %v11899_v8 = vcombine.low %v6583_v16, %v6593_v26  ;;  %v6607_v62 = vsel %vm14730_vm11, %v6602_v45, %v6606_v15  ;;  %v6612_v39 = vrot.slane %v6611_v2, 4  ;;  %v6643_v42 = vshrl.u32 %v16559_v30, 16  ;;  %v16594_v45 = vld [vmem:[#allocation2 + $0xa0] sm:$0xf] }
 0x3ca   : > { %v6626_v6 = vrot.slane %v6625_v19, 4  ;;  %v6634_v56 = vrot.slane %v6632_v27, 4  ;;  %v6640_v38 = vrot.slane %v6638_v10, 5  ;;  %v6646_v7 = vshll.u32 %v16559_v30, 16  ;;  %v16598_v27 = vld [vmem:[#allocation2 + $0xa4] sm:$0x1] }
 0x3cb   : > { %13360 = vmatprep.mubr.bf16.mxu1 %v11899_v8  ;;  %v6617_v29 = vsel %vm14730_vm11, %v6612_v39, %v6616_v53  ;;  %v6645_v49 = vrot.slane %v6643_v42, 4  ;;  %v6652_v12 = vshll.u32 %v16567_v44, 16  ;;  %v6656_v3 = vshrl.u32 %v16567_v44, 16  ;;  %v16601_v42 = vld [vmem:[#allocation2 + $0xa8] sm:$0xf] }
 0x3cc   : > { %v11900_v32 = vcombine.low %v6607_v62, %v6617_v29  ;;  %v6631_v14 = vsel %vm14730_vm11, %v6626_v6, %v6630_v31  ;;  %v6635_v11 = vor.u32 %v6634_v56, %v6630_v31  ;;  %v6648_v15 = vrot.slane %v6646_v7, 5 }
 0x3cd   : > { %v6654_v1 = vrot.slane %v6652_v12, 5  ;;  %v6658_v23 = vrot.slane %v6656_v3, 4  ;;  %v6662_v35 = vshll.u32 %v16574_v47, 16  ;;  %v6667_v18 = vshrl.u32 %v16572_v28, 16 }
 0x3ce   : > { %13361 = vmatmul.mubr.bf16.gmra.mrb[16].mxu1 %v11900_v32  ;;  %v6636_v50 = vrot.slane %v6635_v11, 4  ;;  %v6649_v22 = vor.u32 %v6648_v15, %v6645_v49  ;;  %v6670_v54 = vshll.u32 %v16572_v28, 16  ;;  %v6676_v57 = vshll.u32 %v16581_v24, 16  ;;  %v16610_v32 = vld [vmem:[#allocation2 + $0xac] sm:$0xf] }
 0x3cf   : > { %v6659_v53 = vor.u32 %v6658_v23, %v6654_v1  ;;  %v6664_v37 = vrot.slane %v6662_v35, 5  ;;  %v6669_v46 = vrot.slane %v6667_v18, 4  ;;  %v6680_v16 = vshrl.u32 %v16581_v24, 16 }
 0x3d0   : > { %v6641_v2 = vsel %vm14730_vm11, %v6636_v50, %v6640_v38  ;;  %v6650_v31 = vrot.slane %v6649_v22, 4  ;;  %v6672_v26 = vrot.slane %v6670_v54, 5  ;;  %v6678_v19 = vrot.slane %v6676_v57, 5  ;;  %v16616_v54 = vld [vmem:[#allocation2 + $0xb4] sm:$0xf] }
 0x3d1   : > { %v11901_v10 = vcombine.low %v6631_v14, %v6641_v2  ;;  %v6660_v8 = vrot.slane %v6659_v53, 4  ;;  %v6682_v62 = vrot.slane %v6680_v16, 4  ;;  %v6686_v39 = vshll.u32 %v16586_v13, 16  ;;  %v16622_v16 = vld [vmem:[#allocation2 + $0xb8] sm:$0xf] }
 0x3d2   : > { %v6655_v6 = vsel %vm14730_vm11, %v6650_v31, %v6654_v1  ;;  %v6673_v56 = vor.u32 %v6672_v26, %v6669_v46  ;;  %v6691_v7 = vshrl.u32 %v16591_v20, 16  ;;  %v6694_v38 = vshll.u32 %v16591_v20, 16  ;;  %v16612_v1 = vld [vmem:[#allocation2 + $0xb0] sm:$0x1] }
 0x3d3   : > { %13364 = vmatprep.mubr.bf16.mxu1 %v11901_v10  ;;  %v6665_v29 = vsel %vm14730_vm11, %v6660_v8, %v6664_v37  ;;  %v6683_v49 = vor.u32 %v6682_v62, %v6678_v19  ;;  %v6688_v12 = vrot.slane %v6686_v39, 5  ;;  %v6700_v3 = vshll.u32 %v16594_v45, 16 }
 0x3d4   : > { %v11902_v14 = vcombine.low %v6655_v6, %v6665_v29  ;;  %v6674_v11 = vrot.slane %v6673_v56, 4  ;;  %v6693_v15 = vrot.slane %v6691_v7, 4  ;;  %v6696_v23 = vrot.slane %v6694_v38, 5  ;;  %v16627_v56 = vld [vmem:[#allocation2 + $0xbc] sm:$0x1] }
 0x3d5   : > { %v6684_v35 = vrot.slane %v6683_v49, 4  ;;  %v6702_v18 = vrot.slane %v6700_v3, 5  ;;  %v6704_v50 = vshrl.u32 %v16594_v45, 16  ;;  %v6710_v22 = vshll.u32 %v16598_v27, 16 }
 0x3d6   : > { %13365 = vmatmul.mubr.bf16.gmra.mrb[20].mxu1 %v11902_v14  ;;  %v6679_v57 = vsel %vm14730_vm11, %v6674_v11, %v6678_v19  ;;  %v6697_v53 = vor.u32 %v6696_v23, %v6693_v15  ;;  %v6715_v37 = vshrl.u32 %v16601_v42, 16  ;;  %v6718_v46 = vshll.u32 %v16601_v42, 16 }
 0x3d7   : > { %v6689_v2 = vsel %vm14730_vm11, %v6684_v35, %v6688_v12  ;;  %v6706_v31 = vrot.slane %v6704_v50, 4  ;;  %v6712_v26 = vrot.slane %v6710_v22, 5  ;;  %v6724_v10 = vshll.u32 %v16610_v32, 16 }
 0x3d8   : > { %v11903_v8 = vcombine.low %v6679_v57, %v6689_v2  ;;  %v6698_v62 = vrot.slane %v6697_v53, 4  ;;  %v6717_v39 = vrot.slane %v6715_v37, 4  ;;  %v6720_v6 = vrot.slane %v6718_v46, 5 }
 0x3d9   : > { %v6707_v19 = vor.u32 %v6706_v31, %v6702_v18  ;;  %v6726_v7 = vrot.slane %v6724_v10, 5  ;;  %v6728_v38 = vshrl.u32 %v16610_v32, 16  ;;  %v6734_v29 = vshll.u32 %v16612_v1, 16 }
 0x3da   : > { %13368 = vmatprep.mubr.bf16.mxu1 %v11903_v8  ;;  %v6721_v49 = vor.u32 %v6720_v6, %v6717_v39  ;;  %v6739_v12 = vshrl.u32 %v16616_v54, 16  ;;  %v6742_v3 = vshll.u32 %v16616_v54, 16  ;;  %v6703_v14 = vsel %vm14730_vm11, %v6698_v62, %v6702_v18 }
 0x3db   : > { %v6708_v11 = vrot.slane %v6707_v19, 4  ;;  %v6730_v15 = vrot.slane %v6728_v38, 4  ;;  %v6748_v23 = vshll.u32 %v16622_v16, 16  ;;  %v6752_v57 = vshrl.u32 %v16622_v16, 16 }
 0x3dc   : > { %v6722_v35 = vrot.slane %v6721_v49, 4  ;;  %v6741_v50 = vrot.slane %v6739_v12, 4  ;;  %v6744_v22 = vrot.slane %v6742_v3, 5  ;;  %v6758_v2 = vshll.u32 %v16627_v56, 16 }
 0x3dd   : > { %v6713_v53 = vsel %vm14730_vm11, %v6708_v11, %v6712_v26  ;;  %v6731_v37 = vor.u32 %v6730_v15, %v6726_v7  ;;  %v6750_v46 = vrot.slane %v6748_v23, 5  ;;  %v6754_v8 = vrot.slane %v6752_v57, 4 }
 0x3de   : > { %v11904_v31 = vcombine.low %v6703_v14, %v6713_v53  ;;  %v6745_v10 = vor.u32 %v6744_v22, %v6741_v50  ;;  %v6736_v62 = vrot.slane %v6734_v29, 5  ;;  %v6727_v19 = vsel %vm14730_vm11, %v6722_v35, %v6726_v7  ;;  %v14555_v53 = vld [vmem:[#allocation2] sm:$0xf] }
 0x3df   : > { %v6732_v18 = vrot.slane %v6731_v37, 4  ;;  %v6755_v6 = vor.u32 %v6754_v8, %v6750_v46  ;;  %v6760_v49 = vrot.slane %v6758_v2, 5  ;;  %v11922_v14 = vcombine.low %v16490_v51, %v16505_v17  ;;  %v16664_v37 = vld [vmem:[#allocation2 + $0x4] sm:$0xf] }
 0x3e0   : > { %13369 = vmatmul.mubr.bf16.gmra.mrb[24].mxu1 %v11904_v31  ;;  %v6746_v39 = vrot.slane %v6745_v10, 4  ;;  %v11923_v29 = vcombine.low %v16511_v43, %v16518_v48  ;;  %v11924_v11 = vcombine.low %v16522_v60, %v16527_v59  ;;  %v11925_v7 = vcombine.low %v16539_v34, %v16545_v61  ;;  %v14557_v31 = vld [vmem:[#allocation2 + $0xc] sm:$0xf]  ;;  %v16669_v10 = vld [vmem:[#allocation2 + $0x10] sm:$0xf] }
 0x3e1   : > { %v6737_v38 = vsel %vm14730_vm11, %v6732_v18, %v6736_v62  ;;  %v6756_v3 = vrot.slane %v6755_v6, 4  ;;  %v11916_v8 = vcombine.low %v14557_v31, %v16669_v10  ;;  %v14422_v18 = vld [vmem:[%s18052_s4 + $0x88] sm:$0xff]   ;;  %v7364_v62 = vld [vmem:[#allocation2 + $0x54] sm:$0xe]  ;;  %v16675_v6 = vld [vmem:[#allocation2 + $0x1c] sm:$0xf]  ;;  %v18173_v51 = vcombine.low %v16559_v30, %v16567_v44 }
 0x3e2   : > { %v11905_v26 = vcombine.low %v6727_v19, %v6737_v38  ;;  %v6751_v12 = vsel %vm14730_vm11, %v6746_v39, %v6750_v46  ;;  %v11915_v46 = vcombine.low %v14555_v53, %v16664_v37  ;;  %v14559_v39 = vld [vmem:[#allocation2 + $0x18] sm:$0xf]  ;;  %v7365_v38 = vld [vmem:[#allocation2 + $0x60] sm:$0xe]  ;;  %v7466_v2 = vrot.slane %v16520_v4, 5 }
 0x3e3   : > { %v6761_v23 = vsel %vm14730_vm11, %v6756_v3, %v6760_v49  ;;  %v11917_v19 = vcombine.low %v14559_v39, %v16675_v6  ;;  %v7456_v49 = vrot.slane %v16505_v17, 5  ;;  %v7366_v3 = vld [vmem:[#allocation2 + $0x6c] sm:$0xe]  ;;  %v11947_v39 = vrot.slane %v7365_v38, 9 }
 0x3e4   : > { %13372 = vmatprep.mubr.bf16.mxu1 %v11905_v26  ;;  %v11906_v57 = vcombine.low %v6751_v12, %v6761_v23  ;;  %v11946_v26 = vrot.slane %v7364_v62, 9  ;;  %v7463_v12 = vrot.slane %v16518_v48, 5  ;;  %v14561_v23 = vld [vmem:[#allocation2 + $0x24] sm:$0xf]  ;;  %v7470_v38 = vrot.slane %v16527_v59, 5 }
 0x3e5   : > { %v7458_v31 = vrot.slane %v7456_v49, 4  ;;  %v18174_v17 = vcombine.low %v16572_v28, %v16581_v24  ;;  %v7407_v43 = vrot.slane %v16664_v37, 5  ;;  %v7357_v48 = vld [vmem:[#allocation2] sm:$0xe]  ;;  %v18175_v59 = vcombine.low %v16591_v20, %v16594_v45  ;;  %v7359_v37 = vld [vmem:[#allocation2 + $0x18] sm:$0xe] }
 0x3e6   : > { %v16692_v62 = vsel %vm15184_vm14, %v11946_v26, %v7456_v49  ;;  %v16701_v50 = vsel %vm15184_vm14, %v11947_v39, %v7463_v12  ;;  %v7473_v49 = vrot.slane %v16549_v40, 5  ;;  %v7477_v26 = vrot.slane %v16545_v61, 5  ;;  %v7369_v39 = vld [vmem:[#allocation2 + $0x90] sm:$0xe] }
 0x3e7   : > { %v7409_v60 = vrot.slane %v7407_v43, 4  ;;  %v18176_v34 = vcombine.low %v16601_v42, %v16610_v32  ;;  %v7421_v28 = vrot.slane %v16675_v6, 5  ;;  %v18177_v20 = vcombine.low %v16616_v54, %v16622_v16  ;;  %v14564_v42 = vld [vmem:[#allocation2 + $0x14] sm:$0x1] }
 0x3e8   : > { %13373 = vmatmul.mubr.bf16.gmra.mrb[28].mxu1 %v11906_v57  ;;  %v16681_v57 = vld [vmem:[#allocation2 + $0x28] sm:$0xf]  ;;  %v7479_v40 = vrot.slane %v7477_v26, 4  ;;  %v14566_v54 = vld [vmem:[#allocation2 + $0x34] sm:$0xf] }
 0x3e9   : > { %13392 = vmatprep.mubr.bf16.mxu1 %v11915_v46  ;;  %v11918_v53 = vcombine.low %v14561_v23, %v16681_v57  ;;  %v14425_v46 = vld [vmem:[%s18052_s4 + $0x90] sm:$0xff]   ;;  %v7367_v23 = vld [vmem:[#allocation2 + $0x78] sm:$0xe]  ;;  %v7428_v6 = vrot.slane %v16681_v57, 5  ;;  %v7360_v57 = vld [vmem:[#allocation2 + $0x24] sm:$0xe] }
 0x3f0   : > { %13393 = vmatmul.mubr.bf16.vlgmr.msra.gmra.mrb[0].mxu1 %v11916_v8  ;;  %v7459_v8 = vrot.slane %v16509_v5, 5  ;;  %v11948_v5 = vrot.slane %v7366_v3, 9 }
 0x3f1   : > { %13396 = vmatprep.mubr.bf16.mxu1 %v11917_v19  ;;  %13425 = vmatpush3.bf16.msra.mxu1 %v16454_v33  ;;  %v11919_v33 = vcombine.low %v16392_v55, %v16401_v52  ;;  %v7465_v19 = vrot.slane %v7463_v12, 4  ;;  %v7368_v55 = vld [vmem:[#allocation2 + $0x84] sm:$0xe]  ;;  %v14428_v12 = vld [vmem:[%s18052_s4 + $0x98] sm:$0xff]   ;;  %v7484_v52 = vrot.slane %v16567_v44, 5  ;;  %v7414_v44 = vrot.slane %v16669_v10, 5 }
 0x3f2   : > { %13426 = vmatprep.subr.bf16.mxu1 %v14422_v18  ;;  %v16697_v22 = vsel %vm15184_vm14, %v7458_v31, %v7459_v8  ;;  %v11949_v31 = vrot.slane %v7367_v23, 9  ;;  %v7480_v8 = vrot.slane %v16554_v0, 5  ;;  %v7487_v0 = vrot.slane %v16574_v47, 5  ;;  %v14431_v47 = vld [vmem:[%s18052_s4 + $0xa0] sm:$0xff]  }
 0x3f3   : > { %v16708_v4 = vsel %vm15184_vm14, %v7465_v19, %v7466_v2  ;;  %v16720_v2 = vsel %vm15184_vm14, %v11948_v5, %v7470_v38  ;;  %v11950_v19 = vrot.slane %v7368_v55, 9  ;;  %v7491_v23 = vrot.slane %v16581_v24, 5 }
 0x3f4   : > { %v16729_v3 = vsel %vm15184_vm14, %v11949_v31, %v7477_v26  ;;  %v11951_v55 = vrot.slane %v7369_v39, 9  ;;  %v11920_v26 = vcombine.low %v16418_v21, %v16437_v36  ;;  %v7371_v31 = vld [vmem:[#allocation2 + $0xa8] sm:$0xe]  ;;  %v7498_v36 = vrot.slane %v16594_v45, 5  ;;  %v7358_v45 = vld [vmem:[#allocation2 + $0xc] sm:$0xe] }
 0x3f5   : > { %13427 = vmatpush3.bf16.msra.mxu1 %v14422_v18  ;;  %v7472_v18 = vrot.slane %v7470_v38, 4  ;;  %v7486_v38 = vrot.slane %v7484_v52, 4  ;;  %v11921_v5 = vcombine.low %v16460_v9, %v16464_v63 }
 0x3f6   : > { %13428 = vmatprep.subr.bf16.mxu1 %v14425_v46  ;;  %v16757_v21 = vsel %vm15184_vm14, %v11951_v55, %v7491_v23  ;;  %v11953_v55 = vrot.slane %v7371_v31, 9 }
 0x3f7   : > { %v16725_v35 = vsel %vm15184_vm14, %v7472_v18, %v7473_v49  ;;  %v7370_v49 = vld [vmem:[#allocation2 + $0x9c] sm:$0xe]  ;;  %v7494_v18 = vrot.slane %v16586_v13, 5  ;;  %v16753_v39 = vsel %vm15184_vm14, %v7486_v38, %v7487_v0  ;;  %v7500_v38 = vrot.slane %v7498_v36, 4 }
 0x3f8   : > { %13397 = vmatmul.mubr.bf16.gmra.mrb[4].mxu1 %v11918_v53  ;;  %v16737_v53 = vsel %vm15184_vm14, %v7479_v40, %v7480_v8  ;;  %v16749_v8 = vsel %vm15184_vm14, %v11950_v19, %v7484_v52  ;;  %v7505_v52 = vrot.slane %v16610_v32, 5  ;;  %v7372_v19 = vld [vmem:[#allocation2 + $0xb4] sm:$0xe]  ;;  %v7417_v32 = vrot.slane %v14564_v42, 5  ;;  %v7362_v42 = vld [vmem:[#allocation2 + $0x3c] sm:$0xe] }
 0x3f9   : > { %13400 = vmatprep.mubr.bf16.mxu1 %v11919_v33  ;;  %13429 = vmatpush3.bf16.msra.mxu1 %v14425_v46  ;;  %v7493_v33 = vrot.slane %v7491_v23, 4  ;;  %v11952_v46 = vrot.slane %v7370_v49, 9  ;;  %v7501_v23 = vrot.slane %v16598_v27, 5  ;;  %v11954_v31 = vrot.slane %v7372_v19, 9 }
 0x3fa   : > { %13430 = vmatprep.subr.bf16.mxu1 %v14428_v12  ;;  %v7507_v49 = vrot.slane %v7505_v52, 4  ;;  %v16787_v9 = vsel %vm15184_vm14, %v11953_v55, %v7505_v52  ;;  %v11940_v55 = vrot.slane %v7358_v45, 9 }
 0x3fb   : > { %v16764_v13 = vsel %vm15184_vm14, %v7493_v33, %v7494_v18  ;;  %v14434_v33 = vld [vmem:[%s18052_s4 + $0xa8] sm:$0xff]   ;;  %v7508_v18 = vrot.slane %v16612_v1, 5  ;;  %v16779_v0 = vsel %vm15184_vm14, %v11952_v46, %v7498_v36  ;;  %v16783_v27 = vsel %vm15184_vm14, %v7500_v38, %v7501_v23  ;;  %v14565_v38 = vld [vmem:[#allocation2 + $0x20] sm:$0x1] }
 0x3fc   : > { %v7515_v46 = vrot.slane %v16627_v56, 5  ;;  %v7424_v23 = vrot.slane %v14565_v38, 5  ;;  %v7363_v38 = vld [vmem:[#allocation2 + $0x48] sm:$0xe]  ;;  %v8265_v36 = vld [vmem:[#allocation2 + $0xac] sm:$0xf] }
 0x3fd   : > { %13431 = vmatpush3.bf16.msra.mxu1 %v14428_v12  ;;  %v7512_v12 = vrot.slane %v16622_v16, 5  ;;  %v16793_v1 = vsel %vm15184_vm14, %v7507_v49, %v7508_v18  ;;  %v7435_v16 = vrot.slane %v14566_v54, 5  ;;  %v7415_v18 = vsel %vm15184_vm14, %v11940_v55, %v7414_v44  ;;  %v14445_v55 = vld [vmem:[%s18052_s4 + $0xe0] sm:$0xff]  }
 0x3fe   : > { %13432 = vmatprep.subr.bf16.mxu1 %v14431_v47 }
 0x3ff   : > { %v7514_v15 = vrot.slane %v7512_v12, 4  ;;  %v16803_v52 = vsel %vm15184_vm14, %v11954_v31, %v7512_v12 }
 0x400   : > { %13401 = vmatmul.mubr.bf16.gmra.mrb[8].mxu1 %v11920_v26  ;;  %v14437_v26 = vld [vmem:[%s18052_s4 + $0xb0] sm:$0xff]  }
 0x401   : > { %13404 = vmatprep.mubr.bf16.mxu1 %v11921_v5  ;;  %13433 = vmatpush3.bf16.msra.mxu1 %v14431_v47  ;;  %v16807_v19 = vsel %vm15184_vm14, %v7514_v15, %v7515_v46  ;;  %v14440_v5 = vld [vmem:[%s18052_s4 + $0xb8] sm:$0xff]   ;;  %v14441_v15 = vld [vmem:[%s18052_s4 + $0xc0] sm:$0xff]   ;;  %v11939_v47 = vrot.slane %v7357_v48, 9  ;;  %v14442_v46 = vld [vmem:[%s18052_s4 + $0xc8] sm:$0xff]  }
 0x402   : > { %13434 = vmatprep.subr.bf16.mxu1 %v14434_v33  ;;  %v7361_v48 = vld [vmem:[#allocation2 + $0x30] sm:$0xe] }
 0x403   : > { %v7408_v61 = vsel %vm15184_vm14, %v11939_v47, %v7407_v43  ;;  %v14443_v47 = vld [vmem:[%s18052_s4 + $0xd0] sm:$0xff]  }
 0x405   : > { %13435 = vmatpush3.bf16.msra.mxu1 %v14434_v33  ;;  %v11941_v33 = vrot.slane %v7359_v37, 9 }
 0x406   : > { %13436 = vmatprep.subr.bf16.mxu1 %v14437_v26 }
 0x407   : > { %v7422_v31 = vsel %vm15184_vm14, %v11941_v33, %v7421_v28  ;;  %v11945_v33 = vrot.slane %v7363_v38, 9  ;;  %v16945_v38 = vld [vmem:[#allocation2 + $0x64] sm:$0xf] }
 0x408   : > { %13405 = vmatmul.mubr.bf16.gmra.mrb[12].mxu1 %v11922_v14  ;;  %v14563_v14 = vld [vmem:[#allocation2 + $0x8] sm:$0x1] }
 0x409   : > { %13408 = vmatprep.mubr.bf16.mxu1 %v11923_v29  ;;  %13437 = vmatpush3.bf16.msra.mxu1 %v14437_v26  ;;  %v7410_v29 = vrot.slane %v14563_v14, 5  ;;  %v14568_v14 = vld [vmem:[#allocation2 + $0x38] sm:$0x1] }
 0x40a   : > { %13438 = vmatprep.subr.bf16.mxu1 %v14440_v5 }
 0x40b   : > { %v7411_v30 = vsel %vm15184_vm14, %v7409_v60, %v7410_v29  ;;  %v7438_v29 = vrot.slane %v14568_v14, 5  ;;  %v11942_v60 = vrot.slane %v7360_v57, 9  ;;  %v8981_v57 = vld [vmem:[#allocation2 + $0x24] sm:$0xe]  ;;  %v16910_v14 = vld [vmem:[#allocation2 + $0x44] sm:$0x1] }
 0x40c   : > { %v11971_v24 = vcombine.low %v7408_v61, %v7411_v30  ;;  %v11943_v30 = vrot.slane %v7361_v48, 9 }
 0x40d   : > { %13439 = vmatpush3.bf16.msra.mxu1 %v14440_v5  ;;  %v7430_v5 = vrot.slane %v7428_v6, 4 }
 0x40e   : > { %13472 = vmatprep.subr.bf16.mxu1 %v14441_v15 }
 0x410   : > { %13409 = vmatmul.mubr.bf16.gmra.mrb[16].mxu1 %v11924_v11  ;;  %v7416_v11 = vrot.slane %v7414_v44, 4  ;;  %v7449_v44 = vrot.slane %v16464_v63, 5  ;;  %v14570_v63 = vld [vmem:[#allocation2 + $0x44] sm:$0x1] }
 0x411   : > { %13412 = vmatprep.mubr.bf16.mxu1 %v11925_v7  ;;  %v7423_v7 = vrot.slane %v7421_v28, 4  ;;  %v7429_v28 = vsel %vm15184_vm14, %v11942_v60, %v7428_v6  ;;  %v7445_v37 = vrot.slane %v14570_v63, 5  ;;  %v18178_v60 = vcombine.low %v16692_v62, %v16697_v22  ;;  %v16929_v22 = vld [vmem:[%s18052_s4 + $0x100] sm:$0xff]   ;;  %v16931_v62 = vld [vmem:[#allocation2 + $0x5c] sm:$0x1] }
 0x412   : > { %v7418_v10 = vsel %vm15184_vm14, %v7416_v11, %v7417_v32  ;;  %v7436_v11 = vsel %vm15184_vm14, %v11943_v30, %v7435_v16  ;;  %v7451_v32 = vrot.slane %v7449_v44, 4 }
 0x413   : > { %v7425_v49 = vsel %vm15184_vm14, %v7423_v7, %v7424_v23  ;;  %v11972_v12 = vcombine.low %v7415_v18, %v7418_v10  ;;  %v7452_v23 = vrot.slane %v16466_v41, 5  ;;  %v11944_v10 = vrot.slane %v7362_v42, 9  ;;  %v14446_v18 = vld [vmem:[%s18052_s4 + $0xe8] sm:$0xff]  }
 0x414   : > { %v11973_v26 = vcombine.low %v7422_v31, %v7425_v49  ;;  %v7450_v41 = vsel %vm15184_vm14, %v11945_v33, %v7449_v44  ;;  %v14447_v31 = vld [vmem:[%s18052_s4 + $0xf0] sm:$0xff]   ;;  %v18179_v44 = vcombine.low %v16701_v50, %v16708_v4 }
 0x415   : > { %v7453_v49 = vsel %vm15184_vm14, %v7451_v32, %v7452_v23 }
 0x418   : > { %13413 = vmatmul.mubr.bf16.gmra.mrb[20].mxu1 %v18173_v51  ;;  %v7437_v51 = vrot.slane %v7435_v16, 4 }
 0x419   : > { %13416 = vmatprep.mubr.bf16.mxu1 %v18174_v17  ;;  %v14567_v17 = vld [vmem:[#allocation2 + $0x2c] sm:$0x1] }
 0x41a   : > { %v7431_v43 = vrot.slane %v14567_v17, 5  ;;  %v16905_v17 = vld [vmem:[#allocation2 + $0x38] sm:$0x1] }
 0x420   : > { %13417 = vmatmul.mubr.bf16.gmra.mrb[24].mxu1 %v18175_v59  ;;  %v7432_v59 = vsel %vm15184_vm14, %v7430_v5, %v7431_v43  ;;  %v16900_v5 = vld [vmem:[#allocation2 + $0x34] sm:$0xf]  ;;  %v16907_v43 = vld [vmem:[#allocation2 + $0x40] sm:$0xf] }
 0x421   : > { %13420 = vmatprep.mubr.bf16.mxu1 %v18176_v34  ;;  %v14569_v34 = vld [vmem:[#allocation2 + $0x40] sm:$0xf]  ;;  %v9073_v63 = vrot.slane %v16907_v43, 5 }
 0x422   : > { %v7442_v61 = vrot.slane %v14569_v34, 5  ;;  %v12077_v34 = vrot.slane %v8981_v57, 9 }
 0x424   : > { %v7444_v7 = vrot.slane %v7442_v61, 4  ;;  %v7443_v54 = vsel %vm15184_vm14, %v11944_v10, %v7442_v61 }
 0x426   : > { %v7446_v6 = vsel %vm15184_vm14, %v7444_v7, %v7445_v37  ;;  %v8985_v37 = vld [vmem:[#allocation2 + $0x54] sm:$0xe] }
 0x427   : > { %v11976_v16 = vcombine.low %v7443_v54, %v7446_v6  ;;  %v9075_v54 = vrot.slane %v9073_v63, 4  ;;  %v12081_v57 = vrot.slane %v8985_v37, 9 }
 0x428   : > { %13421 = vmatmul.mubr.bf16.gmra.mrb[28].mxu1 %v18177_v20  ;;  %v14444_v20 = vld [vmem:[%s18052_s4 + $0xd8] sm:$0xff]  }
 0x429   : > { %13440 = vmatprep.mubr.bf16.mxu1 %v11971_v24  ;;  %v11974_v24 = vcombine.low %v7429_v28, %v7432_v59  ;;  %v16917_v59 = vld [vmem:[#allocation2 + $0x50] sm:$0x1]  ;;  %v16923_v28 = vld [vmem:[#allocation2 + $0x58] sm:$0xf] }
 0x430   : > { %13441 = vmatmul.mubr.bf16.vlgmr.msra.gmra.mrb[0].mxu1 %v11972_v12  ;;  %v11977_v12 = vcombine.low %v7450_v41, %v7453_v49  ;;  %v8986_v41 = vld [vmem:[#allocation2 + $0x60] sm:$0xe] }
 0x431   : > { %13444 = vmatprep.mubr.bf16.mxu1 %v11973_v26  ;;  %13473 = vmatpush3.bf16.msra.mxu1 %v14441_v15  ;;  %v7439_v15 = vsel %vm15184_vm14, %v7437_v51, %v7438_v29  ;;  %v16898_v26 = vld [vmem:[#allocation2 + $0x2c] sm:$0x1]  ;;  %v14448_v51 = vld [vmem:[%s18052_s4 + $0xf8] sm:$0xff]  }
 0x432   : > { %13474 = vmatprep.subr.bf16.mxu1 %v14442_v46  ;;  %v11975_v45 = vcombine.low %v7436_v11, %v7439_v15  ;;  %v16912_v29 = vld [vmem:[#allocation2 + $0x4c] sm:$0xf]  ;;  %v9062_v30 = vrot.slane %v16898_v26, 5  ;;  %v8983_v15 = vld [vmem:[#allocation2 + $0x3c] sm:$0xe] }
 0x433   : > { %v8984_v11 = vld [vmem:[#allocation2 + $0x48] sm:$0xe]  ;;  %v12079_v32 = vrot.slane %v8983_v15, 9  ;;  %v9080_v6 = vrot.slane %v16912_v29, 5  ;;  %v18182_v15 = vcombine.low %v16720_v2, %v16725_v35  ;;  %v16996_v35 = vld [vmem:[#allocation2 + $0x80] sm:$0x1] }
 0x434   : > { %v12080_v10 = vrot.slane %v8984_v11, 9 }
 0x435   : > { %13475 = vmatpush3.bf16.msra.mxu1 %v14442_v46  ;;  %v16896_v46 = vld [vmem:[#allocation2 + $0x28] sm:$0xf]  ;;  %v16959_v49 = vsel %vm15184_vm14, %v12079_v32, %v9073_v63  ;;  %v18184_v32 = vcombine.low %v16729_v3, %v16737_v53  ;;  %v16994_v63 = vld [vmem:[#allocation2 + $0x74] sm:$0x1] }
 0x436   : > { %13476 = vmatprep.subr.bf16.mxu1 %v14443_v47  ;;  %v9059_v48 = vrot.slane %v16896_v46, 5  ;;  %v9104_v2 = vrot.slane %v16994_v63, 5 }
 0x438   : > { %13445 = vmatmul.mubr.bf16.gmra.mrb[4].mxu1 %v11974_v24  ;;  %v9061_v61 = vrot.slane %v9059_v48, 4  ;;  %v9066_v24 = vrot.slane %v16900_v5, 5 }
 0x439   : > { %13448 = vmatprep.mubr.bf16.mxu1 %v11975_v45  ;;  %13477 = vmatpush3.bf16.msra.mxu1 %v14443_v47  ;;  %v8982_v47 = vld [vmem:[#allocation2 + $0x30] sm:$0xe]  ;;  %v9069_v45 = vrot.slane %v16905_v17, 5 }
 0x43a   : > { %13478 = vmatprep.subr.bf16.mxu1 %v14444_v20  ;;  %v16939_v50 = vsel %vm15184_vm14, %v9061_v61, %v9062_v30  ;;  %v12078_v4 = vrot.slane %v8982_v47, 9  ;;  %v9068_v42 = vrot.slane %v9066_v24, 4  ;;  %v9094_v61 = vrot.slane %v16945_v38, 5  ;;  %v8987_v30 = vld [vmem:[#allocation2 + $0x6c] sm:$0xe] }
 0x43c   : > { %v16949_v23 = vsel %vm15184_vm14, %v12078_v4, %v9066_v24  ;;  %v16955_v33 = vsel %vm15184_vm14, %v9068_v42, %v9069_v45  ;;  %v12082_v45 = vrot.slane %v8986_v41, 9  ;;  %v8988_v42 = vld [vmem:[#allocation2 + $0x78] sm:$0xe]  ;;  %v17034_v24 = vld [vmem:[#allocation2 + $0xa0] sm:$0xf] }
 0x43d   : > { %13479 = vmatpush3.bf16.msra.mxu1 %v14444_v20  ;;  %v16935_v20 = vsel %vm15184_vm14, %v12077_v34, %v9059_v48  ;;  %v16968_v48 = vld [vmem:[#allocation2 + $0x70] sm:$0xf]  ;;  %v9090_v34 = vrot.slane %v16931_v62, 5 }
 0x43e   : > { %13480 = vmatprep.subr.bf16.mxu1 %v14445_v55  ;;  %v17015_v53 = vsel %vm15184_vm14, %v12082_v45, %v9094_v61  ;;  %v9101_v41 = vrot.slane %v16968_v48, 5 }
 0x43f   : > { %18187 = vst [vmem:[#allocation6_spill] sm:$0xff] %v17015_v53  ;;  %v8991_v53 = vld [vmem:[#allocation2 + $0x9c] sm:$0xe] }
 0x440   : > { %13449 = vmatmul.mubr.bf16.gmra.mrb[8].mxu1 %v11976_v16  ;;  %v9083_v16 = vrot.slane %v16917_v59, 5  ;;  %v9103_v45 = vrot.slane %v9101_v41, 4 }
 0x441   : > { %13452 = vmatprep.mubr.bf16.mxu1 %v11977_v12  ;;  %13481 = vmatpush3.bf16.msra.mxu1 %v14445_v55  ;;  %v9076_v55 = vrot.slane %v16910_v14, 5 }
 0x442   : > { %13482 = vmatprep.subr.bf16.mxu1 %v14446_v18 }
 0x443   : > { %v16972_v47 = vsel %vm15184_vm14, %v9075_v54, %v9076_v55  ;;  %v9096_v55 = vrot.slane %v9094_v61, 4  ;;  %v17007_v54 = vld [vmem:[#allocation2 + $0x94] sm:$0xf]  ;;  %v8263_v61 = vld [vmem:[#allocation2 + $0xa4] sm:$0x1] }
 0x444   : > { %18180 = vst [vmem:[#allocation9_spill] sm:$0xff] %v16972_v47  ;;  %v9122_v56 = vrot.slane %v17007_v54, 5  ;;  %v9886_v47 = vld [vmem:[#allocation2 + $0x74] sm:$0x1] }
 0x445   : > { %13483 = vmatpush3.bf16.msra.mxu1 %v14446_v18  ;;  %v16963_v18 = vld [vmem:[#allocation2 + $0x68] sm:$0x1] }
 0x446   : > { %13484 = vmatprep.subr.bf16.mxu1 %v14447_v31 }
 0x448   : > { %13453 = vmatmul.mubr.bf16.gmra.mrb[12].mxu1 %v18178_v60  ;;  %v16976_v60 = vsel %vm15184_vm14, %v12080_v10, %v9080_v6  ;;  %v9097_v10 = vrot.slane %v16963_v18, 5 }
 0x449   : > { %13456 = vmatprep.mubr.bf16.mxu1 %v18179_v44  ;;  %13485 = vmatpush3.bf16.msra.mxu1 %v14447_v31  ;;  %v9082_v31 = vrot.slane %v9080_v6, 4  ;;  %18181 = vst [vmem:[#allocation10_spill] sm:$0xff] %v16976_v60  ;;  %v16983_v44 = vld [vmem:[#allocation2 + $0x7c] sm:$0xf]  ;;  %v17005_v6 = vld [vmem:[#allocation2 + $0x88] sm:$0xf] }
 0x44a   : > { %13486 = vmatprep.subr.bf16.mxu1 %v14448_v51  ;;  %v9115_v12 = vrot.slane %v17005_v6, 5  ;;  %v10624_v60 = vld [vmem:[#allocation2 + $0x6c] sm:$0xe] }
 0x44b   : > { %v16989_v11 = vsel %vm15184_vm14, %v9082_v31, %v9083_v16  ;;  %v12083_v16 = vrot.slane %v8987_v30, 9  ;;  %v17018_v31 = vld [vmem:[#allocation2 + $0x8c] sm:$0x1] }
 0x44c   : > { %18183 = vst [vmem:[#allocation4_spill] sm:$0xff] %v16989_v11  ;;  %v9118_v7 = vrot.slane %v17018_v31, 5  ;;  %v9117_v40 = vrot.slane %v9115_v12, 4  ;;  %v8992_v11 = vld [vmem:[#allocation2 + $0xa8] sm:$0xe] }
 0x44d   : > { %13487 = vmatpush3.bf16.msra.mxu1 %v14448_v51  ;;  %v9087_v51 = vrot.slane %v16923_v28, 5  ;;  %v17031_v30 = vsel %vm15184_vm14, %v12083_v16, %v9101_v41  ;;  %v17044_v16 = vsel %vm15184_vm14, %v9103_v45, %v9104_v2  ;;  %v18193_v2 = vcombine.low %v16749_v8, %v16753_v39  ;;  %v8272_v45 = vld [vmem:[#allocation2 + $0xc8] sm:$0x1] }
 0x44e   : > { %13520 = vmatprep.subr.bf16.mxu1 %v16929_v22  ;;  %18189 = vst [vmem:[#allocation3_spill] sm:$0xff] %v17031_v30  ;;  %18191 = vst [vmem:[#allocation12_spill] sm:$0xff] %v17044_v16  ;;  %v17070_v8 = vsel %vm15184_vm14, %v9117_v40, %v9118_v7  ;;  %v17150_v40 = vld [vmem:[#allocation2 + $0x14] sm:$0x1]  ;;  %v14462_v16 = vld [vmem:[#allocation2 + $0x78] sm:$0xff]  }
 0x44f   : > { %v9089_v4 = vrot.slane %v9087_v51, 4  ;;  %v17002_v37 = vsel %vm15184_vm14, %v12081_v57, %v9087_v51  ;;  %v17024_v51 = vsel %vm15184_vm14, %v9096_v55, %v9097_v10  ;;  %v8990_v57 = vld [vmem:[#allocation2 + $0x90] sm:$0xe]  ;;  %v9111_v10 = vrot.slane %v16996_v35, 5  ;;  %18196 = vst [vmem:[#allocation15_spill] sm:$0xff] %v17070_v8 }
 0x450   : > { %13457 = vmatmul.mubr.bf16.gmra.mrb[16].mxu1 %v18182_v15  ;;  %18185 = vst [vmem:[#allocation7_spill] sm:$0xff] %v17002_v37  ;;  %18188 = vst [vmem:[#allocation5_spill] sm:$0xff] %v17024_v51  ;;  %v12084_v15 = vrot.slane %v8988_v42, 9  ;;  %v12086_v51 = vrot.slane %v8990_v57, 9  ;;  %v17350_v30 = vld [vmem:[#allocation2 + $0x64] sm:$0xf] }
 0x451   : > { %13460 = vmatprep.mubr.bf16.mxu1 %v18184_v32  ;;  %v17011_v3 = vsel %vm15184_vm14, %v9089_v4, %v9090_v34  ;;  %v9108_v34 = vrot.slane %v16983_v44, 5  ;;  %v8989_v4 = vld [vmem:[#allocation2 + $0x84] sm:$0xe]  ;;  %v8260_v32 = vld [vmem:[#allocation2 + $0x98] sm:$0x1]  ;;  %18225 = vst [vmem:[#allocation41_spill] sm:$0xff] %v17350_v30 }
 0x452   : > { %18186 = vst [vmem:[#allocation8_spill] sm:$0xff] %v17011_v3  ;;  %v12085_v41 = vrot.slane %v8989_v4, 9  ;;  %v8266_v4 = vld [vmem:[#allocation2 + $0xb0] sm:$0x1]  ;;  %v9124_v3 = vrot.slane %v9122_v56, 4  ;;  %v9125_v37 = vrot.slane %v8260_v32, 5  ;;  %v17074_v39 = vsel %vm15184_vm14, %v12086_v51, %v9122_v56 }
 0x453   : > { %v17038_v42 = vsel %vm15184_vm14, %v12084_v15, %v9108_v34  ;;  %v9110_v55 = vrot.slane %v9108_v34, 4  ;;  %v18194_v15 = vcombine.low %v16757_v21, %v16764_v13  ;;  %18197 = vst [vmem:[#allocation16_spill] sm:$0xff] %v17074_v39  ;;  %v9129_v32 = vrot.slane %v17034_v24, 5 }
 0x454   : > { %18190 = vst [vmem:[#allocation11_spill] sm:$0xff] %v17038_v42  ;;  %v17066_v57 = vsel %vm15184_vm14, %v12085_v41, %v9115_v12  ;;  %v17081_v13 = vsel %vm15184_vm14, %v9124_v3, %v9125_v37  ;;  %v12087_v12 = vrot.slane %v8991_v53, 9  ;;  %v9136_v41 = vrot.slane %v8265_v36, 5  ;;  %v8994_v37 = vld [vmem:[#allocation2 + $0xc0] sm:$0xe] }
 0x455   : > { %v17052_v34 = vsel %vm15184_vm14, %v9110_v55, %v9111_v10  ;;  %v17062_v55 = vld [vmem:[#allocation2 + $0xb8] sm:$0xf]  ;;  %v8269_v10 = vld [vmem:[#allocation2 + $0xbc] sm:$0x1]  ;;  %18195 = vst [vmem:[#allocation14_spill] sm:$0xff] %v17066_v57  ;;  %18198 = vst [vmem:[#allocation17_spill] sm:$0xff] %v17081_v13 }
 0x456   : > { %18192 = vst [vmem:[#allocation13_spill] sm:$0xff] %v17052_v34  ;;  %v9131_v7 = vrot.slane %v9129_v32, 4  ;;  %v9132_v56 = vrot.slane %v8263_v61, 5  ;;  %v12088_v51 = vrot.slane %v8992_v11, 9  ;;  %v17087_v34 = vsel %vm15184_vm14, %v12087_v12, %v9129_v32  ;;  %v8231_v11 = vld [vmem:[#allocation2 + $0x24] sm:$0xf] }
 0x457   : > { %18199 = vst [vmem:[#allocation18_spill] sm:$0xff] %v17087_v34  ;;  %v9138_v42 = vrot.slane %v9136_v41, 4  ;;  %v9139_v21 = vrot.slane %v8266_v4, 5  ;;  %v9143_v8 = vrot.slane %v17062_v55, 5  ;;  %v9146_v12 = vrot.slane %v8269_v10, 5 }
 0x458   : > { %13461 = vmatmul.mubr.bf16.gmra.mrb[20].mxu1 %v18193_v2  ;;  %v8271_v2 = vld [vmem:[#allocation2 + $0xc4] sm:$0xf]  ;;  %v17092_v36 = vsel %vm15184_vm14, %v9131_v7, %v9132_v56  ;;  %v17096_v3 = vsel %vm15184_vm14, %v12088_v51, %v9136_v41  ;;  %v12090_v7 = vrot.slane %v8994_v37, 9  ;;  %v9153_v13 = vrot.slane %v8272_v45, 5  ;;  %v8225_v37 = vld [vmem:[#allocation2 + $0xc] sm:$0xf] }
 0x459   : > { %13464 = vmatprep.mubr.bf16.mxu1 %v18194_v15  ;;  %v8993_v15 = vld [vmem:[#allocation2 + $0xb4] sm:$0xe]  ;;  %18200 = vst [vmem:[#allocation19_spill] sm:$0xff] %v17092_v36  ;;  %18201 = vst [vmem:[#allocation20_spill] sm:$0xff] %v17096_v3  ;;  %v9150_v61 = vrot.slane %v8271_v2, 5  ;;  %v17102_v32 = vsel %vm15184_vm14, %v9138_v42, %v9139_v21  ;;  %v9145_v4 = vrot.slane %v9143_v8, 4  ;;  %v18203_v41 = vcombine.low %v16779_v0, %v16783_v27 }
 0x45a   : > { %v12089_v53 = vrot.slane %v8993_v15, 9  ;;  %18202 = vst [vmem:[#allocation21_spill] sm:$0xff] %v17102_v32  ;;  %v18206_v10 = vcombine.low %v16787_v9, %v16793_v1  ;;  %v18209_v15 = vcombine.low %v16803_v52, %v16807_v19  ;;  %v14450_v9 = vld [vmem:[#allocation2 + $0x18] sm:$0xff]   ;;  %v14454_v1 = vld [vmem:[%s18052_s4 + $0x108] sm:$0xff]   ;;  %v8274_v52 = vshrl.u32 %v8225_v37, 16 }
 0x45b   : > { %v9152_v56 = vrot.slane %v9150_v61, 4  ;;  %v17115_v42 = vsel %vm15184_vm14, %v9145_v4, %v9146_v12  ;;  %v17124_v45 = vsel %vm15184_vm14, %v12090_v7, %v9150_v61  ;;  %v14452_v51 = vld [vmem:[#allocation2 + $0x24] sm:$0xff]   ;;  %v8277_v19 = vshll.u32 %v8225_v37, 16  ;;  %v14453_v61 = vld [vmem:[#allocation2 + $0x30] sm:$0xff]   ;;  %v14455_v4 = vld [vmem:[#allocation2 + $0x3c] sm:$0xff]  }
 0x45c   : > { %v17111_v2 = vsel %vm15184_vm14, %v12089_v53, %v9143_v8  ;;  %18205 = vst [vmem:[#allocation23_spill] sm:$0xff] %v17115_v42  ;;  %18207 = vst [vmem:[#allocation24_spill] sm:$0xff] %v17124_v45  ;;  %v14449_v8 = vld [vmem:[#allocation2 + $0xc] sm:$0xff]   ;;  %v14460_v12 = vld [vmem:[%s18052_s4 + $0x118] sm:$0xff]   ;;  %v8359_v39 = vshrl.u32 %v16900_v5, 16 }
 0x45d   : > { %18204 = vst [vmem:[#allocation22_spill] sm:$0xff] %v17111_v2  ;;  %v17128_v0 = vsel %vm15184_vm14, %v9152_v56, %v9153_v13  ;;  %v14457_v13 = vld [vmem:[%s18052_s4 + $0x110] sm:$0xff]   ;;  %v8237_v3 = vld [vmem:[#allocation2 + $0x3c] sm:$0xf] }
 0x45e   : > { %18208 = vst [vmem:[#allocation25_spill] sm:$0xff] %v17128_v0  ;;  %v8226_v53 = vld [vmem:[#allocation2 + $0x10] sm:$0xf]  ;;  %v8293_v0 = vshll.u32 %v17150_v40, 16 }
 0x45f   : > { %v8283_v7 = vshll.u32 %v8226_v53, 16  ;;  %v8287_v56 = vshrl.u32 %v8226_v53, 16  ;;  %v14456_v53 = vld [vmem:[#allocation2 + $0x48] sm:$0xff]   ;;  %v8234_v45 = vld [vmem:[#allocation2 + $0x30] sm:$0xf] }
 0x460   : > { %13465 = vmatmul.mubr.bf16.gmra.mrb[24].mxu1 %v18203_v41  ;;  %v8229_v41 = vld [vmem:[#allocation2 + $0x1c] sm:$0xf]  ;;  %v8295_v32 = vrot.slane %v8293_v0, 5  ;;  %v8355_v0 = vshll.u32 %v16900_v5, 16  ;;  %v8403_v5 = vshll.u32 %v16912_v29, 16 }
 0x461   : > { %13468 = vmatprep.mubr.bf16.mxu1 %v18206_v10  ;;  %v8276_v10 = vrot.slane %v8274_v52, 4  ;;  %v17148_v37 = vrot.slane %v8283_v7, 5  ;;  %v8289_v27 = vrot.slane %v8287_v56, 4  ;;  %v8311_v21 = vshrl.u32 %v8229_v41, 16  ;;  %v17155_v52 = vld [vmem:[#allocation2 + $0x20] sm:$0x1] }
 0x462   : > { %v14458_v7 = vld [vmem:[#allocation2 + $0x54] sm:$0xff]  }
 0x463   : > { %v8290_v56 = vor.u32 %v8289_v27, %v17148_v37  ;;  %v8322_v27 = vshrl.u32 %v8231_v11, 16 }
 0x465   : > { %v8291_v42 = vrot.slane %v8290_v56, 4 }
 0x468   : > { %13469 = vmatmul.mubr.bf16.gmra.mrb[28].mxu1 %v18209_v15  ;;  %v14463_v15 = vld [vmem:[%s18052_s4 + $0x120] sm:$0xff]  }
 0x469   : > { %13488 = vmatprep.mubr.bf16.mxu1 %v14449_v8  ;;  %v8279_v8 = vrot.slane %v8277_v19, 5 }
 0x470   : > { %13489 = vmatmul.mubr.bf16.vlgmr.msra.gmra.mrb[0].mxu1 %v14450_v9 }
 0x471   : > { %13492 = vmatprep.mubr.bf16.mxu1 %v14452_v51  ;;  %13521 = vmatpush3.bf16.msra.mxu1 %v16929_v22  ;;  %v8228_v22 = vld [vmem:[#allocation2 + $0x18] sm:$0xf]  ;;  %v8307_v51 = vshll.u32 %v8229_v41, 16  ;;  %v8313_v41 = vrot.slane %v8311_v21, 4  ;;  %v8317_v21 = vshll.u32 %v17155_v52, 16 }
 0x472   : > { %13522 = vmatprep.subr.bf16.mxu1 %v14454_v1  ;;  %v8298_v9 = vshrl.u32 %v8228_v22, 16 }
 0x473   : > { %v8319_v56 = vrot.slane %v8317_v21, 5  ;;  %v8373_v21 = vshll.u32 %v8237_v3, 16 }
 0x474   : > { %v8300_v19 = vrot.slane %v8298_v9, 4  ;;  %v14469_v9 = vld [vmem:[%s18052_s4 + $0x130] sm:$0xff]  }
 0x475   : > { %13523 = vmatpush3.bf16.msra.mxu1 %v14454_v1  ;;  %v8301_v1 = vshll.u32 %v8228_v22, 16  ;;  %v17157_v22 = vrot.slane %v8307_v51, 5  ;;  %v8325_v51 = vshll.u32 %v8231_v11, 16  ;;  %v14472_v11 = vld [vmem:[%s18052_s4 + $0x138] sm:$0xff]  }
 0x476   : > { %13524 = vmatprep.subr.bf16.mxu1 %v14457_v13 }
 0x478   : > { %13493 = vmatmul.mubr.bf16.gmra.mrb[4].mxu1 %v14453_v61  ;;  %v8280_v61 = vor.u32 %v8279_v8, %v8276_v10  ;;  %v8335_v10 = vshrl.u32 %v16896_v46, 16 }
 0x479   : > { %13496 = vmatprep.mubr.bf16.mxu1 %v14455_v4  ;;  %13525 = vmatpush3.bf16.msra.mxu1 %v14457_v13  ;;  %v14466_v13 = vld [vmem:[%s18052_s4 + $0x128] sm:$0xff]   ;;  %v8303_v4 = vrot.slane %v8301_v1, 5 }
 0x47a   : > { %13526 = vmatprep.subr.bf16.mxu1 %v14460_v12  ;;  %v8281_v8 = vrot.slane %v8280_v61, 4  ;;  %v8346_v61 = vshrl.u32 %v8234_v45, 16 }
 0x47b   : > { %v8304_v1 = vor.u32 %v8303_v4, %v8300_v19  ;;  %v14459_v19 = vld [vmem:[#allocation2 + $0x60] sm:$0xff]  }
 0x47c   : > { %v8286_v2 = vsel %vm14730_vm11, %v8281_v8, %v17148_v37  ;;  %v8341_v37 = vshll.u32 %v16898_v26, 16  ;;  %v8348_v8 = vrot.slane %v8346_v61, 4  ;;  %v17189_v26 = vld [vmem:[%s18052_s4 + $0x140] sm:$0xff]   ;;  %v8243_v61 = vld [vmem:[#allocation2 + $0x54] sm:$0xf] }
 0x47d   : > { %13527 = vmatpush3.bf16.msra.mxu1 %v14460_v12  ;;  %v8331_v12 = vshll.u32 %v16896_v46, 16  ;;  %v8314_v46 = vor.u32 %v8313_v41, %v17157_v22  ;;  %v8305_v4 = vrot.slane %v8304_v1, 4  ;;  %v8324_v41 = vrot.slane %v8322_v27, 4 }
 0x47e   : > { %13528 = vmatprep.subr.bf16.mxu1 %v14463_v15  ;;  %v8370_v1 = vshrl.u32 %v8237_v3, 16  ;;  %v8379_v27 = vshll.u32 %v16907_v43, 16 }
 0x47f   : > { %v8310_v3 = vsel %vm14730_vm11, %v8305_v4, %v17157_v22  ;;  %v17203_v22 = vrot.slane %v8403_v5, 5 }
 0x480   : > { %13497 = vmatmul.mubr.bf16.gmra.mrb[8].mxu1 %v14456_v53  ;;  %v17168_v53 = vrot.slane %v8331_v12, 5  ;;  %v8327_v12 = vrot.slane %v8325_v51, 5  ;;  %v17200_v57 = vrot.slane %v8379_v27, 5 }
 0x481   : > { %13500 = vmatprep.mubr.bf16.mxu1 %v14458_v7  ;;  %13529 = vmatpush3.bf16.msra.mxu1 %v14463_v15  ;;  %v8337_v15 = vrot.slane %v8335_v10, 4  ;;  %v8349_v7 = vshll.u32 %v8234_v45, 16  ;;  %v14461_v10 = vld [vmem:[#allocation2 + $0x6c] sm:$0xff]   ;;  %v8296_v45 = vsel %vm14730_vm11, %v8291_v42, %v8295_v32  ;;  %v8383_v32 = vshrl.u32 %v16907_v43, 16  ;;  %v8240_v42 = vld [vmem:[#allocation2 + $0x48] sm:$0xf] }
 0x482   : > { %13530 = vmatprep.subr.bf16.mxu1 %v14466_v13  ;;  %v17184_v51 = vcombine.low %v8286_v2, %v8296_v45  ;;  %v17198_v2 = vrot.slane %v8355_v0, 5  ;;  %v8397_v45 = vshll.u32 %v8240_v42, 16 }
 0x483   : > { %v8338_v36 = vor.u32 %v8337_v15, %v17168_v53  ;;  %v8351_v34 = vrot.slane %v8349_v7, 5 }
 0x484   : > { %v8399_v27 = vrot.slane %v8397_v45, 5 }
 0x485   : > { %13531 = vmatpush3.bf16.msra.mxu1 %v14466_v13  ;;  %v8315_v13 = vrot.slane %v8314_v46, 4  ;;  %v8328_v46 = vor.u32 %v8327_v12, %v8324_v41  ;;  %v8339_v15 = vrot.slane %v8338_v36, 4  ;;  %v8352_v7 = vor.u32 %v8351_v34, %v8348_v8 }
 0x486   : > { %13532 = vmatprep.subr.bf16.mxu1 %v14469_v9  ;;  %v8372_v41 = vrot.slane %v8370_v1, 4  ;;  %v8375_v12 = vrot.slane %v8373_v21, 5  ;;  %v8418_v36 = vshrl.u32 %v8243_v61, 16  ;;  %v8343_v34 = vrot.slane %v8341_v37, 5 }
 0x487   : > { %v8320_v43 = vsel %vm14730_vm11, %v8315_v13, %v8319_v56  ;;  %v8421_v56 = vshll.u32 %v8243_v61, 16  ;;  %v14464_v13 = vld [vmem:[#allocation2 + $0x84] sm:$0xff]   ;;  %v8329_v0 = vrot.slane %v8328_v46, 4  ;;  %v8365_v1 = vshll.u32 %v16905_v17, 16 }
 0x488   : > { %13501 = vmatmul.mubr.bf16.gmra.mrb[12].mxu1 %v14459_v19  ;;  %v8361_v19 = vrot.slane %v8359_v39, 4  ;;  %v8427_v39 = vshll.u32 %v16923_v28, 16  ;;  %v8376_v5 = vor.u32 %v8375_v12, %v8372_v41  ;;  %v8344_v37 = vsel %vm14730_vm11, %v8339_v15, %v8343_v34  ;;  %v14467_v34 = vld [vmem:[#allocation2 + $0x9c] sm:$0xff]  }
 0x489   : > { %13504 = vmatprep.mubr.bf16.mxu1 %v14461_v10  ;;  %13533 = vmatpush3.bf16.msra.mxu1 %v14469_v9  ;;  %v8407_v9 = vshrl.u32 %v16912_v29, 16  ;;  %v8394_v10 = vshrl.u32 %v8240_v42, 16  ;;  %v8385_v29 = vrot.slane %v8383_v32, 4  ;;  %v17209_v32 = vcombine.low %v8310_v3, %v8320_v43  ;;  %v8246_v43 = vld [vmem:[#allocation2 + $0x60] sm:$0xf] }
 0x48a   : > { %13534 = vmatprep.subr.bf16.mxu1 %v14472_v11  ;;  %v8362_v8 = vor.u32 %v8361_v19, %v17198_v2  ;;  %v8353_v42 = vrot.slane %v8352_v7, 4  ;;  %v8334_v17 = vsel %vm14730_vm11, %v8329_v0, %v17168_v53  ;;  %v8389_v61 = vshll.u32 %v16910_v14, 16  ;;  %v14465_v53 = vld [vmem:[#allocation2 + $0x90] sm:$0xff]   ;;  %v8249_v0 = vld [vmem:[#allocation2 + $0x6c] sm:$0xf] }
 0x48b   : > { %v8409_v4 = vrot.slane %v8407_v9, 4  ;;  %v8396_v21 = vrot.slane %v8394_v10, 4  ;;  %v8386_v9 = vor.u32 %v8385_v29, %v17200_v57  ;;  %v17219_v19 = vrot.slane %v8427_v39, 5 }
 0x48c   : > { %v8363_v7 = vrot.slane %v8362_v8, 4  ;;  %v8367_v10 = vrot.slane %v8365_v1, 5  ;;  %v8413_v41 = vshll.u32 %v16917_v59, 16  ;;  %v17222_v15 = vcombine.low %v8334_v17, %v8344_v37 }
 0x48d   : > { %13535 = vmatpush3.bf16.msra.mxu1 %v14472_v11  ;;  %v8431_v11 = vshrl.u32 %v16923_v28, 16  ;;  %v8410_v46 = vor.u32 %v8409_v4, %v17203_v22  ;;  %v8420_v28 = vrot.slane %v8418_v36, 4  ;;  %v8400_v45 = vor.u32 %v8399_v27, %v8396_v21 }
 0x48e   : > { %13568 = vmatprep.subr.bf16.mxu1 %v17189_v26  ;;  %v8358_v12 = vsel %vm14730_vm11, %v8353_v42, %v17198_v2  ;;  %v8377_v29 = vrot.slane %v8376_v5, 4  ;;  %v8387_v4 = vrot.slane %v8386_v9, 4  ;;  %v8391_v39 = vrot.slane %v8389_v61, 5 }
 0x48f   : > { %v8433_v3 = vrot.slane %v8431_v11, 4  ;;  %v8411_v36 = vrot.slane %v8410_v46, 4  ;;  %v8451_v59 = vshll.u32 %v16945_v38, 16  ;;  %v8455_v8 = vshrl.u32 %v16945_v38, 16 }
 0x490   : > { %13505 = vmatmul.mubr.bf16.gmra.mrb[16].mxu1 %v14462_v16  ;;  %v8423_v16 = vrot.slane %v8421_v56, 5  ;;  %v8442_v56 = vshrl.u32 %v8246_v43, 16  ;;  %v8368_v2 = vsel %vm14730_vm11, %v8363_v7, %v8367_v10  ;;  %v8401_v1 = vrot.slane %v8400_v45, 4 }
 0x491   : > { %13508 = vmatprep.mubr.bf16.mxu1 %v14464_v13  ;;  %v8445_v13 = vshll.u32 %v8246_v43, 16  ;;  %v8434_v11 = vor.u32 %v8433_v3, %v17219_v19  ;;  %v8415_v21 = vrot.slane %v8413_v41, 5  ;;  %v8437_v27 = vshll.u32 %v16931_v62, 16  ;;  %v17246_v62 = vld [vmem:[#allocation2 + $0x78] sm:$0xf] }
 0x492   : > { %v8424_v14 = vor.u32 %v8423_v16, %v8420_v28  ;;  %v8382_v42 = vsel %vm14730_vm11, %v8377_v29, %v17200_v57  ;;  %v8392_v5 = vsel %vm14730_vm11, %v8387_v4, %v8391_v39  ;;  %v8466_v9 = vshrl.u32 %v8249_v0, 16  ;;  %v17255_v43 = vld [vmem:[#allocation2 + $0x1c] sm:$0xf]  ;;  %v17266_v29 = vld [vmem:[#allocation2 + $0x20] sm:$0x1] }
 0x493   : > { %v8469_v37 = vshll.u32 %v8249_v0, 16  ;;  %v8416_v38 = vsel %vm14730_vm11, %v8411_v36, %v8415_v21  ;;  %v17242_v28 = vrot.slane %v8442_v56, 4  ;;  %v17244_v16 = vrot.slane %v8445_v13, 5  ;;  %18210 = vst [vmem:[#allocation26_spill] sm:$0xff] %v17255_v43  ;;  %18211 = vst [vmem:[#allocation27_spill] sm:$0xff] %v17266_v29  ;;  %v14468_v13 = vld [vmem:[#allocation2 + $0xa8] sm:$0xff]  }
 0x494   : > { %v17240_v46 = vrot.slane %v8424_v14, 4  ;;  %v17248_v17 = vrot.slane %v8434_v11, 4  ;;  %v17250_v61 = vrot.slane %v8451_v59, 5  ;;  %v17252_v57 = vrot.slane %v8455_v8, 4  ;;  %v10617_v4 = vld [vmem:[#allocation2 + $0x18] sm:$0xe] }
 0x495   : > { %v8475_v3 = vshll.u32 %v16968_v48, 16  ;;  %v17257_v7 = vcombine.low %v8358_v12, %v8368_v2  ;;  %v17259_v10 = vcombine.low %v8382_v42, %v8392_v5  ;;  %v8406_v45 = vsel %vm14730_vm11, %v8401_v1, %v17203_v22  ;;  %v17275_v56 = vld [vmem:[#allocation2 + $0x28] sm:$0xf]  ;;  %v14470_v0 = vld [vmem:[#allocation2 + $0xb4] sm:$0xff]   ;;  %v10618_v59 = vld [vmem:[#allocation2 + $0x24] sm:$0xe] }
 0x496   : > { %v17264_v41 = vrot.slane %v8437_v27, 5  ;;  %v17270_v36 = vrot.slane %v8466_v9, 4  ;;  %v17272_v14 = vrot.slane %v8469_v37, 5  ;;  %v8479_v12 = vshrl.u32 %v16968_v48, 16  ;;  %18212 = vst [vmem:[#allocation28_spill] sm:$0xff] %v17275_v56 }
 0x497   : > { %v10683_v11 = vrot.slane %v17255_v43, 5  ;;  %v17291_v2 = vrot.slane %v8475_v3, 5  ;;  %v17294_v21 = vld [vmem:[#allocation2 + $0x2c] sm:$0x1]  ;;  %v17296_v27 = vld [vmem:[#allocation2 + $0x34] sm:$0xf] }
 0x498   : > { %13509 = vmatmul.mubr.bf16.gmra.mrb[20].mxu1 %v14465_v53  ;;  %v17268_v53 = vcombine.low %v8406_v45, %v8416_v38  ;;  %18213 = vst [vmem:[#allocation29_spill] sm:$0xff] %v17294_v21  ;;  %18214 = vst [vmem:[#allocation30_spill] sm:$0xff] %v17296_v27  ;;  %v17298_v42 = vld [vmem:[#allocation2 + $0x38] sm:$0x1]  ;;  %v17300_v5 = vld [vmem:[#allocation2 + $0x40] sm:$0xf] }
 0x499   : > { %13512 = vmatprep.mubr.bf16.mxu1 %v14467_v34  ;;  %18215 = vst [vmem:[#allocation31_spill] sm:$0xff] %v17298_v42  ;;  %18216 = vst [vmem:[#allocation32_spill] sm:$0xff] %v17300_v5  ;;  %v12211_v9 = vrot.slane %v10617_v4, 9  ;;  %v10685_v37 = vrot.slane %v10683_v11, 4  ;;  %v10686_v38 = vrot.slane %v17266_v29, 5  ;;  %v10690_v45 = vrot.slane %v17275_v56, 5 }
 0x49a   : > { %v17306_v39 = vrot.slane %v8479_v12, 4  ;;  %v12212_v48 = vrot.slane %v10618_v59, 9  ;;  %v17309_v8 = vld [vmem:[#allocation2 + $0x4c] sm:$0xf]  ;;  %v10693_v34 = vrot.slane %v17294_v21, 5  ;;  %v10704_v12 = vrot.slane %v17300_v5, 5 }
 0x49b   : > { %18217 = vst [vmem:[#allocation33_spill] sm:$0xff] %v17309_v8  ;;  %v17313_v4 = vsel %vm15184_vm14, %v12211_v9, %v10683_v11  ;;  %v17317_v1 = vsel %vm15184_vm14, %v10685_v37, %v10686_v38  ;;  %v10620_v3 = vld [vmem:[#allocation2 + $0x3c] sm:$0xe]  ;;  %v17322_v59 = vld [vmem:[#allocation2 + $0x44] sm:$0x1]  ;;  %v10697_v11 = vrot.slane %v17296_v27, 5 }
 0x49c   : > { %18218 = vst [vmem:[#allocation34_spill] sm:$0xff] %v17313_v4  ;;  %18219 = vst [vmem:[#allocation35_spill] sm:$0xff] %v17317_v1  ;;  %v9877_v9 = vld [vmem:[#allocation2 + $0x50] sm:$0x1]  ;;  %v17329_v37 = vsel %vm15184_vm14, %v12212_v48, %v10690_v45  ;;  %v10621_v22 = vld [vmem:[#allocation2 + $0x48] sm:$0xe] }
 0x49d   : > { %18220 = vst [vmem:[#allocation36_spill] sm:$0xff] %v17322_v59  ;;  %18221 = vst [vmem:[#allocation37_spill] sm:$0xff] %v17329_v37  ;;  %v14471_v56 = vld [vmem:[#allocation2 + $0xc0] sm:$0xff]   ;;  %v17336_v43 = vld [vmem:[#allocation2 + $0x58] sm:$0xf]  ;;  %v10699_v1 = vrot.slane %v10697_v11, 4 }
 0x49e   : > { %v10700_v4 = vrot.slane %v17298_v42, 5  ;;  %v12214_v27 = vrot.slane %v10620_v3, 9  ;;  %v10622_v5 = vld [vmem:[#allocation2 + $0x54] sm:$0xe]  ;;  %v12215_v48 = vrot.slane %v10621_v22, 9 }
 0x49f   : > { %v10623_v37 = vld [vmem:[#allocation2 + $0x60] sm:$0xe]  ;;  %v9888_v22 = vld [vmem:[#allocation2 + $0x7c] sm:$0xf] }
 0x4a0   : > { %13513 = vmatmul.mubr.bf16.gmra.mrb[24].mxu1 %v14468_v13  ;;  %v10619_v13 = vld [vmem:[#allocation2 + $0x30] sm:$0xe]  ;;  %v17354_v29 = vsel %vm15184_vm14, %v10699_v1, %v10700_v4  ;;  %v17358_v3 = vsel %vm15184_vm14, %v12214_v27, %v10704_v12  ;;  %v10714_v1 = vrot.slane %v9877_v9, 5  ;;  %v10718_v4 = vrot.slane %v17336_v43, 5 }
 0x4a1   : > { %13516 = vmatprep.mubr.bf16.mxu1 %v14470_v0  ;;  %v10692_v0 = vrot.slane %v10690_v45, 4  ;;  %v12213_v21 = vrot.slane %v10619_v13, 9  ;;  %v17343_v45 = vld [vmem:[#allocation2 + $0x5c] sm:$0x1]  ;;  %v10706_v13 = vrot.slane %v10704_v12, 4  ;;  %18226 = vst [vmem:[#allocation42_spill] sm:$0xff] %v17354_v29 }
 0x4a2   : > { %18223 = vst [vmem:[#allocation39_spill] sm:$0xff] %v17343_v45  ;;  %18227 = vst [vmem:[#allocation43_spill] sm:$0xff] %v17358_v3  ;;  %v12216_v12 = vrot.slane %v10622_v5, 9  ;;  %v12217_v9 = vrot.slane %v10623_v37, 9  ;;  %v9889_v29 = vld [vmem:[#allocation2 + $0x80] sm:$0x1] }
 0x4a3   : > { %v17333_v38 = vsel %vm15184_vm14, %v10692_v0, %v10693_v34  ;;  %v17347_v34 = vsel %vm15184_vm14, %v12213_v21, %v10697_v11  ;;  %v10707_v0 = vrot.slane %v17322_v59, 5  ;;  %v9883_v21 = vld [vmem:[#allocation2 + $0x68] sm:$0x1]  ;;  %v17361_v11 = vld [vmem:[#allocation2 + $0x70] sm:$0xf] }
 0x4a4   : > { %18222 = vst [vmem:[#allocation38_spill] sm:$0xff] %v17333_v38  ;;  %18224 = vst [vmem:[#allocation40_spill] sm:$0xff] %v17347_v34  ;;  %v10711_v38 = vrot.slane %v17309_v8, 5  ;;  %v10721_v8 = vrot.slane %v17343_v45, 5  ;;  %v17385_v5 = vsel %vm15184_vm14, %v12216_v12, %v10718_v4  ;;  %v10728_v27 = vrot.slane %v9883_v21, 5  ;;  %v14474_v37 = vld [vmem:[%s18052_s4 + $0x148] sm:$0xff]  }
 0x4a5   : > { %18228 = vst [vmem:[#allocation44_spill] sm:$0xff] %v17361_v11  ;;  %v17367_v42 = vsel %vm15184_vm14, %v10706_v13, %v10707_v0  ;;  %v10720_v13 = vrot.slane %v10718_v4, 4  ;;  %v10725_v0 = vrot.slane %v17350_v30, 5  ;;  %18232 = vst [vmem:[#allocation48_spill] sm:$0xff] %v17385_v5  ;;  %v10625_v3 = vld [vmem:[#allocation2 + $0x78] sm:$0xe] }
 0x4a6   : > { %18229 = vst [vmem:[#allocation45_spill] sm:$0xff] %v17367_v42  ;;  %v17376_v59 = vsel %vm15184_vm14, %v12215_v48, %v10711_v38  ;;  %v10732_v42 = vrot.slane %v17361_v11, 5  ;;  %v9891_v34 = vld [vmem:[#allocation2 + $0x88] sm:$0xf]  ;;  %v10735_v11 = vrot.slane %v9886_v47, 5  ;;  %v10739_v4 = vrot.slane %v9888_v22, 5 }
 0x4a7   : > { %18230 = vst [vmem:[#allocation46_spill] sm:$0xff] %v17376_v59  ;;  %v17392_v48 = vsel %vm15184_vm14, %v10720_v13, %v10721_v8  ;;  %v10727_v45 = vrot.slane %v10725_v0, 4  ;;  %v17398_v21 = vsel %vm15184_vm14, %v12217_v9, %v10725_v0  ;;  %v10626_v30 = vld [vmem:[#allocation2 + $0x84] sm:$0xe]  ;;  %v12219_v13 = vrot.slane %v10625_v3, 9 }
 0x4a8   : > { %13517 = vmatmul.mubr.bf16.gmra.mrb[28].mxu1 %v14471_v56  ;;  %v10713_v56 = vrot.slane %v10711_v38, 4  ;;  %v9894_v38 = vld [vmem:[#allocation2 + $0x94] sm:$0xf]  ;;  %18233 = vst [vmem:[#allocation49_spill] sm:$0xff] %v17392_v48  ;;  %v10734_v12 = vrot.slane %v10732_v42, 4  ;;  %v10746_v59 = vrot.slane %v9891_v34, 5 }
 0x4a9   : > { %13536 = vmatprep.mubr.bf16.mxu1 %v17184_v51  ;;  %v17405_v8 = vsel %vm15184_vm14, %v10727_v45, %v10728_v27  ;;  %v10627_v48 = vld [vmem:[#allocation2 + $0x90] sm:$0xe]  ;;  %v9895_v9 = vld [vmem:[#allocation2 + $0x98] sm:$0x1]  ;;  %v9897_v0 = vld [vmem:[#allocation2 + $0xa0] sm:$0xf] }
 0x4aa   : > { %v17381_v51 = vsel %vm15184_vm14, %v10713_v56, %v10714_v1  ;;  %v12218_v1 = vrot.slane %v10624_v60, 9  ;;  %v9892_v56 = vld [vmem:[#allocation2 + $0x8c] sm:$0x1]  ;;  %18234 = vst [vmem:[#allocation50_spill] sm:$0xff] %v17405_v8  ;;  %v17415_v5 = vsel %vm15184_vm14, %v10734_v12, %v10735_v11  ;;  %v10741_v3 = vrot.slane %v10739_v4, 4  ;;  %v14475_v12 = vld [vmem:[%s18052_s4 + $0x150] sm:$0xff]  }
 0x4ab   : > { %18231 = vst [vmem:[#allocation47_spill] sm:$0xff] %v17381_v51  ;;  %18236 = vst [vmem:[#allocation52_spill] sm:$0xff] %v17415_v5  ;;  %v10742_v51 = vrot.slane %v9889_v29, 5  ;;  %v9900_v45 = vld [vmem:[#allocation2 + $0xac] sm:$0xf]  ;;  %v12220_v22 = vrot.slane %v10626_v30, 9  ;;  %v17424_v11 = vsel %vm15184_vm14, %v12219_v13, %v10739_v4 }
 0x4ac   : > { %v17409_v60 = vsel %vm15184_vm14, %v12218_v1, %v10732_v42  ;;  %v10749_v27 = vrot.slane %v9892_v56, 5  ;;  %v10628_v1 = vld [vmem:[#allocation2 + $0x9c] sm:$0xe]  ;;  %v9898_v47 = vld [vmem:[#allocation2 + $0xa4] sm:$0x1]  ;;  %v10748_v29 = vrot.slane %v10746_v59, 4 }
 0x4ad   : > { %18235 = vst [vmem:[#allocation51_spill] sm:$0xff] %v17409_v60  ;;  %v12221_v34 = vrot.slane %v10627_v48, 9  ;;  %v9901_v30 = vld [vmem:[#allocation2 + $0xb0] sm:$0x1]  ;;  %v17431_v56 = vsel %vm15184_vm14, %v10741_v3, %v10742_v51  ;;  %v10760_v4 = vrot.slane %v9897_v0, 5  ;;  %v12222_v5 = vrot.slane %v10628_v1, 9 }
 0x4ae   : > { %18237 = vst [vmem:[#allocation53_spill] sm:$0xff] %v17431_v56  ;;  %v9903_v13 = vld [vmem:[#allocation2 + $0xb8] sm:$0xf]  ;;  %v17441_v48 = vsel %vm15184_vm14, %v10748_v29, %v10749_v27  ;;  %v10629_v60 = vld [vmem:[#allocation2 + $0xa8] sm:$0xe]  ;;  %v18240_v51 = vshll.u32 %v16983_v44, 16 }
 0x4af   : > { %18239 = vst [vmem:[#allocation55_spill] sm:$0xff] %v17441_v48  ;;  %v10763_v0 = vrot.slane %v9898_v47, 5  ;;  %v9904_v8 = vld [vmem:[#allocation2 + $0xbc] sm:$0x1]  ;;  %v17459_v29 = vsel %vm15184_vm14, %v12222_v5, %v10760_v4  ;;  %v18314_v58 = vld [vmem:[#allocation46_spill] sm:$0xff] }
 0x4b0   : > { %13537 = vmatmul.mubr.bf16.vlgmr.msra.gmra.mrb[0].mxu1 %v17209_v32  ;;  %v10753_v32 = vrot.slane %v9894_v38, 5  ;;  %v17445_v3 = vrot.slane %v18240_v51, 5  ;;  %v9906_v38 = vld [vmem:[#allocation2 + $0xc4] sm:$0xf]  ;;  %v10767_v51 = vrot.slane %v9900_v45, 5 }
 0x4b1   : > { %13540 = vmatprep.mubr.bf16.mxu1 %v17222_v15  ;;  %13569 = vmatpush3.bf16.msra.mxu1 %v17189_v26  ;;  %v17435_v26 = vsel %vm15184_vm14, %v12220_v22, %v10746_v59  ;;  %v10756_v15 = vrot.slane %v9895_v9, 5  ;;  %v10762_v9 = vrot.slane %v10760_v4, 4  ;;  %v10630_v22 = vld [vmem:[#allocation2 + $0xb4] sm:$0xe]  ;;  %v9907_v59 = vld [vmem:[#allocation2 + $0xc8] sm:$0x1] }
 0x4b2   : > { %13570 = vmatprep.subr.bf16.mxu1 %v14474_v37  ;;  %18238 = vst [vmem:[#allocation54_spill] sm:$0xff] %v17435_v26  ;;  %v10755_v42 = vrot.slane %v10753_v32, 4  ;;  %v17451_v27 = vsel %vm15184_vm14, %v12221_v34, %v10753_v32  ;;  %v12223_v32 = vrot.slane %v10629_v60, 9  ;;  %v10769_v45 = vrot.slane %v10767_v51, 4 }
 0x4b3   : > { %18241 = vst [vmem:[#allocation56_spill] sm:$0xff] %v17451_v27  ;;  %v17468_v34 = vsel %vm15184_vm14, %v10762_v9, %v10763_v0  ;;  %v10770_v4 = vrot.slane %v9901_v30, 5  ;;  %v12224_v48 = vrot.slane %v10630_v22, 9  ;;  %v18243_v26 = vshrl.u32 %v16983_v44, 16 }
 0x4b4   : > { %v17455_v1 = vsel %vm15184_vm14, %v10755_v42, %v10756_v15  ;;  %v10774_v42 = vrot.slane %v9903_v13, 5  ;;  %v10631_v15 = vld [vmem:[#allocation2 + $0xc0] sm:$0xe]  ;;  %v12254_v5 = vcombine.low %v17459_v29, %v17468_v34  ;;  %v10781_v27 = vrot.slane %v9906_v38, 5  ;;  %v17956_v29 = vld [vmem:[%s18054_s6] ss:$0 sm:$0xff] }
 0x4b5   : > { %13571 = vmatpush3.bf16.msra.mxu1 %v14474_v37  ;;  %18242 = vst [vmem:[#allocation57_spill] sm:$0xff] %v17455_v1  ;;  %v14476_v37 = vld [vmem:[%s18052_s4 + $0x158] sm:$0xff]   ;;  %v8505_v56 = vrot.slane %v18243_v26, 4  ;;  %v10777_v1 = vrot.slane %v9904_v8, 5  ;;  %v17478_v60 = vsel %vm15184_vm14, %v12223_v32, %v10767_v51  ;;  %v17482_v13 = vsel %vm15184_vm14, %v10769_v45, %v10770_v4  ;;  %v14477_v8 = vld [vmem:[%s18052_s4 + $0x160] sm:$0xff]  }
 0x4b6   : > { %13572 = vmatprep.subr.bf16.mxu1 %v14475_v12  ;;  %v10776_v47 = vrot.slane %v10774_v42, 4  ;;  %v12225_v44 = vrot.slane %v10631_v15, 9  ;;  %v10783_v26 = vrot.slane %v10781_v27, 4  ;;  %v10784_v38 = vrot.slane %v9907_v59, 5 }
 0x4b7   : > { %v8485_v0 = vshll.u32 %v16994_v63, 16  ;;  %v18245_v22 = vshrl.u32 %v17246_v62, 16  ;;  %v8527_v15 = vshrl.u32 %v17005_v6, 16  ;;  %v18246_v63 = vshll.u32 %v17246_v62, 16 }
 0x4b8   : > { %13541 = vmatmul.mubr.bf16.gmra.mrb[4].mxu1 %v17257_v7  ;;  %v17486_v7 = vsel %vm15184_vm14, %v12224_v48, %v10774_v42  ;;  %v17495_v30 = vsel %vm15184_vm14, %v10776_v47, %v10777_v1  ;;  %v18244_v48 = vor.u32 %v17244_v16, %v17242_v28  ;;  %v8523_v42 = vshll.u32 %v17005_v6, 16 }
 0x4b9   : > { %13544 = vmatprep.mubr.bf16.mxu1 %v17259_v10  ;;  %13573 = vmatpush3.bf16.msra.mxu1 %v14475_v12  ;;  %v8255_v10 = vld [vmem:[#allocation2 + $0x84] sm:$0xf]  ;;  %v12255_v12 = vcombine.low %v17478_v60, %v17482_v13  ;;  %v8492_v51 = vrot.slane %v18245_v22, 4  ;;  %v12256_v32 = vcombine.low %v17486_v7, %v17495_v30  ;;  %v17509_v1 = vsel %vm15184_vm14, %v12225_v44, %v10781_v27 }
 0x4ba   : > { %13574 = vmatprep.subr.bf16.mxu1 %v14476_v37  ;;  %v8449_v9 = vrot.slane %v18244_v48, 4  ;;  %v17513_v28 = vsel %vm15184_vm14, %v10783_v26, %v10784_v38  ;;  %v8495_v16 = vrot.slane %v18246_v63, 5  ;;  %v8514_v59 = vshrl.u32 %v8255_v10, 16 }
 0x4bb   : > { %v8517_v47 = vshll.u32 %v8255_v10, 16  ;;  %v12257_v45 = vcombine.low %v17509_v1, %v17513_v28  ;;  %v18247_v6 = vor.u32 %v17252_v57, %v17250_v61  ;;  %v18248_v27 = vor.u32 %v17272_v14, %v17270_v36  ;;  %v14478_v10 = vld [vmem:[%s18052_s4 + $0x168] sm:$0xff]  }
 0x4bc   : > { %v18249_v26 = vor.u32 %v17306_v39, %v17291_v2  ;;  %v8506_v62 = vor.u32 %v8505_v56, %v17445_v3  ;;  %v18250_v57 = vsel %vm14730_vm11, %v17248_v17, %v17264_v41  ;;  %v18251_v36 = vsel %vm14730_vm11, %v17240_v46, %v17219_v19 }
 0x4bd   : > { %13575 = vmatpush3.bf16.msra.mxu1 %v14476_v37  ;;  %v8459_v4 = vrot.slane %v18247_v6, 4  ;;  %v8473_v44 = vrot.slane %v18248_v27, 4  ;;  %v12057_v14 = vcombine.low %v18251_v36, %v18250_v57  ;;  %v18252_v39 = vshll.u32 %v16963_v18, 16  ;;  %v8258_v6 = vld [vmem:[#allocation2 + $0x90] sm:$0xf]  ;;  %v14480_v36 = vld [vmem:[%s18052_s4 + $0x178] sm:$0xff]  }
 0x4be   : > { %v8483_v37 = vrot.slane %v18249_v26, 4  ;;  %13576 = vmatprep.subr.bf16.mxu1 %v14477_v8  ;;  %v8487_v56 = vrot.slane %v8485_v0, 5  ;;  %v8509_v48 = vshll.u32 %v16996_v35, 16  ;;  %v17546_v22 = vrot.slane %v8523_v42, 5 }
 0x4bf   : > { %v8463_v38 = vrot.slane %v18252_v39, 5  ;;  %v8529_v63 = vrot.slane %v8527_v15, 4  ;;  %v8454_v17 = vsel %vm14730_vm11, %v8449_v9, %v17250_v61  ;;  %v8496_v41 = vor.u32 %v8495_v16, %v8492_v51  ;;  %v14479_v61 = vld [vmem:[%s18052_s4 + $0x170] sm:$0xff]   ;;  %v8261_v15 = vld [vmem:[#allocation2 + $0x9c] sm:$0xf] }
 0x4c0   : > { %13545 = vmatmul.mubr.bf16.gmra.mrb[8].mxu1 %v17268_v53  ;;  %v8516_v19 = vrot.slane %v8514_v59, 4  ;;  %v8519_v46 = vrot.slane %v8517_v47, 5  ;;  %v8478_v35 = vsel %vm14730_vm11, %v8473_v44, %v17291_v2  ;;  %v8488_v53 = vsel %vm14730_vm11, %v8483_v37, %v8487_v56 }
 0x4c1   : > { %13548 = vmatprep.mubr.bf16.mxu1 %v12057_v14  ;;  %13577 = vmatpush3.bf16.msra.mxu1 %v14477_v8  ;;  %v8464_v18 = vsel %vm14730_vm11, %v8459_v4, %v8463_v38  ;;  %v8507_v0 = vrot.slane %v8506_v62, 4  ;;  %v8538_v9 = vshrl.u32 %v8258_v6, 16  ;;  %v8541_v51 = vshll.u32 %v8258_v6, 16 }
 0x4c2   : > { %13578 = vmatprep.subr.bf16.mxu1 %v14478_v10  ;;  %v8547_v8 = vshll.u32 %v17007_v54, 16  ;;  %v8551_v42 = vshrl.u32 %v17007_v54, 16  ;;  %v8511_v16 = vrot.slane %v8509_v48, 5  ;;  %v8530_v59 = vor.u32 %v8529_v63, %v17546_v22 }
 0x4c3   : > { %v8571_v2 = vshll.u32 %v17034_v24, 16  ;;  %v8575_v47 = vshrl.u32 %v17034_v24, 16  ;;  %v12058_v4 = vcombine.low %v8454_v17, %v8464_v18  ;;  %v12059_v27 = vcombine.low %v8478_v35, %v8488_v53  ;;  %v17582_v18 = vld [vmem:[%s18052_s4 + $0x180] sm:$0xff]  }
 0x4c4   : > { %v8497_v44 = vrot.slane %v8496_v41, 4  ;;  %v8520_v26 = vor.u32 %v8519_v46, %v8516_v19  ;;  %v8512_v37 = vsel %vm14730_vm11, %v8507_v0, %v8511_v16  ;;  %v8533_v62 = vshll.u32 %v17018_v31, 16  ;;  %v8264_v46 = vld [vmem:[#allocation2 + $0xa8] sm:$0xf]  ;;  %v14571_v0 = vld [vmem:[#allocation2 + $0xac] sm:$0xf] }
 0x4c5   : > { %13579 = vmatpush3.bf16.msra.mxu1 %v14478_v10  ;;  %v8562_v57 = vshrl.u32 %v8261_v15, 16  ;;  %v8565_v54 = vshll.u32 %v8261_v15, 16  ;;  %v8540_v14 = vrot.slane %v8538_v9, 4  ;;  %v8543_v39 = vrot.slane %v8541_v51, 5 }
 0x4c6   : > { %13580 = vmatprep.subr.bf16.mxu1 %v14479_v61  ;;  %v17572_v24 = vrot.slane %v8547_v8, 5  ;;  %v8553_v38 = vrot.slane %v8551_v42, 4  ;;  %v8531_v56 = vrot.slane %v8530_v59, 4  ;;  %v17574_v10 = vrot.slane %v8571_v2, 5  ;;  %v14572_v59 = vld [vmem:[#allocation2 + $0x98] sm:$0x1] }
 0x4c7   : > { %v8577_v48 = vrot.slane %v8575_v47, 4  ;;  %v8502_v31 = vsel %vm14730_vm11, %v8497_v44, %v17445_v3  ;;  %v8521_v63 = vrot.slane %v8520_v26, 4  ;;  %v8535_v17 = vrot.slane %v8533_v62, 5  ;;  %v8267_v3 = vld [vmem:[#allocation2 + $0xb4] sm:$0xf] }
 0x4c8   : > { %13549 = vmatmul.mubr.bf16.gmra.mrb[12].mxu1 %v12058_v4  ;;  %v12060_v6 = vcombine.low %v8502_v31, %v8512_v37  ;;  %v8564_v41 = vrot.slane %v8562_v57, 4  ;;  %v8567_v19 = vrot.slane %v8565_v54, 5  ;;  %v8544_v35 = vor.u32 %v8543_v39, %v8540_v14  ;;  %v14573_v44 = vld [vmem:[#allocation2 + $0xa4] sm:$0x1] }
 0x4c9   : > { %13552 = vmatprep.mubr.bf16.mxu1 %v12059_v27  ;;  %13581 = vmatpush3.bf16.msra.mxu1 %v14479_v61  ;;  %v8554_v53 = vor.u32 %v8553_v38, %v17572_v24  ;;  %v8595_v9 = vshll.u32 %v14571_v0, 16  ;;  %v8599_v51 = vshrl.u32 %v14571_v0, 16  ;;  %v8536_v61 = vsel %vm14730_vm11, %v8531_v56, %v8535_v17 }
 0x4ca   : > { %13582 = vmatprep.subr.bf16.mxu1 %v14480_v36  ;;  %v8578_v8 = vor.u32 %v8577_v48, %v17574_v10  ;;  %v8619_v42 = vshll.u32 %v17062_v55, 16  ;;  %v8623_v15 = vshrl.u32 %v17062_v55, 16  ;;  %v8526_v16 = vsel %vm14730_vm11, %v8521_v63, %v17546_v22 }
 0x4cb   : > { %v8557_v2 = vshll.u32 %v14572_v59, 16  ;;  %v8586_v47 = vshrl.u32 %v8264_v46, 16  ;;  %v8589_v4 = vshll.u32 %v8264_v46, 16  ;;  %v8568_v27 = vor.u32 %v8567_v19, %v8564_v41  ;;  %v8270_v46 = vld [vmem:[#allocation2 + $0xc0] sm:$0xf] }
 0x4cc   : > { %v8581_v26 = vshll.u32 %v14573_v44, 16  ;;  %v8610_v37 = vshrl.u32 %v8267_v3, 16  ;;  %v8613_v62 = vshll.u32 %v8267_v3, 16  ;;  %v12061_v57 = vcombine.low %v8526_v16, %v8536_v61 }
 0x4cd   : > { %13583 = vmatpush3.bf16.msra.mxu1 %v14480_v36  ;;  %v8555_v54 = vrot.slane %v8554_v53, 4  ;;  %v8597_v14 = vrot.slane %v8595_v9, 5  ;;  %v8601_v55 = vrot.slane %v8599_v51, 4  ;;  %v8545_v39 = vrot.slane %v8544_v35, 4  ;;  %v14574_v9 = vld [vmem:[#allocation2 + $0xc4] sm:$0xf] }
 0x4ce   : > { %13616 = vmatprep.subr.bf16.mxu1 %v17582_v18  ;;  %v8579_v38 = vrot.slane %v8578_v8, 4  ;;  %v8621_v22 = vrot.slane %v8619_v42, 5  ;;  %v8625_v56 = vrot.slane %v8623_v15, 4  ;;  %v8559_v48 = vrot.slane %v8557_v2, 5  ;;  %v14575_v42 = vld [vmem:[#allocation2 + $0xb0] sm:$0x1] }
 0x4cf   : > { %v8588_v31 = vrot.slane %v8586_v47, 4  ;;  %v8591_v36 = vrot.slane %v8589_v4, 5  ;;  %v8569_v63 = vrot.slane %v8568_v27, 4  ;;  %v8583_v17 = vrot.slane %v8581_v26, 5  ;;  %v14576_v27 = vld [vmem:[#allocation2 + $0xbc] sm:$0x1] }
 0x4d0   : > { %13553 = vmatmul.mubr.bf16.gmra.mrb[16].mxu1 %v12060_v6  ;;  %v8612_v41 = vrot.slane %v8610_v37, 4  ;;  %v8615_v19 = vrot.slane %v8613_v62, 5  ;;  %v8560_v0 = vsel %vm14730_vm11, %v8555_v54, %v8559_v48  ;;  %v8602_v53 = vor.u32 %v8601_v55, %v8597_v14 }
 0x4d1   : > { %13556 = vmatprep.mubr.bf16.mxu1 %v12061_v57  ;;  %v8643_v51 = vshll.u32 %v14574_v9, 16  ;;  %v8647_v6 = vshrl.u32 %v14574_v9, 16  ;;  %v8550_v35 = vsel %vm14730_vm11, %v8545_v39, %v17572_v24  ;;  %v8584_v3 = vsel %vm14730_vm11, %v8579_v38, %v8583_v17 }
 0x4d2   : > { %v8626_v61 = vor.u32 %v8625_v56, %v8621_v22  ;;  %v8592_v8 = vor.u32 %v8591_v36, %v8588_v31  ;;  %v8605_v15 = vshll.u32 %v14575_v42, 16  ;;  %v8634_v16 = vshrl.u32 %v8270_v46, 16 }
 0x4d3   : > { %v8637_v59 = vshll.u32 %v8270_v46, 16  ;;  %v12062_v2 = vcombine.low %v8550_v35, %v8560_v0  ;;  %v8574_v47 = vsel %vm14730_vm11, %v8569_v63, %v17574_v10  ;;  %v8616_v4 = vor.u32 %v8615_v19, %v8612_v41  ;;  %v14577_v63 = vld [vmem:[#allocation2 + $0x10] sm:$0xf]  ;;  %v14578_v46 = vld [vmem:[#allocation2 + $0xc8] sm:$0x1] }
 0x4d4   : > { %v8629_v44 = vshll.u32 %v14576_v27, 16  ;;  %v12063_v26 = vcombine.low %v8574_v47, %v8584_v3  ;;  %v8603_v37 = vrot.slane %v8602_v53, 4  ;;  %v8645_v24 = vrot.slane %v8643_v51, 5 }
 0x4d5   : > { %v8649_v62 = vrot.slane %v8647_v6, 4  ;;  %v8627_v57 = vrot.slane %v8626_v61, 4  ;;  %v8593_v54 = vrot.slane %v8592_v8, 4  ;;  %v8607_v55 = vrot.slane %v8605_v15, 5  ;;  %v8979_v8 = vld [vmem:[#allocation2 + $0xc] sm:$0xe] }
 0x4d6   : > { %v8636_v39 = vrot.slane %v8634_v16, 4  ;;  %v8639_v38 = vrot.slane %v8637_v59, 5  ;;  %v8617_v56 = vrot.slane %v8616_v4, 4  ;;  %v8631_v48 = vrot.slane %v8629_v44, 5  ;;  %v14579_v15 = vld [vmem:[#allocation2 + $0x1c] sm:$0xf] }
 0x4d7   : > { %v8608_v31 = vsel %vm14730_vm11, %v8603_v37, %v8607_v55  ;;  %v8650_v10 = vor.u32 %v8649_v62, %v8645_v24  ;;  %v9045_v17 = vrot.slane %v14577_v63, 5  ;;  %v8598_v41 = vsel %vm14730_vm11, %v8593_v54, %v8597_v14  ;;  %v14488_v63 = vld [vmem:[%s18052_s4 + $0x1b8] sm:$0xff]  }
 0x4d8   : > { %13557 = vmatmul.mubr.bf16.gmra.mrb[20].mxu1 %v12062_v2  ;;  %v8632_v36 = vsel %vm14730_vm11, %v8627_v57, %v8631_v48  ;;  %v8640_v19 = vor.u32 %v8639_v38, %v8636_v39  ;;  %v8653_v0 = vshll.u32 %v14578_v46, 16  ;;  %v12064_v53 = vcombine.low %v8598_v41, %v8608_v31  ;;  %v14484_v39 = vld [vmem:[%s18052_s4 + $0x198] sm:$0xff]   ;;  %v18257_v48 = vld [vmem:[#allocation10_spill] sm:$0xff]  ;;  %v18258_v31 = vld [vmem:[#allocation4_spill] sm:$0xff] }
 0x4d9   : > { %13560 = vmatprep.mubr.bf16.mxu1 %v12063_v26  ;;  %v8622_v9 = vsel %vm14730_vm11, %v8617_v56, %v8621_v22  ;;  %v8651_v6 = vrot.slane %v8650_v10, 4  ;;  %v9047_v35 = vrot.slane %v9045_v17, 4  ;;  %v9048_v42 = vrot.slane %v17150_v40, 5  ;;  %v8980_v40 = vld [vmem:[#allocation2 + $0x18] sm:$0xe]  ;;  %v14486_v56 = vld [vmem:[%s18052_s4 + $0x1a8] sm:$0xff]  }
 0x4da   : > { %v12065_v51 = vcombine.low %v8622_v9, %v8632_v36  ;;  %v8641_v3 = vrot.slane %v8640_v19, 4  ;;  %v8655_v61 = vrot.slane %v8653_v0, 5  ;;  %v9052_v16 = vrot.slane %v14579_v15, 5  ;;  %v18261_v10 = vld [vmem:[#allocation8_spill] sm:$0xff]  ;;  %v14487_v36 = vld [vmem:[%s18052_s4 + $0x1b0] sm:$0xff]   ;;  %v18264_v41 = vld [vmem:[#allocation5_spill] sm:$0xff] }
 0x4db   : > { %v12075_v59 = vrot.slane %v8979_v8, 9  ;;  %v9049_v2 = vsel %vm15184_vm14, %v9047_v35, %v9048_v42  ;;  %v9055_v26 = vrot.slane %v17155_v52, 5  ;;  %v12076_v37 = vrot.slane %v8980_v40, 9  ;;  %v14483_v52 = vld [vmem:[%s18052_s4 + $0x190] sm:$0xff]   ;;  %v18266_v46 = vld [vmem:[#allocation3_spill] sm:$0xff]  ;;  %v18267_v0 = vld [vmem:[#allocation12_spill] sm:$0xff] }
 0x4dc   : > { %v8656_v14 = vsel %vm14730_vm11, %v8651_v6, %v8655_v61  ;;  %v8646_v22 = vsel %vm14730_vm11, %v8641_v3, %v8645_v24  ;;  %v9054_v44 = vrot.slane %v9052_v16, 4  ;;  %v14482_v24 = vld [vmem:[%s18052_s4 + $0x188] sm:$0xff]   ;;  %v18253_v55 = vcombine.low %v16935_v20, %v16939_v50  ;;  %v14491_v9 = vld [vmem:[%s18052_s4 + $0x1c0] sm:$0xff]   ;;  %v18272_v3 = vld [vmem:[#allocation14_spill] sm:$0xff] }
 0x4dd   : > { %v12066_v47 = vcombine.low %v8646_v22, %v8656_v14  ;;  %v9046_v4 = vsel %vm15184_vm14, %v12075_v59, %v9045_v17  ;;  %v9053_v57 = vsel %vm15184_vm14, %v12076_v37, %v9052_v16  ;;  %v18254_v38 = vcombine.low %v16949_v23, %v16955_v33  ;;  %v18255_v20 = vld [vmem:[#allocation9_spill] sm:$0xff]  ;;  %v18260_v33 = vld [vmem:[#allocation7_spill] sm:$0xff]  ;;  %v18263_v17 = vld [vmem:[#allocation6_spill] sm:$0xff] }
 0x4de   : > { %v12107_v27 = vcombine.low %v9046_v4, %v9049_v2  ;;  %v9056_v62 = vsel %vm15184_vm14, %v9054_v44, %v9055_v26  ;;  %v18256_v50 = vcombine.low %v16959_v49, %v18255_v20  ;;  %v18259_v23 = vcombine.low %v18257_v48, %v18258_v31  ;;  %v18270_v6 = vld [vmem:[#allocation13_spill] sm:$0xff]  ;;  %v18273_v61 = vld [vmem:[#allocation15_spill] sm:$0xff]  ;;  %v18275_v42 = vld [vmem:[#allocation16_spill] sm:$0xff] }
 0x4df   : > { %v12108_v54 = vcombine.low %v9053_v57, %v9056_v62  ;;  %v18262_v49 = vcombine.low %v18260_v33, %v18261_v10  ;;  %v18265_v19 = vcombine.low %v18263_v17, %v18264_v41  ;;  %v18274_v8 = vcombine.low %v18272_v3, %v18273_v61  ;;  %v18276_v14 = vld [vmem:[#allocation17_spill] sm:$0xff]  ;;  %v18278_v16 = vld [vmem:[#allocation18_spill] sm:$0xff]  ;;  %v18279_v59 = vld [vmem:[#allocation19_spill] sm:$0xff] }
 0x4e0   : > { %13561 = vmatmul.mubr.bf16.gmra.mrb[24].mxu1 %v12064_v53  ;;  %v18268_v53 = vcombine.low %v18266_v46, %v18267_v0  ;;  %v18277_v15 = vcombine.low %v18275_v42, %v18276_v14  ;;  %v18280_v2 = vcombine.low %v18278_v16, %v18279_v59  ;;  %v18281_v22 = vld [vmem:[#allocation20_spill] sm:$0xff]  ;;  %v18285_v44 = vld [vmem:[#allocation23_spill] sm:$0xff]  ;;  %v18288_v62 = vld [vmem:[#allocation25_spill] sm:$0xff] }
 0x4e1   : > { %13564 = vmatprep.mubr.bf16.mxu1 %v12065_v51  ;;  %v18269_v51 = vld [vmem:[#allocation11_spill] sm:$0xff]  ;;  %v18287_v37 = vld [vmem:[#allocation24_spill] sm:$0xff]  ;;  %v14495_v20 = vld [vmem:[#allocation2 + $0x48] sm:$0xff]  }
 0x4e2   : > { %v18271_v35 = vcombine.low %v18269_v51, %v18270_v6  ;;  %v14489_v26 = vld [vmem:[#allocation2 + $0x18] sm:$0xff]   ;;  %v18289_v57 = vcombine.low %v18287_v37, %v18288_v62  ;;  %v14498_v48 = vld [vmem:[#allocation2 + $0x60] sm:$0xff]   ;;  %v14509_v31 = vld [vmem:[%s18052_s4 + $0x1f0] sm:$0xff]  }
 0x4e3   : > { %v14512_v33 = vld [vmem:[%s18052_s4 + $0x1f8] sm:$0xff]   ;;  %v14502_v46 = vld [vmem:[#allocation2 + $0x84] sm:$0xff]  }
 0x4e4   : > { %v14501_v10 = vld [vmem:[#allocation2 + $0x78] sm:$0xff]   ;;  %v18291_v42 = vld [vmem:[#allocation28_spill] sm:$0xff] }
 0x4e5   : > { %v9945_v14 = vshll.u32 %v18291_v42, 16 }
 0x4e8   : > { %13565 = vmatmul.mubr.bf16.gmra.mrb[28].mxu1 %v12066_v47  ;;  %v18282_v47 = vld [vmem:[#allocation21_spill] sm:$0xff] }
 0x4e9   : > { %13584 = vmatprep.mubr.bf16.mxu1 %v12107_v27  ;;  %v18283_v4 = vcombine.low %v18281_v22, %v18282_v47  ;;  %v18284_v27 = vld [vmem:[#allocation22_spill] sm:$0xff]  ;;  %v14505_v47 = vld [vmem:[#allocation2 + $0x9c] sm:$0xff]  }
 0x4ea   : > { %v18286_v40 = vcombine.low %v18284_v27, %v18285_v44  ;;  %v9869_v22 = vld [vmem:[#allocation2 + $0x30] sm:$0xf]  ;;  %v18292_v27 = vld [vmem:[#allocation27_spill] sm:$0xff] }
 0x4eb   : > { %v9931_v44 = vshll.u32 %v18292_v27, 16  ;;  %v9960_v37 = vshrl.u32 %v9869_v22, 16  ;;  %v10632_v27 = vld [vmem:[#allocation2 + $0xcc] sm:$0xe] }
 0x4f0   : > { %13585 = vmatmul.mubr.bf16.vlgmr.msra.gmra.mrb[0].mxu1 %v12108_v54  ;;  %v14490_v54 = vld [vmem:[#allocation2 + $0x24] sm:$0xff]  }
 0x4f1   : > { %13588 = vmatprep.mubr.bf16.mxu1 %v18253_v55  ;;  %13617 = vmatpush3.bf16.msra.mxu1 %v17582_v18  ;;  %v14485_v18 = vld [vmem:[%s18052_s4 + $0x1a0] sm:$0xff]   ;;  %v14492_v55 = vld [vmem:[#allocation2 + $0x30] sm:$0xff]  }
 0x4f2   : > { %13618 = vmatprep.subr.bf16.mxu1 %v14482_v24 }
 0x4f5   : > { %13619 = vmatpush3.bf16.msra.mxu1 %v14482_v24  ;;  %v14494_v24 = vld [vmem:[%s18052_s4 + $0x1c8] sm:$0xff]  }
 0x4f6   : > { %13620 = vmatprep.subr.bf16.mxu1 %v14483_v52 }
 0x4f8   : > { %13589 = vmatmul.mubr.bf16.gmra.mrb[4].mxu1 %v18254_v38  ;;  %v14500_v38 = vld [vmem:[%s18052_s4 + $0x1d8] sm:$0xff]  }
 0x4f9   : > { %13592 = vmatprep.mubr.bf16.mxu1 %v18256_v50  ;;  %13621 = vmatpush3.bf16.msra.mxu1 %v14483_v52  ;;  %v14497_v52 = vld [vmem:[%s18052_s4 + $0x1d0] sm:$0xff]   ;;  %v14503_v50 = vld [vmem:[%s18052_s4 + $0x1e0] sm:$0xff]  }
 0x4fa   : > { %13622 = vmatprep.subr.bf16.mxu1 %v14484_v39 }
 0x4fd   : > { %13623 = vmatpush3.bf16.msra.mxu1 %v14484_v39  ;;  %v14493_v39 = vld [vmem:[#allocation2 + $0x3c] sm:$0xff]  }
 0x4fe   : > { %13624 = vmatprep.subr.bf16.mxu1 %v14485_v18 }
 0x500   : > { %13593 = vmatmul.mubr.bf16.gmra.mrb[8].mxu1 %v18259_v23  ;;  %v14499_v23 = vld [vmem:[#allocation2 + $0x6c] sm:$0xff]  }
 0x501   : > { %13596 = vmatprep.mubr.bf16.mxu1 %v18262_v49  ;;  %13625 = vmatpush3.bf16.msra.mxu1 %v14485_v18  ;;  %v14496_v18 = vld [vmem:[#allocation2 + $0x54] sm:$0xff]   ;;  %v17717_v49 = vld [vmem:[%s18052_s4 + $0x200] sm:$0xff]  }
 0x502   : > { %13626 = vmatprep.subr.bf16.mxu1 %v14486_v56 }
 0x505   : > { %13627 = vmatpush3.bf16.msra.mxu1 %v14486_v56  ;;  %v14506_v56 = vld [vmem:[%s18052_s4 + $0x1e8] sm:$0xff]  }
 0x506   : > { %13628 = vmatprep.subr.bf16.mxu1 %v14487_v36 }
 0x508   : > { %13597 = vmatmul.mubr.bf16.gmra.mrb[12].mxu1 %v18265_v19  ;;  %v9866_v19 = vld [vmem:[#allocation2 + $0x24] sm:$0xf] }
 0x509   : > { %13600 = vmatprep.mubr.bf16.mxu1 %v18268_v53  ;;  %13629 = vmatpush3.bf16.msra.mxu1 %v14487_v36  ;;  %v9863_v36 = vld [vmem:[#allocation2 + $0x18] sm:$0xf]  ;;  %v9939_v3 = vshll.u32 %v9866_v19, 16 }
 0x50a   : > { %13630 = vmatprep.subr.bf16.mxu1 %v14488_v63  ;;  %v9912_v0 = vshrl.u32 %v9863_v36, 16  ;;  %v9915_v53 = vshll.u32 %v9863_v36, 16 }
 0x50b   : > { %v9941_v59 = vrot.slane %v9939_v3, 5  ;;  %v18296_v3 = vld [vmem:[#allocation32_spill] sm:$0xff] }
 0x50c   : > { %v9914_v61 = vrot.slane %v9912_v0, 4 }
 0x50d   : > { %13631 = vmatpush3.bf16.msra.mxu1 %v14488_v63  ;;  %v18290_v63 = vld [vmem:[#allocation26_spill] sm:$0xff] }
 0x50e   : > { %13664 = vmatprep.subr.bf16.mxu1 %v14491_v9  ;;  %v9921_v17 = vshll.u32 %v18290_v63, 16  ;;  %v9925_v41 = vshrl.u32 %v18290_v63, 16 }
 0x510   : > { %13601 = vmatmul.mubr.bf16.gmra.mrb[16].mxu1 %v18271_v35  ;;  %v9923_v51 = vrot.slane %v9921_v17, 5  ;;  %v9927_v6 = vrot.slane %v9925_v41, 4  ;;  %v9936_v35 = vshrl.u32 %v9866_v19, 16  ;;  %v14508_v17 = vld [vmem:[#allocation2 + $0xb4] sm:$0xff]  }
 0x511   : > { %13604 = vmatprep.mubr.bf16.mxu1 %v18274_v8  ;;  %v9917_v8 = vrot.slane %v9915_v53, 5 }
 0x512   : > { %v9938_v16 = vrot.slane %v9936_v35, 4 }
 0x518   : > { %13605 = vmatmul.mubr.bf16.gmra.mrb[20].mxu1 %v18277_v15  ;;  %v9928_v15 = vor.u32 %v9927_v6, %v9923_v51 }
 0x519   : > { %13608 = vmatprep.mubr.bf16.mxu1 %v18280_v2  ;;  %v9949_v2 = vshrl.u32 %v18291_v42, 16  ;;  %v9875_v42 = vld [vmem:[#allocation2 + $0x48] sm:$0xf] }
 0x51a   : > { %v9929_v62 = vrot.slane %v9928_v15, 4 }
 0x520   : > { %13609 = vmatmul.mubr.bf16.gmra.mrb[24].mxu1 %v18283_v4  ;;  %v9918_v4 = vor.u32 %v9917_v8, %v9914_v61  ;;  %v9993_v61 = vshll.u32 %v18296_v3, 16  ;;  %v9997_v8 = vshrl.u32 %v18296_v3, 16 }
 0x521   : > { %13612 = vmatprep.mubr.bf16.mxu1 %v18286_v40  ;;  %v14507_v40 = vld [vmem:[#allocation2 + $0xa8] sm:$0xff]  }
 0x528   : > { %13613 = vmatmul.mubr.bf16.gmra.mrb[28].mxu1 %v18289_v57  ;;  %v9942_v57 = vor.u32 %v9941_v59, %v9938_v16  ;;  %v18297_v16 = vld [vmem:[#allocation33_spill] sm:$0xff] }
 0x529   : > { %13632 = vmatprep.mubr.bf16.mxu1 %v14489_v26  ;;  %v17725_v26 = vrot.slane %v9945_v14, 5  ;;  %v10017_v59 = vshll.u32 %v18297_v16, 16 }
 0x530   : > { %13633 = vmatmul.mubr.bf16.vlgmr.msra.gmra.mrb[0].mxu1 %v14490_v54  ;;  %v9951_v54 = vrot.slane %v9949_v2, 4  ;;  %v17749_v2 = vld [vmem:[#allocation2 + $0xd0] sm:$0xf] }
 0x531   : > { %13636 = vmatprep.mubr.bf16.mxu1 %v14492_v55  ;;  %13665 = vmatpush3.bf16.msra.mxu1 %v14491_v9  ;;  %v14504_v9 = vld [vmem:[#allocation2 + $0x90] sm:$0xff]  }
 0x532   : > { %13666 = vmatprep.subr.bf16.mxu1 %v14494_v24  ;;  %v18293_v55 = vld [vmem:[#allocation30_spill] sm:$0xff] }
 0x535   : > { %13667 = vmatpush3.bf16.msra.mxu1 %v14494_v24  ;;  %v9963_v24 = vshll.u32 %v9869_v22, 16  ;;  %v17751_v22 = vld [vmem:[#allocation2 + $0xd4] sm:$0x1] }
 0x536   : > { %13668 = vmatprep.subr.bf16.mxu1 %v14497_v52 }
 0x538   : > { %13637 = vmatmul.mubr.bf16.gmra.mrb[4].mxu1 %v14493_v39  ;;  %v9973_v39 = vshrl.u32 %v18293_v55, 16 }
 0x539   : > { %13640 = vmatprep.mubr.bf16.mxu1 %v14495_v20  ;;  %13669 = vmatpush3.bf16.msra.mxu1 %v14497_v52  ;;  %v9969_v52 = vshll.u32 %v18293_v55, 16  ;;  %v9933_v20 = vrot.slane %v9931_v44, 5  ;;  %v10788_v44 = vrot.slane %v17749_v2, 5  ;;  %v17759_v55 = vrot.slane %v9993_v61, 5 }
 0x53a   : > { %13670 = vmatprep.subr.bf16.mxu1 %v14500_v38  ;;  %v9975_v63 = vrot.slane %v9973_v39, 4 }
 0x53b   : > { %v17735_v36 = vrot.slane %v9969_v52, 5  ;;  %v9999_v52 = vrot.slane %v9997_v8, 4  ;;  %v10790_v39 = vrot.slane %v10788_v44, 4 }
 0x53d   : > { %13671 = vmatpush3.bf16.msra.mxu1 %v14500_v38  ;;  %v9919_v38 = vrot.slane %v9918_v4, 4  ;;  %v10021_v4 = vshrl.u32 %v18297_v16, 16  ;;  %v10000_v61 = vor.u32 %v9999_v52, %v17759_v55 }
 0x53e   : > { %13672 = vmatprep.subr.bf16.mxu1 %v14503_v50 }
 0x53f   : > { %v9924_v41 = vsel %vm14730_vm11, %v9919_v38, %v9923_v51  ;;  %v14511_v38 = vld [vmem:[#allocation2 + $0xcc] sm:$0xff]  }
 0x540   : > { %13641 = vmatmul.mubr.bf16.gmra.mrb[8].mxu1 %v14496_v18 }
 0x541   : > { %13644 = vmatprep.mubr.bf16.mxu1 %v14498_v48  ;;  %13673 = vmatpush3.bf16.msra.mxu1 %v14503_v50  ;;  %v18294_v50 = vld [vmem:[#allocation29_spill] sm:$0xff]  ;;  %v9872_v48 = vld [vmem:[#allocation2 + $0x3c] sm:$0xf] }
 0x542   : > { %13674 = vmatprep.subr.bf16.mxu1 %v14506_v56  ;;  %v9955_v18 = vshll.u32 %v18294_v50, 16  ;;  %v9984_v53 = vshrl.u32 %v9872_v48, 16  ;;  %v9987_v35 = vshll.u32 %v9872_v48, 16  ;;  %v10011_v50 = vshll.u32 %v9875_v42, 16 }
 0x543   : > { %v10023_v48 = vrot.slane %v10021_v4, 4 }
 0x544   : > { %v17739_v19 = vrot.slane %v9955_v18, 5  ;;  %v17761_v18 = vrot.slane %v10017_v59, 5  ;;  %v10013_v8 = vrot.slane %v10011_v50, 5 }
 0x545   : > { %13675 = vmatpush3.bf16.msra.mxu1 %v14506_v56  ;;  %v9962_v56 = vrot.slane %v9960_v37, 4  ;;  %v9986_v37 = vrot.slane %v9984_v53, 4 }
 0x546   : > { %13676 = vmatprep.subr.bf16.mxu1 %v14509_v31 }
 0x548   : > { %13645 = vmatmul.mubr.bf16.gmra.mrb[12].mxu1 %v14499_v23  ;;  %v17732_v23 = vrot.slane %v9942_v57, 4  ;;  %v10045_v57 = vshrl.u32 %v17336_v43, 16 }
 0x549   : > { %13648 = vmatprep.mubr.bf16.mxu1 %v14501_v10  ;;  %13677 = vmatpush3.bf16.msra.mxu1 %v14509_v31  ;;  %v9934_v31 = vsel %vm14730_vm11, %v9929_v62, %v9933_v20  ;;  %v9965_v10 = vrot.slane %v9963_v24, 5  ;;  %v10041_v62 = vshll.u32 %v17336_v43, 16  ;;  %v9989_v24 = vrot.slane %v9987_v35, 5  ;;  %v18298_v35 = vld [vmem:[#allocation36_spill] sm:$0xff] }
 0x54a   : > { %13678 = vmatprep.subr.bf16.mxu1 %v14512_v33  ;;  %v12187_v6 = vcombine.low %v9924_v41, %v9934_v31  ;;  %v9948_v14 = vsel %vm14730_vm11, %v17732_v23, %v17725_v26  ;;  %v10008_v20 = vshrl.u32 %v9875_v42, 16  ;;  %v10003_v3 = vshll.u32 %v18298_v35, 16 }
 0x54b   : > { %v9966_v15 = vor.u32 %v9965_v10, %v9962_v56  ;;  %v17771_v10 = vrot.slane %v10041_v62, 5  ;;  %v9990_v25 = vor.u32 %v9989_v24, %v9986_v37  ;;  %v10024_v42 = vor.u32 %v10023_v48, %v17761_v18  ;;  %v14580_v37 = vld [vmem:[#allocation2 + $0x50] sm:$0x1]  ;;  %v18300_v24 = vld [vmem:[#allocation39_spill] sm:$0xff]  ;;  %v9884_v48 = vld [vmem:[#allocation2 + $0x6c] sm:$0xf] }
 0x54c   : > { %v10051_v52 = vshll.u32 %v18300_v24, 16 }
 0x54d   : > { %13679 = vmatpush3.bf16.msra.mxu1 %v14512_v33  ;;  %v9952_v33 = vor.u32 %v9951_v54, %v17725_v26  ;;  %v9878_v26 = vld [vmem:[#allocation2 + $0x54] sm:$0xf]  ;;  %v12226_v54 = vrot.slane %v10632_v27, 9  ;;  %v9967_v53 = vrot.slane %v9966_v15, 4  ;;  %v9991_v62 = vrot.slane %v9990_v25, 4 }
 0x54e   : > { %13712 = vmatprep.subr.bf16.mxu1 %v17717_v49  ;;  %v10032_v31 = vshrl.u32 %v9878_v26, 16  ;;  %v10035_v23 = vshll.u32 %v9878_v26, 16  ;;  %v10027_v26 = vshll.u32 %v14580_v37, 16  ;;  %v10080_v25 = vshrl.u32 %v9884_v48, 16 }
 0x54f   : > { %v9953_v51 = vrot.slane %v9952_v33, 4  ;;  %v17765_v56 = vsel %vm15184_vm14, %v12226_v54, %v10788_v44  ;;  %v10005_v54 = vrot.slane %v10003_v3, 5  ;;  %v9996_v35 = vsel %vm14730_vm11, %v9991_v62, %v17759_v55  ;;  %v14515_v55 = vld [vmem:[%s18052_s4 + $0x210] sm:$0xff]  }
 0x550   : > { %13649 = vmatmul.mubr.bf16.gmra.mrb[16].mxu1 %v14502_v46  ;;  %v18295_v46 = vld [vmem:[#allocation31_spill] sm:$0xff]  ;;  %v10034_v16 = vrot.slane %v10032_v31, 4  ;;  %v10037_v59 = vrot.slane %v10035_v23, 5  ;;  %v10053_v3 = vrot.slane %v10051_v52, 5 }
 0x551   : > { %13652 = vmatprep.mubr.bf16.mxu1 %v14504_v9  ;;  %v9979_v0 = vshll.u32 %v18295_v46, 16  ;;  %v14510_v9 = vld [vmem:[#allocation2 + $0xc0] sm:$0xff]   ;;  %v9958_v46 = vsel %vm14730_vm11, %v9953_v51, %v17739_v19  ;;  %v18299_v19 = vld [vmem:[#allocation41_spill] sm:$0xff] }
 0x552   : > { %v10065_v51 = vshll.u32 %v18299_v19, 16  ;;  %v10069_v15 = vshrl.u32 %v18299_v19, 16 }
 0x553   : > { %v9981_v33 = vrot.slane %v9979_v0, 5  ;;  %v10010_v0 = vrot.slane %v10008_v20, 4  ;;  %v10038_v20 = vor.u32 %v10037_v59, %v10034_v16 }
 0x554   : > { %v17793_v23 = vrot.slane %v10065_v51, 5 }
 0x555   : > { %v10039_v59 = vrot.slane %v10038_v20, 4 }
 0x557   : > { %v10044_v52 = vsel %vm14730_vm11, %v10039_v59, %v17771_v10  ;;  %v14585_v59 = vld [vmem:[#allocation2 + $0x94] sm:$0xf] }
 0x558   : > { %13653 = vmatmul.mubr.bf16.gmra.mrb[20].mxu1 %v14505_v47  ;;  %v9976_v47 = vor.u32 %v9975_v63, %v17735_v36  ;;  %v10047_v63 = vrot.slane %v10045_v57, 4  ;;  %v10001_v57 = vrot.slane %v10000_v61, 4  ;;  %v10083_v61 = vshll.u32 %v9884_v48, 16  ;;  %v14516_v48 = vld [vmem:[%s18052_s4 + $0x218] sm:$0xff]  }
 0x559   : > { %13656 = vmatprep.mubr.bf16.mxu1 %v14507_v40  ;;  %v10791_v40 = vrot.slane %v17751_v22, 5 }
 0x55a   : > { %v10048_v27 = vor.u32 %v10047_v63, %v17771_v10  ;;  %v10085_v37 = vrot.slane %v10083_v61, 5 }
 0x55b   : > { %v17769_v43 = vsel %vm15184_vm14, %v10790_v39, %v10791_v40  ;;  %v9972_v40 = vsel %vm14730_vm11, %v9967_v53, %v17735_v36  ;;  %v10014_v39 = vor.u32 %v10013_v8, %v10010_v0  ;;  %v9887_v0 = vld [vmem:[#allocation2 + $0x78] sm:$0xf]  ;;  %v10006_v8 = vsel %vm14730_vm11, %v10001_v57, %v10005_v54 }
 0x55c   : > { %v12258_v41 = vcombine.low %v17765_v56, %v17769_v43  ;;  %v10049_v36 = vrot.slane %v10048_v27, 4  ;;  %v12190_v54 = vcombine.low %v9996_v35, %v10006_v8  ;;  %v14517_v8 = vld [vmem:[%s18052_s4 + $0x220] sm:$0xff]  }
 0x560   : > { %13657 = vmatmul.mubr.bf16.gmra.mrb[24].mxu1 %v14508_v17  ;;  %v9881_v17 = vld [vmem:[#allocation2 + $0x60] sm:$0xf] }
 0x561   : > { %13660 = vmatprep.mubr.bf16.mxu1 %v14510_v9  ;;  %v9977_v9 = vrot.slane %v9976_v47, 4  ;;  %v10056_v4 = vshrl.u32 %v9881_v17, 16  ;;  %v10059_v44 = vshll.u32 %v9881_v17, 16  ;;  %v12188_v47 = vcombine.low %v9948_v14, %v9958_v46  ;;  %v14514_v14 = vld [vmem:[%s18052_s4 + $0x208] sm:$0xff]   ;;  %v18301_v46 = vld [vmem:[#allocation44_spill] sm:$0xff] }
 0x562   : > { %v10029_v17 = vrot.slane %v10027_v26, 5  ;;  %v10089_v53 = vshll.u32 %v18301_v46, 16  ;;  %v14582_v26 = vld [vmem:[#allocation2 + $0x7c] sm:$0xf] }
 0x563   : > { %v10058_v50 = vrot.slane %v10056_v4, 4  ;;  %v10061_v31 = vrot.slane %v10059_v44, 5  ;;  %v10054_v4 = vsel %vm14730_vm11, %v10049_v36, %v10053_v3  ;;  %v10113_v62 = vshll.u32 %v14582_v26, 16  ;;  %v9890_v36 = vld [vmem:[#allocation2 + $0x84] sm:$0xf] }
 0x564   : > { %v17811_v51 = vrot.slane %v10089_v53, 5  ;;  %v10117_v57 = vshrl.u32 %v14582_v26, 16  ;;  %v10128_v35 = vshrl.u32 %v9890_v36, 16  ;;  %v10131_v3 = vshll.u32 %v9890_v36, 16 }
 0x565   : > { %v10062_v27 = vor.u32 %v10061_v31, %v10058_v50  ;;  %v17823_v53 = vrot.slane %v10113_v62, 5 }
 0x566   : > { %v10130_v26 = vrot.slane %v10128_v35, 4  ;;  %v10133_v62 = vrot.slane %v10131_v3, 5 }
 0x567   : > { %v10063_v20 = vrot.slane %v10062_v27, 4  ;;  %v10165_v27 = vshrl.u32 %v14585_v59, 16 }
 0x568   : > { %13661 = vmatmul.mubr.bf16.gmra.mrb[28].mxu1 %v14511_v38  ;;  %v10025_v38 = vrot.slane %v10024_v42, 4  ;;  %v10015_v42 = vrot.slane %v10014_v39, 4 }
 0x569   : > { %13680 = vmatprep.mubr.bf16.mxu1 %v12187_v6  ;;  %v9982_v6 = vsel %vm14730_vm11, %v9977_v9, %v9981_v33  ;;  %v10071_v33 = vrot.slane %v10069_v15, 4  ;;  %v10093_v9 = vshrl.u32 %v18301_v46, 16  ;;  %v14583_v46 = vld [vmem:[#allocation2 + $0x74] sm:$0x1] }
 0x56a   : > { %v12189_v63 = vcombine.low %v9972_v40, %v9982_v6  ;;  %v10030_v16 = vsel %vm14730_vm11, %v10025_v38, %v10029_v17  ;;  %v10107_v40 = vshll.u32 %v9887_v0, 16  ;;  %v10082_v6 = vrot.slane %v10080_v25, 4  ;;  %v14584_v25 = vld [vmem:[#allocation2 + $0x88] sm:$0xf] }
 0x56b   : > { %v10072_v44 = vor.u32 %v10071_v33, %v17793_v23  ;;  %v10095_v15 = vrot.slane %v10093_v9, 4  ;;  %v10020_v24 = vsel %vm14730_vm11, %v10015_v42, %v17761_v18  ;;  %v12192_v38 = vcombine.low %v10044_v52, %v10054_v4 }
 0x56c   : > { %v12191_v39 = vcombine.low %v10020_v24, %v10030_v16  ;;  %v10109_v18 = vrot.slane %v10107_v40, 5  ;;  %v10086_v17 = vor.u32 %v10085_v37, %v10082_v6  ;;  %v10099_v10 = vshll.u32 %v14583_v46, 16  ;;  %v14586_v6 = vld [vmem:[#allocation2 + $0x80] sm:$0x1]  ;;  %v9896_v24 = vld [vmem:[#allocation2 + $0x9c] sm:$0xf] }
 0x56d   : > { %v10073_v31 = vrot.slane %v10072_v44, 4  ;;  %v10096_v33 = vor.u32 %v10095_v15, %v17811_v51  ;;  %v10119_v9 = vrot.slane %v10117_v57, 4  ;;  %v10137_v61 = vshll.u32 %v14584_v25, 16 }
 0x56e   : > { %v10161_v4 = vshll.u32 %v14585_v59, 16  ;;  %v10068_v44 = vsel %vm14730_vm11, %v10063_v20, %v17793_v23  ;;  %v10087_v15 = vrot.slane %v10086_v17, 4  ;;  %v10123_v37 = vshll.u32 %v14586_v6, 16 }
 0x56f   : > { %v10120_v40 = vor.u32 %v10119_v9, %v17823_v53  ;;  %v17834_v57 = vrot.slane %v10137_v61, 5  ;;  %v10167_v20 = vrot.slane %v10165_v27, 4  ;;  %v10176_v17 = vshrl.u32 %v9896_v24, 16 }
 0x570   : > { %13681 = vmatmul.mubr.bf16.vlgmr.msra.gmra.mrb[0].mxu1 %v12188_v47  ;;  %v10104_v47 = vshrl.u32 %v9887_v0, 16  ;;  %v10141_v0 = vshrl.u32 %v14584_v25, 16  ;;  %v10179_v46 = vshll.u32 %v9896_v24, 16  ;;  %v10125_v9 = vrot.slane %v10123_v37, 5  ;;  %v14587_v25 = vld [vmem:[#allocation2 + $0x8c] sm:$0x1] }
 0x571   : > { %13684 = vmatprep.mubr.bf16.mxu1 %v12189_v63  ;;  %13713 = vmatpush3.bf16.msra.mxu1 %v17717_v49  ;;  %v14581_v49 = vld [vmem:[#allocation2 + $0x68] sm:$0x1]  ;;  %v10147_v61 = vshll.u32 %v14587_v25, 16 }
 0x572   : > { %13714 = vmatprep.subr.bf16.mxu1 %v14514_v14  ;;  %v10075_v19 = vshll.u32 %v14581_v49, 16  ;;  %v10106_v63 = vrot.slane %v10104_v47, 4  ;;  %v10097_v49 = vrot.slane %v10096_v33, 4  ;;  %v10101_v47 = vrot.slane %v10099_v10, 5 }
 0x573   : > { %v10092_v33 = vsel %vm14730_vm11, %v10087_v15, %v17811_v51  ;;  %v10149_v24 = vrot.slane %v10147_v61, 5  ;;  %v9905_v61 = vld [vmem:[#allocation2 + $0xc0] sm:$0xf] }
 0x574   : > { %v10077_v50 = vrot.slane %v10075_v19, 5  ;;  %v10110_v19 = vor.u32 %v10109_v18, %v10106_v63  ;;  %v10121_v63 = vrot.slane %v10120_v40, 4  ;;  %v10134_v18 = vor.u32 %v10133_v62, %v10130_v26  ;;  %v14520_v62 = vld [vmem:[%s18052_s4 + $0x238] sm:$0xff]  }
 0x575   : > { %13715 = vmatpush3.bf16.msra.mxu1 %v14514_v14  ;;  %v9893_v14 = vld [vmem:[#allocation2 + $0x90] sm:$0xf]  ;;  %v10181_v40 = vrot.slane %v10179_v46, 5 }
 0x576   : > { %13716 = vmatprep.subr.bf16.mxu1 %v14515_v55  ;;  %v10152_v42 = vshrl.u32 %v9893_v14, 16  ;;  %v10155_v16 = vshll.u32 %v9893_v14, 16  ;;  %v10126_v59 = vsel %vm14730_vm11, %v10121_v63, %v10125_v9 }
 0x578   : > { %13685 = vmatmul.mubr.bf16.gmra.mrb[4].mxu1 %v12190_v54  ;;  %v10143_v54 = vrot.slane %v10141_v0, 4  ;;  %v10154_v23 = vrot.slane %v10152_v42, 4  ;;  %v10157_v52 = vrot.slane %v10155_v16, 5  ;;  %v14588_v0 = vld [vmem:[#allocation2 + $0xa0] sm:$0xf] }
 0x579   : > { %13688 = vmatprep.mubr.bf16.mxu1 %v12191_v39  ;;  %13717 = vmatpush3.bf16.msra.mxu1 %v14515_v55  ;;  %v10078_v55 = vsel %vm14730_vm11, %v10073_v31, %v10077_v50  ;;  %v17836_v39 = vrot.slane %v10161_v4, 5  ;;  %v14518_v50 = vld [vmem:[%s18052_s4 + $0x228] sm:$0xff]   ;;  %v10111_v31 = vrot.slane %v10110_v19, 4  ;;  %v10189_v42 = vshrl.u32 %v14588_v0, 16  ;;  %v14589_v4 = vld [vmem:[#allocation2 + $0x98] sm:$0x1] }
 0x57a   : > { %13718 = vmatprep.subr.bf16.mxu1 %v14516_v48  ;;  %v12193_v36 = vcombine.low %v10068_v44, %v10078_v55  ;;  %v10144_v14 = vor.u32 %v10143_v54, %v17834_v57  ;;  %v10158_v35 = vor.u32 %v10157_v52, %v10154_v23  ;;  %v9899_v16 = vld [vmem:[#allocation2 + $0xa8] sm:$0xf]  ;;  %v10171_v27 = vshll.u32 %v14589_v4, 16  ;;  %v14590_v44 = vld [vmem:[#allocation2 + $0xac] sm:$0xf] }
 0x57b   : > { %v10168_v3 = vor.u32 %v10167_v20, %v17836_v39  ;;  %v10116_v51 = vsel %vm14730_vm11, %v10111_v31, %v17823_v53  ;;  %v10209_v55 = vshll.u32 %v14590_v44, 16  ;;  %v10135_v19 = vrot.slane %v10134_v18, 4  ;;  %v14591_v18 = vld [vmem:[#allocation2 + $0xa4] sm:$0x1] }
 0x57c   : > { %v10145_v15 = vrot.slane %v10144_v14, 4  ;;  %v10159_v53 = vrot.slane %v10158_v35, 4  ;;  %v10200_v37 = vshrl.u32 %v9899_v16, 16  ;;  %v10203_v26 = vshll.u32 %v9899_v16, 16 }
 0x57d   : > { %13719 = vmatpush3.bf16.msra.mxu1 %v14516_v48  ;;  %v10102_v48 = vsel %vm14730_vm11, %v10097_v49, %v10101_v47  ;;  %v10213_v49 = vshrl.u32 %v14590_v44, 16  ;;  %v10178_v47 = vrot.slane %v10176_v17, 4  ;;  %v10169_v6 = vrot.slane %v10168_v3, 4  ;;  %v14592_v3 = vld [vmem:[#allocation2 + $0xb8] sm:$0xf] }
 0x57e   : > { %13720 = vmatprep.subr.bf16.mxu1 %v14517_v8  ;;  %v12194_v10 = vcombine.low %v10092_v33, %v10102_v48  ;;  %v12195_v54 = vcombine.low %v10116_v51, %v10126_v59  ;;  %v10191_v52 = vrot.slane %v10189_v42, 4  ;;  %v10173_v20 = vrot.slane %v10171_v27, 5 }
 0x57f   : > { %v10215_v48 = vrot.slane %v10213_v49, 4  ;;  %v10140_v31 = vsel %vm14730_vm11, %v10135_v19, %v17834_v57  ;;  %v10150_v33 = vsel %vm14730_vm11, %v10145_v15, %v10149_v24  ;;  %v10182_v63 = vor.u32 %v10181_v40, %v10178_v47  ;;  %v9908_v47 = vld [vmem:[#allocation2 + $0xcc] sm:$0xf] }
 0x580   : > { %13689 = vmatmul.mubr.bf16.gmra.mrb[8].mxu1 %v12192_v38  ;;  %v14519_v38 = vld [vmem:[%s18052_s4 + $0x230] sm:$0xff]   ;;  %v10195_v14 = vshll.u32 %v14591_v18, 16  ;;  %v10164_v17 = vsel %vm14730_vm11, %v10159_v53, %v17836_v39  ;;  %v10174_v46 = vsel %vm14730_vm11, %v10169_v6, %v10173_v20  ;;  %v10205_v9 = vrot.slane %v10203_v26, 5 }
 0x581   : > { %13692 = vmatprep.mubr.bf16.mxu1 %v12193_v36  ;;  %13721 = vmatpush3.bf16.msra.mxu1 %v14517_v8  ;;  %v10185_v8 = vshll.u32 %v14588_v0, 16  ;;  %v17861_v36 = vrot.slane %v10209_v55, 5  ;;  %v10233_v51 = vshll.u32 %v14592_v3, 16  ;;  %v10237_v25 = vshrl.u32 %v14592_v3, 16  ;;  %v14594_v55 = vld [vmem:[#allocation2 + $0xb0] sm:$0x1] }
 0x582   : > { %13722 = vmatprep.subr.bf16.mxu1 %v14518_v50  ;;  %v12196_v39 = vcombine.low %v10140_v31, %v10150_v33  ;;  %v12197_v59 = vcombine.low %v10164_v17, %v10174_v46  ;;  %v10183_v4 = vrot.slane %v10182_v63, 4  ;;  %v10197_v27 = vrot.slane %v10195_v14, 5 }
 0x583   : > { %v17859_v23 = vrot.slane %v10185_v8, 5  ;;  %v10216_v0 = vor.u32 %v10215_v48, %v17861_v36  ;;  %v14593_v8 = vld [vmem:[#allocation2 + $0xc4] sm:$0xf]  ;;  %v10219_v49 = vshll.u32 %v14594_v55, 16  ;;  %v10248_v19 = vshrl.u32 %v9905_v61, 16 }
 0x584   : > { %v10257_v42 = vshll.u32 %v14593_v8, 16  ;;  %v10261_v16 = vshrl.u32 %v14593_v8, 16  ;;  %v10251_v15 = vshll.u32 %v9905_v61, 16  ;;  %v10235_v6 = vrot.slane %v10233_v51, 5  ;;  %v14596_v8 = vld [vmem:[#allocation2 + $0xc8] sm:$0x1] }
 0x585   : > { %13723 = vmatpush3.bf16.msra.mxu1 %v14518_v50  ;;  %v9902_v50 = vld [vmem:[#allocation2 + $0xb4] sm:$0xf]  ;;  %v10192_v35 = vor.u32 %v10191_v52, %v17859_v23  ;;  %v10217_v26 = vrot.slane %v10216_v0, 4  ;;  %v10272_v20 = vshrl.u32 %v9908_v47, 16  ;;  %v10275_v48 = vshll.u32 %v9908_v47, 16 }
 0x586   : > { %13724 = vmatprep.subr.bf16.mxu1 %v14519_v38  ;;  %v10224_v57 = vshrl.u32 %v9902_v50, 16  ;;  %v10259_v24 = vrot.slane %v10257_v42, 5  ;;  %v10263_v52 = vrot.slane %v10261_v16, 4  ;;  %v10221_v33 = vrot.slane %v10219_v49, 5 }
 0x587   : > { %v10193_v40 = vrot.slane %v10192_v35, 4  ;;  %v10250_v63 = vrot.slane %v10248_v19, 4  ;;  %v10253_v18 = vrot.slane %v10251_v15, 5  ;;  %v10188_v14 = vsel %vm14730_vm11, %v10183_v4, %v17859_v23  ;;  %v14595_v35 = vld [vmem:[#allocation2 + $0xbc] sm:$0x1] }
 0x588   : > { %13693 = vmatmul.mubr.bf16.gmra.mrb[12].mxu1 %v12194_v10  ;;  %v10202_v10 = vrot.slane %v10200_v37, 4  ;;  %v10226_v53 = vrot.slane %v10224_v57, 4  ;;  %v10239_v37 = vrot.slane %v10237_v25, 4  ;;  %v10243_v57 = vshll.u32 %v14595_v35, 16  ;;  %v18315_v35 = vld [vmem:[#allocation47_spill] sm:$0xff] }
 0x589   : > { %13696 = vmatprep.mubr.bf16.mxu1 %v12195_v54  ;;  %13725 = vmatpush3.bf16.msra.mxu1 %v14519_v38  ;;  %v10227_v38 = vshll.u32 %v9902_v50, 16  ;;  %v10285_v50 = vshrl.u32 %v17749_v2, 16  ;;  %v10198_v17 = vsel %vm14730_vm11, %v10193_v40, %v10197_v27  ;;  %v10264_v3 = vor.u32 %v10263_v52, %v10259_v24 }
 0x58a   : > { %13726 = vmatprep.subr.bf16.mxu1 %v14520_v62  ;;  %v10206_v44 = vor.u32 %v10205_v9, %v10202_v10  ;;  %v10240_v46 = vor.u32 %v10239_v37, %v10235_v6  ;;  %v10222_v10 = vsel %vm14730_vm11, %v10217_v26, %v10221_v33  ;;  %v10277_v51 = vrot.slane %v10275_v48, 5  ;;  %v18305_v33 = vld [vmem:[#allocation37_spill] sm:$0xff] }
 0x58b   : > { %v10229_v54 = vrot.slane %v10227_v38, 5  ;;  %v10287_v61 = vrot.slane %v10285_v50, 4  ;;  %v12198_v0 = vcombine.low %v10188_v14, %v10198_v17  ;;  %v10254_v38 = vor.u32 %v10253_v18, %v10250_v63  ;;  %v18302_v50 = vld [vmem:[#allocation34_spill] sm:$0xff] }
 0x58c   : > { %v10207_v31 = vrot.slane %v10206_v44, 4  ;;  %v10267_v42 = vshll.u32 %v14596_v8, 16  ;;  %v10265_v4 = vrot.slane %v10264_v3, 4  ;;  %v10291_v49 = vshll.u32 %v17751_v22, 16  ;;  %v18306_v63 = vld [vmem:[#allocation38_spill] sm:$0xff]  ;;  %v18317_v3 = vld [vmem:[#allocation48_spill] sm:$0xff] }
 0x58d   : > { %13727 = vmatpush3.bf16.msra.mxu1 %v14520_v62  ;;  %v10281_v62 = vshll.u32 %v17749_v2, 16  ;;  %v10230_v9 = vor.u32 %v10229_v54, %v10226_v53  ;;  %v10274_v2 = vrot.slane %v10272_v20, 4  ;;  %v10255_v19 = vrot.slane %v10254_v38, 4  ;;  %v18309_v14 = vld [vmem:[#allocation42_spill] sm:$0xff]  ;;  %v18325_v8 = vld [vmem:[#allocation53_spill] sm:$0xff] }
 0x58e   : > { %v10212_v23 = vsel %vm14730_vm11, %v10207_v31, %v17861_v36  ;;  %v10269_v15 = vrot.slane %v10267_v42, 5  ;;  %v10293_v26 = vrot.slane %v10291_v49, 5  ;;  %v18307_v18 = vcombine.low %v18305_v33, %v18306_v63 }
 0x58f   : > { %v10283_v25 = vrot.slane %v10281_v62, 5  ;;  %v12199_v16 = vcombine.low %v10212_v23, %v10222_v10  ;;  %v10231_v27 = vrot.slane %v10230_v9, 4  ;;  %v10278_v44 = vor.u32 %v10277_v51, %v10274_v2  ;;  %v18312_v10 = vld [vmem:[#allocation45_spill] sm:$0xff]  ;;  %v18323_v23 = vld [vmem:[#allocation52_spill] sm:$0xff] }
 0x590   : > { %13697 = vmatmul.mubr.bf16.gmra.mrb[16].mxu1 %v12196_v39  ;;  %v10241_v39 = vrot.slane %v10240_v46, 4  ;;  %v10270_v36 = vsel %vm14730_vm11, %v10265_v4, %v10269_v15  ;;  %v10260_v52 = vsel %vm14730_vm11, %v10255_v19, %v10259_v24  ;;  %v18308_v24 = vld [vmem:[#allocation40_spill] sm:$0xff]  ;;  %v18311_v46 = vld [vmem:[#allocation43_spill] sm:$0xff]  ;;  %v18318_v2 = vld [vmem:[#allocation49_spill] sm:$0xff]  ;;  %v18326_v42 = vcombine.low %v17424_v11, %v18325_v8 }
 0x591   : > { %13700 = vmatprep.mubr.bf16.mxu1 %v12197_v59  ;;  %v10245_v59 = vrot.slane %v10243_v57, 5  ;;  %v10288_v55 = vor.u32 %v10287_v61, %v10283_v25  ;;  %v10236_v40 = vsel %vm14730_vm11, %v10231_v27, %v10235_v6  ;;  %v10279_v53 = vrot.slane %v10278_v44, 4  ;;  %v18303_v6 = vld [vmem:[#allocation35_spill] sm:$0xff]  ;;  %v18330_v4 = vld [vmem:[#allocation56_spill] sm:$0xff]  ;;  %v18331_v27 = vld [vmem:[#allocation57_spill] sm:$0xff] }
 0x592   : > { %v12201_v20 = vcombine.low %v10260_v52, %v10270_v36  ;;  %v18304_v31 = vcombine.low %v18302_v50, %v18303_v6  ;;  %v18310_v17 = vcombine.low %v18308_v24, %v18309_v14  ;;  %v18313_v9 = vcombine.low %v18311_v46, %v18312_v10 }
 0x593   : > { %v10246_v47 = vsel %vm14730_vm11, %v10241_v39, %v10245_v59  ;;  %v10289_v37 = vrot.slane %v10288_v55, 4  ;;  %v10284_v22 = vsel %vm14730_vm11, %v10279_v53, %v10283_v25  ;;  %v18316_v57 = vcombine.low %v18314_v58, %v18315_v35  ;;  %v18320_v25 = vld [vmem:[#allocation50_spill] sm:$0xff]  ;;  %v18328_v39 = vld [vmem:[#allocation55_spill] sm:$0xff] }
 0x594   : > { %v12200_v54 = vcombine.low %v10236_v40, %v10246_v47  ;;  %v18319_v51 = vcombine.low %v18317_v3, %v18318_v2  ;;  %v18321_v61 = vcombine.low %v17398_v21, %v18320_v25  ;;  %v18332_v44 = vcombine.low %v18330_v4, %v18331_v27  ;;  %v17951_v21 = vld [vmem:[%s18053_s5] ss:$0 sm:$0xff] }
 0x595   : > { %v10294_v48 = vsel %vm14730_vm11, %v10289_v37, %v10293_v26 }
 0x596   : > { %v12202_v62 = vcombine.low %v10284_v22, %v10294_v48 }
 0x598   : > { %13701 = vmatmul.mubr.bf16.gmra.mrb[20].mxu1 %v12198_v0  ;;  %v18322_v0 = vld [vmem:[#allocation51_spill] sm:$0xff] }
 0x599   : > { %13704 = vmatprep.mubr.bf16.mxu1 %v12199_v16  ;;  %v18324_v38 = vcombine.low %v18322_v0, %v18323_v23  ;;  %v18327_v16 = vld [vmem:[#allocation54_spill] sm:$0xff] }
 0x59a   : > { %v18329_v59 = vcombine.low %v18327_v16, %v18328_v39 }
 0x5a0   : > { %13705 = vmatmul.mubr.bf16.gmra.mrb[24].mxu1 %v12200_v54 }
 0x5a1   : > { %13708 = vmatprep.mubr.bf16.mxu1 %v12201_v20 }
 0x5a8   : > { %13709 = vmatmul.mubr.bf16.gmra.mrb[28].mxu1 %v12202_v62 }
 0x5a9   : > { %13728 = vmatprep.mubr.bf16.mxu1 %v18304_v31 }
 0x5b0   : > { %13729 = vmatmul.mubr.bf16.vlgmr.msra.gmra.mrb[0].mxu1 %v18307_v18 }
 0x5b1   : > { %13732 = vmatprep.mubr.bf16.mxu1 %v18310_v17 }
 0x5b8   : > { %13733 = vmatmul.mubr.bf16.gmra.mrb[4].mxu1 %v18313_v9 }
 0x5b9   : > { %13736 = vmatprep.mubr.bf16.mxu1 %v18316_v57 }
 0x5c0   : > { %13737 = vmatmul.mubr.bf16.gmra.mrb[8].mxu1 %v18319_v51 }
 0x5c1   : > { %13740 = vmatprep.mubr.bf16.mxu1 %v18321_v61 }
 0x5c8   : > { %13741 = vmatmul.mubr.bf16.gmra.mrb[12].mxu1 %v18324_v38 }
 0x5c9   : > { %13744 = vmatprep.mubr.bf16.mxu1 %v18326_v42 }
 0x5d0   : > { %13745 = vmatmul.mubr.bf16.gmra.mrb[16].mxu1 %v18329_v59 }
 0x5d1   : > { %13748 = vmatprep.mubr.bf16.mxu1 %v18332_v44 }
 0x5d8   : > { %13749 = vmatmul.mubr.bf16.gmra.mrb[20].mxu1 %v12254_v5 }
 0x5d9   : > { %13752 = vmatprep.mubr.bf16.mxu1 %v12255_v12 }
 0x5e0   : > { %13753 = vmatmul.mubr.bf16.gmra.mrb[24].mxu1 %v12256_v32 }
 0x5e1   : > { %13756 = vmatprep.mubr.bf16.mxu1 %v12257_v45 }
 0x5e8   : > { %13757 = vmatmul.mubr.bf16.gmra.mrb[28].mxu1 %v12258_v41 }
 0x683   : > { %v13730_v11 = vpop.f32.mrb[0].mxu1 }
 0x684   : > { %v11124_v34 = vmul.f32 %v13730_v11, %v17951_v21  ;;  %v10956_v5 = vpop.f32.mrb[1].mxu1 }
 0x685   : > { %v11122_v60 = vmul.f32 %v17951_v21, %v10956_v5  ;;  %v13731_v13 = vpop.f32.mrb[2].mxu1 }
 0x686   : > { %v11163_v7 = vadd.f32 %v17956_v29, %v11124_v34  ;;  %v11125_v12 = vmul.f32 %v13731_v13, %v17951_v21  ;;  %v10959_v30 = vpop.f32.mrb[3].mxu1 }
 0x687   : > { %v11161_v32 = vadd.f32 %v17956_v29, %v11122_v60  ;;  %v11123_v1 = vmul.f32 %v17951_v21, %v10959_v30 }
 0x688   : > { %v11164_v28 = vadd.f32 %v17956_v29, %v11125_v12  ;;  %v11195_v56 = vmax.f32 %v11163_v7, 0.0 }
 0x689   : > { %v11162_v45 = vadd.f32 %v17956_v29, %v11123_v1  ;;  %v11193_v41 = vmax.f32 %v11161_v32, 0.0 }
 0x68a   : > { %v11196_v43 = vmax.f32 %v11164_v28, 0.0 }
 0x68b   : > { %v11194_v55 = vmax.f32 %v11162_v45, 0.0  ;;  %v13734_v49 = vpop.f32.mrb[4].mxu1 }
 0x68c   : > { %v12377_v19 = vpack.c.bf16 %v11196_v43, %v11195_v56  ;;  %v11128_v15 = vmul.f32 %v13734_v49, %v17951_v21  ;;  %v10972_v47 = vpop.f32.mrb[5].mxu1 }
 0x68d   : > { %v12372_v36 = vpack.c.bf16 %v11194_v55, %v11193_v41  ;;  %v11126_v40 = vmul.f32 %v17951_v21, %v10972_v47  ;;  %v13735_v53 = vpop.f32.mrb[6].mxu1 }
 0x68e   : > { %12449 = vst [vmem:[%s17971_s9 + $0x8] sm:$0xff] %v12377_v19   ;;  %v11167_v37 = vadd.f32 %v17956_v29, %v11128_v15  ;;  %v11129_v26 = vmul.f32 %v13735_v53, %v17951_v21  ;;  %v10975_v54 = vpop.f32.mrb[7].mxu1 }
 0x68f   : > { %12373 = vst [vmem:[%s17971_s9] sm:$0xff] %v12372_v36   ;;  %v11165_v52 = vadd.f32 %v17956_v29, %v11126_v40  ;;  %v11127_v20 = vmul.f32 %v17951_v21, %v10975_v54 }
 0x690   : > { %v11168_v22 = vadd.f32 %v17956_v29, %v11129_v26  ;;  %v11199_v62 = vmax.f32 %v11167_v37, 0.0 }
 0x691   : > { %v11166_v48 = vadd.f32 %v17956_v29, %v11127_v20  ;;  %v11197_v6 = vmax.f32 %v11165_v52, 0.0 }
 0x692   : > { %v11200_v50 = vmax.f32 %v11168_v22, 0.0 }
 0x693   : > { %v11198_v31 = vmax.f32 %v11166_v48, 0.0  ;;  %v13738_v33 = vpop.f32.mrb[8].mxu1 }
 0x694   : > { %v12387_v63 = vpack.c.bf16 %v11200_v50, %v11199_v62  ;;  %v11132_v18 = vmul.f32 %v13738_v33, %v17951_v21  ;;  %v10988_v24 = vpop.f32.mrb[9].mxu1 }
 0x695   : > { %v12382_v14 = vpack.c.bf16 %v11198_v31, %v11197_v6  ;;  %v11130_v17 = vmul.f32 %v17951_v21, %v10988_v24  ;;  %v13739_v46 = vpop.f32.mrb[10].mxu1 }
 0x696   : > { %12451 = vst [vmem:[%s17971_s9 + $0x18] sm:$0xff] %v12387_v63   ;;  %v11171_v10 = vadd.f32 %v17956_v29, %v11132_v18  ;;  %v11133_v9 = vmul.f32 %v13739_v46, %v17951_v21  ;;  %v10991_v58 = vpop.f32.mrb[11].mxu1 }
 0x697   : > { %12450 = vst [vmem:[%s17971_s9 + $0x10] sm:$0xff] %v12382_v14   ;;  %v11169_v35 = vadd.f32 %v17956_v29, %v11130_v17  ;;  %v11131_v57 = vmul.f32 %v17951_v21, %v10991_v58 }
 0x698   : > { %v11172_v3 = vadd.f32 %v17956_v29, %v11133_v9  ;;  %v11203_v51 = vmax.f32 %v11171_v10, 0.0 }
 0x699   : > { %v11170_v2 = vadd.f32 %v17956_v29, %v11131_v57  ;;  %v11201_v61 = vmax.f32 %v11169_v35, 0.0 }
 0x69a   : > { %v11204_v25 = vmax.f32 %v11172_v3, 0.0 }
 0x69b   : > { %v11202_v0 = vmax.f32 %v11170_v2, 0.0  ;;  %v13742_v23 = vpop.f32.mrb[12].mxu1 }
 0x69c   : > { %v12397_v38 = vpack.c.bf16 %v11204_v25, %v11203_v51  ;;  %v11136_v8 = vmul.f32 %v13742_v23, %v17951_v21  ;;  %v11004_v42 = vpop.f32.mrb[13].mxu1 }
 0x69d   : > { %v12392_v16 = vpack.c.bf16 %v11202_v0, %v11201_v61  ;;  %v11134_v39 = vmul.f32 %v17951_v21, %v11004_v42  ;;  %v13743_v59 = vpop.f32.mrb[14].mxu1 }
 0x69e   : > { %12453 = vst [vmem:[%s17971_s9 + $0x28] sm:$0xff] %v12397_v38   ;;  %v11175_v4 = vadd.f32 %v17956_v29, %v11136_v8  ;;  %v11137_v27 = vmul.f32 %v13743_v59, %v17951_v21  ;;  %v11007_v44 = vpop.f32.mrb[15].mxu1 }
 0x69f   : > { %12452 = vst [vmem:[%s17971_s9 + $0x20] sm:$0xff] %v12392_v16   ;;  %v11173_v11 = vadd.f32 %v17956_v29, %v11134_v39  ;;  %v11135_v34 = vmul.f32 %v17951_v21, %v11007_v44 }
 0x6a0   : > { %v11176_v5 = vadd.f32 %v17956_v29, %v11137_v27  ;;  %v11207_v13 = vmax.f32 %v11175_v4, 0.0 }
 0x6a1   : > { %v11174_v60 = vadd.f32 %v17956_v29, %v11135_v34  ;;  %v11205_v12 = vmax.f32 %v11173_v11, 0.0 }
 0x6a2   : > { %v11208_v7 = vmax.f32 %v11176_v5, 0.0 }
 0x6a3   : > { %v11206_v30 = vmax.f32 %v11174_v60, 0.0  ;;  %v13746_v32 = vpop.f32.mrb[16].mxu1 }
 0x6a4   : > { %v12407_v1 = vpack.c.bf16 %v11208_v7, %v11207_v13  ;;  %v11140_v28 = vmul.f32 %v13746_v32, %v17951_v21  ;;  %v11020_v45 = vpop.f32.mrb[17].mxu1 }
 0x6a5   : > { %v12402_v56 = vpack.c.bf16 %v11206_v30, %v11205_v12  ;;  %v11138_v43 = vmul.f32 %v17951_v21, %v11020_v45  ;;  %v13747_v41 = vpop.f32.mrb[18].mxu1 }
 0x6a6   : > { %12455 = vst [vmem:[%s17971_s9 + $0x38] sm:$0xff] %v12407_v1   ;;  %v11179_v55 = vadd.f32 %v17956_v29, %v11140_v28  ;;  %v11141_v49 = vmul.f32 %v13747_v41, %v17951_v21  ;;  %v11023_v19 = vpop.f32.mrb[19].mxu1 }
 0x6a7   : > { %12454 = vst [vmem:[%s17971_s9 + $0x30] sm:$0xff] %v12402_v56   ;;  %v11177_v15 = vadd.f32 %v17956_v29, %v11138_v43  ;;  %v11139_v47 = vmul.f32 %v17951_v21, %v11023_v19 }
 0x6a8   : > { %v11180_v36 = vadd.f32 %v17956_v29, %v11141_v49  ;;  %v11211_v53 = vmax.f32 %v11179_v55, 0.0 }
 0x6a9   : > { %v11178_v40 = vadd.f32 %v17956_v29, %v11139_v47  ;;  %v11209_v26 = vmax.f32 %v11177_v15, 0.0 }
 0x6aa   : > { %v11212_v37 = vmax.f32 %v11180_v36, 0.0 }
 0x6ab   : > { %v11210_v54 = vmax.f32 %v11178_v40, 0.0  ;;  %v13750_v52 = vpop.f32.mrb[20].mxu1 }
 0x6ac   : > { %v12417_v20 = vpack.c.bf16 %v11212_v37, %v11211_v53  ;;  %v11144_v22 = vmul.f32 %v13750_v52, %v17951_v21  ;;  %v11036_v48 = vpop.f32.mrb[21].mxu1 }
 0x6ad   : > { %v12412_v62 = vpack.c.bf16 %v11210_v54, %v11209_v26  ;;  %v11142_v50 = vmul.f32 %v17951_v21, %v11036_v48  ;;  %v13751_v6 = vpop.f32.mrb[22].mxu1 }
 0x6ae   : > { %12457 = vst [vmem:[%s17971_s9 + $0x48] sm:$0xff] %v12417_v20   ;;  %v11183_v31 = vadd.f32 %v17956_v29, %v11144_v22  ;;  %v11145_v33 = vmul.f32 %v13751_v6, %v17951_v21  ;;  %v11039_v63 = vpop.f32.mrb[23].mxu1 }
 0x6af   : > { %12456 = vst [vmem:[%s17971_s9 + $0x40] sm:$0xff] %v12412_v62   ;;  %v11181_v18 = vadd.f32 %v17956_v29, %v11142_v50  ;;  %v11143_v24 = vmul.f32 %v17951_v21, %v11039_v63 }
 0x6b0   : > { %v11184_v14 = vadd.f32 %v17956_v29, %v11145_v33  ;;  %v11215_v46 = vmax.f32 %v11183_v31, 0.0 }
 0x6b1   : > { %v11182_v17 = vadd.f32 %v17956_v29, %v11143_v24  ;;  %v11213_v9 = vmax.f32 %v11181_v18, 0.0 }
 0x6b2   : > { %v11216_v10 = vmax.f32 %v11184_v14, 0.0 }
 0x6b3   : > { %v11214_v58 = vmax.f32 %v11182_v17, 0.0  ;;  %v13754_v35 = vpop.f32.mrb[24].mxu1 }
 0x6b4   : > { %v12427_v57 = vpack.c.bf16 %v11216_v10, %v11215_v46  ;;  %v11148_v3 = vmul.f32 %v13754_v35, %v17951_v21  ;;  %v11052_v2 = vpop.f32.mrb[25].mxu1 }
 0x6b5   : > { %v12422_v51 = vpack.c.bf16 %v11214_v58, %v11213_v9  ;;  %v11146_v25 = vmul.f32 %v17951_v21, %v11052_v2  ;;  %v13755_v61 = vpop.f32.mrb[26].mxu1 }
 0x6b6   : > { %12459 = vst [vmem:[%s17971_s9 + $0x58] sm:$0xff] %v12427_v57   ;;  %v11187_v0 = vadd.f32 %v17956_v29, %v11148_v3  ;;  %v11149_v23 = vmul.f32 %v13755_v61, %v17951_v21  ;;  %v11055_v38 = vpop.f32.mrb[27].mxu1 }
 0x6b7   : > { %12458 = vst [vmem:[%s17971_s9 + $0x50] sm:$0xff] %v12422_v51   ;;  %v11185_v8 = vadd.f32 %v17956_v29, %v11146_v25  ;;  %v11147_v42 = vmul.f32 %v17951_v21, %v11055_v38 }
 0x6b8   : > { %v11188_v16 = vadd.f32 %v17956_v29, %v11149_v23  ;;  %v11219_v59 = vmax.f32 %v11187_v0, 0.0 }
 0x6b9   : > { %v11186_v39 = vadd.f32 %v17956_v29, %v11147_v42  ;;  %v11217_v27 = vmax.f32 %v11185_v8, 0.0 }
 0x6ba   : > { %v11220_v4 = vmax.f32 %v11188_v16, 0.0 }
 0x6bb   : > { %v11218_v44 = vmax.f32 %v11186_v39, 0.0  ;;  %v13758_v11 = vpop.f32.mrb[28].mxu1 }
 0x6bc   : > { %v12437_v34 = vpack.c.bf16 %v11220_v4, %v11219_v59  ;;  %v11152_v5 = vmul.f32 %v13758_v11, %v17951_v21  ;;  %v11068_v60 = vpop.f32.mrb[29].mxu1 }
 0x6bd   : > { %v12432_v13 = vpack.c.bf16 %v11218_v44, %v11217_v27  ;;  %v11150_v7 = vmul.f32 %v17951_v21, %v11068_v60  ;;  %v13759_v12 = vpop.f32.mrb[30].mxu1 }
 0x6be   : > { %12461 = vst [vmem:[%s17971_s9 + $0x68] sm:$0xff] %v12437_v34   ;;  %v11191_v30 = vadd.f32 %v17956_v29, %v11152_v5  ;;  %v11153_v32 = vmul.f32 %v13759_v12, %v17951_v21  ;;  %v11071_v1 = vpop.f32.mrb[31].mxu1 }
 0x6bf   : > { %12460 = vst [vmem:[%s17971_s9 + $0x60] sm:$0xff] %v12432_v13   ;;  %v11189_v28 = vadd.f32 %v17956_v29, %v11150_v7  ;;  %v11151_v45 = vmul.f32 %v17951_v21, %v11071_v1 }
 0x6c0   : > { %v11192_v56 = vadd.f32 %v17956_v29, %v11153_v32  ;;  %v11223_v41 = vmax.f32 %v11191_v30, 0.0 }
 0x6c1   : > { %v11190_v43 = vadd.f32 %v17956_v29, %v11151_v45  ;;  %v11221_v49 = vmax.f32 %v11189_v28, 0.0 }
 0x6c2   : > { %v11224_v55 = vmax.f32 %v11192_v56, 0.0 }
 0x6c3   : > { %v11222_v19 = vmax.f32 %v11190_v43, 0.0 }
 0x6c4   : > { %v12447_v15 = vpack.c.bf16 %v11224_v55, %v11223_v41 }
 0x6c5   : > { %v12442_v47 = vpack.c.bf16 %v11222_v19, %v11221_v49 }
 0x6c6   : > { %12463 = vst [vmem:[%s17971_s9 + $0x78] sm:$0xff] %v12447_v15  }
 0x6c7   : > { %12462 = vst [vmem:[%s17971_s9 + $0x70] sm:$0xff] %v12442_v47  }
 0x6c8 PF: > { %s17_s24 = sadd.s32 1, %s14603_s24  }
 0x6c9   : > { %p14_p4 = scmp.ge.s32.totalorder %s17_s24, 4  }
 0x6cb   :  { %16 = sbr.rel (!%p14_p4) target bundleno = 1 (0x1), region = 97 }

</bundles_post_ra>
